<compile_context>
chip_gen: v6e
topology: v6e:2x2x1
jax: 0.10.0
libtpu: 0.0.40
codegen_flags: <defaults>
</compile_context>

<pallas_src>
import functools

import jax
import jax.numpy as jnp
import numpy as np
from jax.experimental import pallas as pl
from jax.experimental.pallas import tpu as pltpu


# ------------------------------ static geometry ------------------------------

IN_H = IN_W = 28          # input image
K1 = 5                    # conv1 kernel
C1_OUT = 5
P1_H = P1_W = 12          # pooled grid after conv1 (24 -> 12)
B1 = 768                  # per-pool-tap block for conv1 output (>= 5*12*12 = 720, 6*128)

K2 = 5                    # conv2 kernel
C2_IN = 5
C2_OUT = 10
P2_H = P2_W = 4           # pooled grid after conv2 (8 -> 4)
B2 = 256                  # per-pool-tap block for conv2 output (>= 10*4*4 = 160, 2*128)

FC1_IN = 160              # torch flatten size (10*4*4)
FC1_IN_PAD = 256          # padded to B2
FC1_OUT = 80
FC1_OUT_PAD = 128         # lane-dense fc1 output
N_CLASSES = 10
OUT_PAD = 128             # lane-dense logits / output store
NEG_BIG = -1e30           # padded-logit bias (cannot affect max / sum-exp)


# ------------------------------ fused Pallas kernel ------------------------------

def _testnet_kernel(x_ref, w1_ref, b1_ref, w2_ref, b2_ref,
                    fc1w_ref, fc1b_ref, fc2w_ref, fc2b_ref, o_ref, *, cdt):
    # conv1 as Toeplitz matmul: [TB, 784](bf16) @ [784, 4*B1](bf16) -> f32, then cast
    # the epilogue to `cdt` (bf16 on v6e/v7x, f32 on v5e).
    h1 = jnp.dot(x_ref[...], w1_ref[...], preferred_element_type=jnp.float32)
    h1 = h1.astype(cdt)

    # 2x2 max-pool == elementwise max over the four 128-aligned tap blocks.
    p1 = jnp.maximum(
        jnp.maximum(h1[:, 0 * B1:1 * B1], h1[:, 1 * B1:2 * B1]),
        jnp.maximum(h1[:, 2 * B1:3 * B1], h1[:, 3 * B1:4 * B1]))
    # Bias is identical across the 4 taps -> add once post-pool, then ReLU.
    p1 = jnp.maximum(p1 + b1_ref[...].astype(cdt), 0).astype(jnp.bfloat16)   # [TB, 768]

    # conv2 as Toeplitz matmul: [TB, 768] @ [768, 4*B2] -> [TB, 1024]
    h2 = jnp.dot(p1, w2_ref[...], preferred_element_type=jnp.float32).astype(cdt)
    p2 = jnp.maximum(
        jnp.maximum(h2[:, 0 * B2:1 * B2], h2[:, 1 * B2:2 * B2]),
        jnp.maximum(h2[:, 2 * B2:3 * B2], h2[:, 3 * B2:4 * B2]))
    p2 = jnp.maximum(p2 + b2_ref[...].astype(cdt), 0).astype(jnp.bfloat16)   # [TB, 256]
                                                                             # lanes 0..159
                                                                             # == torch view(N,-1)

    # fc1 + relu  (weight rows padded 160->256, cols padded 80->128 with zeros)
    f1 = jnp.dot(p2, fc1w_ref[...], preferred_element_type=jnp.float32) + fc1b_ref[...]
    f1 = jnp.maximum(f1, 0.0).astype(jnp.bfloat16)                           # [TB, 128]

    # fc2  (cols padded 10->128, padded bias = -1e30 so padded logits vanish)
    f2 = jnp.dot(f1, fc2w_ref[...], preferred_element_type=jnp.float32) + fc2b_ref[...]

    # log_softmax (max-stabilized, f32); padded lanes contribute exp(-1e30-m) == 0.
    m = jnp.max(f2, axis=-1, keepdims=True)
    z = f2 - m
    lse = jnp.log(jnp.sum(jnp.exp(z), axis=-1, keepdims=True))
    o_ref[...] = z - lse                                                     # [TB, 128] lane-dense


# ------------------------------ wrapper / tiling ------------------------------

def _round_up(v, m):
    return ((v + m - 1) // m) * m


def _device_tuning():
    """Trace-time chip detection: epilogue dtype, max batch tile, VMEM limit."""
    try:
        kind = jax.devices()[0].device_kind.lower()
    except Exception:  # pragma: no cover - fall through to conservative defaults
        kind = ""
    is_v5 = "v5" in kind
    is_v6 = "v6" in kind
    cdt = jnp.float32 if is_v5 else jnp.bfloat16          # v5e: no bf16 VPU path
    big_vmem = is_v5 or is_v6                             # 128 MiB parts
    max_tb = 512 if big_vmem else 256                     # v7x (64 MiB): keep 256
    vmem = (64 if big_vmem else 32) * 1024 * 1024
    return cdt, max_tb, vmem


def _wspec(shape):
    """Constant-index weight block: DMA'd once; single-buffered when supported."""
    try:
        return pl.BlockSpec(shape, lambda i: (0, 0), pipeline_mode=pl.Buffered(1))
    except Exception:
        return pl.BlockSpec(shape, lambda i: (0, 0))


def testnet_forward(x_nchw, kp):
    """x_nchw: [N, 1, 28, 28] float32 (or bf16); kp: dict from prepare_kernel_params."""
    N = x_nchw.shape[0]
    cdt, max_tb, vmem_limit = _device_tuning()

    # Batch tile: multiple of 8 sublanes; >=2 grid steps whenever N allows it so both
    # v7x TensorCores get work; remainder handled by zero-padding the batch.
    tb = min(max_tb, max(8, _round_up(pl.cdiv(N, 2), 8)))
    grid_n = pl.cdiv(N, tb)
    n_pad = grid_n * tb

    # C == 1, so the contiguous NCHW flatten equals the (h, w) row-major flatten.
    # Stream the activations in bf16 (halves the per-tile HBM->VMEM DMA).
    x_flat = x_nchw.reshape(N, IN_H * IN_W).astype(jnp.bfloat16)
    if n_pad != N:
        x_flat = jnp.pad(x_flat, ((0, n_pad - N), (0, 0)))

    out = pl.pallas_call(
        functools.partial(_testnet_kernel, cdt=cdt),
        out_shape=jax.ShapeDtypeStruct((n_pad, OUT_PAD), jnp.float32),
        grid=(grid_n,),
        in_specs=[
            pl.BlockSpec((tb, IN_H * IN_W), lambda i: (i, 0)),   # x (bf16, streamed)
            _wspec((IN_H * IN_W, 4 * B1)),                       # conv1 Toeplitz (bf16)
            _wspec((1, B1)),                                     # conv1 bias (f32)
            _wspec((B1, 4 * B2)),                                # conv2 Toeplitz (bf16)
            _wspec((1, B2)),                                     # conv2 bias (f32)
            _wspec((FC1_IN_PAD, FC1_OUT_PAD)),                   # fc1 w (padded, bf16)
            _wspec((1, FC1_OUT_PAD)),                            # fc1 b
            _wspec((FC1_OUT_PAD, OUT_PAD)),                      # fc2 w (padded, bf16)
            _wspec((1, OUT_PAD)),                                # fc2 b (-1e30 padded)
        ],
        out_specs=pl.BlockSpec((tb, OUT_PAD), lambda i: (i, 0)),
        compiler_params=pltpu.CompilerParams(
            dimension_semantics=("parallel",),
            vmem_limit_bytes=vmem_limit,
        ),
    )(x_flat, kp["w1"], kp["b1"], kp["w2"], kp["b2"],
      kp["fc1w"], kp["fc1b"], kp["fc2w"], kp["fc2b"])

    return out[:N, :N_CLASSES]


# --------------------- one-time init: Toeplitz weight expansion ---------------------

def _build_conv1_toeplitz(w, b):
    """w: [5,1,5,5] OIHW, b: [5].  Returns W: [4*B1, 784], bias: [B1].

    Output row index = (di*2+dj)*B1 + (c*12 + oh)*12 + ow, where the conv1 output
    spatial position is (2*oh+di, 2*ow+dj); rows [720, B1) of each tap block are 0.
    """
    w = np.asarray(w, np.float32)
    b = np.asarray(b, np.float32)
    W = np.zeros((4 * B1, IN_H * IN_W), np.float32)
    di, dj, co, oh, ow, ki, kj = np.indices((2, 2, C1_OUT, P1_H, P1_W, K1, K1))
    out_idx = (di * 2 + dj) * B1 + (co * P1_H + oh) * P1_W + ow
    y = 2 * oh + di + ki
    x = 2 * ow + dj + kj
    in_idx = y * IN_W + x
    W[out_idx.ravel(), in_idx.ravel()] = w[co.ravel(), 0, ki.ravel(), kj.ravel()]
    blk = np.zeros((B1,), np.float32)
    blk[:C1_OUT * P1_H * P1_W] = np.repeat(b, P1_H * P1_W)
    return W, blk


def _build_conv2_toeplitz(w, b):
    """w: [10,5,5,5] OIHW, b: [10].  Returns W: [4*B2, B1], bias: [B2].

    Input column index = (ci*12 + y)*12 + x over the pooled-1 layout produced by the
    kernel (columns [720, B1) stay 0, matching the zero-padded pool-1 lanes).
    """
    w = np.asarray(w, np.float32)
    b = np.asarray(b, np.float32)
    W = np.zeros((4 * B2, B1), np.float32)
    di, dj, co, oh, ow, ci, ki, kj = np.indices((2, 2, C2_OUT, P2_H, P2_W, C2_IN, K2, K2))
    out_idx = (di * 2 + dj) * B2 + (co * P2_H + oh) * P2_W + ow
    y = 2 * oh + di + ki
    x = 2 * ow + dj + kj
    in_idx = (ci * P1_H + y) * P1_W + x
    W[out_idx.ravel(), in_idx.ravel()] = w[co.ravel(), ci.ravel(), ki.ravel(), kj.ravel()]
    blk = np.zeros((B2,), np.float32)
    blk[:C2_OUT * P2_H * P2_W] = np.repeat(b, P2_H * P2_W)
    return W, blk


def prepare_kernel_params(p):
    """Host-side, one-time: Toeplitz expansion, lane padding, transposes, bf16 casts."""
    W1, b1e = _build_conv1_toeplitz(p["conv1_w"], p["conv1_b"])
    W2, b2e = _build_conv2_toeplitz(p["conv2_w"], p["conv2_b"])

    fc1w = np.zeros((FC1_IN_PAD, FC1_OUT_PAD), np.float32)
    fc1w[:FC1_IN, :FC1_OUT] = np.asarray(p["fc1_w"], np.float32)
    fc1b = np.zeros((1, FC1_OUT_PAD), np.float32)
    fc1b[0, :FC1_OUT] = np.asarray(p["fc1_b"], np.float32)

    fc2w = np.zeros((FC1_OUT_PAD, OUT_PAD), np.float32)
    fc2w[:FC1_OUT, :N_CLASSES] = np.asarray(p["fc2_w"], np.float32)
    fc2b = np.full((1, OUT_PAD), NEG_BIG, np.float32)     # padded logits -> -1e30
    fc2b[0, :N_CLASSES] = np.asarray(p["fc2_b"], np.float32)

    return {
        "w1": jnp.asarray(W1.T, jnp.bfloat16),                       # [784, 3072]
        "b1": jnp.asarray(b1e.reshape(1, -1), jnp.float32),          # [1, 768]
        "w2": jnp.asarray(W2.T, jnp.bfloat16),                       # [768, 1024]
        "b2": jnp.asarray(b2e.reshape(1, -1), jnp.float32),          # [1, 256]
        "fc1w": jnp.asarray(fc1w, jnp.bfloat16),                     # [256, 128]
        "fc1b": jnp.asarray(fc1b, jnp.float32),                      # [1, 128]
        "fc2w": jnp.asarray(fc2w, jnp.bfloat16),                     # [128, 128]
        "fc2b": jnp.asarray(fc2b, jnp.float32),                      # [1, 128]
    }


# --------------------------------- parameters ---------------------------------

def init_params(key):
    ks = jax.random.split(key, 8)
    s = 0.05
    return {
        "conv1_w": s * jax.random.normal(ks[0], (5, 1, 5, 5), jnp.float32),   # OIHW
        "conv1_b": s * jax.random.normal(ks[1], (5,), jnp.float32),
        "conv2_w": s * jax.random.normal(ks[2], (10, 5, 5, 5), jnp.float32),
        "conv2_b": s * jax.random.normal(ks[3], (10,), jnp.float32),
        "fc1_w":   s * jax.random.normal(ks[4], (160, 80), jnp.float32),      # [in, out]
        "fc1_b":   s * jax.random.normal(ks[5], (80,), jnp.float32),
        "fc2_w":   s * jax.random.normal(ks[6], (80, 10), jnp.float32),
        "fc2_b":   s * jax.random.normal(ks[7], (10,), jnp.float32),
    }


# Pure-JAX reference (matches the PyTorch forward semantics).
def ref_forward(x_nchw, p):
    x = jax.lax.conv_general_dilated(
        x_nchw, p["conv1_w"], (1, 1), "VALID",
        dimension_numbers=("NCHW", "OIHW", "NCHW")) + p["conv1_b"].reshape(1, -1, 1, 1)
    x = jax.nn.relu(jax.lax.reduce_window(x, -jnp.inf, jax.lax.max,
                                          (1, 1, 2, 2), (1, 1, 2, 2), "VALID"))
    x = jax.lax.conv_general_dilated(
        x, p["conv2_w"], (1, 1), "VALID",
        dimension_numbers=("NCHW", "OIHW", "NCHW")) + p["conv2_b"].reshape(1, -1, 1, 1)
    x = jax.nn.relu(jax.lax.reduce_window(x, -jnp.inf, jax.lax.max,
                                          (1, 1, 2, 2), (1, 1, 2, 2), "VALID"))
    x = x.reshape(x.shape[0], -1)
    x = jax.nn.relu(x @ p["fc1_w"] + p["fc1_b"])
    x = x @ p["fc2_w"] + p["fc2_b"]
    return jax.nn.log_softmax(x, axis=1)


if __name__ == "__main__":
    key = jax.random.PRNGKey(0)
    k_x, k_p = jax.random.split(key)
    x = jax.random.normal(k_x, (2, 1, 28, 28), jnp.float32)   # MNIST-like NCHW input
    params = init_params(k_p)
    kparams = prepare_kernel_params(params)                   # one-time host-side prep

    fwd = jax.jit(testnet_forward)
    out = jax.block_until_ready(fwd(x, kparams))
    assert out.shape == (2, 10) and bool(jnp.all(jnp.isfinite(out)))

    # log_softmax rows must exponentiate to a probability distribution.
    row_sums = np.asarray(jnp.sum(jnp.exp(out), axis=1))
    assert np.allclose(row_sums, 1.0, atol=1e-3)

    # Compare against the pure-JAX reference (loose tol: bf16 MXU operands + bf16 epilogue).
    ref = np.asarray(jax.block_until_ready(ref_forward(x, params)))
    if not np.allclose(np.asarray(out), ref, atol=3e-2, rtol=3e-2):
        raise AssertionError("Pallas TestNet output deviates from reference")

    print("KERNEL_OK")
</pallas_src>

<mosaic_0001>
module attributes {stable_mosaic.version = 11 : i64} {
  func.func @_testnet_kernel(%arg0: i32, %arg1: memref<8x784xbf16, #tpu.memory_space<vmem>>, %arg2: memref<784x3072xbf16, #tpu.memory_space<vmem>>, %arg3: memref<1x768xf32, #tpu.memory_space<vmem>>, %arg4: memref<768x1024xbf16, #tpu.memory_space<vmem>>, %arg5: memref<1x256xf32, #tpu.memory_space<vmem>>, %arg6: memref<256x128xbf16, #tpu.memory_space<vmem>>, %arg7: memref<1x128xf32, #tpu.memory_space<vmem>>, %arg8: memref<128x128xbf16, #tpu.memory_space<vmem>>, %arg9: memref<1x128xf32, #tpu.memory_space<vmem>>, %arg10: memref<8x128xf32, #tpu.memory_space<vmem>>) attributes {dimension_semantics = [#tpu.dimension_semantics<parallel>], iteration_bounds = array<i64: 1>, scalar_prefetch = 0 : i64, scratch_operands = 0 : i64, tpu.core_type = #tpu.core_type<tc>, window_params = [{transform_indices = @transform_0, window_bounds = array<i64: 8, 784>}, {pipeline_mode = #tpu.pipeline_mode<synchronous>, transform_indices = @transform_1, window_bounds = array<i64: 784, 3072>}, {pipeline_mode = #tpu.pipeline_mode<synchronous>, transform_indices = @transform_2, window_bounds = array<i64: 1, 768>}, {pipeline_mode = #tpu.pipeline_mode<synchronous>, transform_indices = @transform_3, window_bounds = array<i64: 768, 1024>}, {pipeline_mode = #tpu.pipeline_mode<synchronous>, transform_indices = @transform_4, window_bounds = array<i64: 1, 256>}, {pipeline_mode = #tpu.pipeline_mode<synchronous>, transform_indices = @transform_5, window_bounds = array<i64: 256, 128>}, {pipeline_mode = #tpu.pipeline_mode<synchronous>, transform_indices = @transform_6, window_bounds = array<i64: 1, 128>}, {pipeline_mode = #tpu.pipeline_mode<synchronous>, transform_indices = @transform_7, window_bounds = array<i64: 128, 128>}, {pipeline_mode = #tpu.pipeline_mode<synchronous>, transform_indices = @transform_8, window_bounds = array<i64: 1, 128>}, {transform_indices = @transform_9, window_bounds = array<i64: 8, 128>}]} {
    %c0 = arith.constant 0 : index
    %c0_0 = arith.constant 0 : index
    %0 = vector.load %arg1[%c0, %c0_0] : memref<8x784xbf16, #tpu.memory_space<vmem>>, vector<8x784xbf16>
    %c0_1 = arith.constant 0 : index
    %c0_2 = arith.constant 0 : index
    %1 = vector.load %arg2[%c0_1, %c0_2] : memref<784x3072xbf16, #tpu.memory_space<vmem>>, vector<784x3072xbf16>
    %cst = arith.constant dense<0.000000e+00> : vector<8x3072xf32>
    %2 = tpu.matmul %0, %1, %cst {dimension_numbers = #tpu.dot_dimension_numbers<[1], [0], [0], [1], [0, 0, 1, 1], [], []>} : vector<8x784xbf16>, vector<784x3072xbf16>, vector<8x3072xf32> -> vector<8x3072xf32>
    %3 = arith.truncf %2 : vector<8x3072xf32> to vector<8x3072xbf16>
    %4 = vector.extract_strided_slice %3 {offsets = [0, 0], sizes = [8, 768], strides = [1, 1]} : vector<8x3072xbf16> to vector<8x768xbf16>
    %5 = vector.extract_strided_slice %3 {offsets = [0, 768], sizes = [8, 768], strides = [1, 1]} : vector<8x3072xbf16> to vector<8x768xbf16>
    %6 = arith.maximumf %4, %5 : vector<8x768xbf16>
    %7 = vector.extract_strided_slice %3 {offsets = [0, 1536], sizes = [8, 768], strides = [1, 1]} : vector<8x3072xbf16> to vector<8x768xbf16>
    %8 = vector.extract_strided_slice %3 {offsets = [0, 2304], sizes = [8, 768], strides = [1, 1]} : vector<8x3072xbf16> to vector<8x768xbf16>
    %9 = arith.maximumf %7, %8 : vector<8x768xbf16>
    %10 = arith.maximumf %6, %9 : vector<8x768xbf16>
    %c0_3 = arith.constant 0 : index
    %c0_4 = arith.constant 0 : index
    %11 = vector.load %arg3[%c0_3, %c0_4] : memref<1x768xf32, #tpu.memory_space<vmem>>, vector<1x768xf32>
    %12 = arith.truncf %11 : vector<1x768xf32> to vector<1x768xbf16>
    %13 = vector.broadcast %12 : vector<1x768xbf16> to vector<8x768xbf16>
    %14 = arith.addf %10, %13 : vector<8x768xbf16>
    %cst_5 = arith.constant 0.000000e+00 : bf16
    %15 = vector.broadcast %cst_5 : bf16 to vector<8x768xbf16>
    %16 = arith.maximumf %14, %15 : vector<8x768xbf16>
    %c0_6 = arith.constant 0 : index
    %c0_7 = arith.constant 0 : index
    %17 = vector.load %arg4[%c0_6, %c0_7] : memref<768x1024xbf16, #tpu.memory_space<vmem>>, vector<768x1024xbf16>
    %cst_8 = arith.constant dense<0.000000e+00> : vector<8x1024xf32>
    %18 = tpu.matmul %16, %17, %cst_8 {dimension_numbers = #tpu.dot_dimension_numbers<[1], [0], [0], [1], [0, 0, 1, 1], [], []>} : vector<8x768xbf16>, vector<768x1024xbf16>, vector<8x1024xf32> -> vector<8x1024xf32>
    %19 = arith.truncf %18 : vector<8x1024xf32> to vector<8x1024xbf16>
    %20 = vector.extract_strided_slice %19 {offsets = [0, 0], sizes = [8, 256], strides = [1, 1]} : vector<8x1024xbf16> to vector<8x256xbf16>
    %21 = vector.extract_strided_slice %19 {offsets = [0, 256], sizes = [8, 256], strides = [1, 1]} : vector<8x1024xbf16> to vector<8x256xbf16>
    %22 = arith.maximumf %20, %21 : vector<8x256xbf16>
    %23 = vector.extract_strided_slice %19 {offsets = [0, 512], sizes = [8, 256], strides = [1, 1]} : vector<8x1024xbf16> to vector<8x256xbf16>
    %24 = vector.extract_strided_slice %19 {offsets = [0, 768], sizes = [8, 256], strides = [1, 1]} : vector<8x1024xbf16> to vector<8x256xbf16>
    %25 = arith.maximumf %23, %24 : vector<8x256xbf16>
    %26 = arith.maximumf %22, %25 : vector<8x256xbf16>
    %c0_9 = arith.constant 0 : index
    %c0_10 = arith.constant 0 : index
    %27 = vector.load %arg5[%c0_9, %c0_10] : memref<1x256xf32, #tpu.memory_space<vmem>>, vector<1x256xf32>
    %28 = arith.truncf %27 : vector<1x256xf32> to vector<1x256xbf16>
    %29 = vector.broadcast %28 : vector<1x256xbf16> to vector<8x256xbf16>
    %30 = arith.addf %26, %29 : vector<8x256xbf16>
    %cst_11 = arith.constant 0.000000e+00 : bf16
    %31 = vector.broadcast %cst_11 : bf16 to vector<8x256xbf16>
    %32 = arith.maximumf %30, %31 : vector<8x256xbf16>
    %c0_12 = arith.constant 0 : index
    %c0_13 = arith.constant 0 : index
    %33 = vector.load %arg6[%c0_12, %c0_13] : memref<256x128xbf16, #tpu.memory_space<vmem>>, vector<256x128xbf16>
    %cst_14 = arith.constant dense<0.000000e+00> : vector<8x128xf32>
    %34 = tpu.matmul %32, %33, %cst_14 {dimension_numbers = #tpu.dot_dimension_numbers<[1], [0], [0], [1], [0, 0, 1, 1], [], []>} : vector<8x256xbf16>, vector<256x128xbf16>, vector<8x128xf32> -> vector<8x128xf32>
    %c0_15 = arith.constant 0 : index
    %c0_16 = arith.constant 0 : index
    %35 = vector.load %arg7[%c0_15, %c0_16] : memref<1x128xf32, #tpu.memory_space<vmem>>, vector<1x128xf32>
    %36 = vector.broadcast %35 : vector<1x128xf32> to vector<8x128xf32>
    %37 = arith.addf %34, %36 : vector<8x128xf32>
    %cst_17 = arith.constant 0.000000e+00 : f32
    %38 = vector.broadcast %cst_17 : f32 to vector<8x128xf32>
    %39 = arith.maximumf %37, %38 : vector<8x128xf32>
    %40 = arith.truncf %39 : vector<8x128xf32> to vector<8x128xbf16>
    %c0_18 = arith.constant 0 : index
    %c0_19 = arith.constant 0 : index
    %41 = vector.load %arg8[%c0_18, %c0_19] : memref<128x128xbf16, #tpu.memory_space<vmem>>, vector<128x128xbf16>
    %cst_20 = arith.constant dense<0.000000e+00> : vector<8x128xf32>
    %42 = tpu.matmul %40, %41, %cst_20 {dimension_numbers = #tpu.dot_dimension_numbers<[1], [0], [0], [1], [0, 0, 1, 1], [], []>} : vector<8x128xbf16>, vector<128x128xbf16>, vector<8x128xf32> -> vector<8x128xf32>
    %c0_21 = arith.constant 0 : index
    %c0_22 = arith.constant 0 : index
    %43 = vector.load %arg9[%c0_21, %c0_22] : memref<1x128xf32, #tpu.memory_space<vmem>>, vector<1x128xf32>
    %44 = vector.broadcast %43 : vector<1x128xf32> to vector<8x128xf32>
    %45 = arith.addf %42, %44 : vector<8x128xf32>
    %cst_23 = arith.constant dense<0xFF800000> : vector<8xf32>
    %46 = vector.multi_reduction <maximumf>, %45, %cst_23 [1] : vector<8x128xf32> to vector<8xf32>
    %47 = vector.shape_cast %46 : vector<8xf32> to vector<8x1xf32>
    %48 = vector.broadcast %47 : vector<8x1xf32> to vector<8x128xf32>
    %49 = arith.subf %45, %48 : vector<8x128xf32>
    %50 = math.exp %49 : vector<8x128xf32>
    %cst_24 = arith.constant dense<0.000000e+00> : vector<8xf32>
    %51 = vector.multi_reduction <add>, %50, %cst_24 [1] : vector<8x128xf32> to vector<8xf32>
    %52 = vector.shape_cast %51 : vector<8xf32> to vector<8x1xf32>
    %53 = math.log %52 : vector<8x1xf32>
    %54 = vector.broadcast %53 : vector<8x1xf32> to vector<8x128xf32>
    %55 = arith.subf %49, %54 : vector<8x128xf32>
    %c0_25 = arith.constant 0 : index
    %c0_26 = arith.constant 0 : index
    %56 = vector.load %arg10[%c0_25, %c0_26] : memref<8x128xf32, #tpu.memory_space<vmem>>, vector<8x128xf32>
    tpu.vector_store %arg10[%c0_25, %c0_26], %55 {strides = array<i32>} : memref<8x128xf32, #tpu.memory_space<vmem>>, vector<8x128xf32>,
    return
  }
  func.func @transform_0(%arg0: i32) -> (i32, i32) {
    %c0_i32 = arith.constant 0 : i32
    %c0_i32_0 = arith.constant 0 : i32
    return %arg0, %c0_i32 : i32, i32
  }
  func.func @transform_1(%arg0: i32) -> (i32, i32) {
    %c0_i32 = arith.constant 0 : i32
    %c0_i32_0 = arith.constant 0 : i32
    %c0_i32_1 = arith.constant 0 : i32
    return %c0_i32, %c0_i32_0 : i32, i32
  }
  func.func @transform_2(%arg0: i32) -> (i32, i32) {
    %c0_i32 = arith.constant 0 : i32
    %c0_i32_0 = arith.constant 0 : i32
    %c0_i32_1 = arith.constant 0 : i32
    return %c0_i32, %c0_i32_0 : i32, i32
  }
  func.func @transform_3(%arg0: i32) -> (i32, i32) {
    %c0_i32 = arith.constant 0 : i32
    %c0_i32_0 = arith.constant 0 : i32
    %c0_i32_1 = arith.constant 0 : i32
    return %c0_i32, %c0_i32_0 : i32, i32
  }
  func.func @transform_4(%arg0: i32) -> (i32, i32) {
    %c0_i32 = arith.constant 0 : i32
    %c0_i32_0 = arith.constant 0 : i32
    %c0_i32_1 = arith.constant 0 : i32
    return %c0_i32, %c0_i32_0 : i32, i32
  }
  func.func @transform_5(%arg0: i32) -> (i32, i32) {
    %c0_i32 = arith.constant 0 : i32
    %c0_i32_0 = arith.constant 0 : i32
    %c0_i32_1 = arith.constant 0 : i32
    return %c0_i32, %c0_i32_0 : i32, i32
  }
  func.func @transform_6(%arg0: i32) -> (i32, i32) {
    %c0_i32 = arith.constant 0 : i32
    %c0_i32_0 = arith.constant 0 : i32
    %c0_i32_1 = arith.constant 0 : i32
    return %c0_i32, %c0_i32_0 : i32, i32
  }
  func.func @transform_7(%arg0: i32) -> (i32, i32) {
    %c0_i32 = arith.constant 0 : i32
    %c0_i32_0 = arith.constant 0 : i32
    %c0_i32_1 = arith.constant 0 : i32
    return %c0_i32, %c0_i32_0 : i32, i32
  }
  func.func @transform_8(%arg0: i32) -> (i32, i32) {
    %c0_i32 = arith.constant 0 : i32
    %c0_i32_0 = arith.constant 0 : i32
    %c0_i32_1 = arith.constant 0 : i32
    return %c0_i32, %c0_i32_0 : i32, i32
  }
  func.func @transform_9(%arg0: i32) -> (i32, i32) {
    %c0_i32 = arith.constant 0 : i32
    %c0_i32_0 = arith.constant 0 : i32
    return %arg0, %c0_i32 : i32, i32
  }
}

</mosaic_0001>

<bundles_post_ra>
// kernel: testnet_forward.1
= control target key start
LH: loop header
LB: loop body
LE: loop exit
PB: predicated region body
PF: predicated region fallthrough
CT: control target
= control target key end

     0   :  { %14 = vsyncpa [#allocation3], 0  ;;  %s14958_s0 = inlined_call_operand.vmem [shape: bf16[8,784], index: 0, kind: input, shape index: {}]   ;;  %s14959_s1 = inlined_call_operand.hbm [shape: bf16[784,3072], index: 1, kind: input, shape index: {}]   ;;  %s14960_s2 = inlined_call_operand.hbm [shape: f32[1,768], index: 2, kind: input, shape index: {}]   ;;  %s14961_s3 = inlined_call_operand.hbm [shape: bf16[768,1024], index: 3, kind: input, shape index: {}]   ;;  %s14962_s4 = inlined_call_operand.hbm [shape: f32[1,256], index: 4, kind: input, shape index: {}]   ;;  %s14963_s5 = inlined_call_operand.hbm [shape: bf16[256,128], index: 5, kind: input, shape index: {}]   ;;  %s14964_s6 = inlined_call_operand.hbm [shape: f32[1,128], index: 6, kind: input, shape index: {}]   ;;  %s14965_s7 = inlined_call_operand.hbm [shape: bf16[128,128], index: 7, kind: input, shape index: {}]   ;;  %s14966_s8 = inlined_call_operand.hbm [shape: f32[1,128], index: 8, kind: input, shape index: {}]   ;;  %s14967_s9 = inlined_call_operand.vmem [shape: f32[8,128], index: 9, kind: output, shape index: {}]  }
   0x1   :  { %15 = vsyncpa [#allocation5], 0 }
   0x2   :  { %16 = vsyncpa [#allocation8], 0 }
   0x3   :  { %17 = vsyncpa [#allocation11], 0 }
   0x4   :  { %18 = vsyncpa [#allocation14], 0  ;;  %s14357_s30 = smov [#allocation4]   ;;  %s14358_s11 = smov [#allocation7]  }
   0x5   :  { %s39_s10 = sshll.u32 %s14357_s30, 4  ;;  %s61_s12 = sshll.u32 %s14358_s11, 4  ;;  %s40_s10 = int_to_ptr.vmem [resolvable:$true] %s39_s10  ;;  %s62_s12 = int_to_ptr.vmem [resolvable:$true] %s61_s12 }
   0x6   :  { %s14195_s13 = scalar_lea.vmem %s40_s10, 96  ;;  %p14200_p1 = scmp.lt.s32.totalorder %s40_s10, %s40_s10 }
   0x7   :  { %p14196_p0 = scmp.ne.s32.totalorder %s40_s10, %s14195_s13  ;;  %p14201_p2 = scmp.lt.s32.totalorder %s14195_s13, %s14195_s13 }
   0x9   :  { %p14202_p3 = por %p14201_p2, %p14200_p1 }
   0xb   :  { %p14203_p4 = pnand %p14202_p3, %p14196_p0 }
   0xd   :  { %14206 = shalt.err (!%p14203_p4)
}
   0xe   :  { %42 = dma.hbm_to_vmem [thread:$0]  %s14960_s2, 96, %s40_s10, [#allocation5]  }
   0xf   :  { %s14215_s16 = scalar_lea.vmem %s62_s12, 32  ;;  %p14220_p6 = scmp.lt.s32.totalorder %s62_s12, %s62_s12 }
  0x10   :  { %p14216_p5 = scmp.ne.s32.totalorder %s62_s12, %s14215_s16  ;;  %p14221_p7 = scmp.lt.s32.totalorder %s14215_s16, %s14215_s16 }
  0x12   :  { %p14222_p8 = por %p14221_p7, %p14220_p6 }
  0x14   :  { %p14223_p9 = pnand %p14222_p8, %p14216_p5 }
  0x16   :  { %14226 = shalt.err (!%p14223_p9)
}
  0x17   :  { %64 = dma.hbm_to_vmem [thread:$0]  %s14962_s4, 32, %s62_s12, [#allocation8]  }
  0x18   :  { %s14359_s19 = smov [#allocation10]   ;;  %s14360_s21 = smov [#allocation2]  }
  0x19   :  { %s83_s20 = sshll.u32 %s14359_s19, 4  ;;  %s26_s22 = sshll.u32 %s14360_s21, 4  ;;  %s84_s20 = int_to_ptr.vmem [resolvable:$true] %s83_s20  ;;  %s27_s22 = int_to_ptr.vmem [resolvable:$true] %s26_s22 }
  0x1a   :  { %s14235_s23 = scalar_lea.vmem %s84_s20, 16  ;;  %s14239_s2 = scalar_lea.vmem %s84_s20, 32 }
  0x1b   :  { %p14236_p10 = scmp.ne.s32.totalorder %s84_s20, %s14235_s23  ;;  %p14240_p11 = scmp.lt.s32.totalorder %s84_s20, %s84_s20 }
  0x1c   :  { %p14241_p12 = scmp.lt.s32.totalorder %s14239_s2, %s14235_s23 }
  0x1e   :  { %p14242_p13 = por %p14241_p12, %p14240_p11 }
  0x20   :  { %p14243_p0 = pnand %p14242_p13, %p14236_p10 }
  0x22   :  { %14246 = shalt.err (!%p14243_p0)
}
  0x23   :  { %86 = dma.hbm_to_vmem [thread:$0]  %s14964_s6, 16, %s84_s20, [#allocation11]  }
  0x24   :  { %s14255_s26 = scalar_lea.vmem %s27_s22, 150528  ;;  %p14260_p2 = scmp.lt.s32.totalorder %s27_s22, %s27_s22 }
  0x25   :  { %p14256_p1 = scmp.ne.s32.totalorder %s27_s22, %s14255_s26  ;;  %p14261_p3 = scmp.lt.s32.totalorder %s14255_s26, %s14255_s26 }
  0x27   :  { %p14262_p4 = por %p14261_p3, %p14260_p2 }
  0x29   :  { %p14263_p5 = pnand %p14262_p4, %p14256_p1 }
  0x2b   :  { %14266 = shalt.err (!%p14263_p5)
}
  0x2c   :  { %s14361_s4 = smov 1536   ;;  %s14362_s27 = smov 96  }
  0x2d   :  { %32 = dma.hbm_to_vmem [thread:$0]  %s14959_s1, 150528, %s27_s22, [#allocation3], %s14361_s4, %s14361_s4, %s14362_s27  }
  0x2e   :  { %s14363_s30 = smov [#allocation6]  }
  0x2f   :  { %s48_s10 = sshll.u32 %s14363_s30, 4  ;;  %s49_s10 = int_to_ptr.vmem [resolvable:$true] %s48_s10 }
  0x30   :  { %s14275_s11 = scalar_lea.vmem %s49_s10, 49152  ;;  %p14280_p7 = scmp.lt.s32.totalorder %s49_s10, %s49_s10 }
  0x31   :  { %p14276_p6 = scmp.ne.s32.totalorder %s49_s10, %s14275_s11  ;;  %p14281_p8 = scmp.lt.s32.totalorder %s14275_s11, %s14275_s11 }
  0x33   :  { %p14282_p9 = por %p14281_p8, %p14280_p7 }
  0x35   :  { %p14283_p10 = pnand %p14282_p9, %p14276_p6 }
  0x37   :  { %14286 = shalt.err (!%p14283_p10)
}
  0x38   :  { %s14364_s6 = smov 512   ;;  %s14365_s12 = smov 32  }
  0x39   :  { %54 = dma.hbm_to_vmem [thread:$0]  %s14961_s3, 49152, %s49_s10, [#allocation5], %s14364_s6, %s14364_s6, %s14365_s12  }
  0x3a   :  { %s14366_s15 = smov [#allocation9]  }
  0x3b   :  { %s70_s16 = sshll.u32 %s14366_s15, 4  ;;  %s71_s16 = int_to_ptr.vmem [resolvable:$true] %s70_s16 }
  0x3c   :  { %s14295_s1 = scalar_lea.vmem %s71_s16, 2048  ;;  %p14300_p12 = scmp.lt.s32.totalorder %s71_s16, %s71_s16 }
  0x3d   :  { %p14296_p11 = scmp.ne.s32.totalorder %s71_s16, %s14295_s1  ;;  %p14301_p13 = scmp.lt.s32.totalorder %s14295_s1, %s14295_s1 }
  0x3f   :  { %p14302_p0 = por %p14301_p13, %p14300_p12 }
  0x41   :  { %p14303_p1 = pnand %p14302_p0, %p14296_p11 }
  0x43   :  { %14306 = shalt.err (!%p14303_p1)
}
  0x44   :  { %s14367_s17 = smov 64   ;;  %s14368_s18 = smov 4  }
  0x45   :  { %76 = dma.hbm_to_vmem [thread:$0]  %s14963_s5, 2048, %s71_s16, [#allocation8], %s14367_s17, %s14367_s17, %s14368_s18  }
  0x46   :  { %s14369_s21 = smov [#allocation12]   ;;  %s14370_s23 = smov [#allocation13]  }
  0x47   :  { %s92_s22 = sshll.u32 %s14369_s21, 4  ;;  %s105_s3 = sshll.u32 %s14370_s23, 4  ;;  %s93_s22 = int_to_ptr.vmem [resolvable:$true] %s92_s22  ;;  %s106_s3 = int_to_ptr.vmem [resolvable:$true] %s105_s3 }
  0x48   :  { %s14315_s2 = scalar_lea.vmem %s93_s22, 1024  ;;  %p14320_p3 = scmp.lt.s32.totalorder %s93_s22, %s93_s22 }
  0x49   :  { %p14316_p2 = scmp.ne.s32.totalorder %s93_s22, %s14315_s2  ;;  %p14321_p4 = scmp.lt.s32.totalorder %s14315_s2, %s14315_s2 }
  0x4b   :  { %p14322_p5 = por %p14321_p4, %p14320_p3 }
  0x4d   :  { %p14323_p6 = pnand %p14322_p5, %p14316_p2 }
  0x4f   :  { %14326 = shalt.err (!%p14323_p6)
}
  0x50   :  { %98 = dma.hbm_to_vmem [thread:$0]  %s14965_s7, 1024, %s93_s22, [#allocation11], %s14367_s17, %s14367_s17, %s14368_s18  }
  0x51   :  { %s14335_s26 = scalar_lea.vmem %s106_s3, 16  ;;  %s14339_s5 = scalar_lea.vmem %s106_s3, 32 }
  0x52   :  { %p14336_p7 = scmp.ne.s32.totalorder %s106_s3, %s14335_s26  ;;  %p14340_p8 = scmp.lt.s32.totalorder %s106_s3, %s106_s3 }
  0x53   :  { %p14341_p9 = scmp.lt.s32.totalorder %s14339_s5, %s14335_s26 }
  0x55   :  { %p14342_p10 = por %p14341_p9, %p14340_p8 }
  0x57   :  { %p14343_p11 = pnand %p14342_p10, %p14336_p7 }
  0x59   :  { %14346 = shalt.err (!%p14343_p11)
}
  0x5a   :  { %108 = dma.hbm_to_vmem [thread:$0]  %s14966_s8, 16, %s106_s3, [#allocation14]  }
  0x5b   :  { %14347 = dma.done.wait [#allocation3], 150528  }
  0x5c   :  { %14348 = vsyncadd [#allocation3], 4294816768 }
  0x5d   :  { %14349 = dma.done.wait [#allocation5], 49248  }
  0x5e   :  { %14350 = vsyncadd [#allocation5], 4294918048 }
  0x5f   :  { %14351 = dma.done.wait [#allocation8], 2080  }
  0x60   :  { %14352 = vsyncadd [#allocation8], 4294965216 }
  0x61   :  { %14353 = dma.done.wait [#allocation11], 1040  }
  0x62   :  { %14354 = vsyncadd [#allocation11], 4294966256 }
  0x63   :  { %14355 = dma.done.wait [#allocation14], 16  }
  0x64   :  { %14356 = vsyncadd [#allocation14], 4294967280  ;;  %v306_v0 = vld [vmem:[#allocation2 + $0x540] sm:$0xff]  ;;  %v14456_v54 = vld [vmem:[%s14958_s0 + $0x8] sm:$0xff]  ;;  %vm7218_vm0 = vcmask 130048   ;;  %vm14373_vm1 = vmmov 0  }
  0x65   :  { %v318_v1 = vld [vmem:[#allocation2 + $0x5a0] sm:$0xff]  ;;  %v14464_v59 = vcombine.high %v14456_v54, %v14456_v54 }
  0x66   :  { %v690_v2 = vld [vmem:[#allocation2 + $0x1140] sm:$0xff]  ;;  %v12650_v3 = vcombine.high %v306_v0, %v318_v1  ;;  %v12649_v5 = vcombine.low %v306_v0, %v318_v1 }
  0x67   :  { %v702_v4 = vld [vmem:[#allocation2 + $0x11a0] sm:$0xff]  ;;  %7295 = vmatprep.mubr.bf16.mxu1 %v14464_v59 }
  0x68   :  { %v282_v6 = vld [vmem:[#allocation2 + $0x480] sm:$0xff]  ;;  %v13034_v8 = vcombine.high %v690_v2, %v702_v4  ;;  %v13033_v9 = vcombine.low %v690_v2, %v702_v4  ;;  %7222 = vmatprep.subr.bf16.mxu0 %v12650_v3 }
  0x69   :  { %v294_v7 = vld [vmem:[#allocation2 + $0x4e0] sm:$0xff]  ;;  %7223 = vmatpush1.bf16.msra.mxu0 %v12649_v5 }
  0x6a   :  { %v12626_v10 = vcombine.high %v282_v6, %v294_v7  ;;  %v666_v11 = vld [vmem:[#allocation2 + $0x1080] sm:$0xff]  ;;  %7263 = vmatprep.subr.bf16.mxu1 %v13034_v8  ;;  %v12625_v18 = vcombine.low %v282_v6, %v294_v7 }
  0x6b   :  { %v678_v12 = vld [vmem:[#allocation2 + $0x10e0] sm:$0xff]  ;;  %7264 = vmatpush1.bf16.msra.mxu1 %v13033_v9 }
  0x6c   :  { %v258_v13 = vld [vmem:[#allocation2 + $0x3c0] sm:$0xff]  ;;  %v13010_v14 = vcombine.high %v666_v11, %v678_v12  ;;  %7224 = vmatprep.subr.bf16.mxu0 %v12626_v10  ;;  %v13009_v19 = vcombine.low %v666_v11, %v678_v12 }
  0x6d   :  { %v270_v15 = vld [vmem:[#allocation2 + $0x420] sm:$0xff]  ;;  %7225 = vmatpush1.bf16.msra.mxu0 %v12625_v18 }
  0x6e   :  { %v642_v16 = vld [vmem:[#allocation2 + $0xfc0] sm:$0xff]  ;;  %v12602_v20 = vcombine.high %v258_v13, %v270_v15  ;;  %7265 = vmatprep.subr.bf16.mxu1 %v13010_v14  ;;  %v12601_v26 = vcombine.low %v258_v13, %v270_v15 }
  0x6f   :  { %v654_v17 = vld [vmem:[#allocation2 + $0x1020] sm:$0xff]  ;;  %7266 = vmatpush1.bf16.msra.mxu1 %v13009_v19 }
  0x70   :  { %v12986_v21 = vcombine.high %v642_v16, %v654_v17  ;;  %v234_v22 = vld [vmem:[#allocation2 + $0x300] sm:$0xff]  ;;  %7226 = vmatprep.subr.bf16.mxu0 %v12602_v20  ;;  %v12985_v27 = vcombine.low %v642_v16, %v654_v17 }
  0x71   :  { %v246_v23 = vld [vmem:[#allocation2 + $0x360] sm:$0xff]  ;;  %7227 = vmatpush1.bf16.msra.mxu0 %v12601_v26 }
  0x72   :  { %v618_v24 = vld [vmem:[#allocation2 + $0xf00] sm:$0xff]  ;;  %v12578_v28 = vcombine.high %v234_v22, %v246_v23  ;;  %7267 = vmatprep.subr.bf16.mxu1 %v12986_v21  ;;  %v12577_v34 = vcombine.low %v234_v22, %v246_v23 }
  0x73   :  { %v630_v25 = vld [vmem:[#allocation2 + $0xf60] sm:$0xff]  ;;  %7268 = vmatpush1.bf16.msra.mxu1 %v12985_v27 }
  0x74   :  { %v12962_v29 = vcombine.high %v618_v24, %v630_v25  ;;  %v210_v30 = vld [vmem:[#allocation2 + $0x240] sm:$0xff]  ;;  %7228 = vmatprep.subr.bf16.mxu0 %v12578_v28  ;;  %v12961_v35 = vcombine.low %v618_v24, %v630_v25 }
  0x75   :  { %v222_v31 = vld [vmem:[#allocation2 + $0x2a0] sm:$0xff]  ;;  %7229 = vmatpush1.bf16.msra.mxu0 %v12577_v34 }
  0x76   :  { %v594_v32 = vld [vmem:[#allocation2 + $0xe40] sm:$0xff]  ;;  %v12554_v36 = vcombine.high %v210_v30, %v222_v31  ;;  %7269 = vmatprep.subr.bf16.mxu1 %v12962_v29  ;;  %v12553_v42 = vcombine.low %v210_v30, %v222_v31 }
  0x77   :  { %v606_v33 = vld [vmem:[#allocation2 + $0xea0] sm:$0xff]  ;;  %7270 = vmatpush1.bf16.msra.mxu1 %v12961_v35 }
  0x78   :  { %v12938_v37 = vcombine.high %v594_v32, %v606_v33  ;;  %v186_v38 = vld [vmem:[#allocation2 + $0x180] sm:$0xff]  ;;  %7230 = vmatprep.subr.bf16.mxu0 %v12554_v36  ;;  %v12937_v43 = vcombine.low %v594_v32, %v606_v33 }
  0x79   :  { %v198_v39 = vld [vmem:[#allocation2 + $0x1e0] sm:$0xff]  ;;  %7231 = vmatpush1.bf16.msra.mxu0 %v12553_v42 }
  0x7a   :  { %v570_v40 = vld [vmem:[#allocation2 + $0xd80] sm:$0xff]  ;;  %v12530_v44 = vcombine.high %v186_v38, %v198_v39  ;;  %7271 = vmatprep.subr.bf16.mxu1 %v12938_v37  ;;  %v12529_v50 = vcombine.low %v186_v38, %v198_v39 }
  0x7b   :  { %v582_v41 = vld [vmem:[#allocation2 + $0xde0] sm:$0xff]  ;;  %7272 = vmatpush1.bf16.msra.mxu1 %v12937_v43 }
  0x7c   :  { %v12914_v45 = vcombine.high %v570_v40, %v582_v41  ;;  %v162_v46 = vld [vmem:[#allocation2 + $0xc0] sm:$0xff]  ;;  %7232 = vmatprep.subr.bf16.mxu0 %v12530_v44  ;;  %v12913_v51 = vcombine.low %v570_v40, %v582_v41 }
  0x7d   :  { %v174_v47 = vld [vmem:[#allocation2 + $0x120] sm:$0xff]  ;;  %7233 = vmatpush1.bf16.msra.mxu0 %v12529_v50 }
  0x7e   :  { %v546_v48 = vld [vmem:[#allocation2 + $0xcc0] sm:$0xff]  ;;  %v12506_v52 = vcombine.high %v162_v46, %v174_v47  ;;  %7273 = vmatprep.subr.bf16.mxu1 %v12914_v45  ;;  %v12505_v62 = vcombine.low %v162_v46, %v174_v47 }
  0x7f   :  { %v558_v49 = vld [vmem:[#allocation2 + $0xd20] sm:$0xff]  ;;  %7274 = vmatpush1.bf16.msra.mxu1 %v12913_v51 }
  0x80   :  { %v14451_v53 = vld [vmem:[%s14958_s0] sm:$0xff]  ;;  %v12890_v55 = vcombine.high %v546_v48, %v558_v49  ;;  %7234 = vmatprep.subr.bf16.mxu0 %v12506_v52  ;;  %v12889_v63 = vcombine.low %v546_v48, %v558_v49 }
  0x81   :  { %v138_v56 = vld [vmem:[#allocation2] sm:$0xff]  ;;  %v14460_v58 = vcombine.high %v14451_v53, %v14451_v53  ;;  %7235 = vmatpush1.bf16.msra.mxu0 %v12505_v62 }
  0x82   :  { %v150_v57 = vld [vmem:[#allocation2 + $0x60] sm:$0xff]  ;;  %7275 = vmatprep.subr.bf16.mxu1 %v12890_v55 }
  0x83   :  { %v522_v60 = vld [vmem:[#allocation2 + $0xc00] sm:$0xff]  ;;  %7254 = vmatprep.mubr.bf16.mxu0 %v14460_v58  ;;  %v12482_v0 = vcombine.high %v138_v56, %v150_v57  ;;  %v12481_v6 = vcombine.low %v138_v56, %v150_v57  ;;  %7276 = vmatpush1.bf16.msra.mxu1 %v12889_v63 }
  0x84   :  { %v534_v61 = vld [vmem:[#allocation2 + $0xc60] sm:$0xff] }
  0x85   :  { %v12866_v1 = vcombine.high %v522_v60, %v534_v61  ;;  %v498_v2 = vld [vmem:[#allocation2 + $0xb40] sm:$0xff]  ;;  %7236 = vmatprep.subr.bf16.mxu0 %v12482_v0  ;;  %v12865_v7 = vcombine.low %v522_v60, %v534_v61 }
  0x86   :  { %v510_v3 = vld [vmem:[#allocation2 + $0xba0] sm:$0xff]  ;;  %7237 = vmatpush1.bf16.msra.mxu0 %v12481_v6 }
  0x87   :  { %v882_v4 = vld [vmem:[#allocation2 + $0x1740] sm:$0xff]  ;;  %v12842_v8 = vcombine.high %v498_v2, %v510_v3  ;;  %7277 = vmatprep.subr.bf16.mxu1 %v12866_v1  ;;  %v12841_v14 = vcombine.low %v498_v2, %v510_v3 }
  0x88   :  { %v894_v5 = vld [vmem:[#allocation2 + $0x17a0] sm:$0xff]  ;;  %7278 = vmatpush1.bf16.msra.mxu1 %v12865_v7 }
  0x89   :  { %v13226_v9 = vcombine.high %v882_v4, %v894_v5  ;;  %v474_v10 = vld [vmem:[#allocation2 + $0xa80] sm:$0xff]  ;;  %7238 = vmatprep.subr.bf16.mxu0 %v12842_v8  ;;  %v13225_v15 = vcombine.low %v882_v4, %v894_v5 }
  0x8a   :  { %v486_v11 = vld [vmem:[#allocation2 + $0xae0] sm:$0xff]  ;;  %7239 = vmatpush2.bf16.msra.mxu0 %v12841_v14 }
  0x8b   :  { %v858_v12 = vld [vmem:[#allocation2 + $0x1680] sm:$0xff]  ;;  %v12818_v16 = vcombine.high %v474_v10, %v486_v11  ;;  %7279 = vmatprep.subr.bf16.mxu1 %v13226_v9  ;;  %v12817_v22 = vcombine.low %v474_v10, %v486_v11 }
  0x8c   :  { %v870_v13 = vld [vmem:[#allocation2 + $0x16e0] sm:$0xff]  ;;  %7280 = vmatpush2.bf16.msra.mxu1 %v13225_v15 }
  0x8d   :  { %v13202_v17 = vcombine.high %v858_v12, %v870_v13  ;;  %v450_v18 = vld [vmem:[#allocation2 + $0x9c0] sm:$0xff]  ;;  %7240 = vmatprep.subr.bf16.mxu0 %v12818_v16  ;;  %v13201_v23 = vcombine.low %v858_v12, %v870_v13  ;;  %v14470_v16 = vcombine.low %v14451_v53, %v14451_v53 }
  0x8e   :  { %v462_v19 = vld [vmem:[#allocation2 + $0xa20] sm:$0xff]  ;;  %7241 = vmatpush2.bf16.msra.mxu0 %v12817_v22 }
  0x8f   :  { %v834_v20 = vld [vmem:[#allocation2 + $0x15c0] sm:$0xff]  ;;  %v12794_v24 = vcombine.high %v450_v18, %v462_v19  ;;  %7281 = vmatprep.subr.bf16.mxu1 %v13202_v17  ;;  %v12793_v30 = vcombine.low %v450_v18, %v462_v19  ;;  %v307_v17 = vld [vmem:[#allocation2 + $0x548] sm:$0xff]  ;;  %v14474_v19 = vcombine.low %v14456_v54, %v14456_v54 }
  0x90   :  { %v846_v21 = vld [vmem:[#allocation2 + $0x1620] sm:$0xff]  ;;  %7282 = vmatpush2.bf16.msra.mxu1 %v13201_v23  ;;  %v319_v18 = vld [vmem:[#allocation2 + $0x5a8] sm:$0xff] }
  0x91   :  { %v13178_v25 = vcombine.high %v834_v20, %v846_v21  ;;  %v426_v26 = vld [vmem:[#allocation2 + $0x900] sm:$0xff]  ;;  %7242 = vmatprep.subr.bf16.mxu0 %v12794_v24  ;;  %v13177_v31 = vcombine.low %v834_v20, %v846_v21  ;;  %v14479_v21 = vld [vmem:[%s14958_s0 + $0x10] sm:$0xff] }
  0x92   :  { %v438_v27 = vld [vmem:[#allocation2 + $0x960] sm:$0xff]  ;;  %7243 = vmatpush2.bf16.msra.mxu0 %v12793_v30  ;;  %v14484_v54 = vcombine.high %v14479_v21, %v14479_v21 }
  0x93   :  { %v810_v28 = vld [vmem:[#allocation2 + $0x1500] sm:$0xff]  ;;  %v12770_v32 = vcombine.high %v426_v26, %v438_v27  ;;  %7283 = vmatprep.subr.bf16.mxu1 %v13178_v25  ;;  %v12769_v38 = vcombine.low %v426_v26, %v438_v27  ;;  %v12652_v25 = vcombine.high %v307_v17, %v319_v18 }
  0x94   :  { %v822_v29 = vld [vmem:[#allocation2 + $0x1560] sm:$0xff]  ;;  %7284 = vmatpush2.bf16.msra.mxu1 %v13177_v31  ;;  %v14371_v31 = vmov 0  }
  0x95   :  { %v13154_v33 = vcombine.high %v810_v28, %v822_v29  ;;  %v402_v34 = vld [vmem:[#allocation2 + $0x840] sm:$0xff]  ;;  %7244 = vmatprep.subr.bf16.mxu0 %v12770_v32  ;;  %v13153_v39 = vcombine.low %v810_v28, %v822_v29  ;;  %v283_v28 = vld [vmem:[#allocation2 + $0x488] sm:$0xff]  ;;  %v14491_v32 = vld [vmem:[%s14958_s0 + $0x18] ss:$0 sps:$4 sm:$0xff]  }
  0x96   :  { %v414_v35 = vld [vmem:[#allocation2 + $0x8a0] sm:$0xff]  ;;  %7245 = vmatpush2.bf16.msra.mxu0 %v12769_v38  ;;  %v295_v29 = vld [vmem:[#allocation2 + $0x4e8] sm:$0xff] }
  0x97   :  { %v786_v36 = vld [vmem:[#allocation2 + $0x1440] sm:$0xff]  ;;  %v12746_v40 = vcombine.high %v402_v34, %v414_v35  ;;  %7285 = vmatprep.subr.bf16.mxu1 %v13154_v33  ;;  %v12745_v46 = vcombine.low %v402_v34, %v414_v35  ;;  %v12651_v35 = vcombine.low %v307_v17, %v319_v18  ;;  %v271_v38 = vld [vmem:[#allocation2 + $0x428] sm:$0xff] }
  0x98   :  { %v798_v37 = vld [vmem:[#allocation2 + $0x14a0] sm:$0xff]  ;;  %7286 = vmatpush2.bf16.msra.mxu1 %v13153_v39 }
  0x99   :  { %v13130_v41 = vcombine.high %v786_v36, %v798_v37  ;;  %v378_v42 = vld [vmem:[#allocation2 + $0x780] sm:$0xff]  ;;  %7246 = vmatprep.subr.bf16.mxu0 %v12746_v40  ;;  %v13129_v47 = vcombine.low %v786_v36, %v798_v37  ;;  %v259_v37 = vld [vmem:[#allocation2 + $0x3c8] sm:$0xff]  ;;  %v12628_v40 = vcombine.high %v283_v28, %v295_v29 }
  0x9a   :  { %v390_v43 = vld [vmem:[#allocation2 + $0x7e0] sm:$0xff]  ;;  %7247 = vmatpush2.bf16.msra.mxu0 %v12745_v46  ;;  %v247_v46 = vld [vmem:[#allocation2 + $0x368] sm:$0xff] }
  0x9b   :  { %v762_v44 = vld [vmem:[#allocation2 + $0x1380] sm:$0xff]  ;;  %v12722_v48 = vcombine.high %v378_v42, %v390_v43  ;;  %7287 = vmatprep.subr.bf16.mxu1 %v13130_v41  ;;  %v12721_v56 = vcombine.low %v378_v42, %v390_v43  ;;  %v12627_v43 = vcombine.low %v283_v28, %v295_v29 }
  0x9c   :  { %v774_v45 = vld [vmem:[#allocation2 + $0x13e0] sm:$0xff]  ;;  %7288 = vmatpush2.bf16.msra.mxu1 %v13129_v47 }
  0x9d   :  { %v13106_v49 = vcombine.high %v762_v44, %v774_v45  ;;  %v354_v50 = vld [vmem:[#allocation2 + $0x6c0] sm:$0xff]  ;;  %7248 = vmatprep.subr.bf16.mxu0 %v12722_v48  ;;  %v13105_v57 = vcombine.low %v762_v44, %v774_v45  ;;  %v235_v45 = vld [vmem:[#allocation2 + $0x308] sm:$0xff]  ;;  %v12604_v48 = vcombine.high %v259_v37, %v271_v38 }
  0x9e   :  { %v366_v51 = vld [vmem:[#allocation2 + $0x720] sm:$0xff]  ;;  %7249 = vmatpush2.bf16.msra.mxu0 %v12721_v56  ;;  %v223_v56 = vld [vmem:[#allocation2 + $0x2a8] sm:$0xff] }
  0x9f   :  { %v738_v52 = vld [vmem:[#allocation2 + $0x12c0] sm:$0xff]  ;;  %v12698_v60 = vcombine.high %v354_v50, %v366_v51  ;;  %7289 = vmatprep.subr.bf16.mxu1 %v13106_v49  ;;  %v12697_v2 = vcombine.low %v354_v50, %v366_v51  ;;  %v12603_v51 = vcombine.low %v259_v37, %v271_v38 }
  0xa0   :  { %v750_v55 = vld [vmem:[#allocation2 + $0x1320] sm:$0xff]  ;;  %7290 = vmatpush2.bf16.msra.mxu1 %v13105_v57 }
  0xa1   :  { %v13082_v61 = vcombine.high %v738_v52, %v750_v55  ;;  %v330_v62 = vld [vmem:[#allocation2 + $0x600] sm:$0xff]  ;;  %7250 = vmatprep.subr.bf16.mxu0 %v12698_v60  ;;  %v13081_v3 = vcombine.low %v738_v52, %v750_v55  ;;  %v211_v55 = vld [vmem:[#allocation2 + $0x248] sm:$0xff]  ;;  %v12580_v60 = vcombine.high %v235_v45, %v247_v46 }
  0xa2   :  { %v342_v63 = vld [vmem:[#allocation2 + $0x660] sm:$0xff]  ;;  %7251 = vmatpush2.bf16.msra.mxu0 %v12697_v2  ;;  %v199_v2 = vld [vmem:[#allocation2 + $0x1e8] sm:$0xff] }
  0xa3   :  { %v714_v0 = vld [vmem:[#allocation2 + $0x1200] sm:$0xff]  ;;  %v12674_v4 = vcombine.high %v330_v62, %v342_v63  ;;  %7291 = vmatprep.subr.bf16.mxu1 %v13082_v61  ;;  %v12673_v10 = vcombine.low %v330_v62, %v342_v63  ;;  %v12579_v63 = vcombine.low %v235_v45, %v247_v46 }
  0xa4   :  { %v726_v1 = vld [vmem:[#allocation2 + $0x1260] sm:$0xff]  ;;  %7292 = vmatpush2.bf16.msra.mxu1 %v13081_v3 }
  0xa5   :  { %v13058_v5 = vcombine.high %v714_v0, %v726_v1  ;;  %v1074_v6 = vld [vmem:[#allocation2 + $0x1d40] sm:$0xff]  ;;  %7252 = vmatprep.subr.bf16.mxu0 %v12674_v4  ;;  %v13057_v11 = vcombine.low %v714_v0, %v726_v1  ;;  %v187_v1 = vld [vmem:[#allocation2 + $0x188] sm:$0xff]  ;;  %v12556_v4 = vcombine.high %v211_v55, %v223_v56 }
  0xa6   :  { %v1086_v7 = vld [vmem:[#allocation2 + $0x1da0] sm:$0xff]  ;;  %7253 = vmatpush2.bf16.msra.mxu0 %v12673_v10 }
  0xa7   :  { %v1290_v8 = vld [vmem:[#allocation2 + $0x2400] sm:$0xff]  ;;  %v13418_v12 = vcombine.high %v1074_v6, %v1086_v7  ;;  %7293 = vmatprep.subr.bf16.mxu1 %v13058_v5  ;;  %v13417_v20 = vcombine.low %v1074_v6, %v1086_v7  ;;  %v12555_v7 = vcombine.low %v211_v55, %v223_v56 }
  0xa8   :  { %v1302_v9 = vld [vmem:[#allocation2 + $0x2460] sm:$0xff]  ;;  %7294 = vmatpush2.bf16.msra.mxu1 %v13057_v11 }
  0xa9   :  { %v13634_v13 = vcombine.high %v1290_v8, %v1302_v9  ;;  %v1050_v14 = vld [vmem:[#allocation2 + $0x1c80] sm:$0xff]  ;;  %7304 = vmatprep.subr.bf16.mxu0 %v13418_v12  ;;  %v13633_v22 = vcombine.low %v1290_v8, %v1302_v9  ;;  %7255 = vmatmul.mubr.bf16.vlgmr.msra.gmra.mxu0 %v14470_v16  ;;  %v12532_v9 = vcombine.high %v187_v1, %v199_v2  ;;  %v163_v12 = vld [vmem:[#allocation2 + $0xc8] sm:$0xff] }
  0xaa   :  { %v1062_v15 = vld [vmem:[#allocation2 + $0x1ce0] sm:$0xff]  ;;  %7305 = vmatpush1.bf16.msra.mxu0 %v13417_v20  ;;  %7336 = vmatprep.mubr.bf16.mxu0 %v14484_v54 }
  0xab   :  { %v13394_v23 = vcombine.high %v1050_v14, %v1062_v15  ;;  %v1026_v24 = vld [vmem:[#allocation2 + $0x1bc0] sm:$0xff]  ;;  %7359 = vmatprep.subr.bf16.mxu1 %v13634_v13  ;;  %7296 = vmatmul.mubr.bf16.vlgmr.msra.gmra.mxu1 %v14474_v19  ;;  %v13393_v26 = vcombine.low %v1050_v14, %v1062_v15  ;;  %v175_v13 = vld [vmem:[#allocation2 + $0x128] sm:$0xff]  ;;  %v12531_v15 = vcombine.low %v187_v1, %v199_v2 }
  0xac   :  { %v1038_v53 = vld [vmem:[#allocation2 + $0x1c20] sm:$0xff]  ;;  %7360 = vmatpush1.bf16.msra.mxu1 %v13633_v22  ;;  %7377 = vmatprep.mubr.bf16.mxu1 %v14371_v31  ;;  %v12508_v18 = vcombine.high %v163_v12, %v175_v13 }
  0xad   :  { %7306 = vmatprep.subr.bf16.mxu0 %v13394_v23  ;;  %v13370_v27 = vcombine.high %v1026_v24, %v1038_v53  ;;  %v1002_v30 = vld [vmem:[#allocation2 + $0x1b00] sm:$0xff]  ;;  %7386 = vmatprep.subr.bf16.mxu1 %v12652_v25  ;;  %v13369_v34 = vcombine.low %v1026_v24, %v1038_v53  ;;  %v139_v23 = vld [vmem:[#allocation2 + $0x8] sm:$0xff]  ;;  %v12507_v25 = vcombine.low %v163_v12, %v175_v13 }
  0xae   :  { %v1014_v33 = vld [vmem:[#allocation2 + $0x1b60] sm:$0xff]  ;;  %7307 = vmatpush1.bf16.msra.mxu0 %v13393_v26  ;;  %v151_v24 = vld [vmem:[#allocation2 + $0x68] sm:$0xff] }
  0xaf   :  { %7308 = vmatprep.subr.bf16.mxu0 %v13370_v27  ;;  %v13346_v36 = vcombine.high %v1002_v30, %v1014_v33  ;;  %v978_v39 = vld [vmem:[#allocation2 + $0x1a40] sm:$0xff]  ;;  %v13345_v42 = vcombine.low %v1002_v30, %v1014_v33  ;;  %v12484_v27 = vcombine.high %v139_v23, %v151_v24  ;;  %v499_v30 = vld [vmem:[#allocation2 + $0xb48] sm:$0xff] }
  0xb0   :  { %v990_v41 = vld [vmem:[#allocation2 + $0x1aa0] sm:$0xff]  ;;  %v511_v33 = vld [vmem:[#allocation2 + $0xba8] sm:$0xff] }
  0xb1   :  { %v13322_v44 = vcombine.high %v978_v39, %v990_v41  ;;  %v954_v47 = vld [vmem:[#allocation2 + $0x1980] sm:$0xff]  ;;  %v13321_v50 = vcombine.low %v978_v39, %v990_v41  ;;  %v12844_v37 = vcombine.high %v499_v30, %v511_v33  ;;  %v487_v41 = vld [vmem:[#allocation2 + $0xae8] sm:$0xff] }
  0xb2   :  { %7309 = vmatpush1.bf16.msra.mxu0 %v13369_v34  ;;  %v966_v49 = vld [vmem:[#allocation2 + $0x19e0] sm:$0xff]  ;;  %v379_v12 = vld [vmem:[#allocation2 + $0x788] sm:$0xff] }
  0xb3   :  { %13657 = vmatmul.mubr.msk.bf16.vlgmr.msra.gmra.mxu1 %vm7218_vm0, %v14491_v32  ;;  %7310 = vmatprep.subr.bf16.mxu0 %v13346_v36  ;;  %v13298_v52 = vcombine.high %v954_v47, %v966_v49  ;;  %v930_v57 = vld [vmem:[#allocation2 + $0x18c0] sm:$0xff]  ;;  %v13297_v62 = vcombine.low %v954_v47, %v966_v49  ;;  %v463_v49 = vld [vmem:[#allocation2 + $0xa28] sm:$0xff] }
  0xb4   :  { %7387 = vmatpush1.bf16.msra.mxu1 %v12651_v35  ;;  %7418 = vmatprep.mubr.bf16.mxu1 %v14460_v58  ;;  %v942_v61 = vld [vmem:[#allocation2 + $0x1920] sm:$0xff]  ;;  %v12483_v35 = vcombine.low %v139_v23, %v151_v24  ;;  %v391_v13 = vld [vmem:[#allocation2 + $0x7e8] sm:$0xff] }
  0xb5   :  { %7388 = vmatprep.subr.bf16.mxu1 %v12628_v40  ;;  %v13274_v0 = vcombine.high %v930_v57, %v942_v61  ;;  %v906_v3 = vld [vmem:[#allocation2 + $0x1800] sm:$0xff]  ;;  %v13273_v6 = vcombine.low %v930_v57, %v942_v61  ;;  %v475_v40 = vld [vmem:[#allocation2 + $0xa88] sm:$0xff] }
  0xb6   :  { %7311 = vmatpush1.bf16.msra.mxu0 %v13345_v42  ;;  %v918_v5 = vld [vmem:[#allocation2 + $0x1860] sm:$0xff]  ;;  %v12820_v45 = vcombine.high %v475_v40, %v487_v41  ;;  %v439_v61 = vld [vmem:[#allocation2 + $0x968] sm:$0xff] }
  0xb7   :  { %7312 = vmatprep.subr.bf16.mxu0 %v13322_v44  ;;  %v13250_v8 = vcombine.high %v906_v3, %v918_v5  ;;  %v1266_v10 = vld [vmem:[#allocation2 + $0x2340] sm:$0xff]  ;;  %v13249_v14 = vcombine.low %v906_v3, %v918_v5  ;;  %v415_v5 = vld [vmem:[#allocation2 + $0x8a8] sm:$0xff] }
  0xb8   :  { %7389 = vmatpush1.bf16.msra.mxu1 %v12627_v43  ;;  %v1278_v11 = vld [vmem:[#allocation2 + $0x23a0] sm:$0xff]  ;;  %v12843_v43 = vcombine.low %v499_v30, %v511_v33  ;;  %v355_v23 = vld [vmem:[#allocation2 + $0x6c8] sm:$0xff]  ;;  %v14499_v30 = vcombine.low %v14479_v21, %v14479_v21 }
  0xb9   :  { %7390 = vmatprep.subr.bf16.mxu1 %v12604_v48  ;;  %v13610_v17 = vcombine.high %v1266_v10, %v1278_v11  ;;  %v1242_v20 = vld [vmem:[#allocation2 + $0x2280] sm:$0xff]  ;;  %v13609_v53 = vcombine.low %v1266_v10, %v1278_v11  ;;  %v451_v48 = vld [vmem:[#allocation2 + $0x9c8] sm:$0xff] }
  0xba   :  { %7313 = vmatpush1.bf16.msra.mxu0 %v13321_v50  ;;  %v1254_v22 = vld [vmem:[#allocation2 + $0x22e0] sm:$0xff]  ;;  %v12796_v55 = vcombine.high %v451_v48, %v463_v49  ;;  %v367_v24 = vld [vmem:[#allocation2 + $0x728] sm:$0xff] }
  0xbb   :  { %7314 = vmatprep.subr.bf16.mxu0 %v13298_v52  ;;  %v13586_v26 = vcombine.high %v1242_v20, %v1254_v22  ;;  %v1218_v28 = vld [vmem:[#allocation2 + $0x21c0] sm:$0xff]  ;;  %v13585_v34 = vcombine.low %v1242_v20, %v1254_v22  ;;  %v691_v20 = vld [vmem:[#allocation2 + $0x1148] sm:$0xff] }
  0xbc   :  { %7391 = vmatpush1.bf16.msra.mxu1 %v12603_v51  ;;  %v1230_v29 = vld [vmem:[#allocation2 + $0x2220] sm:$0xff]  ;;  %v12819_v51 = vcombine.low %v475_v40, %v487_v41  ;;  %v703_v22 = vld [vmem:[#allocation2 + $0x11a8] sm:$0xff] }
  0xbd   :  { %7392 = vmatprep.subr.bf16.mxu1 %v12580_v60  ;;  %v13562_v36 = vcombine.high %v1218_v28, %v1230_v29  ;;  %v1194_v38 = vld [vmem:[#allocation2 + $0x2100] sm:$0xff]  ;;  %v13561_v42 = vcombine.low %v1218_v28, %v1230_v29  ;;  %v427_v60 = vld [vmem:[#allocation2 + $0x908] sm:$0xff] }
  0xbe   :  { %7315 = vmatpush1.bf16.msra.mxu0 %v13297_v62  ;;  %v1206_v39 = vld [vmem:[#allocation2 + $0x2160] sm:$0xff]  ;;  %v12772_v1 = vcombine.high %v427_v60, %v439_v61  ;;  %v667_v28 = vld [vmem:[#allocation2 + $0x1088] sm:$0xff] }
  0xbf   :  { %7316 = vmatprep.subr.bf16.mxu0 %v13274_v0  ;;  %v13538_v44 = vcombine.high %v1194_v38, %v1206_v39  ;;  %v1170_v46 = vld [vmem:[#allocation2 + $0x2040] sm:$0xff]  ;;  %v13537_v50 = vcombine.low %v1194_v38, %v1206_v39  ;;  %v679_v29 = vld [vmem:[#allocation2 + $0x10e8] sm:$0xff] }
  0xc0   :  { %7393 = vmatpush1.bf16.msra.mxu1 %v12579_v63  ;;  %v1182_v47 = vld [vmem:[#allocation2 + $0x20a0] sm:$0xff]  ;;  %v12795_v63 = vcombine.low %v451_v48, %v463_v49  ;;  %v331_v33 = vld [vmem:[#allocation2 + $0x608] sm:$0xff] }
  0xc1   :  { %7394 = vmatprep.subr.bf16.mxu1 %v12556_v4  ;;  %v13514_v52 = vcombine.high %v1170_v46, %v1182_v47  ;;  %v1146_v56 = vld [vmem:[#allocation2 + $0x1f80] sm:$0xff]  ;;  %v13513_v62 = vcombine.low %v1170_v46, %v1182_v47  ;;  %v403_v4 = vld [vmem:[#allocation2 + $0x848] sm:$0xff] }
  0xc2   :  { %7317 = vmatpush1.bf16.msra.mxu0 %v13273_v6  ;;  %v1158_v57 = vld [vmem:[#allocation2 + $0x1fe0] sm:$0xff]  ;;  %v643_v39 = vld [vmem:[#allocation2 + $0xfc8] sm:$0xff] }
  0xc3   :  { %7318 = vmatprep.subr.bf16.mxu0 %v13250_v8  ;;  %v13490_v0 = vcombine.high %v1146_v56, %v1158_v57  ;;  %v1122_v2 = vld [vmem:[#allocation2 + $0x1ec0] sm:$0xff]  ;;  %v13489_v6 = vcombine.low %v1146_v56, %v1158_v57  ;;  %v655_v40 = vld [vmem:[#allocation2 + $0x1028] sm:$0xff] }
  0xc4   :  { %7395 = vmatpush1.bf16.msra.mxu1 %v12555_v7  ;;  %v1134_v3 = vld [vmem:[#allocation2 + $0x1f20] sm:$0xff]  ;;  %v12771_v7 = vcombine.low %v427_v60, %v439_v61  ;;  %v1075_v41 = vld [vmem:[#allocation2 + $0x1d48] sm:$0xff] }
  0xc5   :  { %7396 = vmatprep.subr.bf16.mxu1 %v12532_v9  ;;  %v13466_v8 = vcombine.high %v1122_v2, %v1134_v3  ;;  %v12748_v9 = vcombine.high %v403_v4, %v415_v5  ;;  %v1098_v10 = vld [vmem:[#allocation2 + $0x1e00] sm:$0xff]  ;;  %v619_v46 = vld [vmem:[#allocation2 + $0xf08] sm:$0xff] }
  0xc6   :  { %7319 = vmatpush1.bf16.msra.mxu0 %v13249_v14  ;;  %v1110_v11 = vld [vmem:[#allocation2 + $0x1e60] sm:$0xff]  ;;  %v13465_v14 = vcombine.low %v1122_v2, %v1134_v3  ;;  %v631_v47 = vld [vmem:[#allocation2 + $0xf68] sm:$0xff] }
  0xc7   :  { %7320 = vmatprep.subr.bf16.mxu0 %v13610_v17  ;;  %v13442_v17 = vcombine.high %v1098_v10, %v1110_v11  ;;  %v1051_v48 = vld [vmem:[#allocation2 + $0x1c88] sm:$0xff] }
  0xc8   :  { %7397 = vmatpush1.bf16.msra.mxu1 %v12531_v15  ;;  %v12747_v15 = vcombine.low %v403_v4, %v415_v5  ;;  %v1063_v49 = vld [vmem:[#allocation2 + $0x1ce8] sm:$0xff] }
  0xc9   :  { %7398 = vmatprep.subr.bf16.mxu1 %v12508_v18  ;;  %v12724_v18 = vcombine.high %v379_v12, %v391_v13  ;;  %v595_v56 = vld [vmem:[#allocation2 + $0xe48] sm:$0xff] }
  0xca   :  { %7321 = vmatpush2.bf16.msra.mxu0 %v13609_v53  ;;  %v13441_v53 = vcombine.low %v1098_v10, %v1110_v11  ;;  %v607_v57 = vld [vmem:[#allocation2 + $0xea8] sm:$0xff] }
  0xcb   :  { %7322 = vmatprep.subr.bf16.mxu0 %v13586_v26  ;;  %v13036_v26 = vcombine.high %v691_v20, %v703_v22  ;;  %v1027_v60 = vld [vmem:[#allocation2 + $0x1bc8] sm:$0xff] }
  0xcc   :  { %7399 = vmatpush1.bf16.msra.mxu1 %v12507_v25  ;;  %v12723_v25 = vcombine.low %v379_v12, %v391_v13  ;;  %v1039_v61 = vld [vmem:[#allocation2 + $0x1c28] sm:$0xff] }
  0xcd   :  { %7400 = vmatprep.subr.bf16.mxu1 %v12484_v27  ;;  %v12700_v27 = vcombine.high %v355_v23, %v367_v24  ;;  %v571_v2 = vld [vmem:[#allocation2 + $0xd88] sm:$0xff] }
  0xce   :  { %7323 = vmatpush2.bf16.msra.mxu0 %v13585_v34  ;;  %v343_v34 = vld [vmem:[#allocation2 + $0x668] sm:$0xff] }
  0xcf   :  { %7324 = vmatprep.subr.bf16.mxu0 %v13562_v36  ;;  %v12699_v36 = vcombine.low %v355_v23, %v367_v24  ;;  %v12676_v38 = vcombine.high %v331_v33, %v343_v34  ;;  %v12675_v21 = vcombine.low %v331_v33, %v343_v34  ;;  %v583_v3 = vld [vmem:[#allocation2 + $0xde8] sm:$0xff] }
  0xd0   :  { %7401 = vmatpush1.bf16.msra.mxu1 %v12483_v35  ;;  %v13035_v35 = vcombine.low %v691_v20, %v703_v22  ;;  %v1003_v4 = vld [vmem:[#allocation2 + $0x1b08] sm:$0xff] }
  0xd1   :  { %7402 = vmatprep.subr.bf16.mxu1 %v12844_v37  ;;  %v13012_v37 = vcombine.high %v667_v28, %v679_v29  ;;  %v1015_v5 = vld [vmem:[#allocation2 + $0x1b68] sm:$0xff] }
  0xd2   :  { %7325 = vmatpush2.bf16.msra.mxu0 %v13561_v42  ;;  %v1087_v42 = vld [vmem:[#allocation2 + $0x1da8] sm:$0xff] }
  0xd3   :  { %7326 = vmatprep.subr.bf16.mxu0 %v13538_v44  ;;  %v12988_v44 = vcombine.high %v643_v39, %v655_v40  ;;  %v547_v10 = vld [vmem:[#allocation2 + $0xcc8] sm:$0xff] }
  0xd4   :  { %7403 = vmatpush2.bf16.msra.mxu1 %v12843_v43  ;;  %v13011_v43 = vcombine.low %v667_v28, %v679_v29  ;;  %v559_v11 = vld [vmem:[#allocation2 + $0xd28] sm:$0xff] }
  0xd5   :  { %7404 = vmatprep.subr.bf16.mxu1 %v12820_v45  ;;  %v13420_v45 = vcombine.high %v1075_v41, %v1087_v42  ;;  %v979_v12 = vld [vmem:[#allocation2 + $0x1a48] sm:$0xff] }
  0xd6   :  { %7327 = vmatpush2.bf16.msra.mxu0 %v13537_v50  ;;  %v12987_v50 = vcombine.low %v643_v39, %v655_v40  ;;  %v991_v13 = vld [vmem:[#allocation2 + $0x1aa8] sm:$0xff] }
  0xd7   :  { %7328 = vmatprep.subr.bf16.mxu0 %v13514_v52  ;;  %v12964_v52 = vcombine.high %v619_v46, %v631_v47  ;;  %v523_v20 = vld [vmem:[#allocation2 + $0xc08] sm:$0xff] }
  0xd8   :  { %7405 = vmatpush2.bf16.msra.mxu1 %v12819_v51  ;;  %v13419_v51 = vcombine.low %v1075_v41, %v1087_v42  ;;  %v535_v22 = vld [vmem:[#allocation2 + $0xc68] sm:$0xff] }
  0xd9   :  { %7406 = vmatprep.subr.bf16.mxu1 %v12796_v55  ;;  %v13396_v55 = vcombine.high %v1051_v48, %v1063_v49  ;;  %v955_v23 = vld [vmem:[#allocation2 + $0x1988] sm:$0xff] }
  0xda   :  { %7329 = vmatpush2.bf16.msra.mxu0 %v13513_v62  ;;  %v12963_v62 = vcombine.low %v619_v46, %v631_v47  ;;  %v967_v24 = vld [vmem:[#allocation2 + $0x19e8] sm:$0xff] }
  0xdb   :  { %7330 = vmatprep.subr.bf16.mxu0 %v13490_v0  ;;  %v12940_v0 = vcombine.high %v595_v56, %v607_v57  ;;  %v883_v28 = vld [vmem:[#allocation2 + $0x1748] sm:$0xff] }
  0xdc   :  { %7407 = vmatpush2.bf16.msra.mxu1 %v12795_v63  ;;  %v13395_v63 = vcombine.low %v1051_v48, %v1063_v49  ;;  %v895_v29 = vld [vmem:[#allocation2 + $0x17a8] sm:$0xff] }
  0xdd   :  { %7408 = vmatprep.subr.bf16.mxu1 %v12772_v1  ;;  %v13372_v1 = vcombine.high %v1027_v60, %v1039_v61  ;;  %v931_v33 = vld [vmem:[#allocation2 + $0x18c8] sm:$0xff] }
  0xde   :  { %7331 = vmatpush2.bf16.msra.mxu0 %v13489_v6  ;;  %v12939_v6 = vcombine.low %v595_v56, %v607_v57  ;;  %v943_v34 = vld [vmem:[#allocation2 + $0x1928] sm:$0xff] }
  0xdf   :  { %7332 = vmatprep.subr.bf16.mxu0 %v13466_v8  ;;  %v12916_v8 = vcombine.high %v571_v2, %v583_v3  ;;  %v859_v39 = vld [vmem:[#allocation2 + $0x1688] sm:$0xff] }
  0xe0   :  { %7409 = vmatpush2.bf16.msra.mxu1 %v12771_v7  ;;  %v13371_v7 = vcombine.low %v1027_v60, %v1039_v61  ;;  %v871_v40 = vld [vmem:[#allocation2 + $0x16e8] sm:$0xff] }
  0xe1   :  { %7410 = vmatprep.subr.bf16.mxu1 %v12748_v9  ;;  %v13348_v9 = vcombine.high %v1003_v4, %v1015_v5  ;;  %v907_v41 = vld [vmem:[#allocation2 + $0x1808] sm:$0xff] }
  0xe2   :  { %7333 = vmatpush2.bf16.msra.mxu0 %v13465_v14  ;;  %v12915_v14 = vcombine.low %v571_v2, %v583_v3  ;;  %v919_v42 = vld [vmem:[#allocation2 + $0x1868] sm:$0xff] }
  0xe3   :  { %7334 = vmatprep.subr.bf16.mxu0 %v13442_v17  ;;  %v12892_v17 = vcombine.high %v547_v10, %v559_v11  ;;  %v835_v46 = vld [vmem:[#allocation2 + $0x15c8] sm:$0xff] }
  0xe4   :  { %7411 = vmatpush2.bf16.msra.mxu1 %v12747_v15  ;;  %v13347_v15 = vcombine.low %v1003_v4, %v1015_v5  ;;  %v847_v47 = vld [vmem:[#allocation2 + $0x1628] sm:$0xff] }
  0xe5   :  { %7412 = vmatprep.subr.bf16.mxu1 %v12724_v18  ;;  %v13324_v18 = vcombine.high %v979_v12, %v991_v13  ;;  %v1267_v48 = vld [vmem:[#allocation2 + $0x2348] sm:$0xff] }
  0xe6   :  { %7335 = vmatpush2.bf16.msra.mxu0 %v13441_v53  ;;  %v12891_v53 = vcombine.low %v547_v10, %v559_v11  ;;  %v1279_v49 = vld [vmem:[#allocation2 + $0x23a8] sm:$0xff] }
  0xe7   :  { %7427 = vmatprep.subr.bf16.mxu0 %v13036_v26  ;;  %v12868_v26 = vcombine.high %v523_v20, %v535_v22  ;;  %v811_v56 = vld [vmem:[#allocation2 + $0x1508] sm:$0xff] }
  0xe8   :  { %7413 = vmatpush2.bf16.msra.mxu1 %v12723_v25  ;;  %v13323_v25 = vcombine.low %v979_v12, %v991_v13  ;;  %v823_v57 = vld [vmem:[#allocation2 + $0x1568] sm:$0xff] }
  0xe9   :  { %7414 = vmatprep.subr.bf16.mxu1 %v12700_v27  ;;  %7337 = vmatmul.mubr.bf16.vlgmr.msra.gmra.mxu0 %v14499_v30  ;;  %v13300_v27 = vcombine.high %v955_v23, %v967_v24  ;;  %v1243_v60 = vld [vmem:[#allocation2 + $0x2288] sm:$0xff] }
  0xea   :  { %7428 = vmatpush1.bf16.msra.mxu0 %v13035_v35  ;;  %7459 = vmatprep.mubr.bf16.mxu0 %v14464_v59  ;;  %v12867_v35 = vcombine.low %v523_v20, %v535_v22  ;;  %v1255_v61 = vld [vmem:[#allocation2 + $0x22e8] sm:$0xff] }
  0xeb   :  { %7429 = vmatprep.subr.bf16.mxu0 %v13012_v37  ;;  %v13228_v37 = vcombine.high %v883_v28, %v895_v29  ;;  %v787_v2 = vld [vmem:[#allocation2 + $0x1448] sm:$0xff] }
  0xec   :  { %7415 = vmatpush2.bf16.msra.mxu1 %v12699_v36  ;;  %v13299_v36 = vcombine.low %v955_v23, %v967_v24  ;;  %v799_v3 = vld [vmem:[#allocation2 + $0x14a8] sm:$0xff] }
  0xed   :  { %7416 = vmatprep.subr.bf16.mxu1 %v12676_v38  ;;  %v13276_v38 = vcombine.high %v931_v33, %v943_v34  ;;  %v1219_v4 = vld [vmem:[#allocation2 + $0x21c8] sm:$0xff] }
  0xee   :  { %7430 = vmatpush1.bf16.msra.mxu0 %v13011_v43  ;;  %v13227_v43 = vcombine.low %v883_v28, %v895_v29  ;;  %v1231_v5 = vld [vmem:[#allocation2 + $0x2228] sm:$0xff] }
  0xef   :  { %7431 = vmatprep.subr.bf16.mxu0 %v12988_v44  ;;  %v13204_v44 = vcombine.high %v859_v39, %v871_v40  ;;  %v763_v10 = vld [vmem:[#allocation2 + $0x1388] sm:$0xff] }
  0xf0   :  { %7417 = vmatpush2.bf16.msra.mxu1 %v12675_v21  ;;  %v13275_v21 = vcombine.low %v931_v33, %v943_v34  ;;  %v775_v11 = vld [vmem:[#allocation2 + $0x13e8] sm:$0xff] }
  0xf1   :  { %7468 = vmatprep.subr.bf16.mxu1 %v13420_v45  ;;  %v13252_v45 = vcombine.high %v907_v41, %v919_v42  ;;  %v1195_v12 = vld [vmem:[#allocation2 + $0x2108] sm:$0xff] }
  0xf2   :  { %7432 = vmatpush1.bf16.msra.mxu0 %v12987_v50  ;;  %v13203_v50 = vcombine.low %v859_v39, %v871_v40  ;;  %v1207_v13 = vld [vmem:[#allocation2 + $0x2168] sm:$0xff] }
  0xf3   :  { %7419 = vmatmul.mubr.bf16.vlgmr.msra.gmra.mxu1 %v14470_v16  ;;  %7433 = vmatprep.subr.bf16.mxu0 %v12964_v52  ;;  %v13180_v52 = vcombine.high %v835_v46, %v847_v47  ;;  %v739_v20 = vld [vmem:[#allocation2 + $0x12c8] sm:$0xff] }
  0xf4   :  { %7469 = vmatpush1.bf16.msra.mxu1 %v13419_v51  ;;  %7500 = vmatprep.mubr.bf16.mxu1 %v14484_v54  ;;  %v13251_v51 = vcombine.low %v907_v41, %v919_v42  ;;  %v751_v22 = vld [vmem:[#allocation2 + $0x1328] sm:$0xff] }
  0xf5   :  { %7470 = vmatprep.subr.bf16.mxu1 %v13396_v55  ;;  %v13612_v55 = vcombine.high %v1267_v48, %v1279_v49  ;;  %v1171_v23 = vld [vmem:[#allocation2 + $0x2048] sm:$0xff] }
  0xf6   :  { %7434 = vmatpush1.bf16.msra.mxu0 %v12963_v62  ;;  %v13179_v62 = vcombine.low %v835_v46, %v847_v47  ;;  %v1183_v24 = vld [vmem:[#allocation2 + $0x20a8] sm:$0xff]  ;;  %v308_v46 = vld [vmem:[#allocation2 + $0x550] sm:$0xff] }
  0xf7   :  { %7435 = vmatprep.subr.bf16.mxu0 %v12940_v0  ;;  %v13156_v0 = vcombine.high %v811_v56, %v823_v57  ;;  %v715_v28 = vld [vmem:[#allocation2 + $0x1208] sm:$0xff]  ;;  %v320_v47 = vld [vmem:[#allocation2 + $0x5b0] sm:$0xff] }
  0xf8   :  { %7471 = vmatpush1.bf16.msra.mxu1 %v13395_v63  ;;  %v13611_v63 = vcombine.low %v1267_v48, %v1279_v49  ;;  %v727_v29 = vld [vmem:[#allocation2 + $0x1268] sm:$0xff] }
  0xf9   :  { %7472 = vmatprep.subr.bf16.mxu1 %v13372_v1  ;;  %v13588_v1 = vcombine.high %v1243_v60, %v1255_v61  ;;  %v1147_v33 = vld [vmem:[#allocation2 + $0x1f88] sm:$0xff] }
  0xfa   :  { %7436 = vmatpush1.bf16.msra.mxu0 %v12939_v6  ;;  %v13155_v6 = vcombine.low %v811_v56, %v823_v57  ;;  %v1159_v34 = vld [vmem:[#allocation2 + $0x1fe8] sm:$0xff]  ;;  %v692_v56 = vld [vmem:[#allocation2 + $0x1150] sm:$0xff] }
  0xfb   :  { %7437 = vmatprep.subr.bf16.mxu0 %v12916_v8  ;;  %v13132_v8 = vcombine.high %v787_v2, %v799_v3  ;;  %v1291_v39 = vld [vmem:[#allocation2 + $0x2408] sm:$0xff]  ;;  %v704_v57 = vld [vmem:[#allocation2 + $0x11b0] sm:$0xff] }
  0xfc   :  { %7473 = vmatpush1.bf16.msra.mxu1 %v13371_v7  ;;  %v13587_v7 = vcombine.low %v1243_v60, %v1255_v61  ;;  %v1303_v40 = vld [vmem:[#allocation2 + $0x2468] sm:$0xff]  ;;  %v13038_v61 = vcombine.high %v692_v56, %v704_v57 }
  0xfd   :  { %7474 = vmatprep.subr.bf16.mxu1 %v13348_v9  ;;  %v13564_v9 = vcombine.high %v1219_v4, %v1231_v5  ;;  %v1123_v41 = vld [vmem:[#allocation2 + $0x1ec8] sm:$0xff] }
  0xfe   :  { %7438 = vmatpush1.bf16.msra.mxu0 %v12915_v14  ;;  %v13131_v14 = vcombine.low %v787_v2, %v799_v3  ;;  %v1135_v42 = vld [vmem:[#allocation2 + $0x1f28] sm:$0xff]  ;;  %v12653_v2 = vcombine.low %v308_v46, %v320_v47  ;;  %v13037_v3 = vcombine.low %v692_v56, %v704_v57 }
  0xff   :  { %7439 = vmatprep.subr.bf16.mxu0 %v12892_v17  ;;  %v13108_v17 = vcombine.high %v763_v10, %v775_v11  ;;  %v1099_v48 = vld [vmem:[#allocation2 + $0x1e08] sm:$0xff] }
 0x100   :  { %7475 = vmatpush1.bf16.msra.mxu1 %v13347_v15  ;;  %v13563_v15 = vcombine.low %v1219_v4, %v1231_v5  ;;  %v1111_v49 = vld [vmem:[#allocation2 + $0x1e68] sm:$0xff] }
 0x101   :  { %7476 = vmatprep.subr.bf16.mxu1 %v13324_v18  ;;  %v13540_v18 = vcombine.high %v1195_v12, %v1207_v13  ;;  %v13443_v60 = vcombine.low %v1099_v48, %v1111_v49 }
 0x102   :  { %7440 = vmatpush1.bf16.msra.mxu0 %v12891_v53  ;;  %v13107_v53 = vcombine.low %v763_v10, %v775_v11 }
 0x103   :  { %7441 = vmatprep.subr.bf16.mxu0 %v12868_v26  ;;  %v13084_v26 = vcombine.high %v739_v20, %v751_v22 }
 0x104   :  { %7477 = vmatpush1.bf16.msra.mxu1 %v13323_v25  ;;  %v13539_v25 = vcombine.low %v1195_v12, %v1207_v13 }
 0x105   :  { %7478 = vmatprep.subr.bf16.mxu1 %v13300_v27  ;;  %v13516_v27 = vcombine.high %v1171_v23, %v1183_v24 }
 0x106   :  { %7442 = vmatpush1.bf16.msra.mxu0 %v12867_v35  ;;  %v13083_v35 = vcombine.low %v739_v20, %v751_v22 }
 0x107   :  { %7443 = vmatprep.subr.bf16.mxu0 %v13228_v37  ;;  %v13060_v37 = vcombine.high %v715_v28, %v727_v29 }
 0x108   :  { %7479 = vmatpush1.bf16.msra.mxu1 %v13299_v36  ;;  %v13515_v36 = vcombine.low %v1171_v23, %v1183_v24  ;;  %v212_v24 = vld [vmem:[#allocation2 + $0x250] sm:$0xff] }
 0x109   :  { %7480 = vmatprep.subr.bf16.mxu1 %v13276_v38  ;;  %v13492_v38 = vcombine.high %v1147_v33, %v1159_v34 }
 0x10a   :  { %7444 = vmatpush2.bf16.msra.mxu0 %v13227_v43  ;;  %v13059_v43 = vcombine.low %v715_v28, %v727_v29 }
 0x10b   :  { %7445 = vmatprep.subr.bf16.mxu0 %v13204_v44  ;;  %v13636_v44 = vcombine.high %v1291_v39, %v1303_v40 }
 0x10c   :  { %7481 = vmatpush1.bf16.msra.mxu1 %v13275_v21  ;;  %v13491_v21 = vcombine.low %v1147_v33, %v1159_v34  ;;  %v188_v34 = vld [vmem:[#allocation2 + $0x190] sm:$0xff] }
 0x10d   :  { %7482 = vmatprep.subr.bf16.mxu1 %v13252_v45  ;;  %v13468_v45 = vcombine.high %v1123_v41, %v1135_v42 }
 0x10e   :  { %7446 = vmatpush2.bf16.msra.mxu0 %v13203_v50  ;;  %v13635_v50 = vcombine.low %v1291_v39, %v1303_v40 }
 0x10f   :  { %7447 = vmatprep.subr.bf16.mxu0 %v13180_v52  ;;  %v12654_v52 = vcombine.high %v308_v46, %v320_v47 }
 0x110   :  { %7483 = vmatpush1.bf16.msra.mxu1 %v13251_v51  ;;  %v13467_v51 = vcombine.low %v1123_v41, %v1135_v42  ;;  %v164_v42 = vld [vmem:[#allocation2 + $0xd0] sm:$0xff] }
 0x111   :  { %7484 = vmatprep.subr.bf16.mxu1 %v13612_v55  ;;  %v13444_v55 = vcombine.high %v1099_v48, %v1111_v49  ;;  %v140_v49 = vld [vmem:[#allocation2 + $0x10] sm:$0xff] }
 0x112   :  { %7448 = vmatpush2.bf16.msra.mxu0 %v13179_v62  ;;  %v284_v62 = vld [vmem:[#allocation2 + $0x490] sm:$0xff] }
 0x113   :  { %7449 = vmatprep.subr.bf16.mxu0 %v13156_v0  ;;  %v668_v0 = vld [vmem:[#allocation2 + $0x1090] sm:$0xff] }
 0x114   :  { %7485 = vmatpush2.bf16.msra.mxu1 %v13611_v63  ;;  %v296_v63 = vld [vmem:[#allocation2 + $0x4f0] sm:$0xff] }
 0x115   :  { %7486 = vmatprep.subr.bf16.mxu1 %v13588_v1  ;;  %v680_v1 = vld [vmem:[#allocation2 + $0x10f0] sm:$0xff]  ;;  %v12630_v4 = vcombine.high %v284_v62, %v296_v63  ;;  %v12629_v10 = vcombine.low %v284_v62, %v296_v63 }
 0x116   :  { %7450 = vmatpush2.bf16.msra.mxu0 %v13155_v6  ;;  %v13014_v5 = vcombine.high %v668_v0, %v680_v1  ;;  %v260_v6 = vld [vmem:[#allocation2 + $0x3d0] sm:$0xff]  ;;  %v13013_v11 = vcombine.low %v668_v0, %v680_v1 }
 0x117   :  { %7451 = vmatprep.subr.bf16.mxu0 %v13132_v8  ;;  %v644_v8 = vld [vmem:[#allocation2 + $0xfd0] sm:$0xff] }
 0x118   :  { %7487 = vmatpush2.bf16.msra.mxu1 %v13587_v7  ;;  %v272_v7 = vld [vmem:[#allocation2 + $0x430] sm:$0xff] }
 0x119   :  { %7488 = vmatprep.subr.bf16.mxu1 %v13564_v9  ;;  %v656_v9 = vld [vmem:[#allocation2 + $0x1030] sm:$0xff]  ;;  %v12606_v12 = vcombine.high %v260_v6, %v272_v7 }
 0x11a   :  { %7452 = vmatpush2.bf16.msra.mxu0 %v13131_v14  ;;  %v12990_v13 = vcombine.high %v644_v8, %v656_v9  ;;  %v236_v14 = vld [vmem:[#allocation2 + $0x310] sm:$0xff]  ;;  %v12989_v20 = vcombine.low %v644_v8, %v656_v9 }
 0x11b   :  { %7453 = vmatprep.subr.bf16.mxu0 %v13108_v17  ;;  %v620_v17 = vld [vmem:[#allocation2 + $0xf10] sm:$0xff] }
 0x11c   :  { %7489 = vmatpush2.bf16.msra.mxu1 %v13563_v15  ;;  %v248_v15 = vld [vmem:[#allocation2 + $0x370] sm:$0xff] }
 0x11d   :  { %7490 = vmatprep.subr.bf16.mxu1 %v13540_v18  ;;  %v632_v18 = vld [vmem:[#allocation2 + $0xf70] sm:$0xff]  ;;  %v12582_v22 = vcombine.high %v236_v14, %v248_v15 }
 0x11e   :  { %7454 = vmatpush2.bf16.msra.mxu0 %v13107_v53  ;;  %v12966_v23 = vcombine.high %v620_v17, %v632_v18  ;;  %v224_v53 = vld [vmem:[#allocation2 + $0x2b0] sm:$0xff]  ;;  %v12965_v28 = vcombine.low %v620_v17, %v632_v18 }
 0x11f   :  { %7455 = vmatprep.subr.bf16.mxu0 %v13084_v26  ;;  %v608_v26 = vld [vmem:[#allocation2 + $0xeb0] sm:$0xff]  ;;  %v12558_v29 = vcombine.high %v212_v24, %v224_v53 }
 0x120   :  { %7491 = vmatpush2.bf16.msra.mxu1 %v13539_v25  ;;  %v596_v25 = vld [vmem:[#allocation2 + $0xe50] sm:$0xff] }
 0x121   :  { %7492 = vmatprep.subr.bf16.mxu1 %v13516_v27  ;;  %v12581_v27 = vcombine.low %v236_v14, %v248_v15  ;;  %v12942_v33 = vcombine.high %v596_v25, %v608_v26  ;;  %v12941_v39 = vcombine.low %v596_v25, %v608_v26  ;;  %v512_v62 = vld [vmem:[#allocation2 + $0xbb0] sm:$0xff] }
 0x122   :  { %7456 = vmatpush2.bf16.msra.mxu0 %v13083_v35  ;;  %v200_v35 = vld [vmem:[#allocation2 + $0x1f0] sm:$0xff] }
 0x123   :  { %7457 = vmatprep.subr.bf16.mxu0 %v13060_v37  ;;  %v584_v37 = vld [vmem:[#allocation2 + $0xdf0] sm:$0xff]  ;;  %v12534_v40 = vcombine.high %v188_v34, %v200_v35 }
 0x124   :  { %7493 = vmatpush2.bf16.msra.mxu1 %v13515_v36  ;;  %v572_v36 = vld [vmem:[#allocation2 + $0xd90] sm:$0xff] }
 0x125   :  { %7494 = vmatprep.subr.bf16.mxu1 %v13492_v38  ;;  %v12557_v38 = vcombine.low %v212_v24, %v224_v53  ;;  %v12918_v41 = vcombine.high %v572_v36, %v584_v37  ;;  %v12917_v46 = vcombine.low %v572_v36, %v584_v37  ;;  %v884_v63 = vld [vmem:[#allocation2 + $0x1750] sm:$0xff] }
 0x126   :  { %7458 = vmatpush2.bf16.msra.mxu0 %v13059_v43  ;;  %v176_v43 = vld [vmem:[#allocation2 + $0x130] sm:$0xff] }
 0x127   :  { %7523 = vmatprep.subr.bf16.mxu0 %v13636_v44  ;;  %v560_v44 = vld [vmem:[#allocation2 + $0xd30] sm:$0xff]  ;;  %v12510_v47 = vcombine.high %v164_v42, %v176_v43 }
 0x128   :  { %7495 = vmatpush2.bf16.msra.mxu1 %v13491_v21  ;;  %v548_v21 = vld [vmem:[#allocation2 + $0xcd0] sm:$0xff] }
 0x129   :  { %7496 = vmatprep.subr.bf16.mxu1 %v13468_v45  ;;  %7460 = vmatmul.mubr.bf16.vlgmr.msra.gmra.mxu0 %v14474_v19  ;;  %v12533_v45 = vcombine.low %v188_v34, %v200_v35  ;;  %v12894_v48 = vcombine.high %v548_v21, %v560_v44  ;;  %v12893_v56 = vcombine.low %v548_v21, %v560_v44  ;;  %v896_v0 = vld [vmem:[#allocation2 + $0x17b0] sm:$0xff] }
 0x12a   :  { %7524 = vmatpush1.bf16.msra.mxu0 %v13635_v50  ;;  %7541 = vmatprep.mubr.bf16.mxu0 %v14371_v31  ;;  %v152_v50 = vld [vmem:[#allocation2 + $0x70] sm:$0xff] }
 0x12b   :  { %7550 = vmatprep.subr.bf16.mxu0 %v12654_v52  ;;  %v536_v52 = vld [vmem:[#allocation2 + $0xc70] sm:$0xff]  ;;  %v12486_v57 = vcombine.high %v140_v49, %v152_v50  ;;  %v12485_v1 = vcombine.low %v140_v49, %v152_v50 }
 0x12c   :  { %7497 = vmatpush2.bf16.msra.mxu1 %v13467_v51  ;;  %v524_v51 = vld [vmem:[#allocation2 + $0xc10] sm:$0xff] }
 0x12d   :  { %7498 = vmatprep.subr.bf16.mxu1 %v13444_v55  ;;  %v12509_v55 = vcombine.low %v164_v42, %v176_v43  ;;  %v872_v8 = vld [vmem:[#allocation2 + $0x16f0] sm:$0xff] }
 0x12e   :  { %v464_v14 = vld [vmem:[#allocation2 + $0xa30] sm:$0xff] }
 0x12f   :  { %v836_v15 = vld [vmem:[#allocation2 + $0x15d0] sm:$0xff] }
 0x130   :  { %7499 = vmatpush2.bf16.msra.mxu1 %v13443_v60  ;;  %v12870_v60 = vcombine.high %v524_v51, %v536_v52  ;;  %v848_v17 = vld [vmem:[#allocation2 + $0x1630] sm:$0xff] }
 0x131   :  { %7591 = vmatprep.subr.bf16.mxu1 %v13038_v61  ;;  %13658 = vmatmul.mubr.msk.bf16.vlgmr.msra.gmra.mxu0 %vm7218_vm0, %v14491_v32  ;;  %v12605_v32 = vcombine.low %v260_v6, %v272_v7  ;;  %v500_v61 = vld [vmem:[#allocation2 + $0xb50] sm:$0xff] }
 0x132   :  { %7551 = vmatpush1.bf16.msra.mxu0 %v12653_v2  ;;  %7582 = vmatprep.mubr.bf16.mxu0 %v14460_v58  ;;  %v12869_v2 = vcombine.low %v524_v51, %v536_v52  ;;  %v488_v6 = vld [vmem:[#allocation2 + $0xaf0] sm:$0xff]  ;;  %v12845_v9 = vcombine.low %v500_v61, %v512_v62 }
 0x133   :  { %7501 = vmatmul.mubr.bf16.vlgmr.msra.gmra.mxu1 %v14499_v30  ;;  %7552 = vmatprep.subr.bf16.mxu0 %v12630_v4  ;;  %v13230_v4 = vcombine.high %v884_v63, %v896_v0  ;;  %v860_v7 = vld [vmem:[#allocation2 + $0x1690] sm:$0xff] }
 0x134   :  { %7592 = vmatpush1.bf16.msra.mxu1 %v13037_v3  ;;  %7623 = vmatprep.mubr.bf16.mxu1 %v14464_v59  ;;  %v12846_v3 = vcombine.high %v500_v61, %v512_v62  ;;  %v440_v24 = vld [vmem:[#allocation2 + $0x970] sm:$0xff] }
 0x135   :  { %7593 = vmatprep.subr.bf16.mxu1 %v13014_v5  ;;  %v476_v5 = vld [vmem:[#allocation2 + $0xa90] sm:$0xff] }
 0x136   :  { %7553 = vmatpush1.bf16.msra.mxu0 %v12629_v10  ;;  %v13229_v10 = vcombine.low %v884_v63, %v896_v0  ;;  %v12821_v18 = vcombine.low %v476_v5, %v488_v6  ;;  %v812_v53 = vld [vmem:[#allocation2 + $0x1510] sm:$0xff] }
 0x137   :  { %7554 = vmatprep.subr.bf16.mxu0 %v12606_v12  ;;  %v13206_v12 = vcombine.high %v860_v7, %v872_v8  ;;  %v824_v25 = vld [vmem:[#allocation2 + $0x1570] sm:$0xff] }
 0x138   :  { %7594 = vmatpush1.bf16.msra.mxu1 %v13013_v11  ;;  %v12822_v11 = vcombine.high %v476_v5, %v488_v6  ;;  %v416_v34 = vld [vmem:[#allocation2 + $0x8b0] sm:$0xff] }
 0x139   :  { %7595 = vmatprep.subr.bf16.mxu1 %v12990_v13  ;;  %v452_v13 = vld [vmem:[#allocation2 + $0x9d0] sm:$0xff] }
 0x13a   :  { %7555 = vmatpush1.bf16.msra.mxu0 %v12605_v32  ;;  %v13205_v32 = vcombine.low %v860_v7, %v872_v8  ;;  %v12797_v26 = vcombine.low %v452_v13, %v464_v14  ;;  %v788_v35 = vld [vmem:[#allocation2 + $0x1450] sm:$0xff] }
 0x13b   :  { %7556 = vmatprep.subr.bf16.mxu0 %v12582_v22  ;;  %v13182_v22 = vcombine.high %v836_v15, %v848_v17  ;;  %v800_v36 = vld [vmem:[#allocation2 + $0x14b0] sm:$0xff] }
 0x13c   :  { %7596 = vmatpush1.bf16.msra.mxu1 %v12989_v20  ;;  %v12798_v20 = vcombine.high %v452_v13, %v464_v14  ;;  %v392_v42 = vld [vmem:[#allocation2 + $0x7f0] sm:$0xff] }
 0x13d   :  { %7597 = vmatprep.subr.bf16.mxu1 %v12966_v23  ;;  %v428_v23 = vld [vmem:[#allocation2 + $0x910] sm:$0xff] }
 0x13e   :  { %7557 = vmatpush1.bf16.msra.mxu0 %v12581_v27  ;;  %v13181_v27 = vcombine.low %v836_v15, %v848_v17  ;;  %v12773_v37 = vcombine.low %v428_v23, %v440_v24  ;;  %v764_v43 = vld [vmem:[#allocation2 + $0x1390] sm:$0xff] }
 0x13f   :  { %7558 = vmatprep.subr.bf16.mxu0 %v12558_v29  ;;  %v13158_v29 = vcombine.high %v812_v53, %v824_v25  ;;  %v776_v21 = vld [vmem:[#allocation2 + $0x13f0] sm:$0xff] }
 0x140   :  { %7598 = vmatpush1.bf16.msra.mxu1 %v12965_v28  ;;  %v12774_v28 = vcombine.high %v428_v23, %v440_v24  ;;  %v368_v49 = vld [vmem:[#allocation2 + $0x730] sm:$0xff]  ;;  %v309_v23 = vld [vmem:[#allocation2 + $0x558] sm:$0xff] }
 0x141   :  { %7599 = vmatprep.subr.bf16.mxu1 %v12942_v33  ;;  %v404_v33 = vld [vmem:[#allocation2 + $0x850] sm:$0xff]  ;;  %v321_v24 = vld [vmem:[#allocation2 + $0x5b8] sm:$0xff] }
 0x142   :  { %7559 = vmatpush1.bf16.msra.mxu0 %v12557_v38  ;;  %v13157_v38 = vcombine.low %v812_v53, %v824_v25  ;;  %v12749_v44 = vcombine.low %v404_v33, %v416_v34  ;;  %v740_v50 = vld [vmem:[#allocation2 + $0x12d0] sm:$0xff] }
 0x143   :  { %7560 = vmatprep.subr.bf16.mxu0 %v12534_v40  ;;  %v13134_v40 = vcombine.high %v788_v35, %v800_v36  ;;  %v752_v51 = vld [vmem:[#allocation2 + $0x1330] sm:$0xff] }
 0x144   :  { %7600 = vmatpush1.bf16.msra.mxu1 %v12941_v39  ;;  %v12750_v39 = vcombine.high %v404_v33, %v416_v34  ;;  %v344_v61 = vld [vmem:[#allocation2 + $0x670] sm:$0xff]  ;;  %v12656_v33 = vcombine.high %v309_v23, %v321_v24 }
 0x145   :  { %7601 = vmatprep.subr.bf16.mxu1 %v12918_v41  ;;  %v380_v41 = vld [vmem:[#allocation2 + $0x790] sm:$0xff] }
 0x146   :  { %7561 = vmatpush1.bf16.msra.mxu0 %v12533_v45  ;;  %v13133_v45 = vcombine.low %v788_v35, %v800_v36  ;;  %v12725_v52 = vcombine.low %v380_v41, %v392_v42  ;;  %v716_v62 = vld [vmem:[#allocation2 + $0x1210] sm:$0xff] }
 0x147   :  { %7562 = vmatprep.subr.bf16.mxu0 %v12510_v47  ;;  %v13110_v47 = vcombine.high %v764_v43, %v776_v21  ;;  %v728_v63 = vld [vmem:[#allocation2 + $0x1270] sm:$0xff] }
 0x148   :  { %7602 = vmatpush1.bf16.msra.mxu1 %v12917_v46  ;;  %v12726_v46 = vcombine.high %v380_v41, %v392_v42  ;;  %v1088_v5 = vld [vmem:[#allocation2 + $0x1db0] sm:$0xff]  ;;  %v13061_v13 = vcombine.low %v716_v62, %v728_v63  ;;  %v285_v42 = vld [vmem:[#allocation2 + $0x498] sm:$0xff] }
 0x149   :  { %7603 = vmatprep.subr.bf16.mxu1 %v12894_v48  ;;  %v356_v48 = vld [vmem:[#allocation2 + $0x6d0] sm:$0xff] }
 0x14a   :  { %7563 = vmatpush1.bf16.msra.mxu0 %v12509_v55  ;;  %v13109_v55 = vcombine.low %v764_v43, %v776_v21  ;;  %v12701_v0 = vcombine.low %v356_v48, %v368_v49  ;;  %v1292_v7 = vld [vmem:[#allocation2 + $0x2410] sm:$0xff]  ;;  %v297_v43 = vld [vmem:[#allocation2 + $0x4f8] sm:$0xff] }
 0x14b   :  { %7564 = vmatprep.subr.bf16.mxu0 %v12486_v57  ;;  %v13086_v57 = vcombine.high %v740_v50, %v752_v51  ;;  %v1304_v8 = vld [vmem:[#allocation2 + $0x2470] sm:$0xff] }
 0x14c   :  { %7604 = vmatpush1.bf16.msra.mxu1 %v12893_v56  ;;  %v12702_v56 = vcombine.high %v356_v48, %v368_v49  ;;  %v13638_v17 = vcombine.high %v1292_v7, %v1304_v8  ;;  %v1028_v34 = vld [vmem:[#allocation2 + $0x1bd0] sm:$0xff]  ;;  %v12632_v48 = vcombine.high %v285_v42, %v297_v43 }
 0x14d   :  { %7605 = vmatprep.subr.bf16.mxu1 %v12870_v60  ;;  %v332_v60 = vld [vmem:[#allocation2 + $0x610] sm:$0xff] }
 0x14e   :  { %7565 = vmatpush1.bf16.msra.mxu0 %v12485_v1  ;;  %v13085_v1 = vcombine.low %v740_v50, %v752_v51  ;;  %v1040_v35 = vld [vmem:[#allocation2 + $0x1c30] sm:$0xff]  ;;  %v261_v51 = vld [vmem:[#allocation2 + $0x3d8] sm:$0xff] }
 0x14f   :  { %7566 = vmatprep.subr.bf16.mxu0 %v12846_v3  ;;  %v13062_v3 = vcombine.high %v716_v62, %v728_v63  ;;  %v1016_v41 = vld [vmem:[#allocation2 + $0x1b70] sm:$0xff] }
 0x150   :  { %7606 = vmatpush1.bf16.msra.mxu1 %v12869_v2  ;;  %v12678_v2 = vcombine.high %v332_v60, %v344_v61  ;;  %v980_v49 = vld [vmem:[#allocation2 + $0x1a50] sm:$0xff] }
 0x151   :  { %7607 = vmatprep.subr.bf16.mxu1 %v13230_v4  ;;  %v1076_v4 = vld [vmem:[#allocation2 + $0x1d50] sm:$0xff] }
 0x152   :  { %7567 = vmatpush2.bf16.msra.mxu0 %v12845_v9  ;;  %v13422_v14 = vcombine.high %v1076_v4, %v1088_v5  ;;  %v13421_v25 = vcombine.low %v1076_v4, %v1088_v5  ;;  %v992_v50 = vld [vmem:[#allocation2 + $0x1ab0] sm:$0xff] }
 0x153   :  { %7568 = vmatprep.subr.bf16.mxu0 %v12822_v11  ;;  %v956_v62 = vld [vmem:[#allocation2 + $0x1990] sm:$0xff] }
 0x154   :  { %7608 = vmatpush2.bf16.msra.mxu1 %v13229_v10  ;;  %v12677_v10 = vcombine.low %v332_v60, %v344_v61  ;;  %v13326_v60 = vcombine.high %v980_v49, %v992_v50  ;;  %v968_v63 = vld [vmem:[#allocation2 + $0x19f0] sm:$0xff] }
 0x155   :  { %7609 = vmatprep.subr.bf16.mxu1 %v13206_v12  ;;  %v13302_v4 = vcombine.high %v956_v62, %v968_v63 }
 0x156   :  { %7569 = vmatpush2.bf16.msra.mxu0 %v12821_v18  ;;  %v1052_v18 = vld [vmem:[#allocation2 + $0x1c90] sm:$0xff] }
 0x157   :  { %7570 = vmatprep.subr.bf16.mxu0 %v12798_v20 }
 0x158   :  { %7610 = vmatpush2.bf16.msra.mxu1 %v13205_v32  ;;  %v1064_v32 = vld [vmem:[#allocation2 + $0x1cf0] sm:$0xff] }
 0x159   :  { %7611 = vmatprep.subr.bf16.mxu1 %v13182_v22 }
 0x15a   :  { %7571 = vmatpush2.bf16.msra.mxu0 %v12797_v26 }
 0x15b   :  { %7572 = vmatprep.subr.bf16.mxu0 %v12774_v28  ;;  %v13398_v28 = vcombine.high %v1052_v18, %v1064_v32 }
 0x15c   :  { %7612 = vmatpush2.bf16.msra.mxu1 %v13181_v27  ;;  %v13637_v27 = vcombine.low %v1292_v7, %v1304_v8  ;;  %v944_v7 = vld [vmem:[#allocation2 + $0x1930] sm:$0xff]  ;;  %v213_v8 = vld [vmem:[#allocation2 + $0x258] sm:$0xff] }
 0x15d   :  { %7613 = vmatprep.subr.bf16.mxu1 %v13158_v29 }
 0x15e   :  { %7573 = vmatpush2.bf16.msra.mxu0 %v12773_v37  ;;  %v13397_v37 = vcombine.low %v1052_v18, %v1064_v32  ;;  %v189_v18 = vld [vmem:[#allocation2 + $0x198] sm:$0xff] }
 0x15f   :  { %7574 = vmatprep.subr.bf16.mxu0 %v12750_v39  ;;  %v201_v32 = vld [vmem:[#allocation2 + $0x1f8] sm:$0xff] }
 0x160   :  { %7614 = vmatpush2.bf16.msra.mxu1 %v13157_v38  ;;  %v13374_v38 = vcombine.high %v1028_v34, %v1040_v35 }
 0x161   :  { %7615 = vmatprep.subr.bf16.mxu1 %v13134_v40  ;;  %v1004_v40 = vld [vmem:[#allocation2 + $0x1b10] sm:$0xff] }
 0x162   :  { %7575 = vmatpush2.bf16.msra.mxu0 %v12749_v44  ;;  %v13373_v44 = vcombine.low %v1028_v34, %v1040_v35 }
 0x163   :  { %7576 = vmatprep.subr.bf16.mxu0 %v12726_v46  ;;  %v13350_v46 = vcombine.high %v1004_v40, %v1016_v41 }
 0x164   :  { %7616 = vmatpush2.bf16.msra.mxu1 %v13133_v45  ;;  %v12655_v45 = vcombine.low %v309_v23, %v321_v24 }
 0x165   :  { %7617 = vmatprep.subr.bf16.mxu1 %v13110_v47 }
 0x166   :  { %7577 = vmatpush2.bf16.msra.mxu0 %v12725_v52  ;;  %v273_v52 = vld [vmem:[#allocation2 + $0x438] sm:$0xff] }
 0x167   :  { %7578 = vmatprep.subr.bf16.mxu0 %v12702_v56  ;;  %v13349_v56 = vcombine.low %v1004_v40, %v1016_v41  ;;  %v12608_v61 = vcombine.high %v261_v51, %v273_v52  ;;  %v141_v40 = vld [vmem:[#allocation2 + $0x18] sm:$0xff] }
 0x168   :  { %7618 = vmatpush2.bf16.msra.mxu1 %v13109_v55  ;;  %v14527_v55 = vld [vmem:[%s14958_s0 + $0x18] ss:$0 sps:$4 sm:$0xff]  }
 0x169   :  { %7619 = vmatprep.subr.bf16.mxu1 %v13086_v57  ;;  %v7256_v6 = vpop.f32.mrf.mxu0  ;;  %v12631_v57 = vcombine.low %v285_v42, %v297_v43  ;;  %v153_v41 = vld [vmem:[#allocation2 + $0x78] sm:$0xff] }
 0x16a   :  { %7579 = vmatpush2.bf16.msra.mxu0 %v12701_v0  ;;  %v237_v0 = vld [vmem:[#allocation2 + $0x318] sm:$0xff] }
 0x16b   :  { %v7297_v9 = vpop.f32.mrf.mxu1  ;;  %v7258_v12 = vpop.f32.mrf.mxu0  ;;  %7580 = vmatprep.subr.bf16.mxu0 %v12678_v2  ;;  %v13325_v2 = vcombine.low %v980_v49, %v992_v50  ;;  %v12487_v50 = vcombine.low %v141_v40, %v153_v41 }
 0x16c   :  { %v14512_v11 = vadd.f32 %v7297_v9, %v7256_v6  ;;  %7620 = vmatpush2.bf16.msra.mxu1 %v13085_v1  ;;  %v249_v1 = vld [vmem:[#allocation2 + $0x378] sm:$0xff]  ;;  %v932_v6 = vld [vmem:[#allocation2 + $0x18d0] sm:$0xff] }
 0x16d   :  { %v7299_v15 = vpop.f32.mrf.mxu1  ;;  %7621 = vmatprep.subr.bf16.mxu1 %v13062_v3  ;;  %v7260_v22 = vpop.f32.mrf.mxu0  ;;  %v12607_v3 = vcombine.low %v261_v51, %v273_v52  ;;  %v12584_v5 = vcombine.high %v237_v0, %v249_v1  ;;  %v225_v9 = vld [vmem:[#allocation2 + $0x2b8] sm:$0xff] }
 0x16e   :  { %v14514_v20 = vadd.f32 %v7299_v15, %v7258_v12  ;;  %7581 = vmatpush2.bf16.msra.mxu0 %v12677_v10  ;;  %v13301_v10 = vcombine.low %v956_v62, %v968_v63  ;;  %v12583_v12 = vcombine.low %v237_v0, %v249_v1  ;;  %v908_v15 = vld [vmem:[#allocation2 + $0x1810] sm:$0xff]  ;;  %v13277_v22 = vcombine.low %v932_v6, %v944_v7 }
 0x16f   :  { %v7301_v53 = vpop.f32.mrf.mxu1  ;;  %v7261_v26 = vpop.f32.mrf.mxu0  ;;  %7632 = vmatprep.subr.bf16.mxu0 %v13422_v14  ;;  %v12560_v14 = vcombine.high %v213_v8, %v225_v9  ;;  %v12559_v23 = vcombine.low %v213_v8, %v225_v9 }
 0x170   :  { %7622 = vmatpush2.bf16.msra.mxu1 %v13061_v13  ;;  %v13278_v13 = vcombine.high %v932_v6, %v944_v7  ;;  %v12536_v53 = vcombine.high %v189_v18, %v201_v32  ;;  %v1280_v26 = vld [vmem:[#allocation2 + $0x23b0] sm:$0xff] }
 0x171   :  { %v7302_v29 = vpop.f32.mrf.mxu1  ;;  %7687 = vmatprep.subr.bf16.mxu1 %v13638_v17  ;;  %7583 = vmatmul.mubr.bf16.vlgmr.msra.gmra.mxu0 %v14470_v16  ;;  %v920_v17 = vld [vmem:[#allocation2 + $0x1870] sm:$0xff] }
 0x172   :  { %7633 = vmatpush1.bf16.msra.mxu0 %v13421_v25  ;;  %7664 = vmatprep.mubr.bf16.mxu0 %v14484_v54  ;;  %v13254_v24 = vcombine.high %v908_v15, %v920_v17  ;;  %v1268_v25 = vld [vmem:[#allocation2 + $0x2350] sm:$0xff]  ;;  %v13253_v29 = vcombine.low %v908_v15, %v920_v17 }
 0x173   :  { %7624 = vmatmul.mubr.bf16.vlgmr.msra.gmra.mxu1 %v14474_v19  ;;  %v14518_v36 = vpop.f32.mrf.mxu1  ;;  %7634 = vmatprep.subr.bf16.mxu0 %v13398_v28  ;;  %v177_v28 = vld [vmem:[#allocation2 + $0x138] sm:$0xff]  ;;  %v13614_v34 = vcombine.high %v1268_v25, %v1280_v26  ;;  %v13613_v42 = vcombine.low %v1268_v25, %v1280_v26 }
 0x174   :  { %7688 = vmatpush1.bf16.msra.mxu1 %v13637_v27  ;;  %7705 = vmatprep.mubr.bf16.mxu1 %v14371_v31  ;;  %v165_v27 = vld [vmem:[#allocation2 + $0xd8] sm:$0xff] }
 0x175   :  { %v14520_v39 = vpop.f32.mrf.mxu1  ;;  %7714 = vmatprep.subr.bf16.mxu1 %v12656_v33  ;;  %v12535_v33 = vcombine.low %v189_v18, %v201_v32  ;;  %v12512_v35 = vcombine.high %v165_v27, %v177_v28  ;;  %v12511_v43 = vcombine.low %v165_v27, %v177_v28 }
 0x176   :  { %7635 = vmatpush1.bf16.msra.mxu0 %v13397_v37  ;;  %v1244_v37 = vld [vmem:[#allocation2 + $0x2290] sm:$0xff] }
 0x177   :  { %v7383_v21 = vpop.f32.mrf.mxu1  ;;  %7636 = vmatprep.subr.bf16.mxu0 %v13374_v38  ;;  %v1256_v38 = vld [vmem:[#allocation2 + $0x22f0] sm:$0xff] }
 0x178   :  { %v13590_v21 = vcombine.high %v1244_v37, %v1256_v38  ;;  %v13589_v49 = vcombine.low %v1244_v37, %v1256_v38 }
 0x179   :  { %v7384_v47 = vpop.f32.mrf.mxu1 }
 0x17a   :  { %7637 = vmatpush1.bf16.msra.mxu0 %v13373_v44  ;;  %v12488_v44 = vcombine.high %v141_v40, %v153_v41  ;;  %v501_v47 = vld [vmem:[#allocation2 + $0xb58] sm:$0xff] }
 0x17b   :  { %13659 = vmatmul.mubr.msk.bf16.vlgmr.msra.gmra.mxu1 %vm7218_vm0, %v14527_v55  ;;  %7638 = vmatprep.subr.bf16.mxu0 %v13350_v46  ;;  %v1232_v46 = vld [vmem:[#allocation2 + $0x2230] sm:$0xff] }
 0x17c   :  { %7715 = vmatpush1.bf16.msra.mxu1 %v12655_v45  ;;  %7746 = vmatprep.mubr.bf16.mxu1 %v14460_v58  ;;  %v1220_v45 = vld [vmem:[#allocation2 + $0x21d0] sm:$0xff] }
 0x17d   :  { %7716 = vmatprep.subr.bf16.mxu1 %v12632_v48  ;;  %v513_v48 = vld [vmem:[#allocation2 + $0xbb8] sm:$0xff]  ;;  %v13566_v51 = vcombine.high %v1220_v45, %v1232_v46  ;;  %v13565_v62 = vcombine.low %v1220_v45, %v1232_v46 }
 0x17e   :  { %7639 = vmatpush1.bf16.msra.mxu0 %v13349_v56  ;;  %v12848_v52 = vcombine.high %v501_v47, %v513_v48  ;;  %v1196_v56 = vld [vmem:[#allocation2 + $0x2110] sm:$0xff]  ;;  %v12847_v63 = vcombine.low %v501_v47, %v513_v48  ;;  %v369_v45 = vld [vmem:[#allocation2 + $0x738] sm:$0xff] }
 0x17f   :  { %7640 = vmatprep.subr.bf16.mxu0 %v13326_v60  ;;  %v477_v60 = vld [vmem:[#allocation2 + $0xa98] sm:$0xff] }
 0x180   :  { %7717 = vmatpush1.bf16.msra.mxu1 %v12631_v57  ;;  %v1208_v57 = vld [vmem:[#allocation2 + $0x2170] sm:$0xff] }
 0x181   :  { %7718 = vmatprep.subr.bf16.mxu1 %v12608_v61  ;;  %v489_v61 = vld [vmem:[#allocation2 + $0xaf8] sm:$0xff]  ;;  %v13542_v0 = vcombine.high %v1196_v56, %v1208_v57  ;;  %v13541_v6 = vcombine.low %v1196_v56, %v1208_v57 }
 0x182   :  { %7641 = vmatpush1.bf16.msra.mxu0 %v13325_v2  ;;  %v12824_v1 = vcombine.high %v477_v60, %v489_v61  ;;  %v1172_v2 = vld [vmem:[#allocation2 + $0x2050] sm:$0xff]  ;;  %v12823_v7 = vcombine.low %v477_v60, %v489_v61  ;;  %v669_v57 = vld [vmem:[#allocation2 + $0x1098] sm:$0xff] }
 0x183   :  { %7642 = vmatprep.subr.bf16.mxu0 %v13302_v4  ;;  %v453_v4 = vld [vmem:[#allocation2 + $0x9d8] sm:$0xff] }
 0x184   :  { %7719 = vmatpush1.bf16.msra.mxu1 %v12607_v3  ;;  %v1184_v3 = vld [vmem:[#allocation2 + $0x20b0] sm:$0xff]  ;;  %v681_v60 = vld [vmem:[#allocation2 + $0x10f8] sm:$0xff] }
 0x185   :  { %7720 = vmatprep.subr.bf16.mxu1 %v12584_v5  ;;  %v465_v5 = vld [vmem:[#allocation2 + $0xa38] sm:$0xff]  ;;  %v13518_v8 = vcombine.high %v1172_v2, %v1184_v3  ;;  %v13517_v15 = vcombine.low %v1172_v2, %v1184_v3 }
 0x186   :  { %7643 = vmatpush1.bf16.msra.mxu0 %v13301_v10  ;;  %v12800_v9 = vcombine.high %v453_v4, %v465_v5  ;;  %v1148_v10 = vld [vmem:[#allocation2 + $0x1f90] sm:$0xff]  ;;  %v12799_v17 = vcombine.low %v453_v4, %v465_v5  ;;  %v657_v4 = vld [vmem:[#allocation2 + $0x1038] sm:$0xff] }
 0x187   :  { %7644 = vmatprep.subr.bf16.mxu0 %v13278_v13  ;;  %v429_v13 = vld [vmem:[#allocation2 + $0x918] sm:$0xff] }
 0x188   :  { %7721 = vmatpush1.bf16.msra.mxu1 %v12583_v12  ;;  %v1160_v12 = vld [vmem:[#allocation2 + $0x1ff0] sm:$0xff]  ;;  %v1077_v5 = vld [vmem:[#allocation2 + $0x1d58] sm:$0xff] }
 0x189   :  { %7722 = vmatprep.subr.bf16.mxu1 %v12560_v14  ;;  %v441_v14 = vld [vmem:[#allocation2 + $0x978] sm:$0xff]  ;;  %v13494_v18 = vcombine.high %v1148_v10, %v1160_v12  ;;  %v13493_v25 = vcombine.low %v1148_v10, %v1160_v12 }
 0x18a   :  { %7645 = vmatpush1.bf16.msra.mxu0 %v13277_v22  ;;  %v12776_v32 = vcombine.high %v429_v13, %v441_v14  ;;  %v1124_v22 = vld [vmem:[#allocation2 + $0x1ed0] sm:$0xff]  ;;  %v12775_v26 = vcombine.low %v429_v13, %v441_v14  ;;  %v621_v13 = vld [vmem:[#allocation2 + $0xf18] sm:$0xff] }
 0x18b   :  { %7646 = vmatprep.subr.bf16.mxu0 %v13254_v24  ;;  %v405_v24 = vld [vmem:[#allocation2 + $0x858] sm:$0xff] }
 0x18c   :  { %7723 = vmatpush1.bf16.msra.mxu1 %v12559_v23  ;;  %v1136_v23 = vld [vmem:[#allocation2 + $0x1f30] sm:$0xff]  ;;  %v633_v14 = vld [vmem:[#allocation2 + $0xf78] sm:$0xff] }
 0x18d   :  { %7724 = vmatprep.subr.bf16.mxu1 %v12536_v53  ;;  %v417_v53 = vld [vmem:[#allocation2 + $0x8b8] sm:$0xff]  ;;  %v13470_v27 = vcombine.high %v1124_v22, %v1136_v23  ;;  %v13469_v37 = vcombine.low %v1124_v22, %v1136_v23  ;;  %v12968_v23 = vcombine.high %v621_v13, %v633_v14 }
 0x18e   :  { %7647 = vmatpush1.bf16.msra.mxu0 %v13253_v29  ;;  %v12752_v28 = vcombine.high %v405_v24, %v417_v53  ;;  %v1100_v29 = vld [vmem:[#allocation2 + $0x1e10] sm:$0xff]  ;;  %v12751_v38 = vcombine.low %v405_v24, %v417_v53 }
 0x18f   :  { %7648 = vmatprep.subr.bf16.mxu0 %v13614_v34  ;;  %v381_v34 = vld [vmem:[#allocation2 + $0x798] sm:$0xff] }
 0x190   :  { %7725 = vmatpush1.bf16.msra.mxu1 %v12535_v33  ;;  %v1112_v33 = vld [vmem:[#allocation2 + $0x1e70] sm:$0xff] }
 0x191   :  { %7726 = vmatprep.subr.bf16.mxu1 %v12512_v35  ;;  %v393_v35 = vld [vmem:[#allocation2 + $0x7f8] sm:$0xff]  ;;  %v13446_v40 = vcombine.high %v1100_v29, %v1112_v33  ;;  %v13445_v47 = vcombine.low %v1100_v29, %v1112_v33  ;;  %v12967_v29 = vcombine.low %v621_v13, %v633_v14 }
 0x192   :  { %7649 = vmatpush2.bf16.msra.mxu0 %v13613_v42  ;;  %v12728_v41 = vcombine.high %v381_v34, %v393_v35  ;;  %v693_v42 = vld [vmem:[#allocation2 + $0x1158] sm:$0xff] }
 0x193   :  { %7650 = vmatprep.subr.bf16.mxu0 %v13590_v21  ;;  %v909_v13 = vld [vmem:[#allocation2 + $0x1818] sm:$0xff] }
 0x194   :  { %7727 = vmatpush1.bf16.msra.mxu1 %v12511_v43  ;;  %v705_v43 = vld [vmem:[#allocation2 + $0x11b8] sm:$0xff] }
 0x195   :  { %7728 = vmatprep.subr.bf16.mxu1 %v12488_v44  ;;  %v357_v44 = vld [vmem:[#allocation2 + $0x6d8] sm:$0xff] }
 0x196   :  { %7651 = vmatpush2.bf16.msra.mxu0 %v13589_v49  ;;  %v12727_v49 = vcombine.low %v381_v34, %v393_v35  ;;  %v12704_v56 = vcombine.high %v357_v44, %v369_v45  ;;  %v12703_v2 = vcombine.low %v357_v44, %v369_v45  ;;  %v549_v45 = vld [vmem:[#allocation2 + $0xcd8] sm:$0xff] }
 0x197   :  { %7652 = vmatprep.subr.bf16.mxu0 %v13566_v51  ;;  %v921_v14 = vld [vmem:[#allocation2 + $0x1878] sm:$0xff] }
 0x198   :  { %7729 = vmatpush1.bf16.msra.mxu1 %v12487_v50  ;;  %v13040_v50 = vcombine.high %v693_v42, %v705_v43 }
 0x199   :  { %7730 = vmatprep.subr.bf16.mxu1 %v12848_v52 }
 0x19a   :  { %7653 = vmatpush2.bf16.msra.mxu0 %v13565_v62  ;;  %v333_v62 = vld [vmem:[#allocation2 + $0x618] sm:$0xff] }
 0x19b   :  { %7654 = vmatprep.subr.bf16.mxu0 %v13542_v0  ;;  %v13039_v0 = vcombine.low %v693_v42, %v705_v43 }
 0x19c   :  { %7731 = vmatpush2.bf16.msra.mxu1 %v12847_v63  ;;  %v345_v63 = vld [vmem:[#allocation2 + $0x678] sm:$0xff] }
 0x19d   :  { %7732 = vmatprep.subr.bf16.mxu1 %v12824_v1  ;;  %v12680_v3 = vcombine.high %v333_v62, %v345_v63 }
 0x19e   :  { %7655 = vmatpush2.bf16.msra.mxu0 %v13541_v6  ;;  %v1089_v6 = vld [vmem:[#allocation2 + $0x1db8] sm:$0xff] }
 0x19f   :  { %7656 = vmatprep.subr.bf16.mxu0 %v13518_v8  ;;  %v12679_v8 = vcombine.low %v333_v62, %v345_v63  ;;  %v13424_v12 = vcombine.high %v1077_v5, %v1089_v6  ;;  %v13423_v22 = vcombine.low %v1077_v5, %v1089_v6  ;;  %v969_v62 = vld [vmem:[#allocation2 + $0x19f8] sm:$0xff] }
 0x1a0   :  { %7733 = vmatpush2.bf16.msra.mxu1 %v12823_v7 }
 0x1a1   :  { %7734 = vmatprep.subr.bf16.mxu1 %v12800_v9 }
 0x1a2   :  { %7657 = vmatpush2.bf16.msra.mxu0 %v13517_v15  ;;  %v1053_v15 = vld [vmem:[#allocation2 + $0x1c98] sm:$0xff] }
 0x1a3   :  { %7658 = vmatprep.subr.bf16.mxu0 %v13494_v18 }
 0x1a4   :  { %7735 = vmatpush2.bf16.msra.mxu1 %v12799_v17  ;;  %v1065_v17 = vld [vmem:[#allocation2 + $0x1cf8] sm:$0xff] }
 0x1a5   :  { %7736 = vmatprep.subr.bf16.mxu1 %v12776_v32  ;;  %v13400_v53 = vcombine.high %v1053_v15, %v1065_v17  ;;  %v13399_v33 = vcombine.low %v1053_v15, %v1065_v17 }
 0x1a6   :  { %7659 = vmatpush2.bf16.msra.mxu0 %v13493_v25  ;;  %v597_v25 = vld [vmem:[#allocation2 + $0xe58] sm:$0xff] }
 0x1a7   :  { %7660 = vmatprep.subr.bf16.mxu0 %v13470_v27  ;;  %v1029_v27 = vld [vmem:[#allocation2 + $0x1bd8] sm:$0xff] }
 0x1a8   :  { %7737 = vmatpush2.bf16.msra.mxu1 %v12775_v26  ;;  %v609_v26 = vld [vmem:[#allocation2 + $0xeb8] sm:$0xff] }
 0x1a9   :  { %7738 = vmatprep.subr.bf16.mxu1 %v12752_v28  ;;  %v7338_v21 = vpop.f32.mrf.mxu0  ;;  %v1041_v28 = vld [vmem:[#allocation2 + $0x1c38] sm:$0xff]  ;;  %v12944_v34 = vcombine.high %v597_v25, %v609_v26  ;;  %v12943_v42 = vcombine.low %v597_v25, %v609_v26  ;;  %v13255_v26 = vcombine.low %v909_v13, %v921_v14 }
 0x1aa   :  { %v7339_v46 = vadd.f32 %v7338_v21, %v14512_v11  ;;  %7661 = vmatpush2.bf16.msra.mxu0 %v13469_v37  ;;  %v13376_v35 = vcombine.high %v1029_v27, %v1041_v28  ;;  %v573_v37 = vld [vmem:[#allocation2 + $0xd98] sm:$0xff]  ;;  %v13375_v43 = vcombine.low %v1029_v27, %v1041_v28 }
 0x1ab   :  { %v7340_v48 = vpop.f32.mrf.mxu0  ;;  %7662 = vmatprep.subr.bf16.mxu0 %v13446_v40  ;;  %v1005_v40 = vld [vmem:[#allocation2 + $0x1b18] sm:$0xff] }
 0x1ac   :  { %7739 = vmatpush2.bf16.msra.mxu1 %v12751_v38  ;;  %v14534_v51 = vadd.f32 %v14518_v36, %v7339_v46  ;;  %v7341_v52 = vadd.f32 %v7340_v48, %v14514_v20  ;;  %v13016_v36 = vcombine.high %v669_v57, %v681_v60  ;;  %v645_v20 = vld [vmem:[#allocation2 + $0xfd8] sm:$0xff] }
 0x1ad   :  { %7740 = vmatprep.subr.bf16.mxu1 %v12728_v41  ;;  %v7342_v61 = vpop.f32.mrf.mxu0  ;;  %v12992_v9 = vcombine.high %v645_v20, %v657_v4  ;;  %v12991_v32 = vcombine.low %v645_v20, %v657_v4  ;;  %v585_v38 = vld [vmem:[#allocation2 + $0xdf8] sm:$0xff] }
 0x1ae   :  { %v14538_v11 = vadd.f32 %v14520_v39, %v7341_v52  ;;  %7663 = vmatpush2.bf16.msra.mxu0 %v13445_v47  ;;  %v13015_v39 = vcombine.low %v669_v57, %v681_v60  ;;  %v1017_v41 = vld [vmem:[#allocation2 + $0x1b78] sm:$0xff]  ;;  %v12920_v21 = vcombine.high %v573_v37, %v585_v38 }
 0x1af   :  { %v7343_v1 = vpop.f32.mrf.mxu0  ;;  %7755 = vmatprep.subr.bf16.mxu0 %v13040_v50  ;;  %v13352_v44 = vcombine.high %v1005_v40, %v1017_v41  ;;  %v561_v46 = vld [vmem:[#allocation2 + $0xd38] sm:$0xff]  ;;  %v13351_v50 = vcombine.low %v1005_v40, %v1017_v41 }
 0x1b0   :  { %7741 = vmatpush2.bf16.msra.mxu1 %v12727_v49  ;;  %v981_v47 = vld [vmem:[#allocation2 + $0x1a58] sm:$0xff]  ;;  %v12919_v49 = vcombine.low %v573_v37, %v585_v38  ;;  %v12896_v52 = vcombine.high %v549_v45, %v561_v46  ;;  %v12895_v63 = vcombine.low %v549_v45, %v561_v46 }
 0x1b1   :  { %7742 = vmatprep.subr.bf16.mxu1 %v12704_v56  ;;  %7665 = vmatmul.mubr.bf16.vlgmr.msra.gmra.mxu0 %v14499_v30  ;;  %v993_v48 = vld [vmem:[#allocation2 + $0x1ab8] sm:$0xff] }
 0x1b2   :  { %7756 = vmatpush1.bf16.msra.mxu0 %v13039_v0  ;;  %7787 = vmatprep.mubr.bf16.mxu0 %v14464_v59  ;;  %v13328_v56 = vcombine.high %v981_v47, %v993_v48  ;;  %v525_v57 = vld [vmem:[#allocation2 + $0xc18] sm:$0xff]  ;;  %v13327_v0 = vcombine.low %v981_v47, %v993_v48 }
 0x1b3   :  { %v14541_v7 = vpop.f32.mrf.mxu1  ;;  %7757 = vmatprep.subr.bf16.mxu0 %v13016_v36  ;;  %v537_v60 = vld [vmem:[#allocation2 + $0xc78] sm:$0xff] }
 0x1b4   :  { %7743 = vmatpush2.bf16.msra.mxu1 %v12703_v2  ;;  %v957_v61 = vld [vmem:[#allocation2 + $0x1998] sm:$0xff]  ;;  %v12872_v1 = vcombine.high %v525_v57, %v537_v60  ;;  %v12871_v5 = vcombine.low %v525_v57, %v537_v60 }
 0x1b5   :  { %v14544_v10 = vpop.f32.mrf.mxu1  ;;  %7744 = vmatprep.subr.bf16.mxu1 %v12680_v3  ;;  %v13304_v2 = vcombine.high %v957_v61, %v969_v62  ;;  %v885_v36 = vld [vmem:[#allocation2 + $0x1758] sm:$0xff]  ;;  %v13303_v6 = vcombine.low %v957_v61, %v969_v62 }
 0x1b6   :  { %7758 = vmatpush1.bf16.msra.mxu0 %v13015_v39  ;;  %v897_v3 = vld [vmem:[#allocation2 + $0x17b8] sm:$0xff] }
 0x1b7   :  { %v7424_v18 = vpop.f32.mrf.mxu1  ;;  %7759 = vmatprep.subr.bf16.mxu0 %v12992_v9  ;;  %v933_v20 = vld [vmem:[#allocation2 + $0x18d8] sm:$0xff]  ;;  %v13232_v39 = vcombine.high %v885_v36, %v897_v3  ;;  %v13231_v15 = vcombine.low %v885_v36, %v897_v3 }
 0x1b8   :  { %7745 = vmatpush2.bf16.msra.mxu1 %v12679_v8  ;;  %v945_v4 = vld [vmem:[#allocation2 + $0x1938] sm:$0xff] }
 0x1b9   :  { %v7425_v24 = vpop.f32.mrf.mxu1  ;;  %7796 = vmatprep.subr.bf16.mxu1 %v13424_v12  ;;  %v13280_v8 = vcombine.high %v933_v20, %v945_v4  ;;  %v861_v9 = vld [vmem:[#allocation2 + $0x1698] sm:$0xff]  ;;  %v13279_v17 = vcombine.low %v933_v20, %v945_v4 }
 0x1ba   :  { %7760 = vmatpush1.bf16.msra.mxu0 %v12991_v32  ;;  %v873_v12 = vld [vmem:[#allocation2 + $0x16f8] sm:$0xff]  ;;  %v13256_v32 = vcombine.high %v909_v13, %v921_v14 }
 0x1bb   :  { %7747 = vmatmul.mubr.bf16.vlgmr.msra.gmra.mxu1 %v14470_v16  ;;  %7761 = vmatprep.subr.bf16.mxu0 %v12968_v23  ;;  %v13208_v18 = vcombine.high %v861_v9, %v873_v12  ;;  %v849_v23 = vld [vmem:[#allocation2 + $0x1638] sm:$0xff]  ;;  %v13207_v25 = vcombine.low %v861_v9, %v873_v12 }
 0x1bc   :  { %7797 = vmatpush1.bf16.msra.mxu1 %v13423_v22  ;;  %7828 = vmatprep.mubr.bf16.mxu1 %v14484_v54  ;;  %v837_v22 = vld [vmem:[#allocation2 + $0x15d8] sm:$0xff] }
 0x1bd   :  { %7798 = vmatprep.subr.bf16.mxu1 %v13400_v53  ;;  %v1269_v24 = vld [vmem:[#allocation2 + $0x2358] sm:$0xff]  ;;  %v13184_v27 = vcombine.high %v837_v22, %v849_v23  ;;  %v13183_v37 = vcombine.low %v837_v22, %v849_v23 }
 0x1be   :  { %7762 = vmatpush1.bf16.msra.mxu0 %v12967_v29  ;;  %v1281_v53 = vld [vmem:[#allocation2 + $0x23b8] sm:$0xff] }
 0x1bf   :  { %7763 = vmatprep.subr.bf16.mxu0 %v12944_v34  ;;  %v13616_v28 = vcombine.high %v1269_v24, %v1281_v53  ;;  %v813_v29 = vld [vmem:[#allocation2 + $0x1518] sm:$0xff]  ;;  %v13615_v38 = vcombine.low %v1269_v24, %v1281_v53 }
 0x1c0   :  { %7799 = vmatpush1.bf16.msra.mxu1 %v13399_v33  ;;  %v825_v33 = vld [vmem:[#allocation2 + $0x1578] sm:$0xff] }
 0x1c1   :  { %7800 = vmatprep.subr.bf16.mxu1 %v13376_v35  ;;  %v1245_v34 = vld [vmem:[#allocation2 + $0x2298] sm:$0xff]  ;;  %v13160_v40 = vcombine.high %v813_v29, %v825_v33  ;;  %v13159_v45 = vcombine.low %v813_v29, %v825_v33  ;;  %v310_v29 = vld [vmem:[#allocation2 + $0x560] sm:$0xff] }
 0x1c2   :  { %7764 = vmatpush1.bf16.msra.mxu0 %v12943_v42  ;;  %v1257_v35 = vld [vmem:[#allocation2 + $0x22f8] sm:$0xff]  ;;  %v322_v33 = vld [vmem:[#allocation2 + $0x5c0] sm:$0xff] }
 0x1c3   :  { %7765 = vmatprep.subr.bf16.mxu0 %v12920_v21  ;;  %v13592_v41 = vcombine.high %v1245_v34, %v1257_v35  ;;  %v789_v42 = vld [vmem:[#allocation2 + $0x1458] sm:$0xff]  ;;  %v13591_v46 = vcombine.low %v1245_v34, %v1257_v35 }
 0x1c4   :  { %7801 = vmatpush1.bf16.msra.mxu1 %v13375_v43  ;;  %v801_v43 = vld [vmem:[#allocation2 + $0x14b8] sm:$0xff] }
 0x1c5   :  { %7802 = vmatprep.subr.bf16.mxu1 %v13352_v44  ;;  %v1221_v21 = vld [vmem:[#allocation2 + $0x21d8] sm:$0xff]  ;;  %v13136_v47 = vcombine.high %v789_v42, %v801_v43  ;;  %v13135_v57 = vcombine.low %v789_v42, %v801_v43 }
 0x1c6   :  { %7766 = vmatpush1.bf16.msra.mxu0 %v12919_v49  ;;  %v1233_v44 = vld [vmem:[#allocation2 + $0x2238] sm:$0xff] }
 0x1c7   :  { %7767 = vmatprep.subr.bf16.mxu0 %v12896_v52  ;;  %v13568_v48 = vcombine.high %v1221_v21, %v1233_v44  ;;  %v765_v49 = vld [vmem:[#allocation2 + $0x1398] sm:$0xff]  ;;  %v13567_v60 = vcombine.low %v1221_v21, %v1233_v44  ;;  %v706_v21 = vld [vmem:[#allocation2 + $0x11c0] sm:$0xff] }
 0x1c8   :  { %7803 = vmatpush1.bf16.msra.mxu1 %v13351_v50  ;;  %v777_v50 = vld [vmem:[#allocation2 + $0x13f8] sm:$0xff] }
 0x1c9   :  { %7804 = vmatprep.subr.bf16.mxu1 %v13328_v56  ;;  %v1197_v52 = vld [vmem:[#allocation2 + $0x2118] sm:$0xff]  ;;  %v13112_v61 = vcombine.high %v765_v49, %v777_v50  ;;  %v13111_v36 = vcombine.low %v765_v49, %v777_v50  ;;  %v286_v50 = vld [vmem:[#allocation2 + $0x4a0] sm:$0xff] }
 0x1ca   :  { %7768 = vmatpush1.bf16.msra.mxu0 %v12895_v63  ;;  %v1209_v56 = vld [vmem:[#allocation2 + $0x2178] sm:$0xff] }
 0x1cb   :  { %7769 = vmatprep.subr.bf16.mxu0 %v12872_v1  ;;  %v13544_v62 = vcombine.high %v1197_v52, %v1209_v56  ;;  %v741_v63 = vld [vmem:[#allocation2 + $0x12d8] sm:$0xff]  ;;  %v13543_v3 = vcombine.low %v1197_v52, %v1209_v56  ;;  %v298_v52 = vld [vmem:[#allocation2 + $0x500] sm:$0xff] }
 0x1cc   :  { %7805 = vmatpush1.bf16.msra.mxu1 %v13327_v0  ;;  %v753_v0 = vld [vmem:[#allocation2 + $0x1338] sm:$0xff] }
 0x1cd   :  { %7806 = vmatprep.subr.bf16.mxu1 %v13304_v2  ;;  %v1173_v1 = vld [vmem:[#allocation2 + $0x2058] sm:$0xff]  ;;  %v13088_v20 = vcombine.high %v741_v63, %v753_v0  ;;  %v13087_v9 = vcombine.low %v741_v63, %v753_v0  ;;  %v12657_v0 = vcombine.low %v310_v29, %v322_v33 }
 0x1ce   :  { %7770 = vmatpush1.bf16.msra.mxu0 %v12871_v5  ;;  %v1185_v2 = vld [vmem:[#allocation2 + $0x20b8] sm:$0xff] }
 0x1cf   :  { %7771 = vmatprep.subr.bf16.mxu0 %v13232_v39  ;;  %v13520_v4 = vcombine.high %v1173_v1, %v1185_v2  ;;  %v717_v5 = vld [vmem:[#allocation2 + $0x1218] sm:$0xff]  ;;  %v13519_v12 = vcombine.low %v1173_v1, %v1185_v2 }
 0x1d0   :  { %7807 = vmatpush1.bf16.msra.mxu1 %v13303_v6  ;;  %v729_v6 = vld [vmem:[#allocation2 + $0x1278] sm:$0xff] }
 0x1d1   :  { %7808 = vmatprep.subr.bf16.mxu1 %v13280_v8  ;;  %v1149_v39 = vld [vmem:[#allocation2 + $0x1f98] sm:$0xff]  ;;  %v13064_v13 = vcombine.high %v717_v5, %v729_v6  ;;  %v13063_v24 = vcombine.low %v717_v5, %v729_v6  ;;  %v262_v5 = vld [vmem:[#allocation2 + $0x3e0] sm:$0xff] }
 0x1d2   :  { %7772 = vmatpush2.bf16.msra.mxu0 %v13231_v15  ;;  %v1161_v8 = vld [vmem:[#allocation2 + $0x1ff8] sm:$0xff]  ;;  %v274_v6 = vld [vmem:[#allocation2 + $0x440] sm:$0xff] }
 0x1d3   :  { %7773 = vmatprep.subr.bf16.mxu0 %v13208_v18  ;;  %v13496_v14 = vcombine.high %v1149_v39, %v1161_v8  ;;  %v1293_v15 = vld [vmem:[#allocation2 + $0x2418] sm:$0xff] }
 0x1d4   :  { %7809 = vmatpush1.bf16.msra.mxu1 %v13279_v17  ;;  %v1305_v17 = vld [vmem:[#allocation2 + $0x2478] sm:$0xff] }
 0x1d5   :  { %7810 = vmatprep.subr.bf16.mxu1 %v13256_v32  ;;  %v1125_v32 = vld [vmem:[#allocation2 + $0x1ed8] sm:$0xff] }
 0x1d6   :  { %7774 = vmatpush2.bf16.msra.mxu0 %v13207_v25  ;;  %v1137_v22 = vld [vmem:[#allocation2 + $0x1f38] sm:$0xff]  ;;  %v13495_v25 = vcombine.low %v1149_v39, %v1161_v8  ;;  %v646_v39 = vld [vmem:[#allocation2 + $0xfe0] sm:$0xff] }
 0x1d7   :  { %7775 = vmatprep.subr.bf16.mxu0 %v13184_v27  ;;  %v1101_v35 = vld [vmem:[#allocation2 + $0x1e18] sm:$0xff]  ;;  %v658_v8 = vld [vmem:[#allocation2 + $0x1040] sm:$0xff] }
 0x1d8   :  { %7811 = vmatpush1.bf16.msra.mxu1 %v13255_v26  ;;  %v13640_v26 = vcombine.high %v1293_v15, %v1305_v17 }
 0x1d9   :  { %7812 = vmatprep.subr.bf16.mxu1 %v13616_v28  ;;  %v13472_v28 = vcombine.high %v1125_v32, %v1137_v22 }
 0x1da   :  { %7776 = vmatpush2.bf16.msra.mxu0 %v13183_v37  ;;  %v1113_v37 = vld [vmem:[#allocation2 + $0x1e78] sm:$0xff] }
 0x1db   :  { %7777 = vmatprep.subr.bf16.mxu0 %v13160_v40  ;;  %v13471_v40 = vcombine.low %v1125_v32, %v1137_v22  ;;  %v13448_v42 = vcombine.high %v1101_v35, %v1113_v37  ;;  %v634_v32 = vld [vmem:[#allocation2 + $0xf80] sm:$0xff]  ;;  %v12993_v22 = vcombine.low %v646_v39, %v658_v8 }
 0x1dc   :  { %7813 = vmatpush2.bf16.msra.mxu1 %v13615_v38  ;;  %v13639_v38 = vcombine.low %v1293_v15, %v1305_v17  ;;  %v238_v15 = vld [vmem:[#allocation2 + $0x320] sm:$0xff] }
 0x1dd   :  { %7814 = vmatprep.subr.bf16.mxu1 %v13592_v41  ;;  %v12658_v41 = vcombine.high %v310_v29, %v322_v33  ;;  %v250_v17 = vld [vmem:[#allocation2 + $0x380] sm:$0xff] }
 0x1de   :  { %7778 = vmatpush2.bf16.msra.mxu0 %v13159_v45 }
 0x1df   :  { %7779 = vmatprep.subr.bf16.mxu0 %v13136_v47  ;;  %v13447_v47 = vcombine.low %v1101_v35, %v1113_v37  ;;  %v190_v35 = vld [vmem:[#allocation2 + $0x1a0] sm:$0xff] }
 0x1e0   :  { %7815 = vmatpush2.bf16.msra.mxu1 %v13591_v46  ;;  %v202_v37 = vld [vmem:[#allocation2 + $0x200] sm:$0xff] }
 0x1e1   :  { %7816 = vmatprep.subr.bf16.mxu1 %v13568_v48 }
 0x1e2   :  { %7780 = vmatpush2.bf16.msra.mxu0 %v13135_v57 }
 0x1e3   :  { %7781 = vmatprep.subr.bf16.mxu0 %v13112_v61  ;;  %v670_v61 = vld [vmem:[#allocation2 + $0x10a0] sm:$0xff] }
 0x1e4   :  { %7817 = vmatpush2.bf16.msra.mxu1 %v13567_v60 }
 0x1e5   :  { %7818 = vmatprep.subr.bf16.mxu1 %v13544_v62  ;;  %v682_v62 = vld [vmem:[#allocation2 + $0x1100] sm:$0xff] }
 0x1e6   :  { %7782 = vmatpush2.bf16.msra.mxu0 %v13111_v36 }
 0x1e7   :  { %7783 = vmatprep.subr.bf16.mxu0 %v13088_v20 }
 0x1e8   :  { %7819 = vmatpush2.bf16.msra.mxu1 %v13543_v3  ;;  %v12634_v3 = vcombine.high %v286_v50, %v298_v52 }
 0x1e9   :  { %7820 = vmatprep.subr.bf16.mxu1 %v13520_v4  ;;  %v7461_v18 = vpop.f32.mrf.mxu0  ;;  %v13018_v4 = vcombine.high %v670_v61, %v682_v62 }
 0x1ea   :  { %v7462_v23 = vadd.f32 %v7461_v18, %v14541_v7  ;;  %7784 = vmatpush2.bf16.msra.mxu0 %v13087_v9  ;;  %v12633_v9 = vcombine.low %v286_v50, %v298_v52  ;;  %v622_v18 = vld [vmem:[#allocation2 + $0xf20] sm:$0xff] }
 0x1eb   :  { %v7463_v53 = vpop.f32.mrf.mxu0  ;;  %7785 = vmatprep.subr.bf16.mxu0 %v13064_v13  ;;  %v12610_v13 = vcombine.high %v262_v5, %v274_v6  ;;  %v12969_v29 = vcombine.low %v622_v18, %v634_v32  ;;  %v142_v50 = vld [vmem:[#allocation2 + $0x20] sm:$0xff] }
 0x1ec   :  { %7821 = vmatpush2.bf16.msra.mxu1 %v13519_v12  ;;  %v7464_v27 = vadd.f32 %v7463_v53, %v14544_v10  ;;  %v694_v10 = vld [vmem:[#allocation2 + $0x1160] sm:$0xff]  ;;  %v13017_v12 = vcombine.low %v670_v61, %v682_v62 }
 0x1ed   :  { %7822 = vmatprep.subr.bf16.mxu1 %v13496_v14  ;;  %v7465_v34 = vpop.f32.mrf.mxu0  ;;  %v13042_v49 = vcombine.high %v694_v10, %v706_v21  ;;  %v13041_v36 = vcombine.low %v694_v10, %v706_v21  ;;  %v12994_v14 = vcombine.high %v646_v39, %v658_v8  ;;  %v214_v53 = vld [vmem:[#allocation2 + $0x260] sm:$0xff] }
 0x1ee   :  { %7786 = vmatpush2.bf16.msra.mxu0 %v13063_v24  ;;  %v12970_v24 = vcombine.high %v622_v18, %v634_v32  ;;  %v166_v10 = vld [vmem:[#allocation2 + $0xe0] sm:$0xff] }
 0x1ef   :  { %v7466_v7 = vpop.f32.mrf.mxu0  ;;  %7851 = vmatprep.subr.bf16.mxu0 %v13640_v26  ;;  %v598_v26 = vld [vmem:[#allocation2 + $0xe60] sm:$0xff] }
 0x1f0   :  { %7823 = vmatpush2.bf16.msra.mxu1 %v13495_v25  ;;  %v226_v25 = vld [vmem:[#allocation2 + $0x2c0] sm:$0xff] }
 0x1f1   :  { %7824 = vmatprep.subr.bf16.mxu1 %v13472_v28  ;;  %7788 = vmatmul.mubr.bf16.vlgmr.msra.gmra.mxu0 %v14474_v19  ;;  %v7543_v43 = vpop.f32.mrf.mxu0  ;;  %v12585_v28 = vcombine.low %v238_v15, %v250_v17  ;;  %v12562_v33 = vcombine.high %v214_v53, %v226_v25  ;;  %v586_v7 = vld [vmem:[#allocation2 + $0xe00] sm:$0xff] }
 0x1f2   :  { %7852 = vmatpush1.bf16.msra.mxu0 %v13639_v38  ;;  %7869 = vmatprep.mubr.bf16.mxu0 %v14371_v31  ;;  %v574_v38 = vld [vmem:[#allocation2 + $0xda0] sm:$0xff] }
 0x1f3   :  { %v7502_v44 = vpop.f32.mrf.mxu1  ;;  %v7545_v46 = vpop.f32.mrf.mxu0  ;;  %7878 = vmatprep.subr.bf16.mxu0 %v12658_v41  ;;  %v178_v21 = vld [vmem:[#allocation2 + $0x140] sm:$0xff] }
 0x1f4   :  { %v7503_v45 = vadd.f32 %v7502_v44, %v7462_v23  ;;  %7825 = vmatpush2.bf16.msra.mxu1 %v13471_v40  ;;  %v12586_v23 = vcombine.high %v238_v15, %v250_v17  ;;  %v12561_v40 = vcombine.low %v214_v53, %v226_v25  ;;  %v550_v44 = vld [vmem:[#allocation2 + $0xce0] sm:$0xff]  ;;  %v12513_v61 = vcombine.low %v166_v10, %v178_v21 }
 0x1f5   :  { %v7504_v48 = vpop.f32.mrf.mxu1  ;;  %7826 = vmatprep.subr.bf16.mxu1 %v13448_v42  ;;  %v7547_v60 = vpop.f32.mrf.mxu0  ;;  %v12538_v42 = vcombine.high %v190_v35, %v202_v37  ;;  %v154_v52 = vld [vmem:[#allocation2 + $0x80] sm:$0xff] }
 0x1f6   :  { %v14552_v56 = vadd.f32 %v7543_v43, %v7503_v45  ;;  %v7505_v57 = vadd.f32 %v7504_v48, %v7464_v27  ;;  %v610_v27 = vld [vmem:[#allocation2 + $0xec0] sm:$0xff]  ;;  %v12922_v43 = vcombine.high %v574_v38, %v586_v7  ;;  %v12514_v48 = vcombine.high %v166_v10, %v178_v21 }
 0x1f7   :  { %v7506_v63 = vpop.f32.mrf.mxu1  ;;  %v7548_v2 = vpop.f32.mrf.mxu0  ;;  %v12946_v34 = vcombine.high %v598_v26, %v610_v27  ;;  %v12945_v41 = vcombine.low %v598_v26, %v610_v27  ;;  %v562_v45 = vld [vmem:[#allocation2 + $0xd40] sm:$0xff] }
 0x1f8   :  { %v14554_v1 = vadd.f32 %v7545_v46, %v7505_v57  ;;  %7827 = vmatpush2.bf16.msra.mxu1 %v13447_v47  ;;  %v12537_v46 = vcombine.low %v190_v35, %v202_v37  ;;  %v12921_v47 = vcombine.low %v574_v38, %v586_v7  ;;  %v526_v57 = vld [vmem:[#allocation2 + $0xc20] sm:$0xff]  ;;  %v12897_v62 = vcombine.low %v550_v44, %v562_v45 }
 0x1f9   :  { %v7507_v20 = vpop.f32.mrf.mxu1  ;;  %7919 = vmatprep.subr.bf16.mxu1 %v13042_v49  ;;  %13660 = vmatmul.mubr.msk.bf16.vlgmr.msra.gmra.mxu0 %vm7218_vm0, %v14527_v55  ;;  %v12609_v55 = vcombine.low %v262_v5, %v274_v6  ;;  %v12898_v49 = vcombine.high %v550_v44, %v562_v45  ;;  %v538_v60 = vld [vmem:[#allocation2 + $0xc80] sm:$0xff]  ;;  %v12490_v63 = vcombine.high %v142_v50, %v154_v52 }
 0x1fa   :  { %7879 = vmatpush1.bf16.msra.mxu0 %v12657_v0  ;;  %7910 = vmatprep.mubr.bf16.mxu0 %v14460_v58  ;;  %v12874_v0 = vcombine.high %v526_v57, %v538_v60  ;;  %v502_v2 = vld [vmem:[#allocation2 + $0xb60] sm:$0xff]  ;;  %v12873_v5 = vcombine.low %v526_v57, %v538_v60 }
 0x1fb   :  { %7829 = vmatmul.mubr.bf16.vlgmr.msra.gmra.mxu1 %v14499_v30  ;;  %7880 = vmatprep.subr.bf16.mxu0 %v12634_v3  ;;  %v886_v3 = vld [vmem:[#allocation2 + $0x1760] sm:$0xff] }
 0x1fc   :  { %7920 = vmatpush1.bf16.msra.mxu1 %v13041_v36  ;;  %7951 = vmatprep.mubr.bf16.mxu1 %v14464_v59  ;;  %v514_v36 = vld [vmem:[#allocation2 + $0xbc0] sm:$0xff] }
 0x1fd   :  { %7921 = vmatprep.subr.bf16.mxu1 %v13018_v4  ;;  %v898_v20 = vld [vmem:[#allocation2 + $0x17c0] sm:$0xff]  ;;  %v12489_v4 = vcombine.low %v142_v50, %v154_v52  ;;  %v12850_v6 = vcombine.high %v502_v2, %v514_v36 }
 0x1fe   :  { %7881 = vmatpush1.bf16.msra.mxu0 %v12633_v9  ;;  %v13234_v39 = vcombine.high %v886_v3, %v898_v20  ;;  %v478_v8 = vld [vmem:[#allocation2 + $0xaa0] sm:$0xff]  ;;  %v13233_v15 = vcombine.low %v886_v3, %v898_v20 }
 0x1ff   :  { %7882 = vmatprep.subr.bf16.mxu0 %v12610_v13  ;;  %v490_v9 = vld [vmem:[#allocation2 + $0xb00] sm:$0xff] }
 0x200   :  { %7922 = vmatpush1.bf16.msra.mxu1 %v13017_v12  ;;  %v862_v12 = vld [vmem:[#allocation2 + $0x16a0] sm:$0xff]  ;;  %v12826_v17 = vcombine.high %v478_v8, %v490_v9 }
 0x201   :  { %7923 = vmatprep.subr.bf16.mxu1 %v12994_v14  ;;  %v874_v13 = vld [vmem:[#allocation2 + $0x1700] sm:$0xff]  ;;  %v12849_v14 = vcombine.low %v502_v2, %v514_v36 }
 0x202   :  { %7883 = vmatpush1.bf16.msra.mxu0 %v12609_v55  ;;  %v13210_v18 = vcombine.high %v862_v12, %v874_v13  ;;  %v454_v32 = vld [vmem:[#allocation2 + $0x9e0] sm:$0xff]  ;;  %v13209_v53 = vcombine.low %v862_v12, %v874_v13 }
 0x203   :  { %7884 = vmatprep.subr.bf16.mxu0 %v12586_v23  ;;  %v466_v55 = vld [vmem:[#allocation2 + $0xa40] sm:$0xff] }
 0x204   :  { %7924 = vmatpush1.bf16.msra.mxu1 %v12993_v22  ;;  %v838_v22 = vld [vmem:[#allocation2 + $0x15e0] sm:$0xff]  ;;  %v12802_v25 = vcombine.high %v454_v32, %v466_v55 }
 0x205   :  { %7925 = vmatprep.subr.bf16.mxu1 %v12970_v24  ;;  %v850_v23 = vld [vmem:[#allocation2 + $0x1640] sm:$0xff]  ;;  %v12825_v24 = vcombine.low %v478_v8, %v490_v9 }
 0x206   :  { %7885 = vmatpush1.bf16.msra.mxu0 %v12585_v28  ;;  %v13186_v26 = vcombine.high %v838_v22, %v850_v23  ;;  %v430_v27 = vld [vmem:[#allocation2 + $0x920] sm:$0xff]  ;;  %v13185_v35 = vcombine.low %v838_v22, %v850_v23 }
 0x207   :  { %7886 = vmatprep.subr.bf16.mxu0 %v12562_v33  ;;  %v442_v28 = vld [vmem:[#allocation2 + $0x980] sm:$0xff] }
 0x208   :  { %7926 = vmatpush1.bf16.msra.mxu1 %v12969_v29  ;;  %v814_v29 = vld [vmem:[#allocation2 + $0x1520] sm:$0xff]  ;;  %v12778_v37 = vcombine.high %v430_v27, %v442_v28 }
 0x209   :  { %7927 = vmatprep.subr.bf16.mxu1 %v12946_v34  ;;  %v826_v33 = vld [vmem:[#allocation2 + $0x1580] sm:$0xff]  ;;  %v12801_v34 = vcombine.low %v454_v32, %v466_v55 }
 0x20a   :  { %7887 = vmatpush1.bf16.msra.mxu0 %v12561_v40  ;;  %v13162_v38 = vcombine.high %v814_v29, %v826_v33  ;;  %v406_v7 = vld [vmem:[#allocation2 + $0x860] sm:$0xff]  ;;  %v13161_v10 = vcombine.low %v814_v29, %v826_v33 }
 0x20b   :  { %7888 = vmatprep.subr.bf16.mxu0 %v12538_v42  ;;  %v418_v40 = vld [vmem:[#allocation2 + $0x8c0] sm:$0xff] }
 0x20c   :  { %7928 = vmatpush1.bf16.msra.mxu1 %v12945_v41  ;;  %v790_v41 = vld [vmem:[#allocation2 + $0x1460] sm:$0xff]  ;;  %v12754_v21 = vcombine.high %v406_v7, %v418_v40 }
 0x20d   :  { %7929 = vmatprep.subr.bf16.mxu1 %v12922_v43  ;;  %v802_v42 = vld [vmem:[#allocation2 + $0x14c0] sm:$0xff]  ;;  %v12777_v43 = vcombine.low %v430_v27, %v442_v28 }
 0x20e   :  { %7889 = vmatpush1.bf16.msra.mxu0 %v12537_v46  ;;  %v13138_v44 = vcombine.high %v790_v41, %v802_v42  ;;  %v382_v45 = vld [vmem:[#allocation2 + $0x7a0] sm:$0xff]  ;;  %v13137_v50 = vcombine.low %v790_v41, %v802_v42 }
 0x20f   :  { %7890 = vmatprep.subr.bf16.mxu0 %v12514_v48  ;;  %v394_v46 = vld [vmem:[#allocation2 + $0x800] sm:$0xff] }
 0x210   :  { %7930 = vmatpush1.bf16.msra.mxu1 %v12921_v47  ;;  %v766_v47 = vld [vmem:[#allocation2 + $0x13a0] sm:$0xff]  ;;  %v12730_v52 = vcombine.high %v382_v45, %v394_v46 }
 0x211   :  { %7931 = vmatprep.subr.bf16.mxu1 %v12898_v49  ;;  %v778_v48 = vld [vmem:[#allocation2 + $0x1400] sm:$0xff]  ;;  %v12753_v49 = vcombine.low %v406_v7, %v418_v40 }
 0x212   :  { %7891 = vmatpush1.bf16.msra.mxu0 %v12513_v61  ;;  %v13114_v57 = vcombine.high %v766_v47, %v778_v48  ;;  %v358_v60 = vld [vmem:[#allocation2 + $0x6e0] sm:$0xff]  ;;  %v13113_v2 = vcombine.low %v766_v47, %v778_v48 }
 0x213   :  { %7892 = vmatprep.subr.bf16.mxu0 %v12490_v63  ;;  %v370_v61 = vld [vmem:[#allocation2 + $0x740] sm:$0xff] }
 0x214   :  { %7932 = vmatpush1.bf16.msra.mxu1 %v12897_v62  ;;  %v742_v62 = vld [vmem:[#allocation2 + $0x12e0] sm:$0xff]  ;;  %v12706_v36 = vcombine.high %v358_v60, %v370_v61 }
 0x215   :  { %7933 = vmatprep.subr.bf16.mxu1 %v12874_v0  ;;  %v754_v63 = vld [vmem:[#allocation2 + $0x1340] sm:$0xff]  ;;  %v12729_v0 = vcombine.low %v382_v45, %v394_v46 }
 0x216   :  { %7893 = vmatpush1.bf16.msra.mxu0 %v12489_v4  ;;  %v13090_v3 = vcombine.high %v742_v62, %v754_v63  ;;  %v334_v20 = vld [vmem:[#allocation2 + $0x620] sm:$0xff]  ;;  %v13089_v8 = vcombine.low %v742_v62, %v754_v63 }
 0x217   :  { %7894 = vmatprep.subr.bf16.mxu0 %v12850_v6  ;;  %v346_v4 = vld [vmem:[#allocation2 + $0x680] sm:$0xff] }
 0x218   :  { %7934 = vmatpush1.bf16.msra.mxu1 %v12873_v5  ;;  %v718_v5 = vld [vmem:[#allocation2 + $0x1220] sm:$0xff]  ;;  %v12682_v9 = vcombine.high %v334_v20, %v346_v4  ;;  %v12681_v55 = vcombine.low %v334_v20, %v346_v4  ;;  %v275_v20 = vld [vmem:[#allocation2 + $0x448] sm:$0xff]  ;;  %v14576_v4 = vld [vmem:[%s14958_s0 + $0x18] ss:$0 sps:$4 sm:$0xff]  }
 0x219   :  { %7935 = vmatprep.subr.bf16.mxu1 %v13234_v39  ;;  %v730_v6 = vld [vmem:[#allocation2 + $0x1280] sm:$0xff]  ;;  %v12705_v39 = vcombine.low %v358_v60, %v370_v61 }
 0x21a   :  { %7895 = vmatpush2.bf16.msra.mxu0 %v12849_v14  ;;  %v13066_v12 = vcombine.high %v718_v5, %v730_v6  ;;  %v1078_v13 = vld [vmem:[#allocation2 + $0x1d60] sm:$0xff] }
 0x21b   :  { %7896 = vmatprep.subr.bf16.mxu0 %v12826_v17  ;;  %v1090_v14 = vld [vmem:[#allocation2 + $0x1dc0] sm:$0xff] }
 0x21c   :  { %7936 = vmatpush2.bf16.msra.mxu1 %v13233_v15  ;;  %v1294_v17 = vld [vmem:[#allocation2 + $0x2420] sm:$0xff] }
 0x21d   :  { %7937 = vmatprep.subr.bf16.mxu1 %v13210_v18  ;;  %v1306_v18 = vld [vmem:[#allocation2 + $0x2480] sm:$0xff] }
 0x21e   :  { %7897 = vmatpush2.bf16.msra.mxu0 %v12825_v24  ;;  %v13065_v24 = vcombine.low %v718_v5, %v730_v6  ;;  %v1054_v27 = vld [vmem:[#allocation2 + $0x1ca0] sm:$0xff]  ;;  %v13641_v40 = vcombine.low %v1294_v17, %v1306_v18 }
 0x21f   :  { %7898 = vmatprep.subr.bf16.mxu0 %v12802_v25  ;;  %v1066_v28 = vld [vmem:[#allocation2 + $0x1d00] sm:$0xff] }
 0x220   :  { %7938 = vmatpush2.bf16.msra.mxu1 %v13209_v53  ;;  %v13426_v53 = vcombine.high %v1078_v13, %v1090_v14  ;;  %v13402_v41 = vcombine.high %v1054_v27, %v1066_v28  ;;  %v13401_v45 = vcombine.low %v1054_v27, %v1066_v28  ;;  %v1006_v48 = vld [vmem:[#allocation2 + $0x1b20] sm:$0xff] }
 0x221   :  { %7939 = vmatprep.subr.bf16.mxu1 %v13186_v26  ;;  %v13642_v26 = vcombine.high %v1294_v17, %v1306_v18 }
 0x222   :  { %7899 = vmatpush2.bf16.msra.mxu0 %v12801_v34  ;;  %v311_v34 = vld [vmem:[#allocation2 + $0x568] sm:$0xff] }
 0x223   :  { %7900 = vmatprep.subr.bf16.mxu0 %v12778_v37 }
 0x224   :  { %7940 = vmatpush2.bf16.msra.mxu1 %v13185_v35  ;;  %v323_v35 = vld [vmem:[#allocation2 + $0x5c8] sm:$0xff] }
 0x225   :  { %7941 = vmatprep.subr.bf16.mxu1 %v13162_v38  ;;  %v13425_v38 = vcombine.low %v1078_v13, %v1090_v14  ;;  %v12659_v61 = vcombine.low %v311_v34, %v323_v35  ;;  %v239_v13 = vld [vmem:[#allocation2 + $0x328] sm:$0xff] }
 0x226   :  { %7901 = vmatpush2.bf16.msra.mxu0 %v12777_v43  ;;  %v12660_v43 = vcombine.high %v311_v34, %v323_v35  ;;  %v251_v14 = vld [vmem:[#allocation2 + $0x388] sm:$0xff]  ;;  %v922_v34 = vld [vmem:[#allocation2 + $0x1880] sm:$0xff] }
 0x227   :  { %7902 = vmatprep.subr.bf16.mxu0 %v12754_v21  ;;  %v1042_v21 = vld [vmem:[#allocation2 + $0x1c40] sm:$0xff]  ;;  %v191_v35 = vld [vmem:[#allocation2 + $0x1a8] sm:$0xff] }
 0x228   :  { %7942 = vmatpush2.bf16.msra.mxu1 %v13161_v10  ;;  %v1030_v10 = vld [vmem:[#allocation2 + $0x1be0] sm:$0xff] }
 0x229   :  { %7943 = vmatprep.subr.bf16.mxu1 %v13138_v44  ;;  %v13378_v46 = vcombine.high %v1030_v10, %v1042_v21  ;;  %v13377_v60 = vcombine.low %v1030_v10, %v1042_v21  ;;  %v167_v10 = vld [vmem:[#allocation2 + $0xe8] sm:$0xff] }
 0x22a   :  { %7903 = vmatpush2.bf16.msra.mxu0 %v12753_v49  ;;  %v1018_v49 = vld [vmem:[#allocation2 + $0x1b80] sm:$0xff]  ;;  %v179_v21 = vld [vmem:[#allocation2 + $0x148] sm:$0xff] }
 0x22b   :  { %7904 = vmatprep.subr.bf16.mxu0 %v12730_v52  ;;  %v299_v52 = vld [vmem:[#allocation2 + $0x508] sm:$0xff]  ;;  %v13354_v62 = vcombine.high %v1006_v48, %v1018_v49  ;;  %v13353_v5 = vcombine.low %v1006_v48, %v1018_v49  ;;  %v12516_v49 = vcombine.high %v167_v10, %v179_v21 }
 0x22c   :  { %7944 = vmatpush2.bf16.msra.mxu1 %v13137_v50  ;;  %v287_v50 = vld [vmem:[#allocation2 + $0x4a8] sm:$0xff] }
 0x22d   :  { %7945 = vmatprep.subr.bf16.mxu1 %v13114_v57  ;;  %v12635_v6 = vcombine.low %v287_v50, %v299_v52 }
 0x22e   :  { %7905 = vmatpush2.bf16.msra.mxu0 %v12729_v0  ;;  %v12636_v0 = vcombine.high %v287_v50, %v299_v52  ;;  %v1246_v50 = vld [vmem:[#allocation2 + $0x22a0] sm:$0xff] }
 0x22f   :  { %7906 = vmatprep.subr.bf16.mxu0 %v12706_v36  ;;  %v994_v36 = vld [vmem:[#allocation2 + $0x1ac0] sm:$0xff] }
 0x230   :  { %7946 = vmatpush2.bf16.msra.mxu1 %v13113_v2  ;;  %v982_v2 = vld [vmem:[#allocation2 + $0x1a60] sm:$0xff] }
 0x231   :  { %7947 = vmatprep.subr.bf16.mxu1 %v13090_v3  ;;  %v7584_v15 = vpop.f32.mrf.mxu0  ;;  %v263_v3 = vld [vmem:[#allocation2 + $0x3e8] sm:$0xff]  ;;  %v1258_v52 = vld [vmem:[#allocation2 + $0x2300] sm:$0xff] }
 0x232   :  { %7907 = vmatpush2.bf16.msra.mxu0 %v12705_v39  ;;  %v13330_v39 = vcombine.high %v982_v2, %v994_v36  ;;  %v12611_v17 = vcombine.low %v263_v3, %v275_v20 }
 0x233   :  { %v7625_v32 = vpop.f32.mrf.mxu1  ;;  %v7586_v23 = vpop.f32.mrf.mxu0  ;;  %7908 = vmatprep.subr.bf16.mxu0 %v12682_v9  ;;  %v958_v9 = vld [vmem:[#allocation2 + $0x19a0] sm:$0xff] }
 0x234   :  { %v14561_v22 = vadd.f32 %v7625_v32, %v7584_v15  ;;  %7948 = vmatpush2.bf16.msra.mxu1 %v13089_v8  ;;  %v12612_v8 = vcombine.high %v263_v3, %v275_v20  ;;  %v13329_v15 = vcombine.low %v982_v2, %v994_v36  ;;  %v12588_v32 = vcombine.high %v239_v13, %v251_v14  ;;  %v1222_v2 = vld [vmem:[#allocation2 + $0x21e0] sm:$0xff]  ;;  %v503_v3 = vld [vmem:[#allocation2 + $0xb68] sm:$0xff] }
 0x235   :  { %v7627_v25 = vpop.f32.mrf.mxu1  ;;  %7949 = vmatprep.subr.bf16.mxu1 %v13066_v12  ;;  %v7588_v33 = vpop.f32.mrf.mxu0  ;;  %v970_v12 = vld [vmem:[#allocation2 + $0x1a00] sm:$0xff]  ;;  %v515_v20 = vld [vmem:[#allocation2 + $0xbc8] sm:$0xff] }
 0x236   :  { %v14563_v29 = vadd.f32 %v7627_v25, %v7586_v23  ;;  %7909 = vmatpush2.bf16.msra.mxu0 %v12681_v55  ;;  %v13306_v18 = vcombine.high %v958_v9, %v970_v12  ;;  %v934_v55 = vld [vmem:[#allocation2 + $0x18e0] sm:$0xff]  ;;  %v13305_v25 = vcombine.low %v958_v9, %v970_v12 }
 0x237   :  { %v7629_v37 = vpop.f32.mrf.mxu1  ;;  %v7589_v7 = vpop.f32.mrf.mxu0  ;;  %7960 = vmatprep.subr.bf16.mxu0 %v13426_v53  ;;  %v946_v23 = vld [vmem:[#allocation2 + $0x1940] sm:$0xff]  ;;  %v227_v53 = vld [vmem:[#allocation2 + $0x2c8] sm:$0xff] }
 0x238   :  { %7950 = vmatpush2.bf16.msra.mxu1 %v13065_v24  ;;  %v215_v24 = vld [vmem:[#allocation2 + $0x268] sm:$0xff]  ;;  %v13282_v27 = vcombine.high %v934_v55, %v946_v23  ;;  %v910_v33 = vld [vmem:[#allocation2 + $0x1820] sm:$0xff] }
 0x239   :  { %v7630_v42 = vpop.f32.mrf.mxu1  ;;  %8015 = vmatprep.subr.bf16.mxu1 %v13642_v26  ;;  %7911 = vmatmul.mubr.bf16.vlgmr.msra.gmra.mxu0 %v14470_v16  ;;  %v12587_v26 = vcombine.low %v239_v13, %v251_v14  ;;  %v12564_v28 = vcombine.high %v215_v24, %v227_v53  ;;  %v203_v37 = vld [vmem:[#allocation2 + $0x208] sm:$0xff]  ;;  %v12563_v7 = vcombine.low %v215_v24, %v227_v53  ;;  %v1234_v36 = vld [vmem:[#allocation2 + $0x2240] sm:$0xff] }
 0x23a   :  { %7961 = vmatpush1.bf16.msra.mxu0 %v13425_v38  ;;  %7992 = vmatprep.mubr.bf16.mxu0 %v14484_v54  ;;  %v13281_v38 = vcombine.low %v934_v55, %v946_v23  ;;  %v1270_v42 = vld [vmem:[#allocation2 + $0x2360] sm:$0xff]  ;;  %v479_v13 = vld [vmem:[#allocation2 + $0xaa8] sm:$0xff] }
 0x23b   :  { %7952 = vmatmul.mubr.bf16.vlgmr.msra.gmra.mxu1 %v14474_v19  ;;  %v14567_v44 = vpop.f32.mrf.mxu1  ;;  %7962 = vmatprep.subr.bf16.mxu0 %v13402_v41  ;;  %v12540_v41 = vcombine.high %v191_v35, %v203_v37  ;;  %v1198_v9 = vld [vmem:[#allocation2 + $0x2120] sm:$0xff]  ;;  %v491_v14 = vld [vmem:[#allocation2 + $0xb08] sm:$0xff] }
 0x23c   :  { %8016 = vmatpush1.bf16.msra.mxu1 %v13641_v40  ;;  %8033 = vmatprep.mubr.bf16.mxu1 %v14371_v31  ;;  %v13258_v40 = vcombine.high %v910_v33, %v922_v34  ;;  %v1210_v12 = vld [vmem:[#allocation2 + $0x2180] sm:$0xff]  ;;  %v455_v24 = vld [vmem:[#allocation2 + $0x9e8] sm:$0xff] }
 0x23d   :  { %v14569_v47 = vpop.f32.mrf.mxu1  ;;  %8042 = vmatprep.subr.bf16.mxu1 %v12660_v43  ;;  %v1282_v43 = vld [vmem:[#allocation2 + $0x23c0] sm:$0xff]  ;;  %v467_v53 = vld [vmem:[#allocation2 + $0xa48] sm:$0xff] }
 0x23e   :  { %7963 = vmatpush1.bf16.msra.mxu0 %v13401_v45  ;;  %v13257_v45 = vcombine.low %v910_v33, %v922_v34  ;;  %v13618_v48 = vcombine.high %v1270_v42, %v1282_v43  ;;  %v1174_v55 = vld [vmem:[#allocation2 + $0x2060] sm:$0xff] }
 0x23f   :  { %v7711_v57 = vpop.f32.mrf.mxu1  ;;  %7964 = vmatprep.subr.bf16.mxu0 %v13378_v46  ;;  %v12539_v46 = vcombine.low %v191_v35, %v203_v37  ;;  %v1186_v23 = vld [vmem:[#allocation2 + $0x20c0] sm:$0xff]  ;;  %v431_v35 = vld [vmem:[#allocation2 + $0x928] sm:$0xff] }
 0x240   :  { %v143_v57 = vld [vmem:[#allocation2 + $0x28] sm:$0xff]  ;;  %v1150_v33 = vld [vmem:[#allocation2 + $0x1fa0] sm:$0xff] }
 0x241   :  { %v7712_v63 = vpop.f32.mrf.mxu1  ;;  %v1162_v34 = vld [vmem:[#allocation2 + $0x2000] sm:$0xff]  ;;  %v443_v37 = vld [vmem:[#allocation2 + $0x988] sm:$0xff] }
 0x242   :  { %7965 = vmatpush1.bf16.msra.mxu0 %v13377_v60  ;;  %v155_v60 = vld [vmem:[#allocation2 + $0x88] sm:$0xff]  ;;  %v13594_v63 = vcombine.high %v1246_v50, %v1258_v52 }
 0x243   :  { %13661 = vmatmul.mubr.msk.bf16.vlgmr.msra.gmra.mxu1 %vm7218_vm0, %v14576_v4  ;;  %7966 = vmatprep.subr.bf16.mxu0 %v13354_v62  ;;  %v12515_v62 = vcombine.low %v167_v10, %v179_v21  ;;  %v407_v10 = vld [vmem:[#allocation2 + $0x868] sm:$0xff] }
 0x244   :  { %8043 = vmatpush1.bf16.msra.mxu1 %v12659_v61  ;;  %8074 = vmatprep.mubr.bf16.mxu1 %v14460_v58  ;;  %v13617_v61 = vcombine.low %v1270_v42, %v1282_v43  ;;  %v1126_v42 = vld [vmem:[#allocation2 + $0x1ee0] sm:$0xff]  ;;  %v419_v21 = vld [vmem:[#allocation2 + $0x8c8] sm:$0xff] }
 0x245   :  { %8044 = vmatprep.subr.bf16.mxu1 %v12636_v0  ;;  %v12492_v0 = vcombine.high %v143_v57, %v155_v60  ;;  %v1138_v43 = vld [vmem:[#allocation2 + $0x1f40] sm:$0xff] }
 0x246   :  { %7967 = vmatpush1.bf16.msra.mxu0 %v13353_v5  ;;  %v13593_v5 = vcombine.low %v1246_v50, %v1258_v52  ;;  %v1102_v50 = vld [vmem:[#allocation2 + $0x1e20] sm:$0xff] }
 0x247   :  { %7968 = vmatprep.subr.bf16.mxu0 %v13330_v39  ;;  %v13570_v39 = vcombine.high %v1222_v2, %v1234_v36  ;;  %v1114_v52 = vld [vmem:[#allocation2 + $0x1e80] sm:$0xff] }
 0x248   :  { %8045 = vmatpush1.bf16.msra.mxu1 %v12635_v6  ;;  %v12491_v6 = vcombine.low %v143_v57, %v155_v60  ;;  %v383_v57 = vld [vmem:[#allocation2 + $0x7a8] sm:$0xff] }
 0x249   :  { %8046 = vmatprep.subr.bf16.mxu1 %v12612_v8  ;;  %v12852_v8 = vcombine.high %v503_v3, %v515_v20  ;;  %v395_v60 = vld [vmem:[#allocation2 + $0x808] sm:$0xff] }
 0x24a   :  { %7969 = vmatpush1.bf16.msra.mxu0 %v13329_v15  ;;  %v13569_v15 = vcombine.low %v1222_v2, %v1234_v36  ;;  %v695_v2 = vld [vmem:[#allocation2 + $0x1168] sm:$0xff] }
 0x24b   :  { %7970 = vmatprep.subr.bf16.mxu0 %v13306_v18  ;;  %v13546_v18 = vcombine.high %v1198_v9, %v1210_v12  ;;  %v707_v36 = vld [vmem:[#allocation2 + $0x11c8] sm:$0xff] }
 0x24c   :  { %8047 = vmatpush1.bf16.msra.mxu1 %v12611_v17  ;;  %v12851_v17 = vcombine.low %v503_v3, %v515_v20  ;;  %v359_v20 = vld [vmem:[#allocation2 + $0x6e8] sm:$0xff] }
 0x24d   :  { %8048 = vmatprep.subr.bf16.mxu1 %v12588_v32  ;;  %v12828_v32 = vcombine.high %v479_v13, %v491_v14 }
 0x24e   :  { %7971 = vmatpush1.bf16.msra.mxu0 %v13305_v25  ;;  %v13545_v25 = vcombine.low %v1198_v9, %v1210_v12  ;;  %v12731_v9 = vcombine.low %v383_v57, %v395_v60  ;;  %v13044_v12 = vcombine.high %v695_v2, %v707_v36 }
 0x24f   :  { %7972 = vmatprep.subr.bf16.mxu0 %v13282_v27  ;;  %v13522_v27 = vcombine.high %v1174_v55, %v1186_v23 }
 0x250   :  { %8049 = vmatpush1.bf16.msra.mxu1 %v12587_v26  ;;  %v12827_v26 = vcombine.low %v479_v13, %v491_v14 }
 0x251   :  { %8050 = vmatprep.subr.bf16.mxu1 %v12564_v28  ;;  %v12804_v28 = vcombine.high %v455_v24, %v467_v53 }
 0x252   :  { %7973 = vmatpush1.bf16.msra.mxu0 %v13281_v38  ;;  %v13521_v38 = vcombine.low %v1174_v55, %v1186_v23  ;;  %v335_v55 = vld [vmem:[#allocation2 + $0x628] sm:$0xff] }
 0x253   :  { %7974 = vmatprep.subr.bf16.mxu0 %v13258_v40  ;;  %v13498_v40 = vcombine.high %v1150_v33, %v1162_v34  ;;  %v347_v23 = vld [vmem:[#allocation2 + $0x688] sm:$0xff] }
 0x254   :  { %8051 = vmatpush1.bf16.msra.mxu1 %v12563_v7  ;;  %v12803_v7 = vcombine.low %v455_v24, %v467_v53  ;;  %v13043_v24 = vcombine.low %v695_v2, %v707_v36  ;;  %v575_v2 = vld [vmem:[#allocation2 + $0xda8] sm:$0xff] }
 0x255   :  { %8052 = vmatprep.subr.bf16.mxu1 %v12540_v41  ;;  %v12780_v41 = vcombine.high %v431_v35, %v443_v37  ;;  %v587_v36 = vld [vmem:[#allocation2 + $0xe08] sm:$0xff] }
 0x256   :  { %7975 = vmatpush1.bf16.msra.mxu0 %v13257_v45  ;;  %v13497_v45 = vcombine.low %v1150_v33, %v1162_v34  ;;  %v1091_v33 = vld [vmem:[#allocation2 + $0x1dc8] sm:$0xff] }
 0x257   :  { %7976 = vmatprep.subr.bf16.mxu0 %v13618_v48  ;;  %v13474_v48 = vcombine.high %v1126_v42, %v1138_v43 }
 0x258   :  { %8053 = vmatpush1.bf16.msra.mxu1 %v12539_v46  ;;  %v12779_v46 = vcombine.low %v431_v35, %v443_v37  ;;  %v12683_v35 = vcombine.low %v335_v55, %v347_v23 }
 0x259   :  { %8054 = vmatprep.subr.bf16.mxu1 %v12516_v49  ;;  %v12756_v49 = vcombine.high %v407_v10, %v419_v21 }
 0x25a   :  { %7977 = vmatpush2.bf16.msra.mxu0 %v13617_v61  ;;  %v13473_v61 = vcombine.low %v1126_v42, %v1138_v43  ;;  %v1055_v42 = vld [vmem:[#allocation2 + $0x1ca8] sm:$0xff] }
 0x25b   :  { %7978 = vmatprep.subr.bf16.mxu0 %v13594_v63  ;;  %v13450_v63 = vcombine.high %v1102_v50, %v1114_v52  ;;  %v1067_v43 = vld [vmem:[#allocation2 + $0x1d08] sm:$0xff] }
 0x25c   :  { %8055 = vmatpush1.bf16.msra.mxu1 %v12515_v62  ;;  %v12755_v62 = vcombine.low %v407_v10, %v419_v21 }
 0x25d   :  { %8056 = vmatprep.subr.bf16.mxu1 %v12492_v0  ;;  %v12732_v0 = vcombine.high %v383_v57, %v395_v60  ;;  %v1031_v57 = vld [vmem:[#allocation2 + $0x1be8] sm:$0xff] }
 0x25e   :  { %7979 = vmatpush2.bf16.msra.mxu0 %v13593_v5  ;;  %v371_v5 = vld [vmem:[#allocation2 + $0x748] sm:$0xff] }
 0x25f   :  { %7980 = vmatprep.subr.bf16.mxu0 %v13570_v39  ;;  %v13449_v39 = vcombine.low %v1102_v50, %v1114_v52  ;;  %v599_v50 = vld [vmem:[#allocation2 + $0xe68] sm:$0xff] }
 0x260   :  { %8057 = vmatpush1.bf16.msra.mxu1 %v12491_v6  ;;  %v611_v52 = vld [vmem:[#allocation2 + $0xec8] sm:$0xff] }
 0x261   :  { %8058 = vmatprep.subr.bf16.mxu1 %v12852_v8  ;;  %v1043_v60 = vld [vmem:[#allocation2 + $0x1c48] sm:$0xff] }
 0x262   :  { %7981 = vmatpush2.bf16.msra.mxu0 %v13569_v15  ;;  %v12708_v15 = vcombine.high %v359_v20, %v371_v5 }
 0x263   :  { %7982 = vmatprep.subr.bf16.mxu0 %v13546_v18  ;;  %v683_v18 = vld [vmem:[#allocation2 + $0x1108] sm:$0xff] }
 0x264   :  { %8059 = vmatpush2.bf16.msra.mxu1 %v12851_v17  ;;  %v671_v17 = vld [vmem:[#allocation2 + $0x10a8] sm:$0xff] }
 0x265   :  { %8060 = vmatprep.subr.bf16.mxu1 %v12828_v32 }
 0x266   :  { %7983 = vmatpush2.bf16.msra.mxu0 %v13545_v25  ;;  %v12707_v25 = vcombine.low %v359_v20, %v371_v5  ;;  %v1019_v20 = vld [vmem:[#allocation2 + $0x1b88] sm:$0xff]  ;;  %v12947_v5 = vcombine.low %v599_v50, %v611_v52 }
 0x267   :  { %7984 = vmatprep.subr.bf16.mxu0 %v13522_v27  ;;  %v659_v27 = vld [vmem:[#allocation2 + $0x1048] sm:$0xff] }
 0x268   :  { %8061 = vmatpush2.bf16.msra.mxu1 %v12827_v26  ;;  %v12684_v26 = vcombine.high %v335_v55, %v347_v23  ;;  %v527_v23 = vld [vmem:[#allocation2 + $0xc28] sm:$0xff] }
 0x269   :  { %8062 = vmatprep.subr.bf16.mxu1 %v12804_v28  ;;  %v1079_v28 = vld [vmem:[#allocation2 + $0x1d68] sm:$0xff] }
 0x26a   :  { %7985 = vmatpush2.bf16.msra.mxu0 %v13521_v38 }
 0x26b   :  { %7986 = vmatprep.subr.bf16.mxu0 %v13498_v40  ;;  %v623_v40 = vld [vmem:[#allocation2 + $0xf28] sm:$0xff] }
 0x26c   :  { %8063 = vmatpush2.bf16.msra.mxu1 %v12803_v7  ;;  %v13428_v7 = vcombine.high %v1079_v28, %v1091_v33 }
 0x26d   :  { %8064 = vmatprep.subr.bf16.mxu1 %v12780_v41  ;;  %v635_v41 = vld [vmem:[#allocation2 + $0xf88] sm:$0xff] }
 0x26e   :  { %7987 = vmatpush2.bf16.msra.mxu0 %v13497_v45  ;;  %v13427_v45 = vcombine.low %v1079_v28, %v1091_v33  ;;  %v887_v28 = vld [vmem:[#allocation2 + $0x1768] sm:$0xff] }
 0x26f   :  { %7988 = vmatprep.subr.bf16.mxu0 %v13474_v48  ;;  %v899_v33 = vld [vmem:[#allocation2 + $0x17c8] sm:$0xff] }
 0x270   :  { %8065 = vmatpush2.bf16.msra.mxu1 %v12779_v46  ;;  %v12972_v46 = vcombine.high %v623_v40, %v635_v41 }
 0x271   :  { %8066 = vmatprep.subr.bf16.mxu1 %v12756_v49  ;;  %v7666_v3 = vpop.f32.mrf.mxu0  ;;  %v13404_v49 = vcombine.high %v1055_v42, %v1067_v43 }
 0x272   :  { %v7667_v6 = vadd.f32 %v7666_v3, %v14561_v22  ;;  %7989 = vmatpush2.bf16.msra.mxu0 %v13473_v61  ;;  %v12971_v61 = vcombine.low %v623_v40, %v635_v41  ;;  %v1007_v3 = vld [vmem:[#allocation2 + $0x1b28] sm:$0xff]  ;;  %v13236_v40 = vcombine.high %v887_v28, %v899_v33 }
 0x273   :  { %v7668_v8 = vpop.f32.mrf.mxu0  ;;  %7990 = vmatprep.subr.bf16.mxu0 %v13450_v63  ;;  %v12948_v63 = vcombine.high %v599_v50, %v611_v52  ;;  %v839_v50 = vld [vmem:[#allocation2 + $0x15e8] sm:$0xff] }
 0x274   :  { %8067 = vmatpush2.bf16.msra.mxu1 %v12755_v62  ;;  %v14583_v13 = vadd.f32 %v14567_v44, %v7667_v6  ;;  %v7669_v14 = vadd.f32 %v7668_v8, %v14563_v29  ;;  %v13020_v44 = vcombine.high %v671_v17, %v683_v18  ;;  %v647_v29 = vld [vmem:[#allocation2 + $0xfe8] sm:$0xff]  ;;  %v13403_v62 = vcombine.low %v1055_v42, %v1067_v43 }
 0x275   :  { %8068 = vmatprep.subr.bf16.mxu1 %v12732_v0  ;;  %v7670_v32 = vpop.f32.mrf.mxu0  ;;  %v12996_v37 = vcombine.high %v647_v29, %v659_v27  ;;  %v12995_v21 = vcombine.low %v647_v29, %v659_v27  ;;  %v13380_v0 = vcombine.high %v1031_v57, %v1043_v60  ;;  %v13379_v6 = vcombine.low %v1031_v57, %v1043_v60  ;;  %v863_v42 = vld [vmem:[#allocation2 + $0x16a8] sm:$0xff] }
 0x276   :  { %v14587_v22 = vadd.f32 %v14569_v47, %v7669_v14  ;;  %7991 = vmatpush2.bf16.msra.mxu0 %v13449_v39  ;;  %v13019_v47 = vcombine.low %v671_v17, %v683_v18  ;;  %v12924_v39 = vcombine.high %v575_v2, %v587_v36  ;;  %v13356_v8 = vcombine.high %v1007_v3, %v1019_v20  ;;  %v983_v14 = vld [vmem:[#allocation2 + $0x1a68] sm:$0xff] }
 0x277   :  { %v7671_v53 = vpop.f32.mrf.mxu0  ;;  %8083 = vmatprep.subr.bf16.mxu0 %v13044_v12  ;;  %v563_v12 = vld [vmem:[#allocation2 + $0xd48] sm:$0xff]  ;;  %v12923_v17 = vcombine.low %v575_v2, %v587_v36  ;;  %v13355_v18 = vcombine.low %v1007_v3, %v1019_v20 }
 0x278   :  { %8069 = vmatpush2.bf16.msra.mxu1 %v12731_v9  ;;  %v551_v9 = vld [vmem:[#allocation2 + $0xce8] sm:$0xff] }
 0x279   :  { %8070 = vmatprep.subr.bf16.mxu1 %v12708_v15  ;;  %7993 = vmatmul.mubr.bf16.vlgmr.msra.gmra.mxu0 %v14499_v30  ;;  %v995_v15 = vld [vmem:[#allocation2 + $0x1ac8] sm:$0xff]  ;;  %v12900_v32 = vcombine.high %v551_v9, %v563_v12 }
 0x27a   :  { %8084 = vmatpush1.bf16.msra.mxu0 %v13043_v24  ;;  %8115 = vmatprep.mubr.bf16.mxu0 %v14464_v59  ;;  %v13332_v55 = vcombine.high %v983_v14, %v995_v15  ;;  %v539_v24 = vld [vmem:[#allocation2 + $0xc88] sm:$0xff] }
 0x27b   :  { %v14590_v34 = vpop.f32.mrf.mxu1  ;;  %8085 = vmatprep.subr.bf16.mxu0 %v13020_v44  ;;  %v959_v53 = vld [vmem:[#allocation2 + $0x19a8] sm:$0xff]  ;;  %v12899_v44 = vcombine.low %v551_v9, %v563_v12  ;;  %v12876_v29 = vcombine.high %v527_v23, %v539_v24 }
 0x27c   :  { %8071 = vmatpush2.bf16.msra.mxu1 %v12707_v25  ;;  %v971_v25 = vld [vmem:[#allocation2 + $0x1a08] sm:$0xff] }
 0x27d   :  { %v14593_v38 = vpop.f32.mrf.mxu1  ;;  %8072 = vmatprep.subr.bf16.mxu1 %v12684_v26  ;;  %v13331_v26 = vcombine.low %v983_v14, %v995_v15  ;;  %v13308_v27 = vcombine.high %v959_v53, %v971_v25  ;;  %v875_v43 = vld [vmem:[#allocation2 + $0x1708] sm:$0xff] }
 0x27e   :  { %8086 = vmatpush1.bf16.msra.mxu0 %v13019_v47  ;;  %v935_v47 = vld [vmem:[#allocation2 + $0x18e8] sm:$0xff] }
 0x27f   :  { %v7752_v10 = vpop.f32.mrf.mxu1  ;;  %8087 = vmatprep.subr.bf16.mxu0 %v12996_v37  ;;  %v12875_v37 = vcombine.low %v527_v23, %v539_v24  ;;  %v851_v52 = vld [vmem:[#allocation2 + $0x1648] sm:$0xff] }
 0x280   :  { %8073 = vmatpush2.bf16.msra.mxu1 %v12683_v35  ;;  %v947_v35 = vld [vmem:[#allocation2 + $0x1948] sm:$0xff] }
 0x281   :  { %v7753_v48 = vpop.f32.mrf.mxu1  ;;  %8124 = vmatprep.subr.bf16.mxu1 %v13428_v7  ;;  %v13307_v7 = vcombine.low %v959_v53, %v971_v25  ;;  %v13284_v41 = vcombine.high %v935_v47, %v947_v35  ;;  %v911_v10 = vld [vmem:[#allocation2 + $0x1828] sm:$0xff] }
 0x282   :  { %8088 = vmatpush1.bf16.msra.mxu0 %v12995_v21  ;;  %v923_v21 = vld [vmem:[#allocation2 + $0x1888] sm:$0xff]  ;;  %v13212_v48 = vcombine.high %v863_v42, %v875_v43 }
 0x283   :  { %8075 = vmatmul.mubr.bf16.vlgmr.msra.gmra.mxu1 %v14470_v16  ;;  %8089 = vmatprep.subr.bf16.mxu0 %v12972_v46  ;;  %v13283_v46 = vcombine.low %v935_v47, %v947_v35  ;;  %v1271_v57 = vld [vmem:[#allocation2 + $0x2368] sm:$0xff] }
 0x284   :  { %8125 = vmatpush1.bf16.msra.mxu1 %v13427_v45  ;;  %8156 = vmatprep.mubr.bf16.mxu1 %v14484_v54  ;;  %v13235_v45 = vcombine.low %v887_v28, %v899_v33  ;;  %v1283_v60 = vld [vmem:[#allocation2 + $0x23c8] sm:$0xff] }
 0x285   :  { %8126 = vmatprep.subr.bf16.mxu1 %v13404_v49  ;;  %v13260_v49 = vcombine.high %v911_v10, %v923_v21  ;;  %v815_v2 = vld [vmem:[#allocation2 + $0x1528] sm:$0xff] }
 0x286   :  { %8090 = vmatpush1.bf16.msra.mxu0 %v12971_v61  ;;  %v13211_v61 = vcombine.low %v863_v42, %v875_v43  ;;  %v827_v36 = vld [vmem:[#allocation2 + $0x1588] sm:$0xff] }
 0x287   :  { %8091 = vmatprep.subr.bf16.mxu0 %v12948_v63  ;;  %v13188_v63 = vcombine.high %v839_v50, %v851_v52  ;;  %v1247_v3 = vld [vmem:[#allocation2 + $0x22a8] sm:$0xff] }
 0x288   :  { %8127 = vmatpush1.bf16.msra.mxu1 %v13403_v62  ;;  %v13259_v62 = vcombine.low %v911_v10, %v923_v21  ;;  %v1259_v20 = vld [vmem:[#allocation2 + $0x2308] sm:$0xff] }
 0x289   :  { %8128 = vmatprep.subr.bf16.mxu1 %v13380_v0  ;;  %v13620_v0 = vcombine.high %v1271_v57, %v1283_v60  ;;  %v791_v9 = vld [vmem:[#allocation2 + $0x1468] sm:$0xff] }
 0x28a   :  { %8092 = vmatpush1.bf16.msra.mxu0 %v12947_v5  ;;  %v13187_v5 = vcombine.low %v839_v50, %v851_v52  ;;  %v803_v12 = vld [vmem:[#allocation2 + $0x14c8] sm:$0xff] }
 0x28b   :  { %8093 = vmatprep.subr.bf16.mxu0 %v12924_v39  ;;  %v13164_v39 = vcombine.high %v815_v2, %v827_v36  ;;  %v1223_v14 = vld [vmem:[#allocation2 + $0x21e8] sm:$0xff] }
 0x28c   :  { %8129 = vmatpush1.bf16.msra.mxu1 %v13379_v6  ;;  %v13619_v6 = vcombine.low %v1271_v57, %v1283_v60  ;;  %v1235_v15 = vld [vmem:[#allocation2 + $0x2248] sm:$0xff] }
 0x28d   :  { %8130 = vmatprep.subr.bf16.mxu1 %v13356_v8  ;;  %v13596_v8 = vcombine.high %v1247_v3, %v1259_v20  ;;  %v767_v23 = vld [vmem:[#allocation2 + $0x13a8] sm:$0xff] }
 0x28e   :  { %8094 = vmatpush1.bf16.msra.mxu0 %v12923_v17  ;;  %v13163_v17 = vcombine.low %v815_v2, %v827_v36  ;;  %v779_v24 = vld [vmem:[#allocation2 + $0x1408] sm:$0xff] }
 0x28f   :  { %8095 = vmatprep.subr.bf16.mxu0 %v12900_v32  ;;  %v13140_v32 = vcombine.high %v791_v9, %v803_v12  ;;  %v1199_v53 = vld [vmem:[#allocation2 + $0x2128] sm:$0xff] }
 0x290   :  { %8131 = vmatpush1.bf16.msra.mxu1 %v13355_v18  ;;  %v13595_v18 = vcombine.low %v1247_v3, %v1259_v20  ;;  %v1211_v25 = vld [vmem:[#allocation2 + $0x2188] sm:$0xff] }
 0x291   :  { %8132 = vmatprep.subr.bf16.mxu1 %v13332_v55  ;;  %v13572_v55 = vcombine.high %v1223_v14, %v1235_v15  ;;  %v743_v28 = vld [vmem:[#allocation2 + $0x12e8] sm:$0xff] }
 0x292   :  { %8096 = vmatpush1.bf16.msra.mxu0 %v12899_v44  ;;  %v13139_v44 = vcombine.low %v791_v9, %v803_v12  ;;  %v755_v33 = vld [vmem:[#allocation2 + $0x1348] sm:$0xff] }
 0x293   :  { %8097 = vmatprep.subr.bf16.mxu0 %v12876_v29  ;;  %v13116_v29 = vcombine.high %v767_v23, %v779_v24  ;;  %v1175_v47 = vld [vmem:[#allocation2 + $0x2068] sm:$0xff] }
 0x294   :  { %8133 = vmatpush1.bf16.msra.mxu1 %v13331_v26  ;;  %v13571_v26 = vcombine.low %v1223_v14, %v1235_v15  ;;  %v1187_v35 = vld [vmem:[#allocation2 + $0x20c8] sm:$0xff] }
 0x295   :  { %8134 = vmatprep.subr.bf16.mxu1 %v13308_v27  ;;  %v13548_v27 = vcombine.high %v1199_v53, %v1211_v25  ;;  %v719_v42 = vld [vmem:[#allocation2 + $0x1228] sm:$0xff] }
 0x296   :  { %8098 = vmatpush1.bf16.msra.mxu0 %v12875_v37  ;;  %v13115_v37 = vcombine.low %v767_v23, %v779_v24  ;;  %v731_v43 = vld [vmem:[#allocation2 + $0x1288] sm:$0xff] }
 0x297   :  { %8099 = vmatprep.subr.bf16.mxu0 %v13236_v40  ;;  %v13092_v40 = vcombine.high %v743_v28, %v755_v33  ;;  %v1151_v10 = vld [vmem:[#allocation2 + $0x1fa8] sm:$0xff] }
 0x298   :  { %8135 = vmatpush1.bf16.msra.mxu1 %v13307_v7  ;;  %v13547_v7 = vcombine.low %v1199_v53, %v1211_v25  ;;  %v1163_v21 = vld [vmem:[#allocation2 + $0x2008] sm:$0xff] }
 0x299   :  { %8136 = vmatprep.subr.bf16.mxu1 %v13284_v41  ;;  %v13524_v41 = vcombine.high %v1175_v47, %v1187_v35  ;;  %v1295_v50 = vld [vmem:[#allocation2 + $0x2428] sm:$0xff]  ;;  %v13499_v2 = vcombine.low %v1151_v10, %v1163_v21 }
 0x29a   :  { %8100 = vmatpush2.bf16.msra.mxu0 %v13235_v45  ;;  %v13091_v45 = vcombine.low %v743_v28, %v755_v33  ;;  %v1307_v52 = vld [vmem:[#allocation2 + $0x2488] sm:$0xff] }
 0x29b   :  { %8101 = vmatprep.subr.bf16.mxu0 %v13212_v48  ;;  %v13068_v48 = vcombine.high %v719_v42, %v731_v43  ;;  %v1127_v60 = vld [vmem:[#allocation2 + $0x1ee8] sm:$0xff]  ;;  %v13644_v36 = vcombine.high %v1295_v50, %v1307_v52  ;;  %v13643_v12 = vcombine.low %v1295_v50, %v1307_v52  ;;  %v9191_v50 = vpack.c.bf16 %v14538_v11, %v14538_v11 }
 0x29c   :  { %8137 = vmatpush1.bf16.msra.mxu1 %v13283_v46  ;;  %v13523_v46 = vcombine.low %v1175_v47, %v1187_v35  ;;  %v1115_v9 = vld [vmem:[#allocation2 + $0x1e88] sm:$0xff]  ;;  %v672_v47 = vld [vmem:[#allocation2 + $0x10b0] sm:$0xff] }
 0x29d   :  { %8138 = vmatprep.subr.bf16.mxu1 %v13260_v49  ;;  %v13500_v49 = vcombine.high %v1151_v10, %v1163_v21  ;;  %v684_v35 = vld [vmem:[#allocation2 + $0x1110] sm:$0xff] }
 0x29e   :  { %8102 = vmatpush2.bf16.msra.mxu0 %v13211_v61  ;;  %v1139_v61 = vld [vmem:[#allocation2 + $0x1f48] sm:$0xff] }
 0x29f   :  { %8103 = vmatprep.subr.bf16.mxu0 %v13188_v63  ;;  %v13067_v63 = vcombine.low %v719_v42, %v731_v43  ;;  %v13476_v20 = vcombine.high %v1127_v60, %v1139_v61  ;;  %v13475_v14 = vcombine.low %v1127_v60, %v1139_v61  ;;  %v660_v60 = vld [vmem:[#allocation2 + $0x1050] sm:$0xff] }
 0x2a0   :  { %8139 = vmatpush1.bf16.msra.mxu1 %v13259_v62 }
 0x2a1   :  { %8140 = vmatprep.subr.bf16.mxu1 %v13620_v0 }
 0x2a2   :  { %8104 = vmatpush2.bf16.msra.mxu0 %v13187_v5  ;;  %v312_v5 = vld [vmem:[#allocation2 + $0x570] sm:$0xff] }
 0x2a3   :  { %8105 = vmatprep.subr.bf16.mxu0 %v13164_v39 }
 0x2a4   :  { %8141 = vmatpush2.bf16.msra.mxu1 %v13619_v6  ;;  %v324_v6 = vld [vmem:[#allocation2 + $0x5d0] sm:$0xff] }
 0x2a5   :  { %8142 = vmatprep.subr.bf16.mxu1 %v13596_v8  ;;  %v1103_v8 = vld [vmem:[#allocation2 + $0x1e28] sm:$0xff]  ;;  %v12662_v15 = vcombine.high %v312_v5, %v324_v6 }
 0x2a6   :  { %8106 = vmatpush2.bf16.msra.mxu0 %v13163_v17  ;;  %v13452_v17 = vcombine.high %v1103_v8, %v1115_v9  ;;  %v13451_v53 = vcombine.low %v1103_v8, %v1115_v9  ;;  %v216_v8 = vld [vmem:[#allocation2 + $0x270] sm:$0xff] }
 0x2a7   :  { %8107 = vmatprep.subr.bf16.mxu0 %v13140_v32  ;;  %v708_v32 = vld [vmem:[#allocation2 + $0x11d0] sm:$0xff] }
 0x2a8   :  { %8143 = vmatpush2.bf16.msra.mxu1 %v13595_v18  ;;  %v228_v9 = vld [vmem:[#allocation2 + $0x2d0] sm:$0xff] }
 0x2a9   :  { %8144 = vmatprep.subr.bf16.mxu1 %v13572_v55 }
 0x2aa   :  { %8108 = vmatpush2.bf16.msra.mxu0 %v13139_v44 }
 0x2ab   :  { %8109 = vmatprep.subr.bf16.mxu0 %v13116_v29  ;;  %v300_v29 = vld [vmem:[#allocation2 + $0x510] sm:$0xff] }
 0x2ac   :  { %8145 = vmatpush2.bf16.msra.mxu1 %v13571_v26  ;;  %v288_v26 = vld [vmem:[#allocation2 + $0x4b0] sm:$0xff] }
 0x2ad   :  { %8146 = vmatprep.subr.bf16.mxu1 %v13548_v27  ;;  %v12638_v21 = vcombine.high %v288_v26, %v300_v29  ;;  %v12637_v61 = vcombine.low %v288_v26, %v300_v29  ;;  %v168_v26 = vld [vmem:[#allocation2 + $0xf0] sm:$0xff] }
 0x2ae   :  { %8110 = vmatpush2.bf16.msra.mxu0 %v13115_v37  ;;  %v9190_v37 = vpack.c.bf16 %v14534_v51, %v14534_v51  ;;  %v648_v51 = vld [vmem:[#allocation2 + $0xff0] sm:$0xff] }
 0x2af   :  { %8111 = vmatprep.subr.bf16.mxu0 %v13092_v40  ;;  %v12661_v40 = vcombine.low %v312_v5, %v324_v6  ;;  %v12998_v11 = vcombine.high %v648_v51, %v660_v60  ;;  %v12997_v5 = vcombine.low %v648_v51, %v660_v60  ;;  %v180_v29 = vld [vmem:[#allocation2 + $0x150] sm:$0xff] }
 0x2b0   :  { %8147 = vmatpush2.bf16.msra.mxu1 %v13547_v7 }
 0x2b1   :  { %8148 = vmatprep.subr.bf16.mxu1 %v13524_v41  ;;  %v7789_v57 = vpop.f32.mrf.mxu0 }
 0x2b2   :  { %v7790_v62 = vadd.f32 %v7789_v57, %v14590_v34  ;;  %8112 = vmatpush2.bf16.msra.mxu0 %v13091_v45 }
 0x2b3   :  { %v7791_v0 = vpop.f32.mrf.mxu0  ;;  %8113 = vmatprep.subr.bf16.mxu0 %v13068_v48  ;;  %v264_v48 = vld [vmem:[#allocation2 + $0x3f0] sm:$0xff] }
 0x2b4   :  { %8149 = vmatpush2.bf16.msra.mxu1 %v13523_v46  ;;  %v7792_v3 = vadd.f32 %v7791_v0, %v14593_v38  ;;  %v696_v38 = vld [vmem:[#allocation2 + $0x1170] sm:$0xff]  ;;  %v13022_v46 = vcombine.high %v672_v47, %v684_v35 }
 0x2b5   :  { %8150 = vmatprep.subr.bf16.mxu1 %v13500_v49  ;;  %v7793_v39 = vpop.f32.mrf.mxu0  ;;  %v13046_v44 = vcombine.high %v696_v38, %v708_v32  ;;  %v13045_v10 = vcombine.low %v696_v38, %v708_v32  ;;  %v276_v49 = vld [vmem:[#allocation2 + $0x450] sm:$0xff] }
 0x2b6   :  { %8114 = vmatpush2.bf16.msra.mxu0 %v13067_v63  ;;  %v13021_v63 = vcombine.low %v672_v47, %v684_v35  ;;  %v12614_v0 = vcombine.high %v264_v48, %v276_v49  ;;  %v192_v38 = vld [vmem:[#allocation2 + $0x1b0] sm:$0xff]  ;;  %v12518_v35 = vcombine.high %v168_v26, %v180_v29 }
 0x2b7   :  { %v7794_v34 = vpop.f32.mrf.mxu0  ;;  %8179 = vmatprep.subr.bf16.mxu0 %v13644_v36  ;;  %v252_v36 = vld [vmem:[#allocation2 + $0x390] sm:$0xff] }
 0x2b8   :  { %8151 = vmatpush2.bf16.msra.mxu1 %v13499_v2  ;;  %v240_v2 = vld [vmem:[#allocation2 + $0x330] sm:$0xff] }
 0x2b9   :  { %8152 = vmatprep.subr.bf16.mxu1 %v13476_v20  ;;  %8116 = vmatmul.mubr.bf16.vlgmr.msra.gmra.mxu0 %v14474_v19  ;;  %v7871_v18 = vpop.f32.mrf.mxu0  ;;  %v12613_v20 = vcombine.low %v264_v48, %v276_v49  ;;  %v12590_v6 = vcombine.high %v240_v2, %v252_v36  ;;  %v612_v34 = vld [vmem:[#allocation2 + $0xed0] sm:$0xff] }
 0x2ba   :  { %8180 = vmatpush1.bf16.msra.mxu0 %v13643_v12  ;;  %8197 = vmatprep.mubr.bf16.mxu0 %v14371_v31  ;;  %v600_v12 = vld [vmem:[#allocation2 + $0xe70] sm:$0xff] }
 0x2bb   :  { %v7830_v55 = vpop.f32.mrf.mxu1  ;;  %v7873_v24 = vpop.f32.mrf.mxu0  ;;  %8206 = vmatprep.subr.bf16.mxu0 %v12662_v15  ;;  %v204_v32 = vld [vmem:[#allocation2 + $0x210] sm:$0xff] }
 0x2bc   :  { %v7831_v23 = vadd.f32 %v7830_v55, %v7790_v62  ;;  %8153 = vmatpush2.bf16.msra.mxu1 %v13475_v14  ;;  %v12589_v14 = vcombine.low %v240_v2, %v252_v36  ;;  %v576_v55 = vld [vmem:[#allocation2 + $0xdb0] sm:$0xff] }
 0x2bd   :  { %v7832_v25 = vpop.f32.mrf.mxu1  ;;  %8154 = vmatprep.subr.bf16.mxu1 %v13452_v17  ;;  %v7875_v33 = vpop.f32.mrf.mxu0  ;;  %v12566_v17 = vcombine.high %v216_v8, %v228_v9  ;;  %v516_v48 = vld [vmem:[#allocation2 + $0xbd0] sm:$0xff] }
 0x2be   :  { %v7872_v27 = vadd.f32 %v7871_v18, %v7831_v23  ;;  %v7833_v28 = vadd.f32 %v7832_v25, %v7792_v3  ;;  %v624_v3 = vld [vmem:[#allocation2 + $0xf30] sm:$0xff]  ;;  %v12950_v18 = vcombine.high %v600_v12, %v612_v34  ;;  %v12542_v25 = vcombine.high %v192_v38, %v204_v32 }
 0x2bf   :  { %v7834_v7 = vpop.f32.mrf.mxu1  ;;  %v7876_v43 = vpop.f32.mrf.mxu0  ;;  %v588_v23 = vld [vmem:[#allocation2 + $0xe10] sm:$0xff]  ;;  %v12541_v33 = vcombine.low %v192_v38, %v204_v32 }
 0x2c0   :  { %v9196_v41 = vpack.c.bf16 %v7872_v27, %v7872_v27  ;;  %v7874_v42 = vadd.f32 %v7873_v24, %v7833_v28  ;;  %8155 = vmatpush2.bf16.msra.mxu1 %v13451_v53  ;;  %v12565_v24 = vcombine.low %v216_v8, %v228_v9  ;;  %v12949_v53 = vcombine.low %v600_v12, %v612_v34  ;;  %v552_v27 = vld [vmem:[#allocation2 + $0xcf0] sm:$0xff] }
 0x2c1   :  { %v7835_v45 = vpop.f32.mrf.mxu1  ;;  %8247 = vmatprep.subr.bf16.mxu1 %v13046_v44  ;;  %13662 = vmatmul.mubr.msk.bf16.vlgmr.msra.gmra.mxu0 %vm7218_vm0, %v14576_v4  ;;  %v636_v4 = vld [vmem:[#allocation2 + $0xf90] sm:$0xff]  ;;  %v12926_v44 = vcombine.high %v576_v55, %v588_v23  ;;  %v12925_v47 = vcombine.low %v576_v55, %v588_v23  ;;  %v12517_v43 = vcombine.low %v168_v26, %v180_v29 }
 0x2c2   :  { %v14605_v52 = vmax.bf16 %v9196_v41, %v9190_v37  ;;  %v9197_v57 = vpack.c.bf16 %v7874_v42, %v7874_v42  ;;  %8207 = vmatpush1.bf16.msra.mxu0 %v12661_v40  ;;  %8238 = vmatprep.mubr.bf16.mxu0 %v14460_v58  ;;  %v12974_v39 = vcombine.high %v624_v3, %v636_v4  ;;  %v564_v28 = vld [vmem:[#allocation2 + $0xd50] sm:$0xff] }
 0x2c3   :  { %8157 = vmatmul.mubr.bf16.vlgmr.msra.gmra.mxu1 %v14499_v30  ;;  %8208 = vmatprep.subr.bf16.mxu0 %v12638_v21  ;;  %v12973_v15 = vcombine.low %v624_v3, %v636_v4  ;;  %v12902_v37 = vcombine.high %v552_v27, %v564_v28  ;;  %v144_v7 = vld [vmem:[#allocation2 + $0x30] sm:$0xff] }
 0x2c4   :  { %v14610_v62 = vmax.bf16 %v9197_v57, %v9191_v50  ;;  %8248 = vmatpush1.bf16.msra.mxu1 %v13045_v10  ;;  %8279 = vmatprep.mubr.bf16.mxu1 %v14464_v59  ;;  %v156_v40 = vld [vmem:[#allocation2 + $0x90] sm:$0xff]  ;;  %v12901_v10 = vcombine.low %v552_v27, %v564_v28 }
 0x2c5   :  { %8249 = vmatprep.subr.bf16.mxu1 %v13022_v46  ;;  %v528_v41 = vld [vmem:[#allocation2 + $0xc30] sm:$0xff]  ;;  %v12494_v21 = vcombine.high %v144_v7, %v156_v40  ;;  %v12493_v57 = vcombine.low %v144_v7, %v156_v40 }
 0x2c6   :  { %8209 = vmatpush1.bf16.msra.mxu0 %v12637_v61  ;;  %v540_v42 = vld [vmem:[#allocation2 + $0xc90] sm:$0xff] }
 0x2c7   :  { %8210 = vmatprep.subr.bf16.mxu0 %v12614_v0  ;;  %v12878_v45 = vcombine.high %v528_v41, %v540_v42  ;;  %v504_v46 = vld [vmem:[#allocation2 + $0xb70] sm:$0xff]  ;;  %v12877_v51 = vcombine.low %v528_v41, %v540_v42 }
 0x2c8   :  { %8250 = vmatpush1.bf16.msra.mxu1 %v13021_v63  ;;  %v888_v49 = vld [vmem:[#allocation2 + $0x1770] sm:$0xff]  ;;  %v12854_v60 = vcombine.high %v504_v46, %v516_v48  ;;  %v12853_v36 = vcombine.low %v504_v46, %v516_v48 }
 0x2c9   :  { %8251 = vmatprep.subr.bf16.mxu1 %v12998_v11  ;;  %v900_v50 = vld [vmem:[#allocation2 + $0x17d0] sm:$0xff] }
 0x2ca   :  { %8211 = vmatpush1.bf16.msra.mxu0 %v12613_v20  ;;  %v13238_v61 = vcombine.high %v888_v49, %v900_v50  ;;  %v480_v63 = vld [vmem:[#allocation2 + $0xab0] sm:$0xff]  ;;  %v13237_v3 = vcombine.low %v888_v49, %v900_v50 }
 0x2cb   :  { %8212 = vmatprep.subr.bf16.mxu0 %v12590_v6  ;;  %v492_v0 = vld [vmem:[#allocation2 + $0xb10] sm:$0xff] }
 0x2cc   :  { %8252 = vmatpush1.bf16.msra.mxu1 %v12997_v5  ;;  %v864_v11 = vld [vmem:[#allocation2 + $0x16b0] sm:$0xff]  ;;  %v12830_v4 = vcombine.high %v480_v63, %v492_v0  ;;  %v12829_v9 = vcombine.low %v480_v63, %v492_v0 }
 0x2cd   :  { %8253 = vmatprep.subr.bf16.mxu1 %v12974_v39  ;;  %v876_v2 = vld [vmem:[#allocation2 + $0x1710] sm:$0xff] }
 0x2ce   :  { %8213 = vmatpush1.bf16.msra.mxu0 %v12589_v14  ;;  %v13214_v20 = vcombine.high %v864_v11, %v876_v2  ;;  %v456_v5 = vld [vmem:[#allocation2 + $0x9f0] sm:$0xff]  ;;  %v13213_v12 = vcombine.low %v864_v11, %v876_v2 }
 0x2cf   :  { %8214 = vmatprep.subr.bf16.mxu0 %v12566_v17  ;;  %v468_v6 = vld [vmem:[#allocation2 + $0xa50] sm:$0xff] }
 0x2d0   :  { %8254 = vmatpush1.bf16.msra.mxu1 %v12973_v15  ;;  %v840_v39 = vld [vmem:[#allocation2 + $0x15f0] sm:$0xff]  ;;  %v12806_v34 = vcombine.high %v456_v5, %v468_v6  ;;  %v12805_v32 = vcombine.low %v456_v5, %v468_v6 }
 0x2d1   :  { %8255 = vmatprep.subr.bf16.mxu1 %v12950_v18  ;;  %v852_v8 = vld [vmem:[#allocation2 + $0x1650] sm:$0xff] }
 0x2d2   :  { %8215 = vmatpush1.bf16.msra.mxu0 %v12565_v24  ;;  %v13190_v14 = vcombine.high %v840_v39, %v852_v8  ;;  %v432_v15 = vld [vmem:[#allocation2 + $0x930] sm:$0xff]  ;;  %v13189_v55 = vcombine.low %v840_v39, %v852_v8 }
 0x2d3   :  { %8216 = vmatprep.subr.bf16.mxu0 %v12542_v25  ;;  %v444_v17 = vld [vmem:[#allocation2 + $0x990] sm:$0xff] }
 0x2d4   :  { %8256 = vmatpush1.bf16.msra.mxu1 %v12949_v53  ;;  %v816_v18 = vld [vmem:[#allocation2 + $0x1530] sm:$0xff]  ;;  %v12782_v23 = vcombine.high %v432_v15, %v444_v17  ;;  %v12781_v29 = vcombine.low %v432_v15, %v444_v17 }
 0x2d5   :  { %8257 = vmatprep.subr.bf16.mxu1 %v12926_v44  ;;  %v828_v38 = vld [vmem:[#allocation2 + $0x1590] sm:$0xff] }
 0x2d6   :  { %8217 = vmatpush1.bf16.msra.mxu0 %v12541_v33  ;;  %v13166_v24 = vcombine.high %v816_v18, %v828_v38  ;;  %v408_v53 = vld [vmem:[#allocation2 + $0x870] sm:$0xff]  ;;  %v13165_v27 = vcombine.low %v816_v18, %v828_v38 }
 0x2d7   :  { %8218 = vmatprep.subr.bf16.mxu0 %v12518_v35  ;;  %v420_v25 = vld [vmem:[#allocation2 + $0x8d0] sm:$0xff] }
 0x2d8   :  { %8258 = vmatpush1.bf16.msra.mxu1 %v12925_v47  ;;  %v792_v44 = vld [vmem:[#allocation2 + $0x1470] sm:$0xff]  ;;  %v12758_v28 = vcombine.high %v408_v53, %v420_v25  ;;  %v12757_v40 = vcombine.low %v408_v53, %v420_v25 }
 0x2d9   :  { %8259 = vmatprep.subr.bf16.mxu1 %v12902_v37  ;;  %v804_v26 = vld [vmem:[#allocation2 + $0x14d0] sm:$0xff] }
 0x2da   :  { %8219 = vmatpush1.bf16.msra.mxu0 %v12517_v43  ;;  %v13142_v33 = vcombine.high %v792_v44, %v804_v26  ;;  %v384_v47 = vld [vmem:[#allocation2 + $0x7b0] sm:$0xff]  ;;  %v13141_v41 = vcombine.low %v792_v44, %v804_v26 }
 0x2db   :  { %8220 = vmatprep.subr.bf16.mxu0 %v12494_v21  ;;  %v396_v35 = vld [vmem:[#allocation2 + $0x810] sm:$0xff] }
 0x2dc   :  { %8260 = vmatpush1.bf16.msra.mxu1 %v12901_v10  ;;  %v768_v37 = vld [vmem:[#allocation2 + $0x13b0] sm:$0xff]  ;;  %v12734_v42 = vcombine.high %v384_v47, %v396_v35  ;;  %v12733_v48 = vcombine.low %v384_v47, %v396_v35 }
 0x2dd   :  { %8261 = vmatprep.subr.bf16.mxu1 %v12878_v45  ;;  %v780_v7 = vld [vmem:[#allocation2 + $0x1410] sm:$0xff] }
 0x2de   :  { %8221 = vmatpush1.bf16.msra.mxu0 %v12493_v57  ;;  %v13118_v43 = vcombine.high %v768_v37, %v780_v7  ;;  %v360_v10 = vld [vmem:[#allocation2 + $0x6f0] sm:$0xff]  ;;  %v13117_v49 = vcombine.low %v768_v37, %v780_v7 }
 0x2df   :  { %8222 = vmatprep.subr.bf16.mxu0 %v12854_v60  ;;  %v372_v21 = vld [vmem:[#allocation2 + $0x750] sm:$0xff] }
 0x2e0   :  { %8262 = vmatpush1.bf16.msra.mxu1 %v12877_v51  ;;  %v744_v45 = vld [vmem:[#allocation2 + $0x12f0] sm:$0xff]  ;;  %v12710_v50 = vcombine.high %v360_v10, %v372_v21  ;;  %v12709_v0 = vcombine.low %v360_v10, %v372_v21  ;;  %v301_v10 = vld [vmem:[#allocation2 + $0x518] sm:$0xff] }
 0x2e1   :  { %8263 = vmatprep.subr.bf16.mxu1 %v13238_v61  ;;  %v756_v46 = vld [vmem:[#allocation2 + $0x1350] sm:$0xff] }
 0x2e2   :  { %8223 = vmatpush2.bf16.msra.mxu0 %v12853_v36  ;;  %v13094_v57 = vcombine.high %v744_v45, %v756_v46  ;;  %v336_v51 = vld [vmem:[#allocation2 + $0x630] sm:$0xff]  ;;  %v13093_v11 = vcombine.low %v744_v45, %v756_v46 }
 0x2e3   :  { %8224 = vmatprep.subr.bf16.mxu0 %v12830_v4  ;;  %v348_v60 = vld [vmem:[#allocation2 + $0x690] sm:$0xff] }
 0x2e4   :  { %8264 = vmatpush2.bf16.msra.mxu1 %v13237_v3  ;;  %v720_v61 = vld [vmem:[#allocation2 + $0x1230] sm:$0xff]  ;;  %v12686_v2 = vcombine.high %v336_v51, %v348_v60  ;;  %v12685_v8 = vcombine.low %v336_v51, %v348_v60  ;;  %v265_v60 = vld [vmem:[#allocation2 + $0x3f8] sm:$0xff] }
 0x2e5   :  { %8265 = vmatprep.subr.bf16.mxu1 %v13214_v20  ;;  %v732_v63 = vld [vmem:[#allocation2 + $0x1290] sm:$0xff] }
 0x2e6   :  { %8225 = vmatpush2.bf16.msra.mxu0 %v12829_v9  ;;  %v13070_v36 = vcombine.high %v720_v61, %v732_v63  ;;  %v1080_v3 = vld [vmem:[#allocation2 + $0x1d70] sm:$0xff] }
 0x2e7   :  { %8226 = vmatprep.subr.bf16.mxu0 %v12806_v34  ;;  %v1092_v4 = vld [vmem:[#allocation2 + $0x1dd0] sm:$0xff]  ;;  %v13069_v34 = vcombine.low %v720_v61, %v732_v63  ;;  %v277_v61 = vld [vmem:[#allocation2 + $0x458] sm:$0xff] }
 0x2e8   :  { %8266 = vmatpush2.bf16.msra.mxu1 %v13213_v12  ;;  %v1296_v5 = vld [vmem:[#allocation2 + $0x2430] sm:$0xff]  ;;  %v13429_v25 = vcombine.low %v1080_v3, %v1092_v4  ;;  %v14629_v63 = vld [vmem:[%s14958_s0 + $0x18] ss:$0 sps:$4 sm:$0xff]  }
 0x2e9   :  { %8267 = vmatprep.subr.bf16.mxu1 %v13190_v14  ;;  %v1308_v6 = vld [vmem:[#allocation2 + $0x2490] sm:$0xff]  ;;  %v13430_v14 = vcombine.high %v1080_v3, %v1092_v4 }
 0x2ea   :  { %8227 = vmatpush2.bf16.msra.mxu0 %v12805_v32  ;;  %v13646_v17 = vcombine.high %v1296_v5, %v1308_v6  ;;  %v1056_v18 = vld [vmem:[#allocation2 + $0x1cb0] sm:$0xff]  ;;  %v13645_v26 = vcombine.low %v1296_v5, %v1308_v6  ;;  %v253_v5 = vld [vmem:[#allocation2 + $0x398] sm:$0xff] }
 0x2eb   :  { %8228 = vmatprep.subr.bf16.mxu0 %v12782_v23  ;;  %v1068_v38 = vld [vmem:[#allocation2 + $0x1d10] sm:$0xff]  ;;  %v313_v23 = vld [vmem:[#allocation2 + $0x578] sm:$0xff] }
 0x2ec   :  { %8268 = vmatpush2.bf16.msra.mxu1 %v13189_v55  ;;  %v1044_v47 = vld [vmem:[#allocation2 + $0x1c50] sm:$0xff]  ;;  %v13405_v37 = vcombine.low %v1056_v18, %v1068_v38 }
 0x2ed   :  { %8269 = vmatprep.subr.bf16.mxu1 %v13166_v24  ;;  %v325_v24 = vld [vmem:[#allocation2 + $0x5d8] sm:$0xff]  ;;  %v996_v51 = vld [vmem:[#allocation2 + $0x1ad0] sm:$0xff] }
 0x2ee   :  { %8229 = vmatpush2.bf16.msra.mxu0 %v12781_v29  ;;  %v13406_v29 = vcombine.high %v1056_v18, %v1068_v38  ;;  %v12663_v46 = vcombine.low %v313_v23, %v325_v24  ;;  %v960_v3 = vld [vmem:[#allocation2 + $0x19b0] sm:$0xff] }
 0x2ef   :  { %8230 = vmatprep.subr.bf16.mxu0 %v12758_v28  ;;  %v12664_v28 = vcombine.high %v313_v23, %v325_v24  ;;  %v972_v4 = vld [vmem:[#allocation2 + $0x1a10] sm:$0xff] }
 0x2f0   :  { %8270 = vmatpush2.bf16.msra.mxu1 %v13165_v27  ;;  %v13309_v18 = vcombine.low %v960_v3, %v972_v4  ;;  %v912_v24 = vld [vmem:[#allocation2 + $0x1830] sm:$0xff] }
 0x2f1   :  { %8271 = vmatprep.subr.bf16.mxu1 %v13142_v33  ;;  %v1032_v33 = vld [vmem:[#allocation2 + $0x1bf0] sm:$0xff] }
 0x2f2   :  { %8231 = vmatpush2.bf16.msra.mxu0 %v12757_v40  ;;  %v13382_v7 = vcombine.high %v1032_v33, %v1044_v47  ;;  %v13381_v45 = vcombine.low %v1032_v33, %v1044_v47  ;;  %v1272_v33 = vld [vmem:[#allocation2 + $0x2370] sm:$0xff] }
 0x2f3   :  { %8232 = vmatprep.subr.bf16.mxu0 %v12734_v42  ;;  %v1020_v42 = vld [vmem:[#allocation2 + $0x1b90] sm:$0xff] }
 0x2f4   :  { %8272 = vmatpush2.bf16.msra.mxu1 %v13141_v41  ;;  %v1008_v41 = vld [vmem:[#allocation2 + $0x1b30] sm:$0xff] }
 0x2f5   :  { %8273 = vmatprep.subr.bf16.mxu1 %v13118_v43  ;;  %v289_v43 = vld [vmem:[#allocation2 + $0x4b8] sm:$0xff]  ;;  %v1284_v47 = vld [vmem:[#allocation2 + $0x23d0] sm:$0xff] }
 0x2f6   :  { %8233 = vmatpush2.bf16.msra.mxu0 %v12733_v48  ;;  %v13358_v48 = vcombine.high %v1008_v41, %v1020_v42 }
 0x2f7   :  { %8234 = vmatprep.subr.bf16.mxu0 %v12710_v50  ;;  %v12640_v50 = vcombine.high %v289_v43, %v301_v10 }
 0x2f8   :  { %8274 = vmatpush2.bf16.msra.mxu1 %v13117_v49 }
 0x2f9   :  { %8275 = vmatprep.subr.bf16.mxu1 %v13094_v57  ;;  %v7912_v20 = vpop.f32.mrf.mxu0  ;;  %v984_v57 = vld [vmem:[#allocation2 + $0x1a70] sm:$0xff] }
 0x2fa   :  { %8235 = vmatpush2.bf16.msra.mxu0 %v12709_v0  ;;  %v13357_v0 = vcombine.low %v1008_v41, %v1020_v42  ;;  %v13333_v6 = vcombine.low %v984_v57, %v996_v51 }
 0x2fb   :  { %v7953_v39 = vpop.f32.mrf.mxu1  ;;  %v7914_v12 = vpop.f32.mrf.mxu0  ;;  %8236 = vmatprep.subr.bf16.mxu0 %v12686_v2  ;;  %v13334_v2 = vcombine.high %v984_v57, %v996_v51 }
 0x2fc   :  { %v14614_v9 = vadd.f32 %v7953_v39, %v7912_v20  ;;  %8276 = vmatpush2.bf16.msra.mxu1 %v13093_v11  ;;  %v12639_v11 = vcombine.low %v289_v43, %v301_v10  ;;  %v241_v20 = vld [vmem:[#allocation2 + $0x338] sm:$0xff]  ;;  %v12615_v39 = vcombine.low %v265_v60, %v277_v61  ;;  %v13622_v43 = vcombine.high %v1272_v33, %v1284_v47 }
 0x2fd   :  { %v7955_v15 = vpop.f32.mrf.mxu1  ;;  %8277 = vmatprep.subr.bf16.mxu1 %v13070_v36  ;;  %v7916_v55 = vpop.f32.mrf.mxu0  ;;  %v12616_v36 = vcombine.high %v265_v60, %v277_v61  ;;  %v12591_v38 = vcombine.low %v241_v20, %v253_v5  ;;  %v1224_v60 = vld [vmem:[#allocation2 + $0x21f0] sm:$0xff] }
 0x2fe   :  { %v14616_v32 = vadd.f32 %v7955_v15, %v7914_v12  ;;  %8237 = vmatpush2.bf16.msra.mxu0 %v12685_v8  ;;  %v13310_v8 = vcombine.high %v960_v3, %v972_v4  ;;  %v12592_v12 = vcombine.high %v241_v20, %v253_v5  ;;  %v217_v15 = vld [vmem:[#allocation2 + $0x278] sm:$0xff]  ;;  %v1236_v61 = vld [vmem:[#allocation2 + $0x2250] sm:$0xff] }
 0x2ff   :  { %v7957_v53 = vpop.f32.mrf.mxu1  ;;  %v7917_v44 = vpop.f32.mrf.mxu0  ;;  %8288 = vmatprep.subr.bf16.mxu0 %v13430_v14  ;;  %v948_v14 = vld [vmem:[#allocation2 + $0x1950] sm:$0xff]  ;;  %v13574_v3 = vcombine.high %v1224_v60, %v1236_v61 }
 0x300   :  { %8278 = vmatpush2.bf16.msra.mxu1 %v13069_v34  ;;  %v936_v34 = vld [vmem:[#allocation2 + $0x18f0] sm:$0xff]  ;;  %v205_v44 = vld [vmem:[#allocation2 + $0x218] sm:$0xff] }
 0x301   :  { %v7958_v27 = vpop.f32.mrf.mxu1  ;;  %8343 = vmatprep.subr.bf16.mxu1 %v13646_v17  ;;  %8239 = vmatmul.mubr.bf16.vlgmr.msra.gmra.mxu0 %v14470_v16  ;;  %v229_v17 = vld [vmem:[#allocation2 + $0x2d8] sm:$0xff]  ;;  %v13286_v55 = vcombine.high %v936_v34, %v948_v14  ;;  %v924_v53 = vld [vmem:[#allocation2 + $0x1890] sm:$0xff] }
 0x302   :  { %8289 = vmatpush1.bf16.msra.mxu0 %v13429_v25  ;;  %8320 = vmatprep.mubr.bf16.mxu0 %v14484_v54  ;;  %v12568_v23 = vcombine.high %v217_v15, %v229_v17  ;;  %v193_v25 = vld [vmem:[#allocation2 + $0x1b8] sm:$0xff]  ;;  %v13262_v27 = vcombine.high %v912_v24, %v924_v53  ;;  %v13261_v41 = vcombine.low %v912_v24, %v924_v53  ;;  %v1200_v20 = vld [vmem:[#allocation2 + $0x2130] sm:$0xff] }
 0x303   :  { %8280 = vmatmul.mubr.bf16.vlgmr.msra.gmra.mxu1 %v14474_v19  ;;  %v14620_v35 = vpop.f32.mrf.mxu1  ;;  %8290 = vmatprep.subr.bf16.mxu0 %v13406_v29  ;;  %v12567_v29 = vcombine.low %v217_v15, %v229_v17  ;;  %v12543_v42 = vcombine.low %v193_v25, %v205_v44  ;;  %v1212_v5 = vld [vmem:[#allocation2 + $0x2190] sm:$0xff] }
 0x304   :  { %8344 = vmatpush1.bf16.msra.mxu1 %v13645_v26  ;;  %8361 = vmatprep.mubr.bf16.mxu1 %v14371_v31  ;;  %v13285_v26 = vcombine.low %v936_v34, %v948_v14  ;;  %v13550_v34 = vcombine.high %v1200_v20, %v1212_v5  ;;  %v1176_v15 = vld [vmem:[#allocation2 + $0x2070] sm:$0xff] }
 0x305   :  { %v14622_v40 = vpop.f32.mrf.mxu1  ;;  %8370 = vmatprep.subr.bf16.mxu1 %v12664_v28  ;;  %v12544_v28 = vcombine.high %v193_v25, %v205_v44  ;;  %v1188_v17 = vld [vmem:[#allocation2 + $0x20d0] sm:$0xff] }
 0x306   :  { %8291 = vmatpush1.bf16.msra.mxu0 %v13405_v37  ;;  %v169_v37 = vld [vmem:[#allocation2 + $0xf8] sm:$0xff]  ;;  %v13526_v24 = vcombine.high %v1176_v15, %v1188_v17  ;;  %v1152_v25 = vld [vmem:[#allocation2 + $0x1fb0] sm:$0xff] }
 0x307   :  { %v8039_v21 = vpop.f32.mrf.mxu1  ;;  %8292 = vmatprep.subr.bf16.mxu0 %v13382_v7  ;;  %v181_v7 = vld [vmem:[#allocation2 + $0x158] sm:$0xff]  ;;  %v1164_v44 = vld [vmem:[#allocation2 + $0x2010] sm:$0xff] }
 0x308   :  { %v12520_v10 = vcombine.high %v169_v37, %v181_v7  ;;  %v1248_v21 = vld [vmem:[#allocation2 + $0x22b0] sm:$0xff] }
 0x309   :  { %v8040_v49 = vpop.f32.mrf.mxu1 }
 0x30a   :  { %8293 = vmatpush1.bf16.msra.mxu0 %v13381_v45  ;;  %v1260_v45 = vld [vmem:[#allocation2 + $0x2310] sm:$0xff]  ;;  %v13621_v49 = vcombine.low %v1272_v33, %v1284_v47  ;;  %v13502_v33 = vcombine.high %v1152_v25, %v1164_v44 }
 0x30b   :  { %13663 = vmatmul.mubr.msk.bf16.vlgmr.msra.gmra.mxu1 %vm7218_vm0, %v14629_v63  ;;  %8294 = vmatprep.subr.bf16.mxu0 %v13358_v48  ;;  %v157_v48 = vld [vmem:[#allocation2 + $0x98] sm:$0xff]  ;;  %v13598_v57 = vcombine.high %v1248_v21, %v1260_v45 }
 0x30c   :  { %8371 = vmatpush1.bf16.msra.mxu1 %v12663_v46  ;;  %8402 = vmatprep.mubr.bf16.mxu1 %v14460_v58  ;;  %v145_v46 = vld [vmem:[#allocation2 + $0x38] sm:$0xff] }
 0x30d   :  { %8372 = vmatprep.subr.bf16.mxu1 %v12640_v50  ;;  %v12519_v50 = vcombine.low %v169_v37, %v181_v7  ;;  %v12496_v51 = vcombine.high %v145_v46, %v157_v48  ;;  %v1128_v37 = vld [vmem:[#allocation2 + $0x1ef0] sm:$0xff] }
 0x30e   :  { %8295 = vmatpush1.bf16.msra.mxu0 %v13357_v0  ;;  %v505_v0 = vld [vmem:[#allocation2 + $0xb78] sm:$0xff]  ;;  %v1140_v7 = vld [vmem:[#allocation2 + $0x1f50] sm:$0xff] }
 0x30f   :  { %8296 = vmatprep.subr.bf16.mxu0 %v13334_v2  ;;  %v13597_v2 = vcombine.low %v1248_v21, %v1260_v45  ;;  %v13478_v21 = vcombine.high %v1128_v37, %v1140_v7 }
 0x310   :  { %8373 = vmatpush1.bf16.msra.mxu1 %v12639_v11  ;;  %v517_v11 = vld [vmem:[#allocation2 + $0xbd8] sm:$0xff] }
 0x311   :  { %8374 = vmatprep.subr.bf16.mxu1 %v12616_v36  ;;  %v12495_v36 = vcombine.low %v145_v46, %v157_v48  ;;  %v12856_v4 = vcombine.high %v505_v0, %v517_v11  ;;  %v1104_v46 = vld [vmem:[#allocation2 + $0x1e30] sm:$0xff] }
 0x312   :  { %8297 = vmatpush1.bf16.msra.mxu0 %v13333_v6  ;;  %v481_v6 = vld [vmem:[#allocation2 + $0xab8] sm:$0xff]  ;;  %v1116_v48 = vld [vmem:[#allocation2 + $0x1e90] sm:$0xff] }
 0x313   :  { %8298 = vmatprep.subr.bf16.mxu0 %v13310_v8  ;;  %v13573_v8 = vcombine.low %v1224_v60, %v1236_v61  ;;  %v13454_v60 = vcombine.high %v1104_v46, %v1116_v48 }
 0x314   :  { %8375 = vmatpush1.bf16.msra.mxu1 %v12615_v39  ;;  %v493_v39 = vld [vmem:[#allocation2 + $0xb18] sm:$0xff] }
 0x315   :  { %8376 = vmatprep.subr.bf16.mxu1 %v12592_v12  ;;  %v12855_v12 = vcombine.low %v505_v0, %v517_v11  ;;  %v12832_v14 = vcombine.high %v481_v6, %v493_v39  ;;  %v697_v0 = vld [vmem:[#allocation2 + $0x1178] sm:$0xff] }
 0x316   :  { %8299 = vmatpush1.bf16.msra.mxu0 %v13309_v18  ;;  %v457_v18 = vld [vmem:[#allocation2 + $0x9f8] sm:$0xff] }
 0x317   :  { %8300 = vmatprep.subr.bf16.mxu0 %v13286_v55  ;;  %v13549_v55 = vcombine.low %v1200_v20, %v1212_v5  ;;  %v709_v11 = vld [vmem:[#allocation2 + $0x11d8] sm:$0xff]  ;;  %v13453_v20 = vcombine.low %v1104_v46, %v1116_v48 }
 0x318   :  { %8377 = vmatpush1.bf16.msra.mxu1 %v12591_v38  ;;  %v469_v38 = vld [vmem:[#allocation2 + $0xa58] sm:$0xff] }
 0x319   :  { %8378 = vmatprep.subr.bf16.mxu1 %v12568_v23  ;;  %v12831_v23 = vcombine.low %v481_v6, %v493_v39  ;;  %v12808_v53 = vcombine.high %v457_v18, %v469_v38  ;;  %v13048_v39 = vcombine.high %v697_v0, %v709_v11 }
 0x31a   :  { %8301 = vmatpush1.bf16.msra.mxu0 %v13285_v26  ;;  %v433_v26 = vld [vmem:[#allocation2 + $0x938] sm:$0xff] }
 0x31b   :  { %8302 = vmatprep.subr.bf16.mxu0 %v13262_v27  ;;  %v13525_v27 = vcombine.low %v1176_v15, %v1188_v17  ;;  %v685_v15 = vld [vmem:[#allocation2 + $0x1118] sm:$0xff] }
 0x31c   :  { %8379 = vmatpush1.bf16.msra.mxu1 %v12567_v29  ;;  %v445_v29 = vld [vmem:[#allocation2 + $0x998] sm:$0xff] }
 0x31d   :  { %8380 = vmatprep.subr.bf16.mxu1 %v12544_v28  ;;  %v12807_v28 = vcombine.low %v457_v18, %v469_v38  ;;  %v12784_v47 = vcombine.high %v433_v26, %v445_v29  ;;  %v337_v18 = vld [vmem:[#allocation2 + $0x638] sm:$0xff] }
 0x31e   :  { %8303 = vmatpush1.bf16.msra.mxu0 %v13261_v41  ;;  %v409_v41 = vld [vmem:[#allocation2 + $0x878] sm:$0xff] }
 0x31f   :  { %8304 = vmatprep.subr.bf16.mxu0 %v13622_v43  ;;  %v13501_v43 = vcombine.low %v1152_v25, %v1164_v44  ;;  %v349_v38 = vld [vmem:[#allocation2 + $0x698] sm:$0xff]  ;;  %v9193_v25 = vpack.c.bf16 %v14554_v1, %v14554_v1 }
 0x320   :  { %8381 = vmatpush1.bf16.msra.mxu1 %v12543_v42  ;;  %v421_v42 = vld [vmem:[#allocation2 + $0x8d8] sm:$0xff]  ;;  %v12687_v1 = vcombine.low %v337_v18, %v349_v38 }
 0x321   :  { %8382 = vmatprep.subr.bf16.mxu1 %v12520_v10  ;;  %v12783_v10 = vcombine.low %v433_v26, %v445_v29  ;;  %v12760_v45 = vcombine.high %v409_v41, %v421_v42  ;;  %v12688_v29 = vcombine.high %v337_v18, %v349_v38  ;;  %v985_v18 = vld [vmem:[#allocation2 + $0x1a78] sm:$0xff] }
 0x322   :  { %8305 = vmatpush2.bf16.msra.mxu0 %v13621_v49  ;;  %v385_v49 = vld [vmem:[#allocation2 + $0x7b8] sm:$0xff] }
 0x323   :  { %8306 = vmatprep.subr.bf16.mxu0 %v13598_v57  ;;  %v13477_v57 = vcombine.low %v1128_v37, %v1140_v7  ;;  %v997_v38 = vld [vmem:[#allocation2 + $0x1ad8] sm:$0xff] }
 0x324   :  { %8383 = vmatpush1.bf16.msra.mxu1 %v12519_v50  ;;  %v397_v50 = vld [vmem:[#allocation2 + $0x818] sm:$0xff] }
 0x325   :  { %8384 = vmatprep.subr.bf16.mxu1 %v12496_v51  ;;  %v12759_v51 = vcombine.low %v409_v41, %v421_v42  ;;  %v12736_v61 = vcombine.high %v385_v49, %v397_v50  ;;  %v12735_v6 = vcombine.low %v385_v49, %v397_v50 }
 0x326   :  { %8307 = vmatpush2.bf16.msra.mxu0 %v13597_v2 }
 0x327   :  { %8308 = vmatprep.subr.bf16.mxu0 %v13574_v3  ;;  %v373_v3 = vld [vmem:[#allocation2 + $0x758] sm:$0xff] }
 0x328   :  { %8385 = vmatpush1.bf16.msra.mxu1 %v12495_v36  ;;  %v361_v36 = vld [vmem:[#allocation2 + $0x6f8] sm:$0xff] }
 0x329   :  { %8386 = vmatprep.subr.bf16.mxu1 %v12856_v4 }
 0x32a   :  { %8309 = vmatpush2.bf16.msra.mxu0 %v13573_v8 }
 0x32b   :  { %8310 = vmatprep.subr.bf16.mxu0 %v13550_v34  ;;  %v12712_v34 = vcombine.high %v361_v36, %v373_v3 }
 0x32c   :  { %8387 = vmatpush2.bf16.msra.mxu1 %v12855_v12 }
 0x32d   :  { %8388 = vmatprep.subr.bf16.mxu1 %v12832_v14  ;;  %v673_v14 = vld [vmem:[#allocation2 + $0x10b8] sm:$0xff] }
 0x32e   :  { %8311 = vmatpush2.bf16.msra.mxu0 %v13549_v55  ;;  %v13023_v37 = vcombine.low %v673_v14, %v685_v15 }
 0x32f   :  { %8312 = vmatprep.subr.bf16.mxu0 %v13526_v24  ;;  %v13047_v24 = vcombine.low %v697_v0, %v709_v11  ;;  %v1033_v0 = vld [vmem:[#allocation2 + $0x1bf8] sm:$0xff] }
 0x330   :  { %8389 = vmatpush2.bf16.msra.mxu1 %v12831_v23  ;;  %v1045_v11 = vld [vmem:[#allocation2 + $0x1c58] sm:$0xff] }
 0x331   :  { %8390 = vmatprep.subr.bf16.mxu1 %v12808_v53 }
 0x332   :  { %8313 = vmatpush2.bf16.msra.mxu0 %v13525_v27  ;;  %v649_v27 = vld [vmem:[#allocation2 + $0xff8] sm:$0xff] }
 0x333   :  { %8314 = vmatprep.subr.bf16.mxu0 %v13502_v33 }
 0x334   :  { %8391 = vmatpush2.bf16.msra.mxu1 %v12807_v28  ;;  %v1093_v28 = vld [vmem:[#allocation2 + $0x1dd8] sm:$0xff] }
 0x335   :  { %8392 = vmatprep.subr.bf16.mxu1 %v12784_v47 }
 0x336   :  { %8315 = vmatpush2.bf16.msra.mxu0 %v13501_v43  ;;  %v625_v43 = vld [vmem:[#allocation2 + $0xf38] sm:$0xff] }
 0x337   :  { %8316 = vmatprep.subr.bf16.mxu0 %v13478_v21  ;;  %v1057_v21 = vld [vmem:[#allocation2 + $0x1cb8] sm:$0xff] }
 0x338   :  { %8393 = vmatpush2.bf16.msra.mxu1 %v12783_v10  ;;  %v637_v10 = vld [vmem:[#allocation2 + $0xf98] sm:$0xff] }
 0x339   :  { %8394 = vmatprep.subr.bf16.mxu1 %v12760_v45  ;;  %v7994_v2 = vpop.f32.mrf.mxu0  ;;  %v1069_v45 = vld [vmem:[#allocation2 + $0x1d18] sm:$0xff]  ;;  %v12976_v50 = vcombine.high %v625_v43, %v637_v10 }
 0x33a   :  { %v7995_v4 = vadd.f32 %v7994_v2, %v14614_v9  ;;  %8317 = vmatpush2.bf16.msra.mxu0 %v13477_v57  ;;  %v9192_v9 = vpack.c.bf16 %v14552_v56, %v14552_v56  ;;  %v661_v56 = vld [vmem:[#allocation2 + $0x1058] sm:$0xff]  ;;  %v12975_v2 = vcombine.low %v625_v43, %v637_v10 }
 0x33b   :  { %v7996_v5 = vpop.f32.mrf.mxu0  ;;  %8318 = vmatprep.subr.bf16.mxu0 %v13454_v60  ;;  %v13000_v7 = vcombine.high %v649_v27, %v661_v56  ;;  %v12999_v48 = vcombine.low %v649_v27, %v661_v56  ;;  %v601_v60 = vld [vmem:[#allocation2 + $0xe78] sm:$0xff] }
 0x33c   :  { %8395 = vmatpush2.bf16.msra.mxu1 %v12759_v51  ;;  %v8036_v8 = vadd.f32 %v14620_v35, %v7995_v4  ;;  %v7997_v12 = vadd.f32 %v7996_v5, %v14616_v32  ;;  %v12711_v35 = vcombine.low %v361_v36, %v373_v3  ;;  %v13024_v32 = vcombine.high %v673_v14, %v685_v15  ;;  %v589_v5 = vld [vmem:[#allocation2 + $0xe18] sm:$0xff] }
 0x33d   :  { %8396 = vmatprep.subr.bf16.mxu1 %v12736_v61  ;;  %v7998_v17 = vpop.f32.mrf.mxu0  ;;  %v13408_v51 = vcombine.high %v1057_v21, %v1069_v45  ;;  %v613_v61 = vld [vmem:[#allocation2 + $0xed8] sm:$0xff]  ;;  %v13407_v36 = vcombine.low %v1057_v21, %v1069_v45  ;;  %v13384_v4 = vcombine.high %v1033_v0, %v1045_v11 }
 0x33e   :  { %v9198_v55 = vpack.c.bf16 %v8036_v8, %v8036_v8  ;;  %v8038_v23 = vadd.f32 %v14622_v40, %v7997_v12  ;;  %8319 = vmatpush2.bf16.msra.mxu0 %v13453_v20  ;;  %v1081_v40 = vld [vmem:[#allocation2 + $0x1d78] sm:$0xff]  ;;  %v12952_v3 = vcombine.high %v601_v60, %v613_v61  ;;  %v12951_v8 = vcombine.low %v601_v60, %v613_v61 }
 0x33f   :  { %v7999_v53 = vpop.f32.mrf.mxu0  ;;  %8411 = vmatprep.subr.bf16.mxu0 %v13048_v39  ;;  %v13432_v42 = vcombine.high %v1081_v40, %v1093_v28  ;;  %v13431_v49 = vcombine.low %v1081_v40, %v1093_v28  ;;  %v577_v20 = vld [vmem:[#allocation2 + $0xdb8] sm:$0xff]  ;;  %v13383_v12 = vcombine.low %v1033_v0, %v1045_v11 }
 0x340   :  { %8397 = vmatpush2.bf16.msra.mxu1 %v12735_v6  ;;  %v14642_v44 = vmax.bf16 %v9198_v55, %v9192_v9  ;;  %v9199_v26 = vpack.c.bf16 %v8038_v23, %v8038_v23  ;;  %v1009_v6 = vld [vmem:[#allocation2 + $0x1b38] sm:$0xff]  ;;  %v12927_v9 = vcombine.low %v577_v20, %v589_v5 }
 0x341   :  { %8398 = vmatprep.subr.bf16.mxu1 %v12712_v34  ;;  %8321 = vmatmul.mubr.bf16.vlgmr.msra.gmra.mxu0 %v14499_v30  ;;  %v1021_v39 = vld [vmem:[#allocation2 + $0x1b98] sm:$0xff]  ;;  %v12928_v34 = vcombine.high %v577_v20, %v589_v5 }
 0x342   :  { %v14645_v33 = vmax.bf16 %v9199_v26, %v9193_v25  ;;  %8412 = vmatpush1.bf16.msra.mxu0 %v13047_v24  ;;  %8443 = vmatprep.mubr.bf16.mxu0 %v14464_v59  ;;  %v13360_v14 = vcombine.high %v1009_v6, %v1021_v39  ;;  %v553_v15 = vld [vmem:[#allocation2 + $0xcf8] sm:$0xff]  ;;  %v13359_v55 = vcombine.low %v1009_v6, %v1021_v39 }
 0x343   :  { %v14647_v47 = vpop.f32.mrf.mxu1  ;;  %8413 = vmatprep.subr.bf16.mxu0 %v13024_v32  ;;  %v565_v17 = vld [vmem:[#allocation2 + $0xd58] sm:$0xff]  ;;  %v13336_v24 = vcombine.high %v985_v18, %v997_v38 }
 0x344   :  { %8399 = vmatpush2.bf16.msra.mxu1 %v12711_v35  ;;  %v12904_v23 = vcombine.high %v553_v15, %v565_v17  ;;  %v529_v53 = vld [vmem:[#allocation2 + $0xc38] sm:$0xff]  ;;  %v12903_v26 = vcombine.low %v553_v15, %v565_v17 }
 0x345   :  { %v14650_v41 = vpop.f32.mrf.mxu1  ;;  %8400 = vmatprep.subr.bf16.mxu1 %v12688_v29  ;;  %v541_v35 = vld [vmem:[#allocation2 + $0xc98] sm:$0xff]  ;;  %v13335_v29 = vcombine.low %v985_v18, %v997_v38 }
 0x346   :  { %8414 = vmatpush1.bf16.msra.mxu0 %v13023_v37  ;;  %v961_v32 = vld [vmem:[#allocation2 + $0x19b8] sm:$0xff]  ;;  %v12880_v27 = vcombine.high %v529_v53, %v541_v35 }
 0x347   :  { %v8080_v46 = vpop.f32.mrf.mxu1  ;;  %8415 = vmatprep.subr.bf16.mxu0 %v13000_v7  ;;  %v973_v25 = vld [vmem:[#allocation2 + $0x1a18] sm:$0xff]  ;;  %v12879_v7 = vcombine.low %v529_v53, %v541_v35 }
 0x348   :  { %8401 = vmatpush2.bf16.msra.mxu1 %v12687_v1  ;;  %v13312_v56 = vcombine.high %v961_v32, %v973_v25  ;;  %v889_v40 = vld [vmem:[#allocation2 + $0x1778] sm:$0xff] }
 0x349   :  { %v8081_v57 = vpop.f32.mrf.mxu1  ;;  %8452 = vmatprep.subr.bf16.mxu1 %v13432_v42  ;;  %v901_v28 = vld [vmem:[#allocation2 + $0x17d8] sm:$0xff]  ;;  %v13311_v42 = vcombine.low %v961_v32, %v973_v25 }
 0x34a   :  { %8416 = vmatpush1.bf16.msra.mxu0 %v12999_v48  ;;  %v937_v37 = vld [vmem:[#allocation2 + $0x18f8] sm:$0xff]  ;;  %v13240_v43 = vcombine.high %v889_v40, %v901_v28 }
 0x34b   :  { %8403 = vmatmul.mubr.bf16.vlgmr.msra.gmra.mxu1 %v14470_v16  ;;  %8417 = vmatprep.subr.bf16.mxu0 %v12976_v50  ;;  %v949_v1 = vld [vmem:[#allocation2 + $0x1958] sm:$0xff] }
 0x34c   :  { %8453 = vmatpush1.bf16.msra.mxu1 %v13431_v49  ;;  %8484 = vmatprep.mubr.bf16.mxu1 %v14484_v54  ;;  %v13288_v10 = vcombine.high %v937_v37, %v949_v1  ;;  %v865_v21 = vld [vmem:[#allocation2 + $0x16b8] sm:$0xff]  ;;  %v13239_v49 = vcombine.low %v889_v40, %v901_v28  ;;  %v13287_v50 = vcombine.low %v937_v37, %v949_v1 }
 0x34d   :  { %8454 = vmatprep.subr.bf16.mxu1 %v13408_v51  ;;  %v877_v45 = vld [vmem:[#allocation2 + $0x1718] sm:$0xff] }
 0x34e   :  { %8418 = vmatpush1.bf16.msra.mxu0 %v12975_v2  ;;  %v913_v46 = vld [vmem:[#allocation2 + $0x1838] sm:$0xff]  ;;  %v13216_v57 = vcombine.high %v865_v21, %v877_v45  ;;  %v13215_v2 = vcombine.low %v865_v21, %v877_v45 }
 0x34f   :  { %8419 = vmatprep.subr.bf16.mxu0 %v12952_v3  ;;  %v925_v48 = vld [vmem:[#allocation2 + $0x1898] sm:$0xff] }
 0x350   :  { %8455 = vmatpush1.bf16.msra.mxu1 %v13407_v36  ;;  %v13264_v51 = vcombine.high %v913_v46, %v925_v48  ;;  %v841_v60 = vld [vmem:[#allocation2 + $0x15f8] sm:$0xff]  ;;  %v13263_v36 = vcombine.low %v913_v46, %v925_v48 }
 0x351   :  { %8456 = vmatprep.subr.bf16.mxu1 %v13384_v4  ;;  %v853_v61 = vld [vmem:[#allocation2 + $0x1658] sm:$0xff] }
 0x352   :  { %8420 = vmatpush1.bf16.msra.mxu0 %v12951_v8  ;;  %v1273_v0 = vld [vmem:[#allocation2 + $0x2378] sm:$0xff]  ;;  %v13192_v3 = vcombine.high %v841_v60, %v853_v61  ;;  %v13191_v8 = vcombine.low %v841_v60, %v853_v61 }
 0x353   :  { %8421 = vmatprep.subr.bf16.mxu0 %v12928_v34  ;;  %v1285_v11 = vld [vmem:[#allocation2 + $0x23d8] sm:$0xff] }
 0x354   :  { %8457 = vmatpush1.bf16.msra.mxu1 %v13383_v12  ;;  %v13624_v4 = vcombine.high %v1273_v0, %v1285_v11  ;;  %v817_v20 = vld [vmem:[#allocation2 + $0x1538] sm:$0xff]  ;;  %v13623_v12 = vcombine.low %v1273_v0, %v1285_v11 }
 0x355   :  { %8458 = vmatprep.subr.bf16.mxu1 %v13360_v14  ;;  %v829_v5 = vld [vmem:[#allocation2 + $0x1598] sm:$0xff] }
 0x356   :  { %8422 = vmatpush1.bf16.msra.mxu0 %v12927_v9  ;;  %v1249_v6 = vld [vmem:[#allocation2 + $0x22b8] sm:$0xff]  ;;  %v13168_v34 = vcombine.high %v817_v20, %v829_v5  ;;  %v13167_v9 = vcombine.low %v817_v20, %v829_v5 }
 0x357   :  { %8423 = vmatprep.subr.bf16.mxu0 %v12904_v23  ;;  %v1261_v39 = vld [vmem:[#allocation2 + $0x2318] sm:$0xff] }
 0x358   :  { %8459 = vmatpush1.bf16.msra.mxu1 %v13359_v55  ;;  %v13600_v14 = vcombine.high %v1249_v6, %v1261_v39  ;;  %v793_v15 = vld [vmem:[#allocation2 + $0x1478] sm:$0xff]  ;;  %v13599_v55 = vcombine.low %v1249_v6, %v1261_v39 }
 0x359   :  { %8460 = vmatprep.subr.bf16.mxu1 %v13336_v24  ;;  %v805_v17 = vld [vmem:[#allocation2 + $0x14d8] sm:$0xff] }
 0x35a   :  { %8424 = vmatpush1.bf16.msra.mxu0 %v12903_v26  ;;  %v1225_v18 = vld [vmem:[#allocation2 + $0x21f8] sm:$0xff]  ;;  %v13144_v23 = vcombine.high %v793_v15, %v805_v17  ;;  %v13143_v26 = vcombine.low %v793_v15, %v805_v17 }
 0x35b   :  { %8425 = vmatprep.subr.bf16.mxu0 %v12880_v27  ;;  %v1237_v38 = vld [vmem:[#allocation2 + $0x2258] sm:$0xff] }
 0x35c   :  { %8461 = vmatpush1.bf16.msra.mxu1 %v13335_v29  ;;  %v13576_v24 = vcombine.high %v1225_v18, %v1237_v38  ;;  %v769_v53 = vld [vmem:[#allocation2 + $0x13b8] sm:$0xff]  ;;  %v13575_v29 = vcombine.low %v1225_v18, %v1237_v38 }
 0x35d   :  { %8462 = vmatprep.subr.bf16.mxu1 %v13312_v56  ;;  %v781_v35 = vld [vmem:[#allocation2 + $0x1418] sm:$0xff] }
 0x35e   :  { %8426 = vmatpush1.bf16.msra.mxu0 %v12879_v7  ;;  %v1201_v32 = vld [vmem:[#allocation2 + $0x2138] sm:$0xff]  ;;  %v13120_v27 = vcombine.high %v769_v53, %v781_v35  ;;  %v13119_v7 = vcombine.low %v769_v53, %v781_v35 }
 0x35f   :  { %8427 = vmatprep.subr.bf16.mxu0 %v13240_v43  ;;  %v1213_v25 = vld [vmem:[#allocation2 + $0x2198] sm:$0xff] }
 0x360   :  { %8463 = vmatpush1.bf16.msra.mxu1 %v13311_v42  ;;  %v13552_v56 = vcombine.high %v1201_v32, %v1213_v25  ;;  %v745_v40 = vld [vmem:[#allocation2 + $0x12f8] sm:$0xff]  ;;  %v13551_v42 = vcombine.low %v1201_v32, %v1213_v25 }
 0x361   :  { %8464 = vmatprep.subr.bf16.mxu1 %v13288_v10  ;;  %v757_v28 = vld [vmem:[#allocation2 + $0x1358] sm:$0xff] }
 0x362   :  { %8428 = vmatpush2.bf16.msra.mxu0 %v13239_v49  ;;  %v1177_v37 = vld [vmem:[#allocation2 + $0x2078] sm:$0xff]  ;;  %v13096_v43 = vcombine.high %v745_v40, %v757_v28  ;;  %v13095_v49 = vcombine.low %v745_v40, %v757_v28 }
 0x363   :  { %8429 = vmatprep.subr.bf16.mxu0 %v13216_v57  ;;  %v1189_v1 = vld [vmem:[#allocation2 + $0x20d8] sm:$0xff] }
 0x364   :  { %8465 = vmatpush1.bf16.msra.mxu1 %v13287_v50  ;;  %v13528_v10 = vcombine.high %v1177_v37, %v1189_v1  ;;  %v721_v21 = vld [vmem:[#allocation2 + $0x1238] sm:$0xff]  ;;  %v13527_v50 = vcombine.low %v1177_v37, %v1189_v1  ;;  %v674_v37 = vld [vmem:[#allocation2 + $0x10c0] sm:$0xff] }
 0x365   :  { %8466 = vmatprep.subr.bf16.mxu1 %v13264_v51  ;;  %v733_v45 = vld [vmem:[#allocation2 + $0x1298] sm:$0xff]  ;;  %v686_v1 = vld [vmem:[#allocation2 + $0x1120] sm:$0xff] }
 0x366   :  { %8430 = vmatpush2.bf16.msra.mxu0 %v13215_v2  ;;  %v1153_v46 = vld [vmem:[#allocation2 + $0x1fb8] sm:$0xff]  ;;  %v13072_v57 = vcombine.high %v721_v21, %v733_v45 }
 0x367   :  { %8431 = vmatprep.subr.bf16.mxu0 %v13192_v3  ;;  %v1165_v48 = vld [vmem:[#allocation2 + $0x2018] sm:$0xff]  ;;  %v13071_v3 = vcombine.low %v721_v21, %v733_v45 }
 0x368   :  { %8467 = vmatpush1.bf16.msra.mxu1 %v13263_v36  ;;  %v13504_v51 = vcombine.high %v1153_v46, %v1165_v48  ;;  %v1297_v60 = vld [vmem:[#allocation2 + $0x2438] sm:$0xff]  ;;  %v13503_v20 = vcombine.low %v1153_v46, %v1165_v48 }
 0x369   :  { %8468 = vmatprep.subr.bf16.mxu1 %v13624_v4  ;;  %v1309_v61 = vld [vmem:[#allocation2 + $0x2498] sm:$0xff] }
 0x36a   :  { %8432 = vmatpush2.bf16.msra.mxu0 %v13191_v8  ;;  %v1129_v11 = vld [vmem:[#allocation2 + $0x1ef8] sm:$0xff]  ;;  %v13648_v5 = vcombine.high %v1297_v60, %v1309_v61  ;;  %v314_v8 = vld [vmem:[#allocation2 + $0x580] sm:$0xff]  ;;  %v13647_v17 = vcombine.low %v1297_v60, %v1309_v61  ;;  %v9195_v60 = vpack.c.bf16 %v14587_v22, %v14587_v22 }
 0x36b   :  { %8433 = vmatprep.subr.bf16.mxu0 %v13168_v34  ;;  %v1141_v2 = vld [vmem:[#allocation2 + $0x1f58] sm:$0xff] }
 0x36c   :  { %8469 = vmatpush2.bf16.msra.mxu1 %v13623_v12  ;;  %v13480_v39 = vcombine.high %v1129_v11, %v1141_v2  ;;  %v326_v12 = vld [vmem:[#allocation2 + $0x5e0] sm:$0xff]  ;;  %v1117_v15 = vld [vmem:[#allocation2 + $0x1e98] sm:$0xff]  ;;  %v13479_v18 = vcombine.low %v1129_v11, %v1141_v2 }
 0x36d   :  { %8470 = vmatprep.subr.bf16.mxu1 %v13600_v14  ;;  %v1105_v14 = vld [vmem:[#allocation2 + $0x1e38] sm:$0xff]  ;;  %v12666_v38 = vcombine.high %v314_v8, %v326_v12  ;;  %v662_v11 = vld [vmem:[#allocation2 + $0x1060] sm:$0xff] }
 0x36e   :  { %8434 = vmatpush2.bf16.msra.mxu0 %v13167_v9  ;;  %v13456_v9 = vcombine.high %v1105_v14, %v1117_v15  ;;  %v13455_v32 = vcombine.low %v1105_v14, %v1117_v15  ;;  %v218_v14 = vld [vmem:[#allocation2 + $0x280] sm:$0xff] }
 0x36f   :  { %8435 = vmatprep.subr.bf16.mxu0 %v13144_v23  ;;  %v710_v23 = vld [vmem:[#allocation2 + $0x11e0] sm:$0xff] }
 0x370   :  { %8471 = vmatpush2.bf16.msra.mxu1 %v13599_v55  ;;  %v230_v15 = vld [vmem:[#allocation2 + $0x2e0] sm:$0xff] }
 0x371   :  { %8472 = vmatprep.subr.bf16.mxu1 %v13576_v24 }
 0x372   :  { %8436 = vmatpush2.bf16.msra.mxu0 %v13143_v26 }
 0x373   :  { %8437 = vmatprep.subr.bf16.mxu0 %v13120_v27  ;;  %v302_v27 = vld [vmem:[#allocation2 + $0x520] sm:$0xff] }
 0x374   :  { %8473 = vmatpush2.bf16.msra.mxu1 %v13575_v29  ;;  %v290_v29 = vld [vmem:[#allocation2 + $0x4c0] sm:$0xff] }
 0x375   :  { %8474 = vmatprep.subr.bf16.mxu1 %v13552_v56  ;;  %v12642_v48 = vcombine.high %v290_v29, %v302_v27  ;;  %v12641_v2 = vcombine.low %v290_v29, %v302_v27  ;;  %v170_v29 = vld [vmem:[#allocation2 + $0x100] sm:$0xff] }
 0x376   :  { %8438 = vmatpush2.bf16.msra.mxu0 %v13119_v7  ;;  %v9194_v7 = vpack.c.bf16 %v14583_v13, %v14583_v13  ;;  %v650_v13 = vld [vmem:[#allocation2 + $0x1000] sm:$0xff] }
 0x377   :  { %8439 = vmatprep.subr.bf16.mxu0 %v13096_v43  ;;  %v12665_v43 = vcombine.low %v314_v8, %v326_v12  ;;  %v13002_v22 = vcombine.high %v650_v13, %v662_v11  ;;  %v13001_v8 = vcombine.low %v650_v13, %v662_v11  ;;  %v182_v27 = vld [vmem:[#allocation2 + $0x160] sm:$0xff] }
 0x378   :  { %8475 = vmatpush2.bf16.msra.mxu1 %v13551_v42 }
 0x379   :  { %8476 = vmatprep.subr.bf16.mxu1 %v13528_v10  ;;  %v8117_v0 = vpop.f32.mrf.mxu0 }
 0x37a   :  { %v8118_v36 = vadd.f32 %v8117_v0, %v14647_v47  ;;  %8440 = vmatpush2.bf16.msra.mxu0 %v13095_v49 }
 0x37b   :  { %v8119_v4 = vpop.f32.mrf.mxu0  ;;  %8441 = vmatprep.subr.bf16.mxu0 %v13072_v57  ;;  %v266_v57 = vld [vmem:[#allocation2 + $0x400] sm:$0xff] }
 0x37c   :  { %8477 = vmatpush2.bf16.msra.mxu1 %v13527_v50  ;;  %v8120_v6 = vadd.f32 %v8119_v4, %v14650_v41  ;;  %v698_v41 = vld [vmem:[#allocation2 + $0x1180] sm:$0xff]  ;;  %v13026_v50 = vcombine.high %v674_v37, %v686_v1 }
 0x37d   :  { %8478 = vmatprep.subr.bf16.mxu1 %v13504_v51  ;;  %v8121_v34 = vpop.f32.mrf.mxu0  ;;  %v13050_v26 = vcombine.high %v698_v41, %v710_v23  ;;  %v13049_v46 = vcombine.low %v698_v41, %v710_v23  ;;  %v278_v51 = vld [vmem:[#allocation2 + $0x460] sm:$0xff] }
 0x37e   :  { %8442 = vmatpush2.bf16.msra.mxu0 %v13071_v3  ;;  %v13025_v3 = vcombine.low %v674_v37, %v686_v1  ;;  %v12618_v4 = vcombine.high %v266_v57, %v278_v51  ;;  %v194_v41 = vld [vmem:[#allocation2 + $0x1c0] sm:$0xff]  ;;  %v12522_v1 = vcombine.high %v170_v29, %v182_v27 }
 0x37f   :  { %v8122_v47 = vpop.f32.mrf.mxu0  ;;  %8507 = vmatprep.subr.bf16.mxu0 %v13648_v5  ;;  %v254_v5 = vld [vmem:[#allocation2 + $0x3a0] sm:$0xff] }
 0x380   :  { %8479 = vmatpush2.bf16.msra.mxu1 %v13503_v20  ;;  %v242_v20 = vld [vmem:[#allocation2 + $0x340] sm:$0xff] }
 0x381   :  { %8480 = vmatprep.subr.bf16.mxu1 %v13480_v39  ;;  %8444 = vmatmul.mubr.bf16.vlgmr.msra.gmra.mxu0 %v14474_v19  ;;  %v8199_v55 = vpop.f32.mrf.mxu0  ;;  %v12617_v39 = vcombine.low %v266_v57, %v278_v51  ;;  %v12594_v12 = vcombine.high %v242_v20, %v254_v5  ;;  %v614_v47 = vld [vmem:[#allocation2 + $0xee0] sm:$0xff] }
 0x382   :  { %8508 = vmatpush1.bf16.msra.mxu0 %v13647_v17  ;;  %8525 = vmatprep.mubr.bf16.mxu0 %v14371_v31  ;;  %v602_v17 = vld [vmem:[#allocation2 + $0xe80] sm:$0xff] }
 0x383   :  { %v8158_v24 = vpop.f32.mrf.mxu1  ;;  %v8201_v35 = vpop.f32.mrf.mxu0  ;;  %8534 = vmatprep.subr.bf16.mxu0 %v12666_v38  ;;  %v206_v23 = vld [vmem:[#allocation2 + $0x220] sm:$0xff] }
 0x384   :  { %v8159_v53 = vadd.f32 %v8158_v24, %v8118_v36  ;;  %8481 = vmatpush2.bf16.msra.mxu1 %v13479_v18  ;;  %v12593_v18 = vcombine.low %v242_v20, %v254_v5  ;;  %v578_v24 = vld [vmem:[#allocation2 + $0xdc0] sm:$0xff] }
 0x385   :  { %v8160_v25 = vpop.f32.mrf.mxu1  ;;  %8482 = vmatprep.subr.bf16.mxu1 %v13456_v9  ;;  %v8203_v28 = vpop.f32.mrf.mxu0  ;;  %v12570_v9 = vcombine.high %v218_v14, %v230_v15  ;;  %v518_v57 = vld [vmem:[#allocation2 + $0xbe0] sm:$0xff] }
 0x386   :  { %v8200_v56 = vadd.f32 %v8199_v55, %v8159_v53  ;;  %v8161_v40 = vadd.f32 %v8160_v25, %v8120_v6  ;;  %v626_v6 = vld [vmem:[#allocation2 + $0xf40] sm:$0xff]  ;;  %v12954_v55 = vcombine.high %v602_v17, %v614_v47  ;;  %v12546_v25 = vcombine.high %v194_v41, %v206_v23 }
 0x387   :  { %v8162_v42 = vpop.f32.mrf.mxu1  ;;  %v8204_v45 = vpop.f32.mrf.mxu0  ;;  %v590_v53 = vld [vmem:[#allocation2 + $0xe20] sm:$0xff]  ;;  %v12545_v28 = vcombine.low %v194_v41, %v206_v23 }
 0x388   :  { %v9200_v10 = vpack.c.bf16 %v8200_v56, %v8200_v56  ;;  %v8202_v21 = vadd.f32 %v8201_v35, %v8161_v40  ;;  %8483 = vmatpush2.bf16.msra.mxu1 %v13455_v32  ;;  %v12569_v35 = vcombine.low %v218_v14, %v230_v15  ;;  %v12953_v32 = vcombine.low %v602_v17, %v614_v47  ;;  %v554_v56 = vld [vmem:[#allocation2 + $0xd00] sm:$0xff] }
 0x389   :  { %v8163_v49 = vpop.f32.mrf.mxu1  ;;  %8575 = vmatprep.subr.bf16.mxu1 %v13050_v26  ;;  %13664 = vmatmul.mubr.msk.bf16.vlgmr.msra.gmra.mxu0 %vm7218_vm0, %v14629_v63  ;;  %v638_v63 = vld [vmem:[#allocation2 + $0xfa0] sm:$0xff]  ;;  %v12930_v26 = vcombine.high %v578_v24, %v590_v53  ;;  %v12929_v37 = vcombine.low %v578_v24, %v590_v53  ;;  %v12521_v45 = vcombine.low %v170_v29, %v182_v27 }
 0x38a   :  { %v14662_v61 = vmax.bf16 %v9200_v10, %v9194_v7  ;;  %v9201_v0 = vpack.c.bf16 %v8202_v21, %v8202_v21  ;;  %8535 = vmatpush1.bf16.msra.mxu0 %v12665_v43  ;;  %8566 = vmatprep.mubr.bf16.mxu0 %v14460_v58  ;;  %v12978_v34 = vcombine.high %v626_v6, %v638_v63  ;;  %v566_v40 = vld [vmem:[#allocation2 + $0xd60] sm:$0xff] }
 0x38b   :  { %8485 = vmatmul.mubr.bf16.vlgmr.msra.gmra.mxu1 %v14499_v30  ;;  %8536 = vmatprep.subr.bf16.mxu0 %v12642_v48  ;;  %v12977_v38 = vcombine.low %v626_v6, %v638_v63  ;;  %v12906_v7 = vcombine.high %v554_v56, %v566_v40  ;;  %v146_v42 = vld [vmem:[#allocation2 + $0x40] sm:$0xff] }
 0x38c   :  { %v14667_v36 = vmax.bf16 %v9201_v0, %v9195_v60  ;;  %8576 = vmatpush1.bf16.msra.mxu1 %v13049_v46  ;;  %8607 = vmatprep.mubr.bf16.mxu1 %v14464_v59  ;;  %v158_v43 = vld [vmem:[#allocation2 + $0xa0] sm:$0xff]  ;;  %v12905_v46 = vcombine.low %v554_v56, %v566_v40 }
 0x38d   :  { %8577 = vmatprep.subr.bf16.mxu1 %v13026_v50  ;;  %v530_v10 = vld [vmem:[#allocation2 + $0xc40] sm:$0xff]  ;;  %v12498_v48 = vcombine.high %v146_v42, %v158_v43  ;;  %v12497_v0 = vcombine.low %v146_v42, %v158_v43 }
 0x38e   :  { %8537 = vmatpush1.bf16.msra.mxu0 %v12641_v2  ;;  %v542_v21 = vld [vmem:[#allocation2 + $0xca0] sm:$0xff] }
 0x38f   :  { %8538 = vmatprep.subr.bf16.mxu0 %v12618_v4  ;;  %v12882_v49 = vcombine.high %v530_v10, %v542_v21  ;;  %v506_v50 = vld [vmem:[#allocation2 + $0xb80] sm:$0xff]  ;;  %v12881_v13 = vcombine.low %v530_v10, %v542_v21 }
 0x390   :  { %8578 = vmatpush1.bf16.msra.mxu1 %v13025_v3  ;;  %v890_v51 = vld [vmem:[#allocation2 + $0x1780] sm:$0xff]  ;;  %v12858_v11 = vcombine.high %v506_v50, %v518_v57  ;;  %v12857_v5 = vcombine.low %v506_v50, %v518_v57 }
 0x391   :  { %8579 = vmatprep.subr.bf16.mxu1 %v13002_v22  ;;  %v902_v60 = vld [vmem:[#allocation2 + $0x17e0] sm:$0xff] }
 0x392   :  { %8539 = vmatpush1.bf16.msra.mxu0 %v12617_v39  ;;  %v13242_v2 = vcombine.high %v890_v51, %v902_v60  ;;  %v482_v3 = vld [vmem:[#allocation2 + $0xac0] sm:$0xff]  ;;  %v13241_v6 = vcombine.low %v890_v51, %v902_v60 }
 0x393   :  { %8540 = vmatprep.subr.bf16.mxu0 %v12594_v12  ;;  %v494_v4 = vld [vmem:[#allocation2 + $0xb20] sm:$0xff] }
 0x394   :  { %8580 = vmatpush1.bf16.msra.mxu1 %v13001_v8  ;;  %v866_v22 = vld [vmem:[#allocation2 + $0x16c0] sm:$0xff]  ;;  %v12834_v63 = vcombine.high %v482_v3, %v494_v4  ;;  %v12833_v15 = vcombine.low %v482_v3, %v494_v4 }
 0x395   :  { %8581 = vmatprep.subr.bf16.mxu1 %v12978_v34  ;;  %v878_v20 = vld [vmem:[#allocation2 + $0x1720] sm:$0xff] }
 0x396   :  { %8541 = vmatpush1.bf16.msra.mxu0 %v12593_v18  ;;  %v13218_v39 = vcombine.high %v866_v22, %v878_v20  ;;  %v458_v8 = vld [vmem:[#allocation2 + $0xa00] sm:$0xff]  ;;  %v13217_v17 = vcombine.low %v866_v22, %v878_v20 }
 0x397   :  { %8542 = vmatprep.subr.bf16.mxu0 %v12570_v9  ;;  %v470_v12 = vld [vmem:[#allocation2 + $0xa60] sm:$0xff] }
 0x398   :  { %8582 = vmatpush1.bf16.msra.mxu1 %v12977_v38  ;;  %v842_v34 = vld [vmem:[#allocation2 + $0x1600] sm:$0xff]  ;;  %v12810_v47 = vcombine.high %v458_v8, %v470_v12  ;;  %v12809_v23 = vcombine.low %v458_v8, %v470_v12 }
 0x399   :  { %8583 = vmatprep.subr.bf16.mxu1 %v12954_v55  ;;  %v854_v14 = vld [vmem:[#allocation2 + $0x1660] sm:$0xff] }
 0x39a   :  { %8543 = vmatpush1.bf16.msra.mxu0 %v12569_v35  ;;  %v13194_v18 = vcombine.high %v842_v34, %v854_v14  ;;  %v434_v38 = vld [vmem:[#allocation2 + $0x940] sm:$0xff]  ;;  %v13193_v24 = vcombine.low %v842_v34, %v854_v14 }
 0x39b   :  { %8544 = vmatprep.subr.bf16.mxu0 %v12546_v25  ;;  %v446_v9 = vld [vmem:[#allocation2 + $0x9a0] sm:$0xff] }
 0x39c   :  { %8584 = vmatpush1.bf16.msra.mxu1 %v12953_v32  ;;  %v818_v55 = vld [vmem:[#allocation2 + $0x1540] sm:$0xff]  ;;  %v12786_v53 = vcombine.high %v434_v38, %v446_v9  ;;  %v12785_v27 = vcombine.low %v434_v38, %v446_v9 }
 0x39d   :  { %8585 = vmatprep.subr.bf16.mxu1 %v12930_v26  ;;  %v830_v41 = vld [vmem:[#allocation2 + $0x15a0] sm:$0xff] }
 0x39e   :  { %8545 = vmatpush1.bf16.msra.mxu0 %v12545_v28  ;;  %v13170_v35 = vcombine.high %v818_v55, %v830_v41  ;;  %v410_v32 = vld [vmem:[#allocation2 + $0x880] sm:$0xff]  ;;  %v13169_v56 = vcombine.low %v818_v55, %v830_v41 }
 0x39f   :  { %8546 = vmatprep.subr.bf16.mxu0 %v12522_v1  ;;  %v422_v25 = vld [vmem:[#allocation2 + $0x8e0] sm:$0xff] }
 0x3a0   :  { %8586 = vmatpush1.bf16.msra.mxu1 %v12929_v37  ;;  %v794_v26 = vld [vmem:[#allocation2 + $0x1480] sm:$0xff]  ;;  %v12762_v40 = vcombine.high %v410_v32, %v422_v25  ;;  %v12761_v43 = vcombine.low %v410_v32, %v422_v25 }
 0x3a1   :  { %8587 = vmatprep.subr.bf16.mxu1 %v12906_v7  ;;  %v806_v29 = vld [vmem:[#allocation2 + $0x14e0] sm:$0xff] }
 0x3a2   :  { %8547 = vmatpush1.bf16.msra.mxu0 %v12521_v45  ;;  %v13146_v28 = vcombine.high %v794_v26, %v806_v29  ;;  %v386_v37 = vld [vmem:[#allocation2 + $0x7c0] sm:$0xff]  ;;  %v13145_v10 = vcombine.low %v794_v26, %v806_v29 }
 0x3a3   :  { %8548 = vmatprep.subr.bf16.mxu0 %v12498_v48  ;;  %v398_v1 = vld [vmem:[#allocation2 + $0x820] sm:$0xff] }
 0x3a4   :  { %8588 = vmatpush1.bf16.msra.mxu1 %v12905_v46  ;;  %v770_v7 = vld [vmem:[#allocation2 + $0x13c0] sm:$0xff]  ;;  %v12738_v21 = vcombine.high %v386_v37, %v398_v1  ;;  %v12737_v57 = vcombine.low %v386_v37, %v398_v1 }
 0x3a5   :  { %8589 = vmatprep.subr.bf16.mxu1 %v12882_v49  ;;  %v782_v42 = vld [vmem:[#allocation2 + $0x1420] sm:$0xff] }
 0x3a6   :  { %8549 = vmatpush1.bf16.msra.mxu0 %v12497_v0  ;;  %v13122_v45 = vcombine.high %v770_v7, %v782_v42  ;;  %v362_v46 = vld [vmem:[#allocation2 + $0x700] sm:$0xff]  ;;  %v13121_v51 = vcombine.low %v770_v7, %v782_v42 }
 0x3a7   :  { %8550 = vmatprep.subr.bf16.mxu0 %v12858_v11  ;;  %v374_v48 = vld [vmem:[#allocation2 + $0x760] sm:$0xff] }
 0x3a8   :  { %8590 = vmatpush1.bf16.msra.mxu1 %v12881_v13  ;;  %v746_v49 = vld [vmem:[#allocation2 + $0x1300] sm:$0xff]  ;;  %v12714_v60 = vcombine.high %v362_v46, %v374_v48  ;;  %v12713_v4 = vcombine.low %v362_v46, %v374_v48  ;;  %v303_v46 = vld [vmem:[#allocation2 + $0x528] sm:$0xff] }
 0x3a9   :  { %8591 = vmatprep.subr.bf16.mxu1 %v13242_v2  ;;  %v758_v50 = vld [vmem:[#allocation2 + $0x1360] sm:$0xff] }
 0x3aa   :  { %8551 = vmatpush2.bf16.msra.mxu0 %v12857_v5  ;;  %v13098_v0 = vcombine.high %v746_v49, %v758_v50  ;;  %v338_v13 = vld [vmem:[#allocation2 + $0x640] sm:$0xff]  ;;  %v13097_v22 = vcombine.low %v746_v49, %v758_v50 }
 0x3ab   :  { %8552 = vmatprep.subr.bf16.mxu0 %v12834_v63  ;;  %v350_v11 = vld [vmem:[#allocation2 + $0x6a0] sm:$0xff] }
 0x3ac   :  { %8592 = vmatpush2.bf16.msra.mxu1 %v13241_v6  ;;  %v722_v2 = vld [vmem:[#allocation2 + $0x1240] sm:$0xff]  ;;  %v12690_v20 = vcombine.high %v338_v13, %v350_v11  ;;  %v12689_v14 = vcombine.low %v338_v13, %v350_v11  ;;  %v267_v11 = vld [vmem:[#allocation2 + $0x408] sm:$0xff] }
 0x3ad   :  { %8593 = vmatprep.subr.bf16.mxu1 %v13218_v39  ;;  %v734_v3 = vld [vmem:[#allocation2 + $0x12a0] sm:$0xff] }
 0x3ae   :  { %8553 = vmatpush2.bf16.msra.mxu0 %v12833_v15  ;;  %v13074_v5 = vcombine.high %v722_v2, %v734_v3  ;;  %v1082_v6 = vld [vmem:[#allocation2 + $0x1d80] sm:$0xff] }
 0x3af   :  { %8554 = vmatprep.subr.bf16.mxu0 %v12810_v47  ;;  %v1094_v63 = vld [vmem:[#allocation2 + $0x1de0] sm:$0xff]  ;;  %v13073_v47 = vcombine.low %v722_v2, %v734_v3  ;;  %v279_v2 = vld [vmem:[#allocation2 + $0x468] sm:$0xff]  ;;  %v14686_v3 = vld [vmem:[%s14958_s0 + $0x18] ss:$0 sps:$4 sm:$0xff]  }
 0x3b0   :  { %8594 = vmatpush2.bf16.msra.mxu1 %v13217_v17  ;;  %v1298_v8 = vld [vmem:[#allocation2 + $0x2440] sm:$0xff]  ;;  %v13433_v25 = vcombine.low %v1082_v6, %v1094_v63 }
 0x3b1   :  { %8595 = vmatprep.subr.bf16.mxu1 %v13194_v18  ;;  %v1310_v12 = vld [vmem:[#allocation2 + $0x24a0] sm:$0xff]  ;;  %v13434_v18 = vcombine.high %v1082_v6, %v1094_v63 }
 0x3b2   :  { %8555 = vmatpush2.bf16.msra.mxu0 %v12809_v23  ;;  %v13650_v9 = vcombine.high %v1298_v8, %v1310_v12  ;;  %v1058_v55 = vld [vmem:[#allocation2 + $0x1cc0] sm:$0xff]  ;;  %v13649_v29 = vcombine.low %v1298_v8, %v1310_v12  ;;  %v255_v8 = vld [vmem:[#allocation2 + $0x3a8] sm:$0xff] }
 0x3b3   :  { %8556 = vmatprep.subr.bf16.mxu0 %v12786_v53  ;;  %v1070_v41 = vld [vmem:[#allocation2 + $0x1d20] sm:$0xff]  ;;  %v315_v53 = vld [vmem:[#allocation2 + $0x588] sm:$0xff] }
 0x3b4   :  { %8596 = vmatpush2.bf16.msra.mxu1 %v13193_v24  ;;  %v1046_v37 = vld [vmem:[#allocation2 + $0x1c60] sm:$0xff]  ;;  %v13409_v7 = vcombine.low %v1058_v55, %v1070_v41 }
 0x3b5   :  { %8597 = vmatprep.subr.bf16.mxu1 %v13170_v35  ;;  %v327_v35 = vld [vmem:[#allocation2 + $0x5e8] sm:$0xff]  ;;  %v998_v13 = vld [vmem:[#allocation2 + $0x1ae0] sm:$0xff] }
 0x3b6   :  { %8557 = vmatpush2.bf16.msra.mxu0 %v12785_v27  ;;  %v13410_v27 = vcombine.high %v1058_v55, %v1070_v41  ;;  %v12667_v50 = vcombine.low %v315_v53, %v327_v35  ;;  %v962_v6 = vld [vmem:[#allocation2 + $0x19c0] sm:$0xff] }
 0x3b7   :  { %8558 = vmatprep.subr.bf16.mxu0 %v12762_v40  ;;  %v12668_v40 = vcombine.high %v315_v53, %v327_v35  ;;  %v974_v63 = vld [vmem:[#allocation2 + $0x1a20] sm:$0xff] }
 0x3b8   :  { %8598 = vmatpush2.bf16.msra.mxu1 %v13169_v56  ;;  %v13313_v55 = vcombine.low %v962_v6, %v974_v63  ;;  %v914_v35 = vld [vmem:[#allocation2 + $0x1840] sm:$0xff] }
 0x3b9   :  { %8599 = vmatprep.subr.bf16.mxu1 %v13146_v28  ;;  %v1034_v28 = vld [vmem:[#allocation2 + $0x1c00] sm:$0xff] }
 0x3ba   :  { %8559 = vmatpush2.bf16.msra.mxu0 %v12761_v43  ;;  %v13386_v42 = vcombine.high %v1034_v28, %v1046_v37  ;;  %v13385_v49 = vcombine.low %v1034_v28, %v1046_v37  ;;  %v1274_v28 = vld [vmem:[#allocation2 + $0x2380] sm:$0xff] }
 0x3bb   :  { %8560 = vmatprep.subr.bf16.mxu0 %v12738_v21  ;;  %v1022_v21 = vld [vmem:[#allocation2 + $0x1ba0] sm:$0xff] }
 0x3bc   :  { %8600 = vmatpush2.bf16.msra.mxu1 %v13145_v10  ;;  %v1010_v10 = vld [vmem:[#allocation2 + $0x1b40] sm:$0xff] }
 0x3bd   :  { %8601 = vmatprep.subr.bf16.mxu1 %v13122_v45  ;;  %v291_v45 = vld [vmem:[#allocation2 + $0x4c8] sm:$0xff]  ;;  %v1286_v37 = vld [vmem:[#allocation2 + $0x23e0] sm:$0xff] }
 0x3be   :  { %8561 = vmatpush2.bf16.msra.mxu0 %v12737_v57  ;;  %v13362_v57 = vcombine.high %v1010_v10, %v1022_v21 }
 0x3bf   :  { %8562 = vmatprep.subr.bf16.mxu0 %v12714_v60  ;;  %v12644_v60 = vcombine.high %v291_v45, %v303_v46 }
 0x3c0   :  { %8602 = vmatpush2.bf16.msra.mxu1 %v13121_v51 }
 0x3c1   :  { %8603 = vmatprep.subr.bf16.mxu1 %v13098_v0  ;;  %v8240_v39 = vpop.f32.mrf.mxu0  ;;  %v986_v0 = vld [vmem:[#allocation2 + $0x1a80] sm:$0xff] }
 0x3c2   :  { %8563 = vmatpush2.bf16.msra.mxu0 %v12713_v4  ;;  %v13361_v4 = vcombine.low %v1010_v10, %v1022_v21  ;;  %v13337_v12 = vcombine.low %v986_v0, %v998_v13 }
 0x3c3   :  { %v8281_v34 = vpop.f32.mrf.mxu1  ;;  %v8242_v17 = vpop.f32.mrf.mxu0  ;;  %8564 = vmatprep.subr.bf16.mxu0 %v12690_v20  ;;  %v13338_v20 = vcombine.high %v986_v0, %v998_v13 }
 0x3c4   :  { %v14671_v15 = vadd.f32 %v8281_v34, %v8240_v39  ;;  %8604 = vmatpush2.bf16.msra.mxu1 %v13097_v22  ;;  %v12643_v22 = vcombine.low %v291_v45, %v303_v46  ;;  %v243_v39 = vld [vmem:[#allocation2 + $0x348] sm:$0xff]  ;;  %v12619_v34 = vcombine.low %v267_v11, %v279_v2  ;;  %v13626_v45 = vcombine.high %v1274_v28, %v1286_v37 }
 0x3c5   :  { %v8283_v38 = vpop.f32.mrf.mxu1  ;;  %8605 = vmatprep.subr.bf16.mxu1 %v13074_v5  ;;  %v8244_v24 = vpop.f32.mrf.mxu0  ;;  %v12620_v5 = vcombine.high %v267_v11, %v279_v2  ;;  %v12595_v41 = vcombine.low %v243_v39, %v255_v8  ;;  %v1226_v11 = vld [vmem:[#allocation2 + $0x2200] sm:$0xff] }
 0x3c6   :  { %v14673_v23 = vadd.f32 %v8283_v38, %v8242_v17  ;;  %8565 = vmatpush2.bf16.msra.mxu0 %v12689_v14  ;;  %v13314_v14 = vcombine.high %v962_v6, %v974_v63  ;;  %v12596_v17 = vcombine.high %v243_v39, %v255_v8  ;;  %v219_v38 = vld [vmem:[#allocation2 + $0x288] sm:$0xff]  ;;  %v1238_v2 = vld [vmem:[#allocation2 + $0x2260] sm:$0xff] }
 0x3c7   :  { %v8285_v32 = vpop.f32.mrf.mxu1  ;;  %v8245_v26 = vpop.f32.mrf.mxu0  ;;  %8616 = vmatprep.subr.bf16.mxu0 %v13434_v18  ;;  %v950_v18 = vld [vmem:[#allocation2 + $0x1960] sm:$0xff]  ;;  %v13578_v6 = vcombine.high %v1226_v11, %v1238_v2 }
 0x3c8   :  { %8606 = vmatpush2.bf16.msra.mxu1 %v13073_v47  ;;  %v938_v47 = vld [vmem:[#allocation2 + $0x1900] sm:$0xff]  ;;  %v207_v26 = vld [vmem:[#allocation2 + $0x228] sm:$0xff] }
 0x3c9   :  { %v8286_v56 = vpop.f32.mrf.mxu1  ;;  %8671 = vmatprep.subr.bf16.mxu1 %v13650_v9  ;;  %8567 = vmatmul.mubr.bf16.vlgmr.msra.gmra.mxu0 %v14470_v16  ;;  %v231_v9 = vld [vmem:[#allocation2 + $0x2e8] sm:$0xff]  ;;  %v13290_v24 = vcombine.high %v938_v47, %v950_v18  ;;  %v926_v32 = vld [vmem:[#allocation2 + $0x18a0] sm:$0xff] }
 0x3ca   :  { %8617 = vmatpush1.bf16.msra.mxu0 %v13433_v25  ;;  %8648 = vmatprep.mubr.bf16.mxu0 %v14484_v54  ;;  %v12572_v53 = vcombine.high %v219_v38, %v231_v9  ;;  %v195_v25 = vld [vmem:[#allocation2 + $0x1c8] sm:$0xff]  ;;  %v13266_v56 = vcombine.high %v914_v35, %v926_v32  ;;  %v13265_v10 = vcombine.low %v914_v35, %v926_v32  ;;  %v1202_v39 = vld [vmem:[#allocation2 + $0x2140] sm:$0xff] }
 0x3cb   :  { %8608 = vmatmul.mubr.bf16.vlgmr.msra.gmra.mxu1 %v14474_v19  ;;  %v14677_v1 = vpop.f32.mrf.mxu1  ;;  %8618 = vmatprep.subr.bf16.mxu0 %v13410_v27  ;;  %v12571_v27 = vcombine.low %v219_v38, %v231_v9  ;;  %v12547_v21 = vcombine.low %v195_v25, %v207_v26  ;;  %v1214_v8 = vld [vmem:[#allocation2 + $0x21a0] sm:$0xff] }
 0x3cc   :  { %8672 = vmatpush1.bf16.msra.mxu1 %v13649_v29  ;;  %8689 = vmatprep.mubr.bf16.mxu1 %v14371_v31  ;;  %v13289_v29 = vcombine.low %v938_v47, %v950_v18  ;;  %v13554_v47 = vcombine.high %v1202_v39, %v1214_v8  ;;  %v1178_v38 = vld [vmem:[#allocation2 + $0x2080] sm:$0xff] }
 0x3cd   :  { %v14679_v43 = vpop.f32.mrf.mxu1  ;;  %8698 = vmatprep.subr.bf16.mxu1 %v12668_v40  ;;  %v12548_v40 = vcombine.high %v195_v25, %v207_v26  ;;  %v1190_v9 = vld [vmem:[#allocation2 + $0x20e0] sm:$0xff] }
 0x3ce   :  { %8619 = vmatpush1.bf16.msra.mxu0 %v13409_v7  ;;  %v171_v7 = vld [vmem:[#allocation2 + $0x108] sm:$0xff]  ;;  %v13530_v35 = vcombine.high %v1178_v38, %v1190_v9  ;;  %v1154_v25 = vld [vmem:[#allocation2 + $0x1fc0] sm:$0xff] }
 0x3cf   :  { %v8367_v48 = vpop.f32.mrf.mxu1  ;;  %8620 = vmatprep.subr.bf16.mxu0 %v13386_v42  ;;  %v183_v42 = vld [vmem:[#allocation2 + $0x168] sm:$0xff]  ;;  %v1166_v26 = vld [vmem:[#allocation2 + $0x2020] sm:$0xff] }
 0x3d0   :  { %v12524_v46 = vcombine.high %v171_v7, %v183_v42  ;;  %v1250_v48 = vld [vmem:[#allocation2 + $0x22c0] sm:$0xff] }
 0x3d1   :  { %v8368_v51 = vpop.f32.mrf.mxu1 }
 0x3d2   :  { %8621 = vmatpush1.bf16.msra.mxu0 %v13385_v49  ;;  %v1262_v49 = vld [vmem:[#allocation2 + $0x2320] sm:$0xff]  ;;  %v13625_v51 = vcombine.low %v1274_v28, %v1286_v37  ;;  %v13506_v28 = vcombine.high %v1154_v25, %v1166_v26 }
 0x3d3   :  { %13665 = vmatmul.mubr.msk.bf16.vlgmr.msra.gmra.mxu1 %vm7218_vm0, %v14686_v3  ;;  %8622 = vmatprep.subr.bf16.mxu0 %v13362_v57  ;;  %v159_v57 = vld [vmem:[#allocation2 + $0xa8] sm:$0xff]  ;;  %v13602_v0 = vcombine.high %v1250_v48, %v1262_v49 }
 0x3d4   :  { %8699 = vmatpush1.bf16.msra.mxu1 %v12667_v50  ;;  %8730 = vmatprep.mubr.bf16.mxu1 %v14460_v58  ;;  %v147_v50 = vld [vmem:[#allocation2 + $0x48] sm:$0xff] }
 0x3d5   :  { %8700 = vmatprep.subr.bf16.mxu1 %v12644_v60  ;;  %v12523_v60 = vcombine.low %v171_v7, %v183_v42  ;;  %v12500_v13 = vcombine.high %v147_v50, %v159_v57  ;;  %v1130_v7 = vld [vmem:[#allocation2 + $0x1f00] sm:$0xff] }
 0x3d6   :  { %8623 = vmatpush1.bf16.msra.mxu0 %v13361_v4  ;;  %v507_v4 = vld [vmem:[#allocation2 + $0xb88] sm:$0xff]  ;;  %v1142_v42 = vld [vmem:[#allocation2 + $0x1f60] sm:$0xff] }
 0x3d7   :  { %8624 = vmatprep.subr.bf16.mxu0 %v13338_v20  ;;  %v13601_v20 = vcombine.low %v1250_v48, %v1262_v49  ;;  %v13482_v48 = vcombine.high %v1130_v7, %v1142_v42 }
 0x3d8   :  { %8701 = vmatpush1.bf16.msra.mxu1 %v12643_v22  ;;  %v519_v22 = vld [vmem:[#allocation2 + $0xbe8] sm:$0xff] }
 0x3d9   :  { %8702 = vmatprep.subr.bf16.mxu1 %v12620_v5  ;;  %v12499_v5 = vcombine.low %v147_v50, %v159_v57  ;;  %v12860_v63 = vcombine.high %v507_v4, %v519_v22  ;;  %v1106_v50 = vld [vmem:[#allocation2 + $0x1e40] sm:$0xff] }
 0x3da   :  { %8625 = vmatpush1.bf16.msra.mxu0 %v13337_v12  ;;  %v483_v12 = vld [vmem:[#allocation2 + $0xac8] sm:$0xff]  ;;  %v1118_v57 = vld [vmem:[#allocation2 + $0x1ea0] sm:$0xff] }
 0x3db   :  { %8626 = vmatprep.subr.bf16.mxu0 %v13314_v14  ;;  %v13577_v14 = vcombine.low %v1226_v11, %v1238_v2  ;;  %v13458_v11 = vcombine.high %v1106_v50, %v1118_v57 }
 0x3dc   :  { %8703 = vmatpush1.bf16.msra.mxu1 %v12619_v34  ;;  %v495_v34 = vld [vmem:[#allocation2 + $0xb28] sm:$0xff] }
 0x3dd   :  { %8704 = vmatprep.subr.bf16.mxu1 %v12596_v17  ;;  %v12859_v17 = vcombine.low %v507_v4, %v519_v22  ;;  %v12836_v18 = vcombine.high %v483_v12, %v495_v34  ;;  %v699_v4 = vld [vmem:[#allocation2 + $0x1188] sm:$0xff] }
 0x3de   :  { %8627 = vmatpush1.bf16.msra.mxu0 %v13313_v55  ;;  %v459_v55 = vld [vmem:[#allocation2 + $0xa08] sm:$0xff] }
 0x3df   :  { %8628 = vmatprep.subr.bf16.mxu0 %v13290_v24  ;;  %v13553_v24 = vcombine.low %v1202_v39, %v1214_v8  ;;  %v711_v22 = vld [vmem:[#allocation2 + $0x11e8] sm:$0xff]  ;;  %v13457_v39 = vcombine.low %v1106_v50, %v1118_v57 }
 0x3e0   :  { %8705 = vmatpush1.bf16.msra.mxu1 %v12595_v41  ;;  %v471_v41 = vld [vmem:[#allocation2 + $0xa68] sm:$0xff] }
 0x3e1   :  { %8706 = vmatprep.subr.bf16.mxu1 %v12572_v53  ;;  %v12835_v53 = vcombine.low %v483_v12, %v495_v34  ;;  %v12812_v32 = vcombine.high %v459_v55, %v471_v41  ;;  %v13052_v34 = vcombine.high %v699_v4, %v711_v22 }
 0x3e2   :  { %8629 = vmatpush1.bf16.msra.mxu0 %v13289_v29  ;;  %v435_v29 = vld [vmem:[#allocation2 + $0x948] sm:$0xff] }
 0x3e3   :  { %8630 = vmatprep.subr.bf16.mxu0 %v13266_v56  ;;  %v13529_v56 = vcombine.low %v1178_v38, %v1190_v9  ;;  %v687_v38 = vld [vmem:[#allocation2 + $0x1128] sm:$0xff] }
 0x3e4   :  { %8707 = vmatpush1.bf16.msra.mxu1 %v12571_v27  ;;  %v447_v27 = vld [vmem:[#allocation2 + $0x9a8] sm:$0xff] }
 0x3e5   :  { %8708 = vmatprep.subr.bf16.mxu1 %v12548_v40  ;;  %v12811_v40 = vcombine.low %v459_v55, %v471_v41  ;;  %v12788_v37 = vcombine.high %v435_v29, %v447_v27  ;;  %v339_v55 = vld [vmem:[#allocation2 + $0x648] sm:$0xff] }
 0x3e6   :  { %8631 = vmatpush1.bf16.msra.mxu0 %v13265_v10  ;;  %v411_v10 = vld [vmem:[#allocation2 + $0x888] sm:$0xff] }
 0x3e7   :  { %8632 = vmatprep.subr.bf16.mxu0 %v13626_v45  ;;  %v13505_v45 = vcombine.low %v1154_v25, %v1166_v26  ;;  %v351_v41 = vld [vmem:[#allocation2 + $0x6a8] sm:$0xff] }
 0x3e8   :  { %8709 = vmatpush1.bf16.msra.mxu1 %v12547_v21  ;;  %v423_v21 = vld [vmem:[#allocation2 + $0x8e8] sm:$0xff] }
 0x3e9   :  { %8710 = vmatprep.subr.bf16.mxu1 %v12524_v46  ;;  %v12787_v46 = vcombine.low %v435_v29, %v447_v27  ;;  %v12764_v49 = vcombine.high %v411_v10, %v423_v21  ;;  %v663_v25 = vld [vmem:[#allocation2 + $0x1068] sm:$0xff] }
 0x3ea   :  { %8633 = vmatpush2.bf16.msra.mxu0 %v13625_v51  ;;  %v387_v51 = vld [vmem:[#allocation2 + $0x7c8] sm:$0xff] }
 0x3eb   :  { %8634 = vmatprep.subr.bf16.mxu0 %v13602_v0  ;;  %v13481_v0 = vcombine.low %v1130_v7, %v1142_v42  ;;  %v1083_v26 = vld [vmem:[#allocation2 + $0x1d88] sm:$0xff] }
 0x3ec   :  { %8711 = vmatpush1.bf16.msra.mxu1 %v12523_v60  ;;  %v399_v60 = vld [vmem:[#allocation2 + $0x828] sm:$0xff] }
 0x3ed   :  { %8712 = vmatprep.subr.bf16.mxu1 %v12500_v13  ;;  %v12763_v13 = vcombine.low %v411_v10, %v423_v21  ;;  %v12740_v2 = vcombine.high %v387_v51, %v399_v60  ;;  %v12739_v12 = vcombine.low %v387_v51, %v399_v60  ;;  %v1095_v29 = vld [vmem:[#allocation2 + $0x1de8] sm:$0xff] }
 0x3ee   :  { %8635 = vmatpush2.bf16.msra.mxu0 %v13601_v20  ;;  %v627_v7 = vld [vmem:[#allocation2 + $0xf48] sm:$0xff] }
 0x3ef   :  { %8636 = vmatprep.subr.bf16.mxu0 %v13578_v6  ;;  %v375_v6 = vld [vmem:[#allocation2 + $0x768] sm:$0xff] }
 0x3f0   :  { %8713 = vmatpush1.bf16.msra.mxu1 %v12499_v5  ;;  %v363_v5 = vld [vmem:[#allocation2 + $0x708] sm:$0xff] }
 0x3f1   :  { %8714 = vmatprep.subr.bf16.mxu1 %v12860_v63  ;;  %v639_v42 = vld [vmem:[#allocation2 + $0xfa8] sm:$0xff] }
 0x3f2   :  { %8637 = vmatpush2.bf16.msra.mxu0 %v13577_v14  ;;  %v1059_v10 = vld [vmem:[#allocation2 + $0x1cc8] sm:$0xff] }
 0x3f3   :  { %8638 = vmatprep.subr.bf16.mxu0 %v13554_v47  ;;  %v12716_v47 = vcombine.high %v363_v5, %v375_v6  ;;  %v1071_v21 = vld [vmem:[#allocation2 + $0x1d28] sm:$0xff] }
 0x3f4   :  { %8715 = vmatpush2.bf16.msra.mxu1 %v12859_v17  ;;  %v13412_v57 = vcombine.high %v1059_v10, %v1071_v21  ;;  %v603_v51 = vld [vmem:[#allocation2 + $0xe88] sm:$0xff] }
 0x3f5   :  { %8716 = vmatprep.subr.bf16.mxu1 %v12836_v18  ;;  %v675_v18 = vld [vmem:[#allocation2 + $0x10c8] sm:$0xff] }
 0x3f6   :  { %8639 = vmatpush2.bf16.msra.mxu0 %v13553_v24  ;;  %v13051_v24 = vcombine.low %v699_v4, %v711_v22  ;;  %v615_v60 = vld [vmem:[#allocation2 + $0xee8] sm:$0xff] }
 0x3f7   :  { %8640 = vmatprep.subr.bf16.mxu0 %v13530_v35  ;;  %v12715_v35 = vcombine.low %v363_v5, %v375_v6  ;;  %v12956_v4 = vcombine.high %v603_v51, %v615_v60  ;;  %v591_v5 = vld [vmem:[#allocation2 + $0xe28] sm:$0xff] }
 0x3f8   :  { %8717 = vmatpush2.bf16.msra.mxu1 %v12835_v53  ;;  %v1011_v6 = vld [vmem:[#allocation2 + $0x1b48] sm:$0xff] }
 0x3f9   :  { %8718 = vmatprep.subr.bf16.mxu1 %v12812_v32  ;;  %v12692_v32 = vcombine.high %v339_v55, %v351_v41 }
 0x3fa   :  { %8641 = vmatpush2.bf16.msra.mxu0 %v13529_v56  ;;  %v12691_v56 = vcombine.low %v339_v55, %v351_v41 }
 0x3fb   :  { %8642 = vmatprep.subr.bf16.mxu0 %v13506_v28 }
 0x3fc   :  { %8719 = vmatpush2.bf16.msra.mxu1 %v12811_v40 }
 0x3fd   :  { %8720 = vmatprep.subr.bf16.mxu1 %v12788_v37  ;;  %v13436_v37 = vcombine.high %v1083_v26, %v1095_v29 }
 0x3fe   :  { %8643 = vmatpush2.bf16.msra.mxu0 %v13505_v45 }
 0x3ff   :  { %8644 = vmatprep.subr.bf16.mxu0 %v13482_v48  ;;  %v13435_v48 = vcombine.low %v1083_v26, %v1095_v29 }
 0x400   :  { %8721 = vmatpush2.bf16.msra.mxu1 %v12787_v46 }
 0x401   :  { %8722 = vmatprep.subr.bf16.mxu1 %v12764_v49  ;;  %v8322_v20 = vpop.f32.mrf.mxu0  ;;  %v12980_v49 = vcombine.high %v627_v7, %v639_v42 }
 0x402   :  { %v8323_v63 = vadd.f32 %v8322_v20, %v14671_v15  ;;  %8645 = vmatpush2.bf16.msra.mxu0 %v13481_v0  ;;  %v1035_v0 = vld [vmem:[#allocation2 + $0x1c08] sm:$0xff] }
 0x403   :  { %v8324_v8 = vpop.f32.mrf.mxu0  ;;  %8646 = vmatprep.subr.bf16.mxu0 %v13458_v11  ;;  %v12979_v11 = vcombine.low %v627_v7, %v639_v42  ;;  %v579_v20 = vld [vmem:[#allocation2 + $0xdc8] sm:$0xff] }
 0x404   :  { %8723 = vmatpush2.bf16.msra.mxu1 %v12763_v13  ;;  %v14693_v14 = vadd.f32 %v14677_v1, %v8323_v63  ;;  %v8325_v17 = vadd.f32 %v8324_v8, %v14673_v23  ;;  %v13028_v1 = vcombine.high %v675_v18, %v687_v38  ;;  %v651_v23 = vld [vmem:[#allocation2 + $0x1008] sm:$0xff] }
 0x405   :  { %8724 = vmatprep.subr.bf16.mxu1 %v12740_v2  ;;  %v8326_v9 = vpop.f32.mrf.mxu0  ;;  %v13004_v40 = vcombine.high %v651_v23, %v663_v25  ;;  %v13003_v46 = vcombine.low %v651_v23, %v663_v25  ;;  %v1047_v13 = vld [vmem:[#allocation2 + $0x1c68] sm:$0xff]  ;;  %v13411_v2 = vcombine.low %v1059_v10, %v1071_v21 }
 0x406   :  { %v14697_v15 = vadd.f32 %v14679_v43, %v8325_v17  ;;  %8647 = vmatpush2.bf16.msra.mxu0 %v13457_v39  ;;  %v13027_v43 = vcombine.low %v675_v18, %v687_v38  ;;  %v13388_v22 = vcombine.high %v1035_v0, %v1047_v13  ;;  %v1023_v63 = vld [vmem:[#allocation2 + $0x1ba8] sm:$0xff]  ;;  %v12955_v39 = vcombine.low %v603_v51, %v615_v60 }
 0x407   :  { %v8327_v53 = vpop.f32.mrf.mxu0  ;;  %8739 = vmatprep.subr.bf16.mxu0 %v13052_v34  ;;  %v13387_v8 = vcombine.low %v1035_v0, %v1047_v13  ;;  %v13364_v34 = vcombine.high %v1011_v6, %v1023_v63  ;;  %v555_v17 = vld [vmem:[#allocation2 + $0xd08] sm:$0xff]  ;;  %v12931_v9 = vcombine.low %v579_v20, %v591_v5  ;;  %v13363_v55 = vcombine.low %v1011_v6, %v1023_v63 }
 0x408   :  { %8725 = vmatpush2.bf16.msra.mxu1 %v12739_v12  ;;  %v12932_v12 = vcombine.high %v579_v20, %v591_v5  ;;  %v987_v18 = vld [vmem:[#allocation2 + $0x1a88] sm:$0xff] }
 0x409   :  { %8726 = vmatprep.subr.bf16.mxu1 %v12716_v47  ;;  %8649 = vmatmul.mubr.bf16.vlgmr.msra.gmra.mxu0 %v14499_v30  ;;  %v567_v47 = vld [vmem:[#allocation2 + $0xd68] sm:$0xff] }
 0x40a   :  { %8740 = vmatpush1.bf16.msra.mxu0 %v13051_v24  ;;  %8771 = vmatprep.mubr.bf16.mxu0 %v14464_v59  ;;  %v999_v38 = vld [vmem:[#allocation2 + $0x1ae8] sm:$0xff]  ;;  %v12908_v41 = vcombine.high %v555_v17, %v567_v47  ;;  %v12907_v23 = vcombine.low %v555_v17, %v567_v47 }
 0x40b   :  { %v14700_v27 = vpop.f32.mrf.mxu1  ;;  %8741 = vmatprep.subr.bf16.mxu0 %v13028_v1  ;;  %v13340_v24 = vcombine.high %v987_v18, %v999_v38  ;;  %v531_v53 = vld [vmem:[#allocation2 + $0xc48] sm:$0xff]  ;;  %v13339_v25 = vcombine.low %v987_v18, %v999_v38 }
 0x40c   :  { %8727 = vmatpush2.bf16.msra.mxu1 %v12715_v35  ;;  %v543_v35 = vld [vmem:[#allocation2 + $0xca8] sm:$0xff] }
 0x40d   :  { %v14703_v28 = vpop.f32.mrf.mxu1  ;;  %8728 = vmatprep.subr.bf16.mxu1 %v12692_v32  ;;  %v963_v1 = vld [vmem:[#allocation2 + $0x19c8] sm:$0xff]  ;;  %v12884_v26 = vcombine.high %v531_v53, %v543_v35  ;;  %v12883_v7 = vcombine.low %v531_v53, %v543_v35 }
 0x40e   :  { %8742 = vmatpush1.bf16.msra.mxu0 %v13027_v43  ;;  %v975_v32 = vld [vmem:[#allocation2 + $0x1a28] sm:$0xff] }
 0x40f   :  { %v8408_v45 = vpop.f32.mrf.mxu1  ;;  %8743 = vmatprep.subr.bf16.mxu0 %v13004_v40  ;;  %v13316_v29 = vcombine.high %v963_v1, %v975_v32  ;;  %v891_v43 = vld [vmem:[#allocation2 + $0x1788] sm:$0xff]  ;;  %v13315_v42 = vcombine.low %v963_v1, %v975_v32 }
 0x410   :  { %8729 = vmatpush2.bf16.msra.mxu1 %v12691_v56  ;;  %v903_v56 = vld [vmem:[#allocation2 + $0x17e8] sm:$0xff] }
 0x411   :  { %v8409_v50 = vpop.f32.mrf.mxu1  ;;  %8780 = vmatprep.subr.bf16.mxu1 %v13436_v37  ;;  %v939_v40 = vld [vmem:[#allocation2 + $0x1908] sm:$0xff]  ;;  %v13244_v10 = vcombine.high %v891_v43, %v903_v56 }
 0x412   :  { %8744 = vmatpush1.bf16.msra.mxu0 %v13003_v46  ;;  %v951_v37 = vld [vmem:[#allocation2 + $0x1968] sm:$0xff]  ;;  %v13243_v50 = vcombine.low %v891_v43, %v903_v56 }
 0x413   :  { %8731 = vmatmul.mubr.bf16.vlgmr.msra.gmra.mxu1 %v14470_v16  ;;  %8745 = vmatprep.subr.bf16.mxu0 %v12980_v49  ;;  %v13292_v21 = vcombine.high %v939_v40, %v951_v37  ;;  %v867_v45 = vld [vmem:[#allocation2 + $0x16c8] sm:$0xff] }
 0x414   :  { %8781 = vmatpush1.bf16.msra.mxu1 %v13435_v48  ;;  %8812 = vmatprep.mubr.bf16.mxu1 %v14484_v54  ;;  %v879_v46 = vld [vmem:[#allocation2 + $0x1728] sm:$0xff] }
 0x415   :  { %8782 = vmatprep.subr.bf16.mxu1 %v13412_v57  ;;  %v915_v48 = vld [vmem:[#allocation2 + $0x1848] sm:$0xff]  ;;  %v13291_v57 = vcombine.low %v939_v40, %v951_v37  ;;  %v13220_v51 = vcombine.high %v867_v45, %v879_v46 }
 0x416   :  { %8746 = vmatpush1.bf16.msra.mxu0 %v12979_v11  ;;  %v927_v49 = vld [vmem:[#allocation2 + $0x18a8] sm:$0xff] }
 0x417   :  { %8747 = vmatprep.subr.bf16.mxu0 %v12956_v4  ;;  %v13268_v60 = vcombine.high %v915_v48, %v927_v49  ;;  %v843_v0 = vld [vmem:[#allocation2 + $0x1608] sm:$0xff]  ;;  %v13219_v4 = vcombine.low %v867_v45, %v879_v46 }
 0x418   :  { %8783 = vmatpush1.bf16.msra.mxu1 %v13411_v2  ;;  %v855_v13 = vld [vmem:[#allocation2 + $0x1668] sm:$0xff] }
 0x419   :  { %8784 = vmatprep.subr.bf16.mxu1 %v13388_v22  ;;  %v1275_v11 = vld [vmem:[#allocation2 + $0x2388] sm:$0xff]  ;;  %v13267_v22 = vcombine.low %v915_v48, %v927_v49  ;;  %v13196_v20 = vcombine.high %v843_v0, %v855_v13 }
 0x41a   :  { %8748 = vmatpush1.bf16.msra.mxu0 %v12955_v39  ;;  %v1287_v2 = vld [vmem:[#allocation2 + $0x23e8] sm:$0xff] }
 0x41b   :  { %8749 = vmatprep.subr.bf16.mxu0 %v12932_v12  ;;  %v13628_v5 = vcombine.high %v1275_v11, %v1287_v2  ;;  %v819_v6 = vld [vmem:[#allocation2 + $0x1548] sm:$0xff]  ;;  %v13195_v12 = vcombine.low %v843_v0, %v855_v13 }
 0x41c   :  { %8785 = vmatpush1.bf16.msra.mxu1 %v13387_v8  ;;  %v831_v63 = vld [vmem:[#allocation2 + $0x15a8] sm:$0xff] }
 0x41d   :  { %8786 = vmatprep.subr.bf16.mxu1 %v13364_v34  ;;  %v1251_v39 = vld [vmem:[#allocation2 + $0x22c8] sm:$0xff]  ;;  %v13627_v34 = vcombine.low %v1275_v11, %v1287_v2  ;;  %v13172_v17 = vcombine.high %v819_v6, %v831_v63 }
 0x41e   :  { %8750 = vmatpush1.bf16.msra.mxu0 %v12931_v9  ;;  %v1263_v8 = vld [vmem:[#allocation2 + $0x2328] sm:$0xff] }
 0x41f   :  { %8751 = vmatprep.subr.bf16.mxu0 %v12908_v41  ;;  %v13604_v47 = vcombine.high %v1251_v39, %v1263_v8  ;;  %v795_v18 = vld [vmem:[#allocation2 + $0x1488] sm:$0xff]  ;;  %v13171_v41 = vcombine.low %v819_v6, %v831_v63 }
 0x420   :  { %8787 = vmatpush1.bf16.msra.mxu1 %v13363_v55  ;;  %v807_v38 = vld [vmem:[#allocation2 + $0x14e8] sm:$0xff] }
 0x421   :  { %8788 = vmatprep.subr.bf16.mxu1 %v13340_v24  ;;  %v1227_v9 = vld [vmem:[#allocation2 + $0x2208] sm:$0xff]  ;;  %v13603_v24 = vcombine.low %v1251_v39, %v1263_v8  ;;  %v13148_v53 = vcombine.high %v795_v18, %v807_v38 }
 0x422   :  { %8752 = vmatpush1.bf16.msra.mxu0 %v12907_v23  ;;  %v1239_v55 = vld [vmem:[#allocation2 + $0x2268] sm:$0xff] }
 0x423   :  { %8753 = vmatprep.subr.bf16.mxu0 %v12884_v26  ;;  %v13580_v35 = vcombine.high %v1227_v9, %v1239_v55  ;;  %v771_v1 = vld [vmem:[#allocation2 + $0x13c8] sm:$0xff]  ;;  %v13147_v26 = vcombine.low %v795_v18, %v807_v38 }
 0x424   :  { %8789 = vmatpush1.bf16.msra.mxu1 %v13339_v25  ;;  %v783_v32 = vld [vmem:[#allocation2 + $0x1428] sm:$0xff] }
 0x425   :  { %8790 = vmatprep.subr.bf16.mxu1 %v13316_v29  ;;  %v1203_v23 = vld [vmem:[#allocation2 + $0x2148] sm:$0xff]  ;;  %v13579_v29 = vcombine.low %v1227_v9, %v1239_v55  ;;  %v13124_v43 = vcombine.high %v771_v1, %v783_v32 }
 0x426   :  { %8754 = vmatpush1.bf16.msra.mxu0 %v12883_v7  ;;  %v1215_v25 = vld [vmem:[#allocation2 + $0x21a8] sm:$0xff] }
 0x427   :  { %8755 = vmatprep.subr.bf16.mxu0 %v13244_v10  ;;  %v13556_v56 = vcombine.high %v1203_v23, %v1215_v25  ;;  %v747_v40 = vld [vmem:[#allocation2 + $0x1308] sm:$0xff]  ;;  %v13123_v10 = vcombine.low %v771_v1, %v783_v32  ;;  %v712_v1 = vld [vmem:[#allocation2 + $0x11f0] sm:$0xff] }
 0x428   :  { %8791 = vmatpush1.bf16.msra.mxu1 %v13315_v42  ;;  %v759_v37 = vld [vmem:[#allocation2 + $0x1368] sm:$0xff] }
 0x429   :  { %8792 = vmatprep.subr.bf16.mxu1 %v13292_v21  ;;  %v1179_v7 = vld [vmem:[#allocation2 + $0x2088] sm:$0xff]  ;;  %v13555_v21 = vcombine.low %v1203_v23, %v1215_v25  ;;  %v13100_v45 = vcombine.high %v747_v40, %v759_v37 }
 0x42a   :  { %8756 = vmatpush2.bf16.msra.mxu0 %v13243_v50  ;;  %v1191_v42 = vld [vmem:[#allocation2 + $0x20e8] sm:$0xff] }
 0x42b   :  { %8757 = vmatprep.subr.bf16.mxu0 %v13220_v51  ;;  %v13532_v46 = vcombine.high %v1179_v7, %v1191_v42  ;;  %v723_v48 = vld [vmem:[#allocation2 + $0x1248] sm:$0xff]  ;;  %v13099_v51 = vcombine.low %v747_v40, %v759_v37  ;;  %v304_v40 = vld [vmem:[#allocation2 + $0x530] sm:$0xff] }
 0x42c   :  { %8793 = vmatpush1.bf16.msra.mxu1 %v13291_v57  ;;  %v735_v49 = vld [vmem:[#allocation2 + $0x12a8] sm:$0xff] }
 0x42d   :  { %8794 = vmatprep.subr.bf16.mxu1 %v13268_v60  ;;  %v1155_v50 = vld [vmem:[#allocation2 + $0x1fc8] sm:$0xff]  ;;  %v13531_v60 = vcombine.low %v1179_v7, %v1191_v42  ;;  %v13076_v0 = vcombine.high %v723_v48, %v735_v49  ;;  %v13075_v6 = vcombine.low %v723_v48, %v735_v49 }
 0x42e   :  { %8758 = vmatpush2.bf16.msra.mxu0 %v13219_v4  ;;  %v1167_v57 = vld [vmem:[#allocation2 + $0x2028] sm:$0xff] }
 0x42f   :  { %8759 = vmatprep.subr.bf16.mxu0 %v13196_v20  ;;  %v13508_v13 = vcombine.high %v1155_v50, %v1167_v57  ;;  %v1299_v11 = vld [vmem:[#allocation2 + $0x2448] sm:$0xff]  ;;  %v13507_v39 = vcombine.low %v1155_v50, %v1167_v57 }
 0x430   :  { %8795 = vmatpush1.bf16.msra.mxu1 %v13267_v22  ;;  %v1311_v2 = vld [vmem:[#allocation2 + $0x24a8] sm:$0xff] }
 0x431   :  { %8796 = vmatprep.subr.bf16.mxu1 %v13628_v5  ;;  %v1131_v22 = vld [vmem:[#allocation2 + $0x1f08] sm:$0xff]  ;;  %v13652_v8 = vcombine.high %v1299_v11, %v1311_v2  ;;  %v13651_v55 = vcombine.low %v1299_v11, %v1311_v2  ;;  %v652_v11 = vld [vmem:[#allocation2 + $0x1010] sm:$0xff] }
 0x432   :  { %8760 = vmatpush2.bf16.msra.mxu0 %v13195_v12  ;;  %v1143_v20 = vld [vmem:[#allocation2 + $0x1f68] sm:$0xff]  ;;  %v664_v2 = vld [vmem:[#allocation2 + $0x1070] sm:$0xff] }
 0x433   :  { %8761 = vmatprep.subr.bf16.mxu0 %v13172_v17  ;;  %v316_v17 = vld [vmem:[#allocation2 + $0x590] sm:$0xff]  ;;  %v1107_v38 = vld [vmem:[#allocation2 + $0x1e48] sm:$0xff] }
 0x434   :  { %8797 = vmatpush2.bf16.msra.mxu1 %v13627_v34  ;;  %v13484_v34 = vcombine.high %v1131_v22, %v1143_v20  ;;  %v1119_v9 = vld [vmem:[#allocation2 + $0x1ea8] sm:$0xff] }
 0x435   :  { %8798 = vmatprep.subr.bf16.mxu1 %v13604_v47  ;;  %v328_v47 = vld [vmem:[#allocation2 + $0x5f0] sm:$0xff] }
 0x436   :  { %8762 = vmatpush2.bf16.msra.mxu0 %v13171_v41  ;;  %v13483_v41 = vcombine.low %v1131_v22, %v1143_v20 }
 0x437   :  { %8763 = vmatprep.subr.bf16.mxu0 %v13148_v53  ;;  %v13460_v53 = vcombine.high %v1107_v38, %v1119_v9 }
 0x438   :  { %8799 = vmatpush2.bf16.msra.mxu1 %v13603_v24  ;;  %v12670_v24 = vcombine.high %v316_v17, %v328_v47 }
 0x439   :  { %8800 = vmatprep.subr.bf16.mxu1 %v13580_v35 }
 0x43a   :  { %8764 = vmatpush2.bf16.msra.mxu0 %v13147_v26  ;;  %v13459_v26 = vcombine.low %v1107_v38, %v1119_v9  ;;  %v604_v38 = vld [vmem:[#allocation2 + $0xe90] sm:$0xff] }
 0x43b   :  { %8765 = vmatprep.subr.bf16.mxu0 %v13124_v43  ;;  %v616_v9 = vld [vmem:[#allocation2 + $0xef0] sm:$0xff] }
 0x43c   :  { %8801 = vmatpush2.bf16.msra.mxu1 %v13579_v29 }
 0x43d   :  { %8802 = vmatprep.subr.bf16.mxu1 %v13556_v56  ;;  %v292_v56 = vld [vmem:[#allocation2 + $0x4d0] sm:$0xff] }
 0x43e   :  { %8766 = vmatpush2.bf16.msra.mxu0 %v13123_v10  ;;  %v676_v10 = vld [vmem:[#allocation2 + $0x10d0] sm:$0xff]  ;;  %v12646_v57 = vcombine.high %v292_v56, %v304_v40 }
 0x43f   :  { %8767 = vmatprep.subr.bf16.mxu0 %v13100_v45 }
 0x440   :  { %8803 = vmatpush2.bf16.msra.mxu1 %v13555_v21  ;;  %v688_v21 = vld [vmem:[#allocation2 + $0x1130] sm:$0xff] }
 0x441   :  { %8804 = vmatprep.subr.bf16.mxu1 %v13532_v46  ;;  %v8445_v4 = vpop.f32.mrf.mxu0  ;;  %v12669_v46 = vcombine.low %v316_v17, %v328_v47  ;;  %v13029_v22 = vcombine.low %v676_v10, %v688_v21  ;;  %v220_v47 = vld [vmem:[#allocation2 + $0x290] sm:$0xff] }
 0x442   :  { %v8446_v5 = vadd.f32 %v8445_v4, %v14700_v27  ;;  %8768 = vmatpush2.bf16.msra.mxu0 %v13099_v51  ;;  %v12645_v4 = vcombine.low %v292_v56, %v304_v40  ;;  %v556_v56 = vld [vmem:[#allocation2 + $0xd10] sm:$0xff] }
 0x443   :  { %v8447_v63 = vpop.f32.mrf.mxu0  ;;  %8769 = vmatprep.subr.bf16.mxu0 %v13076_v0  ;;  %v268_v0 = vld [vmem:[#allocation2 + $0x410] sm:$0xff] }
 0x444   :  { %8805 = vmatpush2.bf16.msra.mxu1 %v13531_v60  ;;  %v8448_v12 = vadd.f32 %v8447_v63, %v14703_v28  ;;  %v700_v28 = vld [vmem:[#allocation2 + $0x1190] sm:$0xff]  ;;  %v13030_v60 = vcombine.high %v676_v10, %v688_v21 }
 0x445   :  { %8806 = vmatprep.subr.bf16.mxu1 %v13508_v13  ;;  %v8449_v18 = vpop.f32.mrf.mxu0  ;;  %v13054_v43 = vcombine.high %v700_v28, %v712_v1  ;;  %v13053_v50 = vcombine.low %v700_v28, %v712_v1  ;;  %v280_v13 = vld [vmem:[#allocation2 + $0x470] sm:$0xff] }
 0x446   :  { %8770 = vmatpush2.bf16.msra.mxu0 %v13075_v6  ;;  %v12622_v20 = vcombine.high %v268_v0, %v280_v13  ;;  %v244_v6 = vld [vmem:[#allocation2 + $0x350] sm:$0xff] }
 0x447   :  { %v8450_v27 = vpop.f32.mrf.mxu0  ;;  %8835 = vmatprep.subr.bf16.mxu0 %v13652_v8  ;;  %v256_v63 = vld [vmem:[#allocation2 + $0x3b0] sm:$0xff] }
 0x448   :  { %8807 = vmatpush2.bf16.msra.mxu1 %v13507_v39  ;;  %v628_v39 = vld [vmem:[#allocation2 + $0xf50] sm:$0xff] }
 0x449   :  { %8808 = vmatprep.subr.bf16.mxu1 %v13484_v34  ;;  %8772 = vmatmul.mubr.bf16.vlgmr.msra.gmra.mxu0 %v14474_v19  ;;  %v8527_v35 = vpop.f32.mrf.mxu0  ;;  %v640_v8 = vld [vmem:[#allocation2 + $0xfb0] sm:$0xff]  ;;  %v12598_v34 = vcombine.high %v244_v6, %v256_v63 }
 0x44a   :  { %8836 = vmatpush1.bf16.msra.mxu0 %v13651_v55  ;;  %8853 = vmatprep.mubr.bf16.mxu0 %v14371_v31  ;;  %v12982_v17 = vcombine.high %v628_v39, %v640_v8  ;;  %v232_v18 = vld [vmem:[#allocation2 + $0x2f0] sm:$0xff]  ;;  %v12597_v55 = vcombine.low %v244_v6, %v256_v63  ;;  %v12981_v27 = vcombine.low %v628_v39, %v640_v8 }
 0x44b   :  { %v8486_v32 = vpop.f32.mrf.mxu1  ;;  %v8529_v25 = vpop.f32.mrf.mxu0  ;;  %8862 = vmatprep.subr.bf16.mxu0 %v12670_v24  ;;  %v12958_v24 = vcombine.high %v604_v38, %v616_v9  ;;  %v580_v28 = vld [vmem:[#allocation2 + $0xdd0] sm:$0xff] }
 0x44c   :  { %v8487_v23 = vadd.f32 %v8486_v32, %v8446_v5  ;;  %8809 = vmatpush2.bf16.msra.mxu1 %v13483_v41  ;;  %v13006_v5 = vcombine.high %v652_v11, %v664_v2  ;;  %v12574_v41 = vcombine.high %v220_v47, %v232_v18  ;;  %v592_v1 = vld [vmem:[#allocation2 + $0xe30] sm:$0xff]  ;;  %v12573_v32 = vcombine.low %v220_v47, %v232_v18 }
 0x44d   :  { %v8488_v29 = vpop.f32.mrf.mxu1  ;;  %8810 = vmatprep.subr.bf16.mxu1 %v13460_v53  ;;  %v8531_v42 = vpop.f32.mrf.mxu0  ;;  %v196_v53 = vld [vmem:[#allocation2 + $0x1d0] sm:$0xff] }
 0x44e   :  { %v14711_v37 = vadd.f32 %v8527_v35, %v8487_v23  ;;  %v8489_v7 = vadd.f32 %v8488_v29, %v8448_v12  ;;  %v13005_v12 = vcombine.low %v652_v11, %v664_v2  ;;  %v208_v35 = vld [vmem:[#allocation2 + $0x230] sm:$0xff]  ;;  %v12957_v23 = vcombine.low %v604_v38, %v616_v9 }
 0x44f   :  { %v8490_v45 = vpop.f32.mrf.mxu1  ;;  %v8532_v49 = vpop.f32.mrf.mxu0  ;;  %v172_v29 = vld [vmem:[#allocation2 + $0x110] sm:$0xff]  ;;  %v12933_v42 = vcombine.low %v580_v28, %v592_v1 }
 0x450   :  { %v14713_v48 = vadd.f32 %v8529_v25, %v8489_v7  ;;  %8811 = vmatpush2.bf16.msra.mxu1 %v13459_v26  ;;  %v12550_v25 = vcombine.high %v196_v53, %v208_v35  ;;  %v12934_v26 = vcombine.high %v580_v28, %v592_v1  ;;  %v568_v40 = vld [vmem:[#allocation2 + $0xd70] sm:$0xff]  ;;  %v12549_v7 = vcombine.low %v196_v53, %v208_v35 }
 0x451   :  { %v8491_v51 = vpop.f32.mrf.mxu1  ;;  %8903 = vmatprep.subr.bf16.mxu1 %v13054_v43  ;;  %13666 = vmatmul.mubr.msk.bf16.vlgmr.msra.gmra.mxu0 %vm7218_vm0, %v14686_v3  ;;  %v12621_v3 = vcombine.low %v268_v0, %v280_v13  ;;  %v184_v43 = vld [vmem:[#allocation2 + $0x170] sm:$0xff]  ;;  %v12910_v21 = vcombine.high %v556_v56, %v568_v40 }
 0x452   :  { %8863 = vmatpush1.bf16.msra.mxu0 %v12669_v46  ;;  %8894 = vmatprep.mubr.bf16.mxu0 %v14460_v58  ;;  %v12526_v10 = vcombine.high %v172_v29, %v184_v43  ;;  %v148_v45 = vld [vmem:[#allocation2 + $0x50] sm:$0xff]  ;;  %v12909_v51 = vcombine.low %v556_v56, %v568_v40 }
 0x453   :  { %8813 = vmatmul.mubr.bf16.vlgmr.msra.gmra.mxu1 %v14499_v30  ;;  %8864 = vmatprep.subr.bf16.mxu0 %v12646_v57  ;;  %v160_v46 = vld [vmem:[#allocation2 + $0xb0] sm:$0xff]  ;;  %v12525_v57 = vcombine.low %v172_v29, %v184_v43 }
 0x454   :  { %8904 = vmatpush1.bf16.msra.mxu1 %v13053_v50  ;;  %8935 = vmatprep.mubr.bf16.mxu1 %v14464_v59  ;;  %v532_v49 = vld [vmem:[#allocation2 + $0xc50] sm:$0xff] }
 0x455   :  { %8905 = vmatprep.subr.bf16.mxu1 %v13030_v60  ;;  %v544_v50 = vld [vmem:[#allocation2 + $0xcb0] sm:$0xff]  ;;  %v12502_v60 = vcombine.high %v148_v45, %v160_v46 }
 0x456   :  { %8865 = vmatpush1.bf16.msra.mxu0 %v12645_v4  ;;  %v12886_v0 = vcombine.high %v532_v49, %v544_v50  ;;  %v508_v13 = vld [vmem:[#allocation2 + $0xb90] sm:$0xff] }
 0x457   :  { %8866 = vmatprep.subr.bf16.mxu0 %v12622_v20  ;;  %v520_v11 = vld [vmem:[#allocation2 + $0xbf0] sm:$0xff]  ;;  %v12885_v20 = vcombine.low %v532_v49, %v544_v50 }
 0x458   :  { %8906 = vmatpush1.bf16.msra.mxu1 %v13029_v22  ;;  %v892_v2 = vld [vmem:[#allocation2 + $0x1790] sm:$0xff]  ;;  %v12501_v22 = vcombine.low %v148_v45, %v160_v46 }
 0x459   :  { %8907 = vmatprep.subr.bf16.mxu1 %v13006_v5  ;;  %v904_v4 = vld [vmem:[#allocation2 + $0x17f0] sm:$0xff]  ;;  %v12862_v5 = vcombine.high %v508_v13, %v520_v11 }
 0x45a   :  { %8867 = vmatpush1.bf16.msra.mxu0 %v12621_v3  ;;  %v13246_v6 = vcombine.high %v892_v2, %v904_v4  ;;  %v484_v63 = vld [vmem:[#allocation2 + $0xad0] sm:$0xff] }
 0x45b   :  { %8868 = vmatprep.subr.bf16.mxu0 %v12598_v34  ;;  %v496_v39 = vld [vmem:[#allocation2 + $0xb30] sm:$0xff]  ;;  %v13245_v34 = vcombine.low %v892_v2, %v904_v4 }
 0x45c   :  { %8908 = vmatpush1.bf16.msra.mxu1 %v13005_v12  ;;  %v868_v8 = vld [vmem:[#allocation2 + $0x16d0] sm:$0xff]  ;;  %v12861_v12 = vcombine.low %v508_v13, %v520_v11 }
 0x45d   :  { %8909 = vmatprep.subr.bf16.mxu1 %v12982_v17  ;;  %v880_v3 = vld [vmem:[#allocation2 + $0x1730] sm:$0xff]  ;;  %v12838_v17 = vcombine.high %v484_v63, %v496_v39 }
 0x45e   :  { %8869 = vmatpush1.bf16.msra.mxu0 %v12597_v55  ;;  %v13222_v47 = vcombine.high %v868_v8, %v880_v3  ;;  %v460_v18 = vld [vmem:[#allocation2 + $0xa10] sm:$0xff] }
 0x45f   :  { %8870 = vmatprep.subr.bf16.mxu0 %v12574_v41  ;;  %v472_v38 = vld [vmem:[#allocation2 + $0xa70] sm:$0xff]  ;;  %v13221_v41 = vcombine.low %v868_v8, %v880_v3 }
 0x460   :  { %8910 = vmatpush1.bf16.msra.mxu1 %v12981_v27  ;;  %v844_v9 = vld [vmem:[#allocation2 + $0x1610] sm:$0xff]  ;;  %v12837_v27 = vcombine.low %v484_v63, %v496_v39 }
 0x461   :  { %8911 = vmatprep.subr.bf16.mxu1 %v12958_v24  ;;  %v856_v55 = vld [vmem:[#allocation2 + $0x1670] sm:$0xff]  ;;  %v12814_v24 = vcombine.high %v460_v18, %v472_v38 }
 0x462   :  { %8871 = vmatpush1.bf16.msra.mxu0 %v12573_v32  ;;  %v13198_v53 = vcombine.high %v844_v9, %v856_v55  ;;  %v436_v35 = vld [vmem:[#allocation2 + $0x950] sm:$0xff] }
 0x463   :  { %8872 = vmatprep.subr.bf16.mxu0 %v12550_v25  ;;  %v448_v28 = vld [vmem:[#allocation2 + $0x9b0] sm:$0xff]  ;;  %v13197_v25 = vcombine.low %v844_v9, %v856_v55 }
 0x464   :  { %8912 = vmatpush1.bf16.msra.mxu1 %v12957_v23  ;;  %v820_v1 = vld [vmem:[#allocation2 + $0x1550] sm:$0xff]  ;;  %v12813_v23 = vcombine.low %v460_v18, %v472_v38 }
 0x465   :  { %8913 = vmatprep.subr.bf16.mxu1 %v12934_v26  ;;  %v832_v32 = vld [vmem:[#allocation2 + $0x15b0] sm:$0xff]  ;;  %v12790_v26 = vcombine.high %v436_v35, %v448_v28 }
 0x466   :  { %8873 = vmatpush1.bf16.msra.mxu0 %v12549_v7  ;;  %v13174_v29 = vcombine.high %v820_v1, %v832_v32  ;;  %v412_v43 = vld [vmem:[#allocation2 + $0x890] sm:$0xff] }
 0x467   :  { %8874 = vmatprep.subr.bf16.mxu0 %v12526_v10  ;;  %v424_v56 = vld [vmem:[#allocation2 + $0x8f0] sm:$0xff]  ;;  %v13173_v10 = vcombine.low %v820_v1, %v832_v32 }
 0x468   :  { %8914 = vmatpush1.bf16.msra.mxu1 %v12933_v42  ;;  %v796_v40 = vld [vmem:[#allocation2 + $0x1490] sm:$0xff]  ;;  %v12789_v42 = vcombine.low %v436_v35, %v448_v28 }
 0x469   :  { %8915 = vmatprep.subr.bf16.mxu1 %v12910_v21  ;;  %v808_v7 = vld [vmem:[#allocation2 + $0x14f0] sm:$0xff]  ;;  %v12766_v21 = vcombine.high %v412_v43, %v424_v56 }
 0x46a   :  { %8875 = vmatpush1.bf16.msra.mxu0 %v12525_v57  ;;  %v13150_v45 = vcombine.high %v796_v40, %v808_v7  ;;  %v388_v46 = vld [vmem:[#allocation2 + $0x7d0] sm:$0xff] }
 0x46b   :  { %8876 = vmatprep.subr.bf16.mxu0 %v12502_v60  ;;  %v400_v49 = vld [vmem:[#allocation2 + $0x830] sm:$0xff]  ;;  %v13149_v60 = vcombine.low %v796_v40, %v808_v7  ;;  %v317_v40 = vld [vmem:[#allocation2 + $0x598] sm:$0xff] }
 0x46c   :  { %8916 = vmatpush1.bf16.msra.mxu1 %v12909_v51  ;;  %v772_v50 = vld [vmem:[#allocation2 + $0x13d0] sm:$0xff]  ;;  %v12765_v51 = vcombine.low %v412_v43, %v424_v56  ;;  %v329_v7 = vld [vmem:[#allocation2 + $0x5f8] sm:$0xff] }
 0x46d   :  { %8917 = vmatprep.subr.bf16.mxu1 %v12886_v0  ;;  %v784_v57 = vld [vmem:[#allocation2 + $0x1430] sm:$0xff]  ;;  %v12742_v0 = vcombine.high %v388_v46, %v400_v49 }
 0x46e   :  { %8877 = vmatpush1.bf16.msra.mxu0 %v12501_v22  ;;  %v13126_v13 = vcombine.high %v772_v50, %v784_v57  ;;  %v364_v11 = vld [vmem:[#allocation2 + $0x710] sm:$0xff] }
 0x46f   :  { %8878 = vmatprep.subr.bf16.mxu0 %v12862_v5  ;;  %v376_v2 = vld [vmem:[#allocation2 + $0x770] sm:$0xff]  ;;  %v13125_v5 = vcombine.low %v772_v50, %v784_v57  ;;  %v12672_v50 = vcombine.high %v317_v40, %v329_v7 }
 0x470   :  { %8918 = vmatpush1.bf16.msra.mxu1 %v12885_v20  ;;  %v748_v4 = vld [vmem:[#allocation2 + $0x1310] sm:$0xff]  ;;  %v12741_v20 = vcombine.low %v388_v46, %v400_v49 }
 0x471   :  { %8919 = vmatprep.subr.bf16.mxu1 %v13246_v6  ;;  %v760_v22 = vld [vmem:[#allocation2 + $0x1370] sm:$0xff]  ;;  %v12718_v6 = vcombine.high %v364_v11, %v376_v2 }
 0x472   :  { %8879 = vmatpush2.bf16.msra.mxu0 %v12861_v12  ;;  %v13102_v63 = vcombine.high %v748_v4, %v760_v22  ;;  %v340_v39 = vld [vmem:[#allocation2 + $0x650] sm:$0xff] }
 0x473   :  { %8880 = vmatprep.subr.bf16.mxu0 %v12838_v17  ;;  %v352_v8 = vld [vmem:[#allocation2 + $0x6b0] sm:$0xff]  ;;  %v13101_v17 = vcombine.low %v748_v4, %v760_v22  ;;  %v293_v22 = vld [vmem:[#allocation2 + $0x4d8] sm:$0xff] }
 0x474   :  { %8920 = vmatpush2.bf16.msra.mxu1 %v13245_v34  ;;  %v724_v3 = vld [vmem:[#allocation2 + $0x1250] sm:$0xff]  ;;  %v12717_v34 = vcombine.low %v364_v11, %v376_v2 }
 0x475   :  { %8921 = vmatprep.subr.bf16.mxu1 %v13222_v47  ;;  %v736_v12 = vld [vmem:[#allocation2 + $0x12b0] sm:$0xff]  ;;  %v12694_v47 = vcombine.high %v340_v39, %v352_v8 }
 0x476   :  { %8881 = vmatpush2.bf16.msra.mxu0 %v12837_v27  ;;  %v13078_v18 = vcombine.high %v724_v3, %v736_v12  ;;  %v1084_v38 = vld [vmem:[#allocation2 + $0x1d90] sm:$0xff]  ;;  %v13077_v1 = vcombine.low %v724_v3, %v736_v12 }
 0x477   :  { %8882 = vmatprep.subr.bf16.mxu0 %v12814_v24  ;;  %v1096_v9 = vld [vmem:[#allocation2 + $0x1df0] sm:$0xff] }
 0x478   :  { %8922 = vmatpush2.bf16.msra.mxu1 %v13221_v41  ;;  %v1300_v27 = vld [vmem:[#allocation2 + $0x2450] sm:$0xff]  ;;  %v13438_v32 = vcombine.high %v1084_v38, %v1096_v9 }
 0x479   :  { %8923 = vmatprep.subr.bf16.mxu1 %v13198_v53  ;;  %v1312_v41 = vld [vmem:[#allocation2 + $0x24b0] sm:$0xff]  ;;  %v12693_v53 = vcombine.low %v340_v39, %v352_v8 }
 0x47a   :  { %8883 = vmatpush2.bf16.msra.mxu0 %v12813_v23  ;;  %v1036_v57 = vld [vmem:[#allocation2 + $0x1c10] sm:$0xff] }
 0x47b   :  { %8884 = vmatprep.subr.bf16.mxu0 %v12790_v26  ;;  %v1060_v26 = vld [vmem:[#allocation2 + $0x1cd0] sm:$0xff] }
 0x47c   :  { %8924 = vmatpush2.bf16.msra.mxu1 %v13197_v25  ;;  %v13654_v25 = vcombine.high %v1300_v27, %v1312_v41  ;;  %v1012_v2 = vld [vmem:[#allocation2 + $0x1b50] sm:$0xff] }
 0x47d   :  { %8925 = vmatprep.subr.bf16.mxu1 %v13174_v29  ;;  %v1072_v29 = vld [vmem:[#allocation2 + $0x1d30] sm:$0xff] }
 0x47e   :  { %8885 = vmatpush2.bf16.msra.mxu0 %v12789_v42  ;;  %v13414_v46 = vcombine.high %v1060_v26, %v1072_v29  ;;  %v1024_v4 = vld [vmem:[#allocation2 + $0x1bb0] sm:$0xff] }
 0x47f   :  { %8886 = vmatprep.subr.bf16.mxu0 %v12766_v21  ;;  %v13366_v39 = vcombine.high %v1012_v2, %v1024_v4  ;;  %v988_v12 = vld [vmem:[#allocation2 + $0x1a90] sm:$0xff] }
 0x480   :  { %8926 = vmatpush2.bf16.msra.mxu1 %v13173_v10  ;;  %v13437_v10 = vcombine.low %v1084_v38, %v1096_v9  ;;  %v13365_v38 = vcombine.low %v1012_v2, %v1024_v4  ;;  %v1288_v2 = vld [vmem:[#allocation2 + $0x23f0] sm:$0xff]  ;;  %v173_v4 = vld [vmem:[#allocation2 + $0x118] sm:$0xff] }
 0x481   :  { %8927 = vmatprep.subr.bf16.mxu1 %v13150_v45  ;;  %v13653_v45 = vcombine.low %v1300_v27, %v1312_v41  ;;  %v964_v41 = vld [vmem:[#allocation2 + $0x19d0] sm:$0xff] }
 0x482   :  { %8887 = vmatpush2.bf16.msra.mxu0 %v12765_v51  ;;  %v1048_v51 = vld [vmem:[#allocation2 + $0x1c70] sm:$0xff] }
 0x483   :  { %8888 = vmatprep.subr.bf16.mxu0 %v12742_v0  ;;  %v13413_v0 = vcombine.low %v1060_v26, %v1072_v29  ;;  %v940_v26 = vld [vmem:[#allocation2 + $0x1910] sm:$0xff] }
 0x484   :  { %8928 = vmatpush2.bf16.msra.mxu1 %v13149_v60  ;;  %v952_v29 = vld [vmem:[#allocation2 + $0x1970] sm:$0xff] }
 0x485   :  { %8929 = vmatprep.subr.bf16.mxu1 %v13126_v13  ;;  %v13390_v13 = vcombine.high %v1036_v57, %v1048_v51 }
 0x486   :  { %8889 = vmatpush2.bf16.msra.mxu0 %v12741_v20  ;;  %v305_v20 = vld [vmem:[#allocation2 + $0x538] sm:$0xff] }
 0x487   :  { %8890 = vmatprep.subr.bf16.mxu0 %v12718_v6  ;;  %v13389_v6 = vcombine.low %v1036_v57, %v1048_v51  ;;  %v12648_v3 = vcombine.high %v293_v22, %v305_v20  ;;  %v12647_v9 = vcombine.low %v293_v22, %v305_v20  ;;  %v185_v22 = vld [vmem:[#allocation2 + $0x178] sm:$0xff] }
 0x488   :  { %8930 = vmatpush2.bf16.msra.mxu1 %v13125_v5 }
 0x489   :  { %8931 = vmatprep.subr.bf16.mxu1 %v13102_v63  ;;  %v8568_v55 = vpop.f32.mrf.mxu0  ;;  %v12671_v63 = vcombine.low %v317_v40, %v329_v7  ;;  %v233_v40 = vld [vmem:[#allocation2 + $0x2f8] sm:$0xff] }
 0x48a   :  { %8891 = vmatpush2.bf16.msra.mxu0 %v12717_v34  ;;  %v1000_v34 = vld [vmem:[#allocation2 + $0x1af0] sm:$0xff] }
 0x48b   :  { %v8609_v24 = vpop.f32.mrf.mxu1  ;;  %v8570_v28 = vpop.f32.mrf.mxu0  ;;  %8892 = vmatprep.subr.bf16.mxu0 %v12694_v47  ;;  %v281_v47 = vld [vmem:[#allocation2 + $0x478] sm:$0xff] }
 0x48c   :  { %v14720_v35 = vadd.f32 %v8609_v24, %v8568_v55  ;;  %8932 = vmatpush2.bf16.msra.mxu1 %v13101_v17  ;;  %v269_v17 = vld [vmem:[#allocation2 + $0x418] sm:$0xff]  ;;  %v13342_v55 = vcombine.high %v988_v12, %v1000_v34  ;;  %v976_v24 = vld [vmem:[#allocation2 + $0x1a30] sm:$0xff] }
 0x48d   :  { %v8611_v23 = vpop.f32.mrf.mxu1  ;;  %8933 = vmatprep.subr.bf16.mxu1 %v13078_v18  ;;  %v8572_v56 = vpop.f32.mrf.mxu0  ;;  %v14735_v18 = vld [vmem:[%s14958_s0 + $0x18] ss:$0 sps:$4 sm:$0xff]   ;;  %v12624_v27 = vcombine.high %v269_v17, %v281_v47  ;;  %v13317_v7 = vcombine.low %v964_v41, %v976_v24 }
 0x48e   :  { %v14722_v43 = vadd.f32 %v8611_v23, %v8570_v28  ;;  %8893 = vmatpush2.bf16.msra.mxu0 %v12693_v53  ;;  %v245_v53 = vld [vmem:[#allocation2 + $0x358] sm:$0xff]  ;;  %v13318_v23 = vcombine.high %v964_v41, %v976_v24 }
 0x48f   :  { %v8613_v42 = vpop.f32.mrf.mxu1  ;;  %v8573_v21 = vpop.f32.mrf.mxu0  ;;  %8944 = vmatprep.subr.bf16.mxu0 %v13438_v32  ;;  %v257_v28 = vld [vmem:[#allocation2 + $0x3b8] sm:$0xff]  ;;  %v12623_v32 = vcombine.low %v269_v17, %v281_v47  ;;  %v12527_v17 = vcombine.low %v173_v4, %v185_v22 }
 0x490   :  { %8934 = vmatpush2.bf16.msra.mxu1 %v13077_v1  ;;  %v13341_v1 = vcombine.low %v988_v12, %v1000_v34  ;;  %v221_v56 = vld [vmem:[#allocation2 + $0x298] sm:$0xff]  ;;  %v12599_v42 = vcombine.low %v245_v53, %v257_v28  ;;  %v916_v21 = vld [vmem:[#allocation2 + $0x1850] sm:$0xff] }
 0x491   :  { %v8614_v49 = vpop.f32.mrf.mxu1  ;;  %8999 = vmatprep.subr.bf16.mxu1 %v13654_v25  ;;  %8895 = vmatmul.mubr.bf16.vlgmr.msra.gmra.mxu0 %v14470_v16  ;;  %v12600_v25 = vcombine.high %v245_v53, %v257_v28  ;;  %v12575_v57 = vcombine.low %v221_v56, %v233_v40  ;;  %v161_v12 = vld [vmem:[#allocation2 + $0xb8] sm:$0xff] }
 0x492   :  { %8945 = vmatpush1.bf16.msra.mxu0 %v13437_v10  ;;  %8976 = vmatprep.mubr.bf16.mxu0 %v14484_v54  ;;  %v12576_v10 = vcombine.high %v221_v56, %v233_v40  ;;  %v209_v49 = vld [vmem:[#allocation2 + $0x238] sm:$0xff] }
 0x493   :  { %8936 = vmatmul.mubr.bf16.vlgmr.msra.gmra.mxu1 %v14474_v19  ;;  %v14726_v60 = vpop.f32.mrf.mxu1  ;;  %8946 = vmatprep.subr.bf16.mxu0 %v13414_v46  ;;  %v197_v46 = vld [vmem:[#allocation2 + $0x1d8] sm:$0xff] }
 0x494   :  { %9000 = vmatpush1.bf16.msra.mxu1 %v13653_v45  ;;  %9017 = vmatprep.mubr.bf16.mxu1 %v14371_v31  ;;  %v928_v45 = vld [vmem:[#allocation2 + $0x18b0] sm:$0xff]  ;;  %v521_v41 = vld [vmem:[#allocation2 + $0xbf8] sm:$0xff] }
 0x495   :  { %v14728_v11 = vpop.f32.mrf.mxu1  ;;  %9026 = vmatprep.subr.bf16.mxu1 %v12672_v50  ;;  %v13293_v50 = vcombine.low %v940_v26, %v952_v29  ;;  %v13270_v51 = vcombine.high %v916_v21, %v928_v45  ;;  %v13269_v20 = vcombine.low %v916_v21, %v928_v45  ;;  %v473_v21 = vld [vmem:[#allocation2 + $0xa78] sm:$0xff] }
 0x496   :  { %8947 = vmatpush1.bf16.msra.mxu0 %v13413_v0  ;;  %v12552_v0 = vcombine.high %v197_v46, %v209_v49 }
 0x497   :  { %v8695_v5 = vpop.f32.mrf.mxu1  ;;  %8948 = vmatprep.subr.bf16.mxu0 %v13390_v13  ;;  %v1276_v13 = vld [vmem:[#allocation2 + $0x2390] sm:$0xff] }
 0x498   :  { %v12551_v5 = vcombine.low %v197_v46, %v209_v49  ;;  %v13629_v34 = vcombine.low %v1276_v13, %v1288_v2 }
 0x499   :  { %v8696_v8 = vpop.f32.mrf.mxu1 }
 0x49a   :  { %8949 = vmatpush1.bf16.msra.mxu0 %v13389_v6  ;;  %v13630_v6 = vcombine.high %v1276_v13, %v1288_v2  ;;  %v1264_v8 = vld [vmem:[#allocation2 + $0x2330] sm:$0xff]  ;;  %v449_v13 = vld [vmem:[#allocation2 + $0x9b8] sm:$0xff] }
 0x49b   :  { %13667 = vmatmul.mubr.msk.bf16.vlgmr.msra.gmra.mxu1 %vm7218_vm0, %v14735_v18  ;;  %8950 = vmatprep.subr.bf16.mxu0 %v13366_v39  ;;  %v1252_v39 = vld [vmem:[#allocation2 + $0x22d0] sm:$0xff] }
 0x49c   :  { %9027 = vmatpush1.bf16.msra.mxu1 %v12671_v63  ;;  %9058 = vmatprep.mubr.bf16.mxu1 %v14460_v58  ;;  %v13294_v58 = vcombine.high %v940_v26, %v952_v29  ;;  %v12528_v63 = vcombine.high %v173_v4, %v185_v22  ;;  %v13606_v47 = vcombine.high %v1252_v39, %v1264_v8  ;;  %v497_v26 = vld [vmem:[#allocation2 + $0xb38] sm:$0xff] }
 0x49d   :  { %9028 = vmatprep.subr.bf16.mxu1 %v12648_v3  ;;  %v149_v3 = vld [vmem:[#allocation2 + $0x58] sm:$0xff]  ;;  %v13605_v24 = vcombine.low %v1252_v39, %v1264_v8 }
 0x49e   :  { %8951 = vmatpush1.bf16.msra.mxu0 %v13365_v38  ;;  %v12504_v38 = vcombine.high %v149_v3, %v161_v12  ;;  %v12503_v53 = vcombine.low %v149_v3, %v161_v12  ;;  %v425_v39 = vld [vmem:[#allocation2 + $0x8f8] sm:$0xff] }
 0x49f   :  { %8952 = vmatprep.subr.bf16.mxu0 %v13342_v55  ;;  %v1240_v55 = vld [vmem:[#allocation2 + $0x2270] sm:$0xff] }
 0x4a0   :  { %9029 = vmatpush1.bf16.msra.mxu1 %v12647_v9  ;;  %v1228_v9 = vld [vmem:[#allocation2 + $0x2210] sm:$0xff] }
 0x4a1   :  { %9030 = vmatprep.subr.bf16.mxu1 %v12624_v27  ;;  %v509_v27 = vld [vmem:[#allocation2 + $0xb98] sm:$0xff]  ;;  %v13582_v28 = vcombine.high %v1228_v9, %v1240_v55  ;;  %v13581_v29 = vcombine.low %v1228_v9, %v1240_v55 }
 0x4a2   :  { %8953 = vmatpush1.bf16.msra.mxu0 %v13341_v1  ;;  %v12864_v1 = vcombine.high %v509_v27, %v521_v41  ;;  %v12863_v56 = vcombine.low %v509_v27, %v521_v41  ;;  %v401_v9 = vld [vmem:[#allocation2 + $0x838] sm:$0xff] }
 0x4a3   :  { %8954 = vmatprep.subr.bf16.mxu0 %v13318_v23  ;;  %v1216_v23 = vld [vmem:[#allocation2 + $0x21b0] sm:$0xff] }
 0x4a4   :  { %9031 = vmatpush1.bf16.msra.mxu1 %v12623_v32  ;;  %v1204_v32 = vld [vmem:[#allocation2 + $0x2150] sm:$0xff] }
 0x4a5   :  { %9032 = vmatprep.subr.bf16.mxu1 %v12600_v25  ;;  %v485_v25 = vld [vmem:[#allocation2 + $0xad8] sm:$0xff]  ;;  %v13558_v40 = vcombine.high %v1204_v32, %v1216_v23  ;;  %v13557_v45 = vcombine.low %v1204_v32, %v1216_v23 }
 0x4a6   :  { %8955 = vmatpush1.bf16.msra.mxu0 %v13317_v7  ;;  %v12840_v7 = vcombine.high %v485_v25, %v497_v26  ;;  %v12839_v46 = vcombine.low %v485_v25, %v497_v26  ;;  %v365_v32 = vld [vmem:[#allocation2 + $0x718] sm:$0xff] }
 0x4a7   :  { %8956 = vmatprep.subr.bf16.mxu0 %v13294_v58  ;;  %v1192_v58 = vld [vmem:[#allocation2 + $0x20f0] sm:$0xff]  ;;  %v377_v23 = vld [vmem:[#allocation2 + $0x778] sm:$0xff] }
 0x4a8   :  { %9033 = vmatpush1.bf16.msra.mxu1 %v12599_v42  ;;  %v1180_v42 = vld [vmem:[#allocation2 + $0x2090] sm:$0xff] }
 0x4a9   :  { %9034 = vmatprep.subr.bf16.mxu1 %v12576_v10  ;;  %v461_v10 = vld [vmem:[#allocation2 + $0xa18] sm:$0xff]  ;;  %v13534_v49 = vcombine.high %v1180_v42, %v1192_v58  ;;  %v13533_v2 = vcombine.low %v1180_v42, %v1192_v58  ;;  %v12720_v58 = vcombine.high %v365_v32, %v377_v23 }
 0x4aa   :  { %8957 = vmatpush1.bf16.msra.mxu0 %v13293_v50  ;;  %v12816_v50 = vcombine.high %v461_v10, %v473_v21  ;;  %v12815_v4 = vcombine.low %v461_v10, %v473_v21  ;;  %v677_v10 = vld [vmem:[#allocation2 + $0x10d8] sm:$0xff] }
 0x4ab   :  { %8958 = vmatprep.subr.bf16.mxu0 %v13270_v51  ;;  %v1168_v51 = vld [vmem:[#allocation2 + $0x2030] sm:$0xff]  ;;  %v689_v21 = vld [vmem:[#allocation2 + $0x1138] sm:$0xff] }
 0x4ac   :  { %9035 = vmatpush1.bf16.msra.mxu1 %v12575_v57  ;;  %v1156_v57 = vld [vmem:[#allocation2 + $0x1fd0] sm:$0xff] }
 0x4ad   :  { %9036 = vmatprep.subr.bf16.mxu1 %v12552_v0  ;;  %v437_v0 = vld [vmem:[#allocation2 + $0x958] sm:$0xff]  ;;  %v13510_v22 = vcombine.high %v1156_v57, %v1168_v51  ;;  %v13509_v8 = vcombine.low %v1156_v57, %v1168_v51  ;;  %v12719_v51 = vcombine.low %v365_v32, %v377_v23 }
 0x4ae   :  { %8959 = vmatpush1.bf16.msra.mxu0 %v13269_v20  ;;  %v12792_v20 = vcombine.high %v437_v0, %v449_v13  ;;  %v12791_v3 = vcombine.low %v437_v0, %v449_v13  ;;  %v665_v13 = vld [vmem:[#allocation2 + $0x1078] sm:$0xff] }
 0x4af   :  { %8960 = vmatprep.subr.bf16.mxu0 %v13630_v6  ;;  %v1144_v6 = vld [vmem:[#allocation2 + $0x1f70] sm:$0xff]  ;;  %v581_v23 = vld [vmem:[#allocation2 + $0xdd8] sm:$0xff] }
 0x4b0   :  { %9037 = vmatpush1.bf16.msra.mxu1 %v12551_v5  ;;  %v1132_v5 = vld [vmem:[#allocation2 + $0x1f10] sm:$0xff] }
 0x4b1   :  { %9038 = vmatprep.subr.bf16.mxu1 %v12528_v63  ;;  %v413_v63 = vld [vmem:[#allocation2 + $0x898] sm:$0xff]  ;;  %v13486_v12 = vcombine.high %v1132_v5, %v1144_v6  ;;  %v13485_v55 = vcombine.low %v1132_v5, %v1144_v6 }
 0x4b2   :  { %8961 = vmatpush2.bf16.msra.mxu0 %v13629_v34  ;;  %v12768_v34 = vcombine.high %v413_v63, %v425_v39  ;;  %v12767_v27 = vcombine.low %v413_v63, %v425_v39  ;;  %v629_v39 = vld [vmem:[#allocation2 + $0xf58] sm:$0xff] }
 0x4b3   :  { %8962 = vmatprep.subr.bf16.mxu0 %v13606_v47  ;;  %v1120_v47 = vld [vmem:[#allocation2 + $0x1eb0] sm:$0xff] }
 0x4b4   :  { %9039 = vmatpush1.bf16.msra.mxu1 %v12527_v17  ;;  %v1108_v17 = vld [vmem:[#allocation2 + $0x1e50] sm:$0xff] }
 0x4b5   :  { %9040 = vmatprep.subr.bf16.mxu1 %v12504_v38  ;;  %v389_v38 = vld [vmem:[#allocation2 + $0x7d8] sm:$0xff]  ;;  %v13462_v41 = vcombine.high %v1108_v17, %v1120_v47  ;;  %v13461_v26 = vcombine.low %v1108_v17, %v1120_v47 }
 0x4b6   :  { %8963 = vmatpush2.bf16.msra.mxu0 %v13605_v24  ;;  %v12744_v24 = vcombine.high %v389_v38, %v401_v9 }
 0x4b7   :  { %8964 = vmatprep.subr.bf16.mxu0 %v13582_v28  ;;  %v713_v28 = vld [vmem:[#allocation2 + $0x11f8] sm:$0xff] }
 0x4b8   :  { %9041 = vmatpush1.bf16.msra.mxu1 %v12503_v53  ;;  %v701_v53 = vld [vmem:[#allocation2 + $0x1198] sm:$0xff] }
 0x4b9   :  { %9042 = vmatprep.subr.bf16.mxu1 %v12864_v1 }
 0x4ba   :  { %8965 = vmatpush2.bf16.msra.mxu0 %v13581_v29 }
 0x4bb   :  { %8966 = vmatprep.subr.bf16.mxu0 %v13558_v40  ;;  %v13056_v40 = vcombine.high %v701_v53, %v713_v28 }
 0x4bc   :  { %9043 = vmatpush2.bf16.msra.mxu1 %v12863_v56  ;;  %v12743_v56 = vcombine.low %v389_v38, %v401_v9 }
 0x4bd   :  { %9044 = vmatprep.subr.bf16.mxu1 %v12840_v7 }
 0x4be   :  { %8967 = vmatpush2.bf16.msra.mxu0 %v13557_v45 }
 0x4bf   :  { %8968 = vmatprep.subr.bf16.mxu0 %v13534_v49  ;;  %v353_v49 = vld [vmem:[#allocation2 + $0x6b8] sm:$0xff] }
 0x4c0   :  { %9045 = vmatpush2.bf16.msra.mxu1 %v12839_v46  ;;  %v341_v46 = vld [vmem:[#allocation2 + $0x658] sm:$0xff] }
 0x4c1   :  { %9046 = vmatprep.subr.bf16.mxu1 %v12816_v50  ;;  %v13055_v50 = vcombine.low %v701_v53, %v713_v28  ;;  %v12696_v0 = vcombine.high %v341_v46, %v353_v49 }
 0x4c2   :  { %8969 = vmatpush2.bf16.msra.mxu0 %v13533_v2  ;;  %v1085_v2 = vld [vmem:[#allocation2 + $0x1d98] sm:$0xff] }
 0x4c3   :  { %8970 = vmatprep.subr.bf16.mxu0 %v13510_v22 }
 0x4c4   :  { %9047 = vmatpush2.bf16.msra.mxu1 %v12815_v4  ;;  %v1097_v4 = vld [vmem:[#allocation2 + $0x1df8] sm:$0xff] }
 0x4c5   :  { %9048 = vmatprep.subr.bf16.mxu1 %v12792_v20  ;;  %v12695_v20 = vcombine.low %v341_v46, %v353_v49  ;;  %v13440_v63 = vcombine.high %v1085_v2, %v1097_v4  ;;  %v13439_v47 = vcombine.low %v1085_v2, %v1097_v4 }
 0x4c6   :  { %8971 = vmatpush2.bf16.msra.mxu0 %v13509_v8  ;;  %v641_v8 = vld [vmem:[#allocation2 + $0xfb8] sm:$0xff] }
 0x4c7   :  { %8972 = vmatprep.subr.bf16.mxu0 %v13486_v12  ;;  %v1073_v12 = vld [vmem:[#allocation2 + $0x1d38] sm:$0xff]  ;;  %v12984_v38 = vcombine.high %v629_v39, %v641_v8  ;;  %v12983_v53 = vcombine.low %v629_v39, %v641_v8 }
 0x4c8   :  { %9049 = vmatpush2.bf16.msra.mxu1 %v12791_v3  ;;  %v1061_v3 = vld [vmem:[#allocation2 + $0x1cd8] sm:$0xff] }
 0x4c9   :  { %9050 = vmatprep.subr.bf16.mxu1 %v12768_v34  ;;  %v8650_v1 = vpop.f32.mrf.mxu0  ;;  %v13416_v9 = vcombine.high %v1061_v3, %v1073_v12  ;;  %v13415_v28 = vcombine.low %v1061_v3, %v1073_v12 }
 0x4ca   :  { %v8651_v25 = vadd.f32 %v8650_v1, %v14720_v35  ;;  %8973 = vmatpush2.bf16.msra.mxu0 %v13485_v55  ;;  %v605_v55 = vld [vmem:[#allocation2 + $0xe98] sm:$0xff] }
 0x4cb   :  { %v8652_v29 = vpop.f32.mrf.mxu0  ;;  %8974 = vmatprep.subr.bf16.mxu0 %v13462_v41  ;;  %v1037_v41 = vld [vmem:[#allocation2 + $0x1c18] sm:$0xff] }
 0x4cc   :  { %9051 = vmatpush2.bf16.msra.mxu1 %v12767_v27  ;;  %v14742_v7 = vadd.f32 %v14726_v60, %v8651_v25  ;;  %v8653_v42 = vadd.f32 %v8652_v29, %v14722_v43  ;;  %v13032_v60 = vcombine.high %v677_v10, %v689_v21  ;;  %v653_v43 = vld [vmem:[#allocation2 + $0x1018] sm:$0xff] }
 0x4cd   :  { %9052 = vmatprep.subr.bf16.mxu1 %v12744_v24  ;;  %v8654_v45 = vpop.f32.mrf.mxu0  ;;  %v13008_v5 = vcombine.high %v653_v43, %v665_v13  ;;  %v13007_v17 = vcombine.low %v653_v43, %v665_v13  ;;  %v617_v27 = vld [vmem:[#allocation2 + $0xef8] sm:$0xff] }
 0x4ce   :  { %v14746_v35 = vadd.f32 %v14728_v11, %v8653_v42  ;;  %8975 = vmatpush2.bf16.msra.mxu0 %v13461_v26  ;;  %v13031_v11 = vcombine.low %v677_v10, %v689_v21  ;;  %v1049_v24 = vld [vmem:[#allocation2 + $0x1c78] sm:$0xff]  ;;  %v12960_v1 = vcombine.high %v605_v55, %v617_v27 }
 0x4cf   :  { %v8655_v57 = vpop.f32.mrf.mxu0  ;;  %9067 = vmatprep.subr.bf16.mxu0 %v13056_v40  ;;  %v13392_v32 = vcombine.high %v1037_v41, %v1049_v24  ;;  %v593_v25 = vld [vmem:[#allocation2 + $0xe38] sm:$0xff]  ;;  %v13391_v40 = vcombine.low %v1037_v41, %v1049_v24 }
 0x4d0   :  { %9053 = vmatpush2.bf16.msra.mxu1 %v12743_v56  ;;  %v1013_v26 = vld [vmem:[#allocation2 + $0x1b58] sm:$0xff]  ;;  %v12959_v56 = vcombine.low %v605_v55, %v617_v27  ;;  %v12935_v46 = vcombine.low %v581_v23, %v593_v25 }
 0x4d1   :  { %9054 = vmatprep.subr.bf16.mxu1 %v12720_v58  ;;  %8977 = vmatmul.mubr.bf16.vlgmr.msra.gmra.mxu0 %v14499_v30  ;;  %v1025_v29 = vld [vmem:[#allocation2 + $0x1bb8] sm:$0xff] }
 0x4d2   :  { %9068 = vmatpush1.bf16.msra.mxu0 %v13055_v50  ;;  %9099 = vmatprep.mubr.bf16.mxu0 %v14464_v59  ;;  %v13368_v42 = vcombine.high %v1013_v26, %v1025_v29  ;;  %v557_v58 = vld [vmem:[#allocation2 + $0xd18] sm:$0xff]  ;;  %v13367_v49 = vcombine.low %v1013_v26, %v1025_v29 }
 0x4d3   :  { %v14749_v22 = vpop.f32.mrf.mxu1  ;;  %9069 = vmatprep.subr.bf16.mxu0 %v13032_v60  ;;  %v569_v10 = vld [vmem:[#allocation2 + $0xd78] sm:$0xff] }
 0x4d4   :  { %9055 = vmatpush2.bf16.msra.mxu1 %v12719_v51  ;;  %v989_v21 = vld [vmem:[#allocation2 + $0x1a98] sm:$0xff]  ;;  %v12911_v43 = vcombine.low %v557_v58, %v569_v10 }
 0x4d5   :  { %v14752_v6 = vpop.f32.mrf.mxu1  ;;  %9056 = vmatprep.subr.bf16.mxu1 %v12696_v0  ;;  %v1001_v45 = vld [vmem:[#allocation2 + $0x1af8] sm:$0xff] }
 0x4d6   :  { %9070 = vmatpush1.bf16.msra.mxu0 %v13031_v11  ;;  %v13344_v50 = vcombine.high %v989_v21, %v1001_v45  ;;  %v533_v57 = vld [vmem:[#allocation2 + $0xc58] sm:$0xff]  ;;  %v13343_v13 = vcombine.low %v989_v21, %v1001_v45 }
 0x4d7   :  { %v8736_v34 = vpop.f32.mrf.mxu1  ;;  %9071 = vmatprep.subr.bf16.mxu0 %v13008_v5  ;;  %v545_v51 = vld [vmem:[#allocation2 + $0xcb8] sm:$0xff] }
 0x4d8   :  { %9057 = vmatpush2.bf16.msra.mxu1 %v12695_v20  ;;  %v965_v60 = vld [vmem:[#allocation2 + $0x19d8] sm:$0xff]  ;;  %v12888_v2 = vcombine.high %v533_v57, %v545_v51  ;;  %v12887_v39 = vcombine.low %v533_v57, %v545_v51 }
 0x4d9   :  { %v8737_v59 = vpop.f32.mrf.mxu1  ;;  %9108 = vmatprep.subr.bf16.mxu1 %v13440_v63  ;;  %v977_v0 = vld [vmem:[#allocation2 + $0x1a38] sm:$0xff] }
 0x4da   :  { %9072 = vmatpush1.bf16.msra.mxu0 %v13007_v17  ;;  %v13320_v4 = vcombine.high %v965_v60, %v977_v0  ;;  %v893_v11 = vld [vmem:[#allocation2 + $0x1798] sm:$0xff]  ;;  %v13319_v8 = vcombine.low %v965_v60, %v977_v0 }
 0x4db   :  { %9059 = vmatmul.mubr.bf16.vlgmr.msra.gmra.mxu1 %v14470_v16  ;;  %9073 = vmatprep.subr.bf16.mxu0 %v12984_v38  ;;  %v12936_v16 = vcombine.high %v581_v23, %v593_v25  ;;  %v905_v20 = vld [vmem:[#allocation2 + $0x17f8] sm:$0xff] }
 0x4dc   :  { %9109 = vmatpush1.bf16.msra.mxu1 %v13439_v47  ;;  %9140 = vmatprep.mubr.bf16.mxu1 %v14484_v54  ;;  %v12912_v54 = vcombine.high %v557_v58, %v569_v10  ;;  %v941_v5 = vld [vmem:[#allocation2 + $0x1918] sm:$0xff]  ;;  %v13248_v3 = vcombine.high %v893_v11, %v905_v20  ;;  %v13247_v59 = vcombine.low %v893_v11, %v905_v20 }
 0x4dd   :  { %9110 = vmatprep.subr.bf16.mxu1 %v13416_v9  ;;  %v953_v63 = vld [vmem:[#allocation2 + $0x1978] sm:$0xff] }
 0x4de   :  { %9074 = vmatpush1.bf16.msra.mxu0 %v12983_v53  ;;  %v13296_v12 = vcombine.high %v941_v5, %v953_v63  ;;  %v869_v34 = vld [vmem:[#allocation2 + $0x16d8] sm:$0xff]  ;;  %v13295_v9 = vcombine.low %v941_v5, %v953_v63 }
 0x4df   :  { %9075 = vmatprep.subr.bf16.mxu0 %v12960_v1  ;;  %v881_v17 = vld [vmem:[#allocation2 + $0x1738] sm:$0xff] }
 0x4e0   :  { %9111 = vmatpush1.bf16.msra.mxu1 %v13415_v28  ;;  %v917_v47 = vld [vmem:[#allocation2 + $0x1858] sm:$0xff]  ;;  %v13224_v55 = vcombine.high %v869_v34, %v881_v17  ;;  %v13223_v1 = vcombine.low %v869_v34, %v881_v17 }
 0x4e1   :  { %9112 = vmatprep.subr.bf16.mxu1 %v13392_v32  ;;  %v929_v38 = vld [vmem:[#allocation2 + $0x18b8] sm:$0xff] }
 0x4e2   :  { %9076 = vmatpush1.bf16.msra.mxu0 %v12959_v56  ;;  %v13272_v27 = vcombine.high %v917_v47, %v929_v38  ;;  %v845_v41 = vld [vmem:[#allocation2 + $0x1618] sm:$0xff]  ;;  %v13271_v32 = vcombine.low %v917_v47, %v929_v38 }
 0x4e3   :  { %9077 = vmatprep.subr.bf16.mxu0 %v12936_v16  ;;  %v857_v24 = vld [vmem:[#allocation2 + $0x1678] sm:$0xff] }
 0x4e4   :  { %9113 = vmatpush1.bf16.msra.mxu1 %v13391_v40  ;;  %v1277_v53 = vld [vmem:[#allocation2 + $0x2398] sm:$0xff]  ;;  %v13200_v23 = vcombine.high %v845_v41, %v857_v24  ;;  %v13199_v16 = vcombine.low %v845_v41, %v857_v24 }
 0x4e5   :  { %9114 = vmatprep.subr.bf16.mxu1 %v13368_v42  ;;  %v1289_v28 = vld [vmem:[#allocation2 + $0x23f8] sm:$0xff] }
 0x4e6   :  { %9078 = vmatpush1.bf16.msra.mxu0 %v12935_v46  ;;  %v13632_v25 = vcombine.high %v1277_v53, %v1289_v28  ;;  %v821_v26 = vld [vmem:[#allocation2 + $0x1558] sm:$0xff]  ;;  %v13631_v42 = vcombine.low %v1277_v53, %v1289_v28 }
 0x4e7   :  { %9079 = vmatprep.subr.bf16.mxu0 %v12912_v54  ;;  %v833_v29 = vld [vmem:[#allocation2 + $0x15b8] sm:$0xff] }
 0x4e8   :  { %9115 = vmatpush1.bf16.msra.mxu1 %v13367_v49  ;;  %v1253_v56 = vld [vmem:[#allocation2 + $0x22d8] sm:$0xff]  ;;  %v13176_v58 = vcombine.high %v821_v26, %v833_v29  ;;  %v13175_v54 = vcombine.low %v821_v26, %v833_v29 }
 0x4e9   :  { %9116 = vmatprep.subr.bf16.mxu1 %v13344_v50  ;;  %v1265_v40 = vld [vmem:[#allocation2 + $0x2338] sm:$0xff] }
 0x4ea   :  { %9080 = vmatpush1.bf16.msra.mxu0 %v12911_v43  ;;  %v13608_v10 = vcombine.high %v1253_v56, %v1265_v40  ;;  %v797_v21 = vld [vmem:[#allocation2 + $0x1498] sm:$0xff]  ;;  %v13607_v50 = vcombine.low %v1253_v56, %v1265_v40 }
 0x4eb   :  { %9081 = vmatprep.subr.bf16.mxu0 %v12888_v2  ;;  %v809_v45 = vld [vmem:[#allocation2 + $0x14f8] sm:$0xff] }
 0x4ec   :  { %9117 = vmatpush1.bf16.msra.mxu1 %v13343_v13  ;;  %v1229_v46 = vld [vmem:[#allocation2 + $0x2218] sm:$0xff]  ;;  %v13152_v57 = vcombine.high %v797_v21, %v809_v45  ;;  %v13151_v2 = vcombine.low %v797_v21, %v809_v45  ;;  %v14761_v21 = vld [vmem:[#allocation6 + $0x1e0] sm:$0xff] }
 0x4ed   :  { %9118 = vmatprep.subr.bf16.mxu1 %v13320_v4  ;;  %v1241_v49 = vld [vmem:[#allocation2 + $0x2278] sm:$0xff] }
 0x4ee   :  { %9082 = vmatpush1.bf16.msra.mxu0 %v12887_v39  ;;  %v13584_v51 = vcombine.high %v1229_v46, %v1241_v49  ;;  %v773_v60 = vld [vmem:[#allocation2 + $0x13d8] sm:$0xff]  ;;  %v13583_v4 = vcombine.low %v1229_v46, %v1241_v49  ;;  %v14763_v46 = vld [vmem:[#allocation4] sm:$0x3f] }
 0x4ef   :  { %9083 = vmatprep.subr.bf16.mxu0 %v13248_v3  ;;  %v785_v0 = vld [vmem:[#allocation2 + $0x1438] sm:$0xff] }
 0x4f0   :  { %9119 = vmatpush1.bf16.msra.mxu1 %v13319_v8  ;;  %v1205_v43 = vld [vmem:[#allocation2 + $0x2158] sm:$0xff]  ;;  %v13128_v11 = vcombine.high %v773_v60, %v785_v0  ;;  %v13127_v3 = vcombine.low %v773_v60, %v785_v0 }
 0x4f1   :  { %9120 = vmatprep.subr.bf16.mxu1 %v13296_v12  ;;  %v1217_v13 = vld [vmem:[#allocation2 + $0x21b8] sm:$0xff] }
 0x4f2   :  { %9084 = vmatpush2.bf16.msra.mxu0 %v13247_v59  ;;  %v13560_v20 = vcombine.high %v1205_v43, %v1217_v13  ;;  %v749_v5 = vld [vmem:[#allocation2 + $0x1318] sm:$0xff]  ;;  %v13559_v12 = vcombine.low %v1205_v43, %v1217_v13  ;;  %v9234_v59 = vlaneseq }
 0x4f3   :  { %9085 = vmatprep.subr.bf16.mxu0 %v13224_v55  ;;  %v761_v63 = vld [vmem:[#allocation2 + $0x1378] sm:$0xff] }
 0x4f4   :  { %9121 = vmatpush1.bf16.msra.mxu1 %v13295_v9  ;;  %v1181_v39 = vld [vmem:[#allocation2 + $0x2098] sm:$0xff]  ;;  %v13104_v34 = vcombine.high %v749_v5, %v761_v63  ;;  %v14756_v28 = vshrl.u32 %v9234_v59, 7  ;;  %v9500_v59 = vld [vmem:[#allocation6 + $0x580] sm:$0xff] }
 0x4f5   :  { %9122 = vmatprep.subr.bf16.mxu1 %v13272_v27  ;;  %v1193_v8 = vld [vmem:[#allocation2 + $0x20f8] sm:$0xff]  ;;  %v13103_v27 = vcombine.low %v749_v5, %v761_v63 }
 0x4f6   :  { %9086 = vmatpush2.bf16.msra.mxu0 %v13223_v1  ;;  %v13536_v17 = vcombine.high %v1181_v39, %v1193_v8  ;;  %v725_v47 = vld [vmem:[#allocation2 + $0x1258] sm:$0xff]  ;;  %v13535_v41 = vcombine.low %v1181_v39, %v1193_v8  ;;  %v9240_v56 = vsub.s32 1, %v14756_v28 }
 0x4f7   :  { %9087 = vmatprep.subr.bf16.mxu0 %v13200_v23  ;;  %v737_v38 = vld [vmem:[#allocation2 + $0x12b8] sm:$0xff] }
 0x4f8   :  { %9123 = vmatpush1.bf16.msra.mxu1 %v13271_v32  ;;  %v1157_v9 = vld [vmem:[#allocation2 + $0x1fd8] sm:$0xff]  ;;  %v13080_v24 = vcombine.high %v725_v47, %v737_v38  ;;  %v13079_v29 = vcombine.low %v725_v47, %v737_v38 }
 0x4f9   :  { %9124 = vmatprep.subr.bf16.mxu1 %v13632_v25  ;;  %v1169_v55 = vld [vmem:[#allocation2 + $0x2038] sm:$0xff] }
 0x4fa   :  { %9088 = vmatpush2.bf16.msra.mxu0 %v13199_v16  ;;  %v13512_v53 = vcombine.high %v1157_v9, %v1169_v55  ;;  %v1301_v1 = vld [vmem:[#allocation2 + $0x2458] sm:$0xff]  ;;  %v13511_v16 = vcombine.low %v1157_v9, %v1169_v55  ;;  %v9504_v9 = vld [vmem:[#allocation6 + $0x5a0] sm:$0xff]  ;;  %v9202_v55 = vpack.c.bf16 %v14693_v14, %v14693_v14  ;;  %v9203_v14 = vpack.c.bf16 %v14697_v15, %v14697_v15 }
 0x4fb   :  { %9089 = vmatprep.subr.bf16.mxu0 %v13176_v58  ;;  %v1313_v32 = vld [vmem:[#allocation2 + $0x24b8] sm:$0xff]  ;;  %v13845_v15 = vcombine.low %v9500_v59, %v9504_v9 }
 0x4fc   :  { %9125 = vmatpush2.bf16.msra.mxu1 %v13631_v42  ;;  %v1133_v25 = vld [vmem:[#allocation2 + $0x1f18] sm:$0xff]  ;;  %v13656_v42 = vcombine.high %v1301_v1, %v1313_v32 }
 0x4fd   :  { %9126 = vmatprep.subr.bf16.mxu1 %v13608_v10  ;;  %v1145_v26 = vld [vmem:[#allocation2 + $0x1f78] sm:$0xff]  ;;  %v14759_v10 = vld [vmem:[#allocation6 + $0x1c0] sm:$0xff] }
 0x4fe   :  { %9090 = vmatpush2.bf16.msra.mxu0 %v13175_v54  ;;  %v13488_v58 = vcombine.high %v1133_v25, %v1145_v26  ;;  %v1109_v49 = vld [vmem:[#allocation2 + $0x1e58] sm:$0xff]  ;;  %v13487_v60 = vcombine.low %v1133_v25, %v1145_v26  ;;  %v13726_v0 = vcombine.high %v14759_v10, %v14761_v21  ;;  %v9368_v25 = vld [vmem:[#allocation6 + $0x160] sm:$0xff] }
 0x4ff   :  { %9091 = vmatprep.subr.bf16.mxu0 %v13152_v57  ;;  %v1121_v54 = vld [vmem:[#allocation2 + $0x1eb8] sm:$0xff]  ;;  %v9241_v57 = vrot.slane %v14763_v46, %v9240_v56 }
 0x500   :  { %9127 = vmatpush2.bf16.msra.mxu1 %v13607_v50  ;;  %v13655_v50 = vcombine.low %v1301_v1, %v1313_v32  ;;  %v13464_v43 = vcombine.high %v1109_v49, %v1121_v54 }
 0x501   :  { %9128 = vmatprep.subr.bf16.mxu1 %v13584_v51  ;;  %v9265_v5 = vpack.c.bf16 %v9241_v57, %v9241_v57 }
 0x502   :  { %9092 = vmatpush2.bf16.msra.mxu0 %v13151_v2 }
 0x503   :  { %9093 = vmatprep.subr.bf16.mxu0 %v13128_v11  ;;  %v9512_v11 = vld [vmem:[#allocation6 + $0x5e0] sm:$0xff] }
 0x504   :  { %9129 = vmatpush2.bf16.msra.mxu1 %v13583_v4  ;;  %v9508_v4 = vld [vmem:[#allocation6 + $0x5c0] sm:$0xff] }
 0x505   :  { %9130 = vmatprep.subr.bf16.mxu1 %v13560_v20  ;;  %v13853_v26 = vcombine.low %v9508_v4, %v9512_v11 }
 0x506   :  { %9094 = vmatpush2.bf16.msra.mxu0 %v13127_v3  ;;  %v13463_v3 = vcombine.low %v1109_v49, %v1121_v54 }
 0x507   :  { %9095 = vmatprep.subr.bf16.mxu0 %v13104_v34  ;;  %v9376_v34 = vld [vmem:[#allocation6 + $0x1a0] sm:$0xff] }
 0x508   :  { %9131 = vmatpush2.bf16.msra.mxu1 %v13559_v12 }
 0x509   :  { %9132 = vmatprep.subr.bf16.mxu1 %v13536_v17  ;;  %v8773_v23 = vpop.f32.mrf.mxu0 }
 0x50a   :  { %9096 = vmatpush2.bf16.msra.mxu0 %v13103_v27  ;;  %v8774_v13 = vadd.f32 %v8773_v23, %v14749_v22  ;;  %v9372_v22 = vld [vmem:[#allocation6 + $0x180] sm:$0xff]  ;;  %v9278_v27 = vpack.i.b16 %v9265_v5, %v9265_v5 }
 0x50b   :  { %v8775_v40 = vpop.f32.mrf.mxu0  ;;  %9097 = vmatprep.subr.bf16.mxu0 %v13080_v24  ;;  %v13718_v32 = vcombine.high %v9372_v22, %v9376_v34  ;;  %v9364_v23 = vld [vmem:[#allocation6 + $0x140] sm:$0xff]  ;;  %v13717_v49 = vcombine.low %v9372_v22, %v9376_v34 }
 0x50c   :  { %9133 = vmatpush2.bf16.msra.mxu1 %v13535_v41  ;;  %v8776_v63 = vadd.f32 %v8775_v40, %v14752_v6  ;;  %v13725_v41 = vcombine.low %v14759_v10, %v14761_v21  ;;  %v9492_v10 = vld [vmem:[#allocation6 + $0x540] sm:$0xff]  ;;  %v13710_v54 = vcombine.high %v9364_v23, %v9368_v25 }
 0x50d   :  { %9134 = vmatprep.subr.bf16.mxu1 %v13512_v53  ;;  %v8777_v45 = vpop.f32.mrf.mxu0  ;;  %v9496_v21 = vld [vmem:[#allocation6 + $0x560] sm:$0xff] }
 0x50e   :  { %9098 = vmatpush2.bf16.msra.mxu0 %v13079_v29  ;;  %v14779_v29 = vsub.s32 0, %v14756_v28  ;;  %v13837_v5 = vcombine.low %v9492_v10, %v9496_v21  ;;  %v9480_v22 = vld [vmem:[#allocation6 + $0x4e0] sm:$0xff] }
 0x50f   :  { %v8778_v51 = vpop.f32.mrf.mxu0  ;;  %9163 = vmatprep.subr.bf16.mxu0 %v13656_v42 }
 0x510   :  { %9135 = vmatpush2.bf16.msra.mxu1 %v13511_v16  ;;  %v13846_v16 = vcombine.high %v9500_v59, %v9504_v9  ;;  %v9283_v45 = vrot.slane %v9278_v27, %v14779_v29  ;;  %v9356_v51 = vld [vmem:[#allocation6 + $0x100] sm:$0xff] }
 0x511   :  { %9136 = vmatprep.subr.bf16.mxu1 %v13488_v58  ;;  %9100 = vmatmul.mubr.bf16.vlgmr.msra.gmra.mxu0 %v14474_v19  ;;  %v8855_v2 = vpop.f32.mrf.mxu0  ;;  %v13854_v19 = vcombine.high %v9508_v4, %v9512_v11  ;;  %v9348_v11 = vld [vmem:[#allocation6 + $0xc0] sm:$0xff] }
 0x512   :  { %9164 = vmatpush1.bf16.msra.mxu0 %v13655_v50  ;;  %9181 = vmatprep.mubr.bf16.mxu0 %v14371_v31  ;;  %v9472_v27 = vld [vmem:[#allocation6 + $0x4a0] sm:$0xff] }
 0x513   :  { %v8814_v20 = vpop.f32.mrf.mxu1  ;;  %v8857_v8 = vpop.f32.mrf.mxu0  ;;  %11628 = vmatprep.subr.bf16.mxu0 %v13726_v0 }
 0x514   :  { %v8815_v39 = vadd.f32 %v8814_v20, %v8774_v13  ;;  %9137 = vmatpush2.bf16.msra.mxu1 %v13487_v60  ;;  %v9360_v60 = vld [vmem:[#allocation6 + $0x120] sm:$0xff] }
 0x515   :  { %v8816_v12 = vpop.f32.mrf.mxu1  ;;  %9138 = vmatprep.subr.bf16.mxu1 %v13464_v43  ;;  %v8859_v38 = vpop.f32.mrf.mxu0  ;;  %v13709_v43 = vcombine.low %v9364_v23, %v9368_v25  ;;  %v9484_v13 = vld [vmem:[#allocation6 + $0x500] sm:$0xff]  ;;  %v13702_v4 = vcombine.high %v9356_v51, %v9360_v60 }
 0x516   :  { %v8856_v17 = vadd.f32 %v8855_v2, %v8815_v39  ;;  %v8817_v47 = vadd.f32 %v8816_v12, %v8776_v63  ;;  %v9352_v20 = vld [vmem:[#allocation6 + $0xe0] sm:$0xff] }
 0x517   :  { %v8818_v6 = vpop.f32.mrf.mxu1  ;;  %v8860_v1 = vpop.f32.mrf.mxu0  ;;  %v9476_v12 = vld [vmem:[#allocation6 + $0x4c0] sm:$0xff]  ;;  %v13693_v9 = vcombine.low %v9348_v11, %v9352_v20 }
 0x518   :  { %v9208_v24 = vpack.c.bf16 %v8856_v17, %v8856_v17  ;;  %v8858_v53 = vadd.f32 %v8857_v8, %v8817_v47  ;;  %9139 = vmatpush2.bf16.msra.mxu1 %v13463_v3  ;;  %v14795_v8 = vld [vmem:[#allocation6 + $0x1c8] sm:$0xff]  ;;  %v9340_v17 = vld [vmem:[#allocation6 + $0x80] sm:$0xff]  ;;  %v13822_v59 = vcombine.high %v9476_v12, %v9480_v22 }
 0x519   :  { %v8819_v40 = vpop.f32.mrf.mxu1  ;;  %11669 = vmatprep.subr.bf16.mxu1 %v13854_v19  ;;  %13668 = vmatmul.mubr.msk.bf16.vlgmr.msra.gmra.mxu0 %vm7218_vm0, %v14735_v18  ;;  %v13838_v18 = vcombine.high %v9492_v10, %v9496_v21  ;;  %v14797_v3 = vld [vmem:[#allocation6 + $0x1e8] sm:$0xff]  ;;  %v13694_v19 = vcombine.high %v9348_v11, %v9352_v20  ;;  %v9344_v47 = vld [vmem:[#allocation6 + $0xa0] sm:$0xff] }
 0x51a   :  { %v14783_v42 = vmax.bf16 %v9208_v24, %v9202_v55  ;;  %v9209_v58 = vpack.c.bf16 %v8858_v53, %v8858_v53  ;;  %11629 = vmatpush1.bf16.msra.mxu0 %v13725_v41  ;;  %v13727_v34 = vcombine.low %v14795_v8, %v14797_v3  ;;  %v9468_v55 = vld [vmem:[#allocation6 + $0x480] sm:$0xff]  ;;  %v13686_v6 = vcombine.high %v9340_v17, %v9344_v47 }
 0x51b   :  { %9141 = vmatmul.mubr.bf16.vlgmr.msra.gmra.mxu1 %v14499_v30  ;;  %11630 = vmatprep.subr.bf16.mxu0 %v13718_v32  ;;  %v9488_v30 = vld [vmem:[#allocation6 + $0x520] sm:$0xff]  ;;  %v13821_v53 = vcombine.low %v9476_v12, %v9480_v22  ;;  %v13814_v1 = vcombine.high %v9468_v55, %v9472_v27  ;;  %v13685_v32 = vcombine.low %v9340_v17, %v9344_v47 }
 0x51c   :  { %v9226_v50 = vmax.bf16 %v14783_v42, %v14605_v52  ;;  %v9221_v57 = vmax.bf16 %v9209_v58, %v9203_v14  ;;  %11670 = vmatpush1.bf16.msra.mxu1 %v13853_v26  ;;  %v13830_v39 = vcombine.high %v9484_v13, %v9488_v30  ;;  %v13829_v38 = vcombine.low %v9484_v13, %v9488_v30  ;;  %v9332_v41 = vld [vmem:[#allocation6 + $0x40] sm:$0xff] }
 0x51d   :  { %11671 = vmatprep.subr.bf16.mxu1 %v13846_v16  ;;  %v9336_v24 = vld [vmem:[#allocation6 + $0x60] sm:$0xff]  ;;  %v13813_v14 = vcombine.low %v9468_v55, %v9472_v27 }
 0x51e   :  { %v9227_v0 = vmax.bf16 %v9221_v57, %v14610_v62  ;;  %11631 = vmatpush1.bf16.msra.mxu0 %v13717_v49  ;;  %v13701_v62 = vcombine.low %v9356_v51, %v9360_v60  ;;  %v9460_v23 = vld [vmem:[#allocation6 + $0x440] sm:$0xff]  ;;  %v13678_v26 = vcombine.high %v9332_v41, %v9336_v24  ;;  %v13677_v10 = vcombine.low %v9332_v41, %v9336_v24 }
 0x51f   :  { %11632 = vmatprep.subr.bf16.mxu0 %v13710_v54  ;;  %v9464_v25 = vld [vmem:[#allocation6 + $0x460] sm:$0xff] }
 0x520   :  { %v9313_v2 = vadd.bf16 %v9283_v45, %v9227_v0  ;;  %11672 = vmatpush1.bf16.msra.mxu1 %v13845_v15  ;;  %v9324_v40 = vld [vmem:[#allocation6] sm:$0xff]  ;;  %v13806_v58 = vcombine.high %v9460_v23, %v9464_v25  ;;  %v13805_v15 = vcombine.low %v9460_v23, %v9464_v25 }
 0x521   :  { %11673 = vmatprep.subr.bf16.mxu1 %v13838_v18  ;;  %v9328_v16 = vld [vmem:[#allocation6 + $0x20] sm:$0xff] }
 0x522   :  { %v14793_v63 = vmax.bf16 %v14371_v31, %v9313_v2  ;;  %11633 = vmatpush1.bf16.msra.mxu0 %v13709_v43  ;;  %v9452_v21 = vld [vmem:[#allocation6 + $0x400] sm:$0xff]  ;;  %v13670_v49 = vcombine.high %v9324_v40, %v9328_v16  ;;  %v13669_v60 = vcombine.low %v9324_v40, %v9328_v16 }
 0x523   :  { %11634 = vmatprep.subr.bf16.mxu0 %v13702_v4  ;;  %v9456_v45 = vld [vmem:[#allocation6 + $0x420] sm:$0xff] }
 0x524   :  { %11660 = vmatprep.mubr.bf16.mxu0 %v14793_v63  ;;  %11674 = vmatpush1.bf16.msra.mxu1 %v13837_v5  ;;  %v9444_v54 = vld [vmem:[#allocation6 + $0x3c0] sm:$0xff]  ;;  %v13798_v51 = vcombine.high %v9452_v21, %v9456_v45  ;;  %v13797_v2 = vcombine.low %v9452_v21, %v9456_v45 }
 0x525   :  { %11675 = vmatprep.subr.bf16.mxu1 %v13830_v39  ;;  %v9448_v57 = vld [vmem:[#allocation6 + $0x3e0] sm:$0xff] }
 0x526   :  { %11635 = vmatpush1.bf16.msra.mxu0 %v13701_v62  ;;  %v9572_v18 = vld [vmem:[#allocation6 + $0x7c0] sm:$0xff]  ;;  %v13790_v43 = vcombine.high %v9444_v54, %v9448_v57  ;;  %v13789_v11 = vcombine.low %v9444_v54, %v9448_v57 }
 0x527   :  { %11636 = vmatprep.subr.bf16.mxu0 %v13694_v19  ;;  %v9576_v0 = vld [vmem:[#allocation6 + $0x7e0] sm:$0xff] }
 0x528   :  { %11676 = vmatpush1.bf16.msra.mxu1 %v13829_v38  ;;  %v9436_v13 = vld [vmem:[#allocation6 + $0x380] sm:$0xff]  ;;  %v13918_v4 = vcombine.high %v9572_v18, %v9576_v0  ;;  %v13917_v22 = vcombine.low %v9572_v18, %v9576_v0 }
 0x529   :  { %11677 = vmatprep.subr.bf16.mxu1 %v13822_v59  ;;  %v9440_v30 = vld [vmem:[#allocation6 + $0x3a0] sm:$0xff] }
 0x52a   :  { %11637 = vmatpush1.bf16.msra.mxu0 %v13693_v9  ;;  %v9564_v20 = vld [vmem:[#allocation6 + $0x780] sm:$0xff]  ;;  %v13782_v39 = vcombine.high %v9436_v13, %v9440_v30  ;;  %v13781_v17 = vcombine.low %v9436_v13, %v9440_v30 }
 0x52b   :  { %11638 = vmatprep.subr.bf16.mxu0 %v13686_v6  ;;  %v9568_v5 = vld [vmem:[#allocation6 + $0x7a0] sm:$0xff] }
 0x52c   :  { %11678 = vmatpush1.bf16.msra.mxu1 %v13821_v53  ;;  %v9428_v62 = vld [vmem:[#allocation6 + $0x340] sm:$0xff]  ;;  %v13910_v19 = vcombine.high %v9564_v20, %v9568_v5  ;;  %v13909_v27 = vcombine.low %v9564_v20, %v9568_v5 }
 0x52d   :  { %11679 = vmatprep.subr.bf16.mxu1 %v13814_v1  ;;  %v9432_v12 = vld [vmem:[#allocation6 + $0x360] sm:$0xff] }
 0x52e   :  { %11639 = vmatpush1.bf16.msra.mxu0 %v13685_v32  ;;  %v9556_v47 = vld [vmem:[#allocation6 + $0x740] sm:$0xff]  ;;  %v13774_v59 = vcombine.high %v9428_v62, %v9432_v12  ;;  %v13773_v41 = vcombine.low %v9428_v62, %v9432_v12 }
 0x52f   :  { %11640 = vmatprep.subr.bf16.mxu0 %v13678_v26  ;;  %v9560_v38 = vld [vmem:[#allocation6 + $0x760] sm:$0xff] }
 0x530   :  { %11680 = vmatpush1.bf16.msra.mxu1 %v13813_v14  ;;  %v9420_v9 = vld [vmem:[#allocation6 + $0x300] sm:$0xff]  ;;  %v13902_v6 = vcombine.high %v9556_v47, %v9560_v38  ;;  %v13901_v25 = vcombine.low %v9556_v47, %v9560_v38 }
 0x531   :  { %11681 = vmatprep.subr.bf16.mxu1 %v13806_v58  ;;  %v9424_v55 = vld [vmem:[#allocation6 + $0x320] sm:$0xff]  ;;  %v9237_v58 = vrot.slane %v14763_v46, %v14779_v29 }
 0x532   :  { %11641 = vmatpush1.bf16.msra.mxu0 %v13677_v10  ;;  %v9548_v24 = vld [vmem:[#allocation6 + $0x700] sm:$0xff]  ;;  %v13766_v1 = vcombine.high %v9420_v9, %v9424_v55  ;;  %v13765_v40 = vcombine.low %v9420_v9, %v9424_v55 }
 0x533   :  { %11642 = vmatprep.subr.bf16.mxu0 %v13670_v49  ;;  %v9552_v53 = vld [vmem:[#allocation6 + $0x720] sm:$0xff] }
 0x534   :  { %11682 = vmatpush1.bf16.msra.mxu1 %v13805_v15  ;;  %v9412_v32 = vld [vmem:[#allocation6 + $0x2c0] sm:$0xff]  ;;  %v13894_v26 = vcombine.high %v9548_v24, %v9552_v53  ;;  %v13893_v49 = vcombine.low %v9548_v24, %v9552_v53 }
 0x535   :  { %11683 = vmatprep.subr.bf16.mxu1 %v13798_v51  ;;  %v9416_v23 = vld [vmem:[#allocation6 + $0x2e0] sm:$0xff] }
 0x536   :  { %11643 = vmatpush1.bf16.msra.mxu0 %v13669_v60  ;;  %v9540_v16 = vld [vmem:[#allocation6 + $0x6c0] sm:$0xff]  ;;  %v13758_v10 = vcombine.high %v9412_v32, %v9416_v23  ;;  %v13757_v57 = vcombine.low %v9412_v32, %v9416_v23  ;;  %v9264_v60 = vpack.c.bf16 %v9237_v58, %v9237_v58 }
 0x537   :  { %11644 = vmatprep.subr.bf16.mxu0 %v13790_v43  ;;  %v9544_v14 = vld [vmem:[#allocation6 + $0x6e0] sm:$0xff] }
 0x538   :  { %11684 = vmatpush1.bf16.msra.mxu1 %v13797_v2  ;;  %v9404_v21 = vld [vmem:[#allocation6 + $0x280] sm:$0xff]  ;;  %v13886_v54 = vcombine.high %v9540_v16, %v9544_v14  ;;  %v13885_v13 = vcombine.low %v9540_v16, %v9544_v14  ;;  %v9271_v20 = vpack.i.b16 %v9264_v60, %v9264_v60 }
 0x539   :  { %11685 = vmatprep.subr.bf16.mxu1 %v13918_v4  ;;  %v9408_v45 = vld [vmem:[#allocation6 + $0x2a0] sm:$0xff] }
 0x53a   :  { %11645 = vmatpush2.bf16.msra.mxu0 %v13789_v11  ;;  %v9532_v15 = vld [vmem:[#allocation6 + $0x680] sm:$0xff]  ;;  %v13750_v18 = vcombine.high %v9404_v21, %v9408_v45  ;;  %v13749_v2 = vcombine.low %v9404_v21, %v9408_v45  ;;  %v9276_v38 = vrot.slane %v9271_v20, %v14779_v29 }
 0x53b   :  { %11646 = vmatprep.subr.bf16.mxu0 %v13782_v39  ;;  %v9536_v51 = vld [vmem:[#allocation6 + $0x6a0] sm:$0xff] }
 0x53c   :  { %11686 = vmatpush2.bf16.msra.mxu1 %v13917_v22  ;;  %v9396_v0 = vld [vmem:[#allocation6 + $0x240] sm:$0xff]  ;;  %v13878_v30 = vcombine.high %v9532_v15, %v9536_v51  ;;  %v13877_v12 = vcombine.low %v9532_v15, %v9536_v51 }
 0x53d   :  { %11687 = vmatprep.subr.bf16.mxu1 %v13910_v19  ;;  %v9400_v43 = vld [vmem:[#allocation6 + $0x260] sm:$0xff] }
 0x53e   :  { %11647 = vmatpush2.bf16.msra.mxu0 %v13781_v17  ;;  %v9524_v4 = vld [vmem:[#allocation6 + $0x640] sm:$0xff]  ;;  %v13742_v5 = vcombine.high %v9396_v0, %v9400_v43  ;;  %v13741_v19 = vcombine.low %v9396_v0, %v9400_v43 }
 0x53f   :  { %11648 = vmatprep.subr.bf16.mxu0 %v13774_v59  ;;  %v9528_v11 = vld [vmem:[#allocation6 + $0x660] sm:$0xff] }
 0x540   :  { %11688 = vmatpush2.bf16.msra.mxu1 %v13909_v27  ;;  %v9388_v39 = vld [vmem:[#allocation6 + $0x200] sm:$0xff]  ;;  %v13870_v22 = vcombine.high %v9524_v4, %v9528_v11  ;;  %v13869_v9 = vcombine.low %v9524_v4, %v9528_v11 }
 0x541   :  { %11689 = vmatprep.subr.bf16.mxu1 %v13902_v6  ;;  %v9392_v62 = vld [vmem:[#allocation6 + $0x220] sm:$0xff] }
 0x542   :  { %11649 = vmatpush2.bf16.msra.mxu0 %v13773_v41  ;;  %v9516_v17 = vld [vmem:[#allocation6 + $0x600] sm:$0xff]  ;;  %v13734_v59 = vcombine.high %v9388_v39, %v9392_v62  ;;  %v13733_v53 = vcombine.low %v9388_v39, %v9392_v62 }
 0x543   :  { %11650 = vmatprep.subr.bf16.mxu0 %v13766_v1  ;;  %v9520_v47 = vld [vmem:[#allocation6 + $0x620] sm:$0xff]  ;;  %v9312_v1 = vadd.bf16 %v9276_v38, %v9226_v50  ;;  %v14824_v38 = vld [vmem:[#allocation6 + $0x5c8] sm:$0xff] }
 0x544   :  { %11690 = vmatpush2.bf16.msra.mxu1 %v13901_v25  ;;  %v9636_v55 = vld [vmem:[#allocation6 + $0x9c0] sm:$0xff]  ;;  %v13862_v41 = vcombine.high %v9516_v17, %v9520_v47 }
 0x545   :  { %11691 = vmatprep.subr.bf16.mxu1 %v13894_v26  ;;  %v9640_v27 = vld [vmem:[#allocation6 + $0x9e0] sm:$0xff]  ;;  %v14817_v50 = vmax.bf16 %v14371_v31, %v9312_v1 }
 0x546   :  { %11651 = vmatpush2.bf16.msra.mxu0 %v13765_v40  ;;  %v13982_v25 = vcombine.high %v9636_v55, %v9640_v27  ;;  %v13861_v40 = vcombine.low %v9516_v17, %v9520_v47  ;;  %v9628_v16 = vld [vmem:[#allocation6 + $0x980] sm:$0xff]  ;;  %v13981_v52 = vcombine.low %v9636_v55, %v9640_v27 }
 0x547   :  { %11652 = vmatprep.subr.bf16.mxu0 %v13758_v10  ;;  %v9632_v14 = vld [vmem:[#allocation6 + $0x9a0] sm:$0xff]  ;;  %v13728_v10 = vcombine.high %v14795_v8, %v14797_v3  ;;  %v9345_v8 = vld [vmem:[#allocation6 + $0xa8] sm:$0xff] }
 0x548   :  { %11692 = vmatpush2.bf16.msra.mxu1 %v13893_v49  ;;  %v13974_v45 = vcombine.high %v9628_v16, %v9632_v14  ;;  %v13973_v51 = vcombine.low %v9628_v16, %v9632_v14  ;;  %v9612_v0 = vld [vmem:[#allocation6 + $0x900] sm:$0xff] }
 0x549   :  { %11693 = vmatprep.subr.bf16.mxu1 %v13886_v54  ;;  %v9620_v54 = vld [vmem:[#allocation6 + $0x940] sm:$0xff] }
 0x54a   :  { %11653 = vmatpush2.bf16.msra.mxu0 %v13757_v57  ;;  %v9624_v57 = vld [vmem:[#allocation6 + $0x960] sm:$0xff] }
 0x54b   :  { %11654 = vmatprep.subr.bf16.mxu0 %v13750_v18  ;;  %v13966_v60 = vcombine.high %v9620_v54, %v9624_v57  ;;  %v9616_v43 = vld [vmem:[#allocation6 + $0x920] sm:$0xff] }
 0x54c   :  { %11694 = vmatpush2.bf16.msra.mxu1 %v13885_v13  ;;  %v9604_v11 = vld [vmem:[#allocation6 + $0x8c0] sm:$0xff] }
 0x54d   :  { %11695 = vmatprep.subr.bf16.mxu1 %v13878_v30  ;;  %v13965_v30 = vcombine.low %v9620_v54, %v9624_v57  ;;  %v9608_v20 = vld [vmem:[#allocation6 + $0x8e0] sm:$0xff] }
 0x54e   :  { %11655 = vmatpush2.bf16.msra.mxu0 %v13749_v2  ;;  %v13958_v2 = vcombine.high %v9612_v0, %v9616_v43  ;;  %v13950_v39 = vcombine.high %v9604_v11, %v9608_v20  ;;  %v9596_v62 = vld [vmem:[#allocation6 + $0x880] sm:$0xff] }
 0x54f   :  { %11656 = vmatprep.subr.bf16.mxu0 %v13742_v5  ;;  %v13957_v5 = vcombine.low %v9612_v0, %v9616_v43  ;;  %v9588_v17 = vld [vmem:[#allocation6 + $0x840] sm:$0xff] }
 0x550   :  { %11696 = vmatpush2.bf16.msra.mxu1 %v13877_v12  ;;  %v9600_v12 = vld [vmem:[#allocation6 + $0x8a0] sm:$0xff] }
 0x551   :  { %v8896_v6 = vpop.f32.mrf.mxu0  ;;  %11697 = vmatprep.subr.bf16.mxu1 %v13870_v22  ;;  %v13949_v22 = vcombine.low %v9604_v11, %v9608_v20  ;;  %v9592_v47 = vld [vmem:[#allocation6 + $0x860] sm:$0xff] }
 0x552   :  { %11657 = vmatpush2.bf16.msra.mxu0 %v13741_v19  ;;  %v13942_v19 = vcombine.high %v9596_v62, %v9600_v12  ;;  %v13934_v27 = vcombine.high %v9588_v17, %v9592_v47  ;;  %v9700_v1 = vld [vmem:[#allocation6 + $0xbc0] sm:$0xff] }
 0x553   :  { %v8937_v24 = vpop.f32.mrf.mxu1  ;;  %v14810_v23 = vpop.f32.mrf.mxu0  ;;  %11658 = vmatprep.subr.bf16.mxu0 %v13734_v59  ;;  %v14826_v59 = vld [vmem:[#allocation6 + $0x5e8] sm:$0xff]  ;;  %v9692_v14 = vld [vmem:[#allocation6 + $0xb80] sm:$0xff] }
 0x554   :  { %v14808_v32 = vadd.f32 %v8937_v24, %v8896_v6  ;;  %11698 = vmatpush2.bf16.msra.mxu1 %v13869_v9  ;;  %v13941_v9 = vcombine.low %v9596_v62, %v9600_v12  ;;  %v13855_v55 = vcombine.low %v14824_v38, %v14826_v59  ;;  %v9580_v6 = vld [vmem:[#allocation6 + $0x800] sm:$0xff]  ;;  %v13933_v24 = vcombine.low %v9588_v17, %v9592_v47 }
 0x555   :  { %v14812_v26 = vpop.f32.mrf.mxu1  ;;  %v8900_v58 = vpop.f32.mrf.mxu0  ;;  %11699 = vmatprep.subr.bf16.mxu1 %v13862_v41  ;;  %v9584_v41 = vld [vmem:[#allocation6 + $0x820] sm:$0xff]  ;;  %v9244_v62 = vsub.s32 2, %v14756_v28  ;;  %v9248_v12 = vsub.s32 3, %v14756_v28 }
 0x556   :  { %11659 = vmatpush2.bf16.msra.mxu0 %v13733_v53  ;;  %v13926_v53 = vcombine.high %v9580_v6, %v9584_v41  ;;  %v9696_v58 = vld [vmem:[#allocation6 + $0xba0] sm:$0xff] }
 0x557   :  { %v8941_v21 = vpop.f32.mrf.mxu1  ;;  %v8901_v42 = vpop.f32.mrf.mxu0  ;;  %11710 = vmatprep.subr.bf16.mxu0 %v13982_v25  ;;  %v9704_v25 = vld [vmem:[#allocation6 + $0xbe0] sm:$0xff] }
 0x558   :  { %11700 = vmatpush2.bf16.msra.mxu1 %v13861_v40  ;;  %v13925_v40 = vcombine.low %v9580_v6, %v9584_v41  ;;  %v14046_v16 = vcombine.high %v9700_v1, %v9704_v25  ;;  %v14038_v21 = vcombine.high %v9692_v14, %v9696_v58  ;;  %v9688_v42 = vld [vmem:[#allocation6 + $0xb60] sm:$0xff] }
 0x559   :  { %v8942_v49 = vpop.f32.mrf.mxu1  ;;  %11661 = vmatmul.mubr.bf16.vlgmr.msra.gmra.mxu0 %v14817_v50  ;;  %11751 = vmatprep.subr.bf16.mxu1 %v13728_v10  ;;  %v14045_v10 = vcombine.low %v9700_v1, %v9704_v25  ;;  %v9676_v54 = vld [vmem:[#allocation6 + $0xb00] sm:$0xff]  ;;  %v8940_v1 = vadd.f32 %v14812_v26, %v14810_v23 }
 0x55a   :  { %11711 = vmatpush1.bf16.msra.mxu0 %v13981_v52  ;;  %v9684_v52 = vld [vmem:[#allocation6 + $0xb40] sm:$0xff] }
 0x55b   :  { %v14820_v15 = vpop.f32.mrf.mxu1  ;;  %11712 = vmatprep.subr.bf16.mxu0 %v13974_v45  ;;  %v14037_v45 = vcombine.low %v9692_v14, %v9696_v58  ;;  %v14030_v49 = vcombine.high %v9684_v52, %v9688_v42  ;;  %v9680_v57 = vld [vmem:[#allocation6 + $0xb20] sm:$0xff]  ;;  %v13856_v58 = vcombine.high %v14824_v38, %v14826_v59  ;;  %v9589_v59 = vld [vmem:[#allocation6 + $0x848] sm:$0xff] }
 0x55c   :  { %v9668_v0 = vld [vmem:[#allocation6 + $0xac0] sm:$0xff] }
 0x55d   :  { %v14822_v18 = vpop.f32.mrf.mxu1  ;;  %v9672_v43 = vld [vmem:[#allocation6 + $0xae0] sm:$0xff] }
 0x55e   :  { %11713 = vmatpush1.bf16.msra.mxu0 %v13973_v51  ;;  %v14029_v51 = vcombine.low %v9684_v52, %v9688_v42  ;;  %v14013_v11 = vcombine.low %v9668_v0, %v9672_v43  ;;  %v9644_v17 = vld [vmem:[#allocation6 + $0xa00] sm:$0xff] }
 0x55f   :  { %v9023_v13 = vpop.f32.mrf.mxu1  ;;  %11714 = vmatprep.subr.bf16.mxu0 %v13966_v60  ;;  %v14022_v60 = vcombine.high %v9676_v54, %v9680_v57  ;;  %v9648_v47 = vld [vmem:[#allocation6 + $0xa20] sm:$0xff] }
 0x560   :  { %v14021_v13 = vcombine.low %v9676_v54, %v9680_v57  ;;  %v13990_v41 = vcombine.high %v9644_v17, %v9648_v47  ;;  %v9205_v54 = vpack.c.bf16 %v14713_v48, %v14713_v48  ;;  %v9377_v48 = vld [vmem:[#allocation6 + $0x1a8] sm:$0xff] }
 0x561   :  { %v9024_v4 = vpop.f32.mrf.mxu1 }
 0x562   :  { %11715 = vmatpush1.bf16.msra.mxu0 %v13965_v30  ;;  %v14014_v30 = vcombine.high %v9668_v0, %v9672_v43  ;;  %v9664_v4 = vld [vmem:[#allocation6 + $0xaa0] sm:$0xff] }
 0x563   :  { %11716 = vmatprep.subr.bf16.mxu0 %v13958_v2  ;;  %v9660_v2 = vld [vmem:[#allocation6 + $0xa80] sm:$0xff] }
 0x564   :  { %v14006_v20 = vcombine.high %v9660_v2, %v9664_v4 }
 0x566   :  { %11717 = vmatpush1.bf16.msra.mxu0 %v13957_v5  ;;  %v9652_v5 = vld [vmem:[#allocation6 + $0xa40] sm:$0xff] }
 0x567   :  { %11718 = vmatprep.subr.bf16.mxu0 %v13950_v39  ;;  %v9656_v39 = vld [vmem:[#allocation6 + $0xa60] sm:$0xff] }
 0x568   :  { %v13997_v6 = vcombine.low %v9652_v5, %v9656_v39 }
 0x56a   :  { %11719 = vmatpush1.bf16.msra.mxu0 %v13949_v22  ;;  %v14005_v22 = vcombine.low %v9660_v2, %v9664_v4 }
 0x56b   :  { %11720 = vmatprep.subr.bf16.mxu0 %v13942_v19  ;;  %v13998_v19 = vcombine.high %v9652_v5, %v9656_v39 }
 0x56e   :  { %11721 = vmatpush1.bf16.msra.mxu0 %v13941_v9  ;;  %v9245_v9 = vrot.slane %v14763_v46, %v9244_v62  ;;  %v9365_v62 = vld [vmem:[#allocation6 + $0x148] sm:$0xff] }
 0x56f   :  { %11722 = vmatprep.subr.bf16.mxu0 %v13934_v27  ;;  %v9249_v27 = vrot.slane %v14763_v46, %v9248_v12  ;;  %v9369_v12 = vld [vmem:[#allocation6 + $0x168] sm:$0xff] }
 0x572   :  { %11723 = vmatpush1.bf16.msra.mxu0 %v13933_v24 }
 0x573   :  { %11724 = vmatprep.subr.bf16.mxu0 %v13926_v53  ;;  %v9266_v53 = vpack.c.bf16 %v9245_v9, %v9245_v9 }
 0x575   :  { %v9285_v52 = vpack.i.b16 %v9266_v53, %v9266_v53  ;;  %v9341_v53 = vld [vmem:[#allocation6 + $0x88] sm:$0xff] }
 0x576   :  { %11725 = vmatpush1.bf16.msra.mxu0 %v13925_v40  ;;  %v9267_v40 = vpack.c.bf16 %v9249_v27, %v9249_v27  ;;  %v9349_v27 = vld [vmem:[#allocation6 + $0xc8] sm:$0xff] }
 0x577   :  { %11726 = vmatprep.subr.bf16.mxu0 %v14046_v16  ;;  %v13989_v16 = vcombine.low %v9644_v17, %v9648_v47  ;;  %v9361_v17 = vld [vmem:[#allocation6 + $0x128] sm:$0xff]  ;;  %v13711_v47 = vcombine.low %v9365_v62, %v9369_v12 }
 0x57a   :  { %11727 = vmatpush2.bf16.msra.mxu0 %v14045_v10 }
 0x57b   :  { %11728 = vmatprep.subr.bf16.mxu0 %v14038_v21 }
 0x57e   :  { %11729 = vmatpush2.bf16.msra.mxu0 %v14037_v45  ;;  %v9204_v45 = vpack.c.bf16 %v14711_v37, %v14711_v37 }
 0x57f   :  { %11730 = vmatprep.subr.bf16.mxu0 %v14030_v49 }
 0x582   :  { %11731 = vmatpush2.bf16.msra.mxu0 %v14029_v51 }
 0x583   :  { %11732 = vmatprep.subr.bf16.mxu0 %v14022_v60 }
 0x586   :  { %11733 = vmatpush2.bf16.msra.mxu0 %v14021_v13 }
 0x587   :  { %11734 = vmatprep.subr.bf16.mxu0 %v14014_v30 }
 0x58a   :  { %11735 = vmatpush2.bf16.msra.mxu0 %v14013_v11  ;;  %v9373_v11 = vld [vmem:[#allocation6 + $0x188] sm:$0xff] }
 0x58b   :  { %11736 = vmatprep.subr.bf16.mxu0 %v14006_v20  ;;  %v13720_v39 = vcombine.high %v9373_v11, %v9377_v48 }
 0x58e   :  { %11737 = vmatpush2.bf16.msra.mxu0 %v14005_v22  ;;  %v13712_v22 = vcombine.high %v9365_v62, %v9369_v12 }
 0x58f   :  { %11738 = vmatprep.subr.bf16.mxu0 %v13998_v19  ;;  %v9357_v19 = vld [vmem:[#allocation6 + $0x108] sm:$0xff] }
 0x590   :  { %v13704_v9 = vcombine.high %v9357_v19, %v9361_v17 }
 0x591   :  { %v8978_v24 = vpop.f32.mrf.mxu0 }
 0x592   :  { %v8979_v25 = vadd.f32 %v8978_v24, %v14808_v32  ;;  %11739 = vmatpush2.bf16.msra.mxu0 %v13997_v6  ;;  %v9292_v32 = vpack.i.b16 %v9267_v40, %v9267_v40  ;;  %v9353_v6 = vld [vmem:[#allocation6 + $0xe8] sm:$0xff]  ;;  %v13687_v40 = vcombine.low %v9341_v53, %v9345_v8 }
 0x593   :  { %v8980_v14 = vpop.f32.mrf.mxu0  ;;  %11740 = vmatprep.subr.bf16.mxu0 %v13990_v41  ;;  %v13703_v41 = vcombine.low %v9357_v19, %v9361_v17  ;;  %v13696_v24 = vcombine.high %v9349_v27, %v9353_v6  ;;  %v13695_v3 = vcombine.low %v9349_v27, %v9353_v6  ;;  %v9397_v19 = vld [vmem:[#allocation6 + $0x248] sm:$0xff] }
 0x594   :  { %v9020_v10 = vadd.f32 %v14820_v15, %v8979_v25  ;;  %v8981_v21 = vadd.f32 %v8980_v14, %v8940_v1  ;;  %v9290_v15 = vrot.slane %v9285_v52, %v14779_v29  ;;  %v9297_v43 = vrot.slane %v9292_v32, %v14779_v29  ;;  %v9333_v1 = vld [vmem:[#allocation6 + $0x48] sm:$0xff] }
 0x595   :  { %v8982_v42 = vpop.f32.mrf.mxu0  ;;  %v9337_v25 = vld [vmem:[#allocation6 + $0x68] sm:$0xff] }
 0x596   :  { %v9210_v49 = vpack.c.bf16 %v9020_v10, %v9020_v10  ;;  %v9022_v23 = vadd.f32 %v14822_v18, %v8981_v21  ;;  %11741 = vmatpush2.bf16.msra.mxu0 %v13989_v16  ;;  %v13680_v16 = vcombine.high %v9333_v1, %v9337_v25  ;;  %v9325_v14 = vld [vmem:[#allocation6 + $0x8] sm:$0xff]  ;;  %v13679_v10 = vcombine.low %v9333_v1, %v9337_v25 }
 0x597   :  { %v8983_v26 = vpop.f32.mrf.mxu0  ;;  %11792 = vmatprep.subr.bf16.mxu0 %v13856_v58  ;;  %v9329_v58 = vld [vmem:[#allocation6 + $0x28] sm:$0xff] }
 0x598   :  { %v9222_v57 = vmax.bf16 %v9210_v49, %v9204_v45  ;;  %v9211_v51 = vpack.c.bf16 %v9022_v23, %v9022_v23  ;;  %v13672_v21 = vcombine.high %v9325_v14, %v9329_v58  ;;  %v9445_v52 = vld [vmem:[#allocation6 + $0x3c8] sm:$0xff]  ;;  %v13671_v45 = vcombine.low %v9325_v14, %v9329_v58 }
 0x599   :  { %v9449_v42 = vld [vmem:[#allocation6 + $0x3e8] sm:$0xff] }
 0x59a   :  { %v9228_v60 = vmax.bf16 %v9222_v57, %v14642_v44  ;;  %v9223_v0 = vmax.bf16 %v9211_v51, %v9205_v54  ;;  %v13792_v49 = vcombine.high %v9445_v52, %v9449_v42  ;;  %v9437_v23 = vld [vmem:[#allocation6 + $0x388] sm:$0xff]  ;;  %v13791_v26 = vcombine.low %v9445_v52, %v9449_v42 }
 0x59b   :  { %v14848_v37 = vpop.f32.mrf.mxu1  ;;  %v9441_v32 = vld [vmem:[#allocation6 + $0x3a8] sm:$0xff] }
 0x59c   :  { %v9229_v18 = vmax.bf16 %v9223_v0, %v14645_v33  ;;  %v9314_v30 = vadd.bf16 %v9290_v15, %v9228_v60  ;;  %v13719_v33 = vcombine.low %v9373_v11, %v9377_v48  ;;  %v13784_v54 = vcombine.high %v9437_v23, %v9441_v32  ;;  %v9429_v57 = vld [vmem:[#allocation6 + $0x348] sm:$0xff] }
 0x59d   :  { %v14851_v13 = vpop.f32.mrf.mxu1  ;;  %v9433_v51 = vld [vmem:[#allocation6 + $0x368] sm:$0xff]  ;;  %v13783_v15 = vcombine.low %v9437_v23, %v9441_v32 }
 0x59e   :  { %v9315_v2 = vadd.bf16 %v9297_v43, %v9229_v18  ;;  %v14857_v44 = vmax.bf16 %v14371_v31, %v9314_v30  ;;  %v13776_v60 = vcombine.high %v9429_v57, %v9433_v51  ;;  %v9421_v0 = vld [vmem:[#allocation6 + $0x308] sm:$0xff]  ;;  %v13775_v18 = vcombine.low %v9429_v57, %v9433_v51 }
 0x59f   :  { %v9064_v4 = vpop.f32.mrf.mxu1  ;;  %v9425_v43 = vld [vmem:[#allocation6 + $0x328] sm:$0xff] }
 0x5a0   :  { %v14854_v5 = vmax.bf16 %v14371_v31, %v9315_v2  ;;  %v13768_v30 = vcombine.high %v9421_v0, %v9425_v43  ;;  %v9413_v2 = vld [vmem:[#allocation6 + $0x2c8] sm:$0xff]  ;;  %v13767_v11 = vcombine.low %v9421_v0, %v9425_v43  ;;  %v9206_v0 = vpack.c.bf16 %v14742_v7, %v14742_v7 }
 0x5a1   :  { %v9065_v20 = vpop.f32.mrf.mxu1  ;;  %v9417_v4 = vld [vmem:[#allocation6 + $0x2e8] sm:$0xff] }
 0x5a2   :  { %11701 = vmatprep.mubr.bf16.mxu1 %v14854_v5  ;;  %v13760_v48 = vcombine.high %v9413_v2, %v9417_v4  ;;  %v9405_v20 = vld [vmem:[#allocation6 + $0x288] sm:$0xff]  ;;  %v13759_v62 = vcombine.low %v9413_v2, %v9417_v4 }
 0x5a3   :  { %11702 = vmatmul.mubr.bf16.vlgmr.msra.gmra.mxu1 %v14857_v44  ;;  %v9401_v17 = vld [vmem:[#allocation6 + $0x268] sm:$0xff] }
 0x5a4   :  { %11752 = vmatpush1.bf16.msra.mxu1 %v13727_v34  ;;  %11783 = vmatprep.mubr.bf16.mxu1 %v14793_v63  ;;  %v13688_v34 = vcombine.high %v9341_v53, %v9345_v8  ;;  %v9389_v53 = vld [vmem:[#allocation6 + $0x208] sm:$0xff]  ;;  %v13743_v1 = vcombine.low %v9397_v19, %v9401_v17 }
 0x5a5   :  { %11753 = vmatprep.subr.bf16.mxu1 %v13720_v39  ;;  %v9409_v39 = vld [vmem:[#allocation6 + $0x2a8] sm:$0xff] }
 0x5a6   :  { %v13751_v27 = vcombine.low %v9405_v20, %v9409_v39  ;;  %v9393_v8 = vld [vmem:[#allocation6 + $0x228] sm:$0xff] }
 0x5a7   :  { %v13735_v32 = vcombine.low %v9389_v53, %v9393_v8 }
 0x5a8   :  { %11754 = vmatpush1.bf16.msra.mxu1 %v13719_v33  ;;  %v13752_v33 = vcombine.high %v9405_v20, %v9409_v39 }
 0x5a9   :  { %11755 = vmatprep.subr.bf16.mxu1 %v13712_v22  ;;  %v9252_v22 = vsub.s32 4, %v14756_v28 }
 0x5ac   :  { %11756 = vmatpush1.bf16.msra.mxu1 %v13711_v47 }
 0x5ad   :  { %11757 = vmatprep.subr.bf16.mxu1 %v13704_v9  ;;  %v9256_v9 = vsub.s32 5, %v14756_v28 }
 0x5b0   :  { %11758 = vmatpush1.bf16.msra.mxu1 %v13703_v41  ;;  %v13744_v41 = vcombine.high %v9397_v19, %v9401_v17 }
 0x5b1   :  { %11759 = vmatprep.subr.bf16.mxu1 %v13696_v24  ;;  %v9253_v24 = vrot.slane %v14763_v46, %v9252_v22 }
 0x5b3   :  { %v9268_v58 = vpack.c.bf16 %v9253_v24, %v9253_v24  ;;  %v9613_v24 = vld [vmem:[#allocation6 + $0x908] sm:$0xff] }
 0x5b4   :  { %11760 = vmatpush1.bf16.msra.mxu1 %v13695_v3 }
 0x5b5   :  { %11761 = vmatprep.subr.bf16.mxu1 %v13688_v34  ;;  %v9257_v34 = vrot.slane %v14763_v46, %v9256_v9  ;;  %v9299_v57 = vpack.i.b16 %v9268_v58, %v9268_v58 }
 0x5b8   :  { %11762 = vmatpush1.bf16.msra.mxu1 %v13687_v40 }
 0x5b9   :  { %11763 = vmatprep.subr.bf16.mxu1 %v13680_v16  ;;  %v13736_v16 = vcombine.high %v9389_v53, %v9393_v8  ;;  %v9617_v53 = vld [vmem:[#allocation6 + $0x928] sm:$0xff] }
 0x5bc   :  { %11764 = vmatpush1.bf16.msra.mxu1 %v13679_v10  ;;  %v9637_v10 = vld [vmem:[#allocation6 + $0x9c8] sm:$0xff] }
 0x5bd   :  { %11765 = vmatprep.subr.bf16.mxu1 %v13672_v21  ;;  %v9641_v21 = vld [vmem:[#allocation6 + $0x9e8] sm:$0xff] }
 0x5be   :  { %v13983_v4 = vcombine.low %v9637_v10, %v9641_v21 }
 0x5c0   :  { %11766 = vmatpush1.bf16.msra.mxu1 %v13671_v45 }
 0x5c1   :  { %11767 = vmatprep.subr.bf16.mxu1 %v13792_v49  ;;  %v9269_v49 = vpack.c.bf16 %v9257_v34, %v9257_v34 }
 0x5c4   :  { %11768 = vmatpush2.bf16.msra.mxu1 %v13791_v26 }
 0x5c5   :  { %11769 = vmatprep.subr.bf16.mxu1 %v13784_v54 }
 0x5c8   :  { %11770 = vmatpush2.bf16.msra.mxu1 %v13783_v15  ;;  %v9629_v15 = vld [vmem:[#allocation6 + $0x988] sm:$0xff] }
 0x5c9   :  { %11771 = vmatprep.subr.bf16.mxu1 %v13776_v60  ;;  %v9633_v60 = vld [vmem:[#allocation6 + $0x9a8] sm:$0xff] }
 0x5ca   :  { %v13976_v39 = vcombine.high %v9629_v15, %v9633_v60  ;;  %v13975_v17 = vcombine.low %v9629_v15, %v9633_v60  ;;  %v9581_v60 = vld [vmem:[#allocation6 + $0x808] sm:$0xff] }
 0x5cc   :  { %11772 = vmatpush2.bf16.msra.mxu1 %v13775_v18  ;;  %v9306_v18 = vpack.i.b16 %v9269_v49, %v9269_v49  ;;  %v9489_v49 = vld [vmem:[#allocation6 + $0x528] sm:$0xff] }
 0x5cd   :  { %11773 = vmatprep.subr.bf16.mxu1 %v13768_v30 }
 0x5ce   :  { %v9311_v19 = vrot.slane %v9306_v18, %v14779_v29 }
 0x5d0   :  { %11774 = vmatpush2.bf16.msra.mxu1 %v13767_v11  ;;  %v9207_v11 = vpack.c.bf16 %v14746_v35, %v14746_v35 }
 0x5d1   :  { %v9101_v12 = vpop.f32.mrf.mxu0  ;;  %11775 = vmatprep.subr.bf16.mxu1 %v13760_v48 }
 0x5d2   :  { %v9102_v25 = vadd.f32 %v9101_v12, %v14848_v37  ;;  %v13984_v37 = vcombine.high %v9637_v10, %v9641_v21  ;;  %v9621_v12 = vld [vmem:[#allocation6 + $0x948] sm:$0xff] }
 0x5d3   :  { %v9103_v47 = vpop.f32.mrf.mxu0 }
 0x5d4   :  { %11776 = vmatpush2.bf16.msra.mxu1 %v13759_v62  ;;  %v9104_v52 = vadd.f32 %v9103_v47, %v14851_v13  ;;  %v9304_v62 = vrot.slane %v9299_v57, %v14779_v29 }
 0x5d5   :  { %v9105_v6 = vpop.f32.mrf.mxu0  ;;  %11777 = vmatprep.subr.bf16.mxu1 %v13752_v33  ;;  %v9625_v33 = vld [vmem:[#allocation6 + $0x968] sm:$0xff] }
 0x5d6   :  { %v13968_v35 = vcombine.high %v9621_v12, %v9625_v33  ;;  %v13967_v8 = vcombine.low %v9621_v12, %v9625_v33 }
 0x5d7   :  { %v9106_v3 = vpop.f32.mrf.mxu0 }
 0x5d8   :  { %11778 = vmatpush2.bf16.msra.mxu1 %v13751_v27  ;;  %v9501_v27 = vld [vmem:[#allocation6 + $0x588] sm:$0xff] }
 0x5d9   :  { %v9183_v40 = vpop.f32.mrf.mxu0  ;;  %11779 = vmatprep.subr.bf16.mxu1 %v13744_v41  ;;  %v9505_v41 = vld [vmem:[#allocation6 + $0x5a8] sm:$0xff] }
 0x5da   :  { %v13848_v34 = vcombine.high %v9501_v27, %v9505_v41  ;;  %v13847_v58 = vcombine.low %v9501_v27, %v9505_v41  ;;  %v9685_v41 = vld [vmem:[#allocation6 + $0xb48] sm:$0xff] }
 0x5db   :  { %v9142_v14 = vpop.f32.mrf.mxu1  ;;  %v9185_v45 = vpop.f32.mrf.mxu0 }
 0x5dc   :  { %v9143_v42 = vadd.f32 %v9142_v14, %v9102_v25  ;;  %11780 = vmatpush2.bf16.msra.mxu1 %v13743_v1  ;;  %v13960_v1 = vcombine.high %v9613_v24, %v9617_v53  ;;  %v9609_v25 = vld [vmem:[#allocation6 + $0x8e8] sm:$0xff]  ;;  %v13959_v14 = vcombine.low %v9613_v24, %v9617_v53 }
 0x5dd   :  { %v9144_v23 = vpop.f32.mrf.mxu1  ;;  %v9187_v54 = vpop.f32.mrf.mxu0  ;;  %11781 = vmatprep.subr.bf16.mxu1 %v13736_v16  ;;  %v9497_v16 = vld [vmem:[#allocation6 + $0x568] sm:$0xff] }
 0x5de   :  { %v9184_v46 = vadd.f32 %v9183_v40, %v9143_v42  ;;  %v9145_v26 = vadd.f32 %v9144_v23, %v9104_v52  ;;  %v9493_v40 = vld [vmem:[#allocation6 + $0x548] sm:$0xff] }
 0x5df   :  { %v9146_v51 = vpop.f32.mrf.mxu1  ;;  %v9188_v30 = vpop.f32.mrf.mxu0  ;;  %v13840_v21 = vcombine.high %v9493_v40, %v9497_v16  ;;  %v9597_v52 = vld [vmem:[#allocation6 + $0x888] sm:$0xff] }
 0x5e0   :  { %v9212_v43 = vpack.c.bf16 %v9184_v46, %v9184_v46  ;;  %v9186_v13 = vadd.f32 %v9185_v45, %v9145_v26  ;;  %11782 = vmatpush2.bf16.msra.mxu1 %v13735_v32  ;;  %v9601_v42 = vld [vmem:[#allocation6 + $0x8a8] sm:$0xff]  ;;  %v13839_v32 = vcombine.low %v9493_v40, %v9497_v16 }
 0x5e1   :  { %v9147_v2 = vpop.f32.mrf.mxu1  ;;  %11833 = vmatprep.subr.bf16.mxu1 %v13984_v37  ;;  %v9485_v45 = vld [vmem:[#allocation6 + $0x508] sm:$0xff]  ;;  %v13944_v46 = vcombine.high %v9597_v52, %v9601_v42  ;;  %v13943_v37 = vcombine.low %v9597_v52, %v9601_v42 }
 0x5e2   :  { %v9224_v48 = vmax.bf16 %v9212_v43, %v9206_v0  ;;  %v9213_v20 = vpack.c.bf16 %v9186_v13, %v9186_v13  ;;  %v13832_v38 = vcombine.high %v9485_v45, %v9489_v49  ;;  %v9477_v26 = vld [vmem:[#allocation6 + $0x4c8] sm:$0xff]  ;;  %v13831_v57 = vcombine.low %v9485_v45, %v9489_v49 }
 0x5e3   :  { %11784 = vmatmul.mubr.bf16.vlgmr.msra.gmra.mxu1 %v14817_v50  ;;  %v9481_v54 = vld [vmem:[#allocation6 + $0x4e8] sm:$0xff] }
 0x5e4   :  { %v9230_v7 = vmax.bf16 %v9224_v48, %v14662_v61  ;;  %v9225_v22 = vmax.bf16 %v9213_v20, %v9207_v11  ;;  %11834 = vmatpush1.bf16.msra.mxu1 %v13983_v4  ;;  %v13824_v15 = vcombine.high %v9477_v26, %v9481_v54  ;;  %v9585_v0 = vld [vmem:[#allocation6 + $0x828] sm:$0xff]  ;;  %v13823_v30 = vcombine.low %v9477_v26, %v9481_v54 }
 0x5e5   :  { %11835 = vmatprep.subr.bf16.mxu1 %v13976_v39  ;;  %v9469_v43 = vld [vmem:[#allocation6 + $0x488] sm:$0xff]  ;;  %v13928_v2 = vcombine.high %v9581_v60, %v9585_v0 }
 0x5e6   :  { %v9231_v47 = vmax.bf16 %v9225_v22, %v14667_v36  ;;  %v9316_v9 = vadd.bf16 %v9304_v62, %v9230_v7  ;;  %v9605_v36 = vld [vmem:[#allocation6 + $0x8c8] sm:$0xff]  ;;  %v13927_v62 = vcombine.low %v9581_v60, %v9585_v0 }
 0x5e7   :  { %v13952_v10 = vcombine.high %v9605_v36, %v9609_v25  ;;  %v13951_v23 = vcombine.low %v9605_v36, %v9609_v25  ;;  %v9473_v13 = vld [vmem:[#allocation6 + $0x4a8] sm:$0xff] }
 0x5e8   :  { %v9317_v6 = vadd.bf16 %v9311_v19, %v9231_v47  ;;  %11836 = vmatpush1.bf16.msra.mxu1 %v13975_v17  ;;  %v14884_v3 = vmax.bf16 %v14371_v31, %v9316_v9  ;;  %v13816_v4 = vcombine.high %v9469_v43, %v9473_v13  ;;  %v9701_v11 = vld [vmem:[#allocation6 + $0xbc8] sm:$0xff]  ;;  %v13815_v12 = vcombine.low %v9469_v43, %v9473_v13 }
 0x5e9   :  { %11837 = vmatprep.subr.bf16.mxu1 %v13968_v35  ;;  %v9705_v48 = vld [vmem:[#allocation6 + $0xbe8] sm:$0xff] }
 0x5ea   :  { %v14881_v61 = vmax.bf16 %v14371_v31, %v9317_v6  ;;  %v9461_v20 = vld [vmem:[#allocation6 + $0x448] sm:$0xff]  ;;  %v14048_v33 = vcombine.high %v9701_v11, %v9705_v48  ;;  %v14047_v35 = vcombine.low %v9701_v11, %v9705_v48 }
 0x5eb   :  { %v9465_v39 = vld [vmem:[#allocation6 + $0x468] sm:$0xff] }
 0x5ec   :  { %11742 = vmatprep.mubr.bf16.mxu0 %v14881_v61  ;;  %11865 = vmatprep.mubr.bf16.mxu1 %v14881_v61  ;;  %v13808_v7 = vcombine.high %v9461_v20, %v9465_v39  ;;  %v9693_v22 = vld [vmem:[#allocation6 + $0xb88] sm:$0xff]  ;;  %v13807_v9 = vcombine.low %v9461_v20, %v9465_v39 }
 0x5ed   :  { %11743 = vmatmul.mubr.bf16.vlgmr.msra.gmra.mxu0 %v14884_v3  ;;  %11838 = vmatpush1.bf16.msra.mxu1 %v13967_v8  ;;  %v9697_v19 = vld [vmem:[#allocation6 + $0xba8] sm:$0xff] }
 0x5ee   :  { %11793 = vmatpush1.bf16.msra.mxu0 %v13855_v55  ;;  %11824 = vmatprep.mubr.bf16.mxu0 %v14854_v5  ;;  %v9593_v55 = vld [vmem:[#allocation6 + $0x868] sm:$0xff]  ;;  %v14040_v27 = vcombine.high %v9693_v22, %v9697_v19 }
 0x5ef   :  { %11794 = vmatprep.subr.bf16.mxu0 %v13848_v34  ;;  %11839 = vmatprep.subr.bf16.mxu1 %v13960_v1  ;;  %v13936_v51 = vcombine.high %v9589_v59, %v9593_v55  ;;  %v13935_v18 = vcombine.low %v9589_v59, %v9593_v55  ;;  %v9453_v17 = vld [vmem:[#allocation6 + $0x408] sm:$0xff]  ;;  %v14039_v34 = vcombine.low %v9693_v22, %v9697_v19 }
 0x5f0   :  { %v9457_v47 = vld [vmem:[#allocation6 + $0x428] sm:$0xff] }
 0x5f1   :  { %11840 = vmatpush1.bf16.msra.mxu1 %v13959_v14  ;;  %v13800_v6 = vcombine.high %v9453_v17, %v9457_v47  ;;  %v9689_v24 = vld [vmem:[#allocation6 + $0xb68] sm:$0xff]  ;;  %v13799_v1 = vcombine.low %v9453_v17, %v9457_v47  ;;  %v9510_v47 = vld [vmem:[#allocation6 + $0x5d0] sm:$0xff] }
 0x5f2   :  { %11795 = vmatpush1.bf16.msra.mxu0 %v13847_v58  ;;  %11841 = vmatprep.subr.bf16.mxu1 %v13952_v10  ;;  %v9573_v53 = vld [vmem:[#allocation6 + $0x7c8] sm:$0xff]  ;;  %v14032_v36 = vcombine.high %v9685_v41, %v9689_v24  ;;  %v14031_v10 = vcombine.low %v9685_v41, %v9689_v24 }
 0x5f3   :  { %11796 = vmatprep.subr.bf16.mxu0 %v13840_v21  ;;  %v9577_v8 = vld [vmem:[#allocation6 + $0x7e8] sm:$0xff] }
 0x5f4   :  { %v13920_v25 = vcombine.high %v9573_v53, %v9577_v8  ;;  %v9677_v40 = vld [vmem:[#allocation6 + $0xb08] sm:$0xff]  ;;  %v13919_v21 = vcombine.low %v9573_v53, %v9577_v8 }
 0x5f5   :  { %11842 = vmatpush1.bf16.msra.mxu1 %v13951_v23  ;;  %v9681_v16 = vld [vmem:[#allocation6 + $0xb28] sm:$0xff] }
 0x5f6   :  { %11797 = vmatpush1.bf16.msra.mxu0 %v13839_v32  ;;  %11843 = vmatprep.subr.bf16.mxu1 %v13944_v46  ;;  %v9565_v14 = vld [vmem:[#allocation6 + $0x788] sm:$0xff]  ;;  %v14024_v52 = vcombine.high %v9677_v40, %v9681_v16  ;;  %v14023_v46 = vcombine.low %v9677_v40, %v9681_v16 }
 0x5f7   :  { %11798 = vmatprep.subr.bf16.mxu0 %v13832_v38  ;;  %v9569_v58 = vld [vmem:[#allocation6 + $0x7a8] sm:$0xff] }
 0x5f8   :  { %v13912_v42 = vcombine.high %v9565_v14, %v9569_v58  ;;  %v9669_v45 = vld [vmem:[#allocation6 + $0xac8] sm:$0xff]  ;;  %v13911_v38 = vcombine.low %v9565_v14, %v9569_v58 }
 0x5f9   :  { %11844 = vmatpush1.bf16.msra.mxu1 %v13943_v37  ;;  %v9673_v49 = vld [vmem:[#allocation6 + $0xae8] sm:$0xff] }
 0x5fa   :  { %11799 = vmatpush1.bf16.msra.mxu0 %v13831_v57  ;;  %11845 = vmatprep.subr.bf16.mxu1 %v13936_v51  ;;  %v9557_v23 = vld [vmem:[#allocation6 + $0x748] sm:$0xff]  ;;  %v14016_v59 = vcombine.high %v9669_v45, %v9673_v49  ;;  %v14015_v51 = vcombine.low %v9669_v45, %v9673_v49  ;;  %v9382_v45 = vld [vmem:[#allocation6 + $0x1d0] sm:$0xff] }
 0x5fb   :  { %11800 = vmatprep.subr.bf16.mxu0 %v13824_v15  ;;  %v9561_v32 = vld [vmem:[#allocation6 + $0x768] sm:$0xff]  ;;  %v9386_v49 = vld [vmem:[#allocation6 + $0x1f0] sm:$0xff] }
 0x5fc   :  { %v13904_v55 = vcombine.high %v9557_v23, %v9561_v32  ;;  %v9661_v26 = vld [vmem:[#allocation6 + $0xa88] sm:$0xff]  ;;  %v13903_v15 = vcombine.low %v9557_v23, %v9561_v32 }
 0x5fd   :  { %11846 = vmatpush1.bf16.msra.mxu1 %v13935_v18  ;;  %v9665_v54 = vld [vmem:[#allocation6 + $0xaa8] sm:$0xff] }
 0x5fe   :  { %11801 = vmatpush1.bf16.msra.mxu0 %v13823_v30  ;;  %11847 = vmatprep.subr.bf16.mxu1 %v13928_v2  ;;  %v9549_v37 = vld [vmem:[#allocation6 + $0x708] sm:$0xff]  ;;  %v14008_v60 = vcombine.high %v9661_v26, %v9665_v54  ;;  %v14007_v2 = vcombine.low %v9661_v26, %v9665_v54  ;;  %v9486_v26 = vld [vmem:[#allocation6 + $0x510] sm:$0xff] }
 0x5ff   :  { %11802 = vmatprep.subr.bf16.mxu0 %v13816_v4  ;;  %v9553_v57 = vld [vmem:[#allocation6 + $0x728] sm:$0xff]  ;;  %v9490_v54 = vld [vmem:[#allocation6 + $0x530] sm:$0xff] }
 0x600   :  { %v13896_v0 = vcombine.high %v9549_v37, %v9553_v57  ;;  %v9653_v43 = vld [vmem:[#allocation6 + $0xa48] sm:$0xff]  ;;  %v13895_v4 = vcombine.low %v9549_v37, %v9553_v57  ;;  %v13729_v57 = vcombine.low %v9382_v45, %v9386_v49 }
 0x601   :  { %11848 = vmatpush1.bf16.msra.mxu1 %v13927_v62  ;;  %v9657_v13 = vld [vmem:[#allocation6 + $0xa68] sm:$0xff] }
 0x602   :  { %11803 = vmatpush1.bf16.msra.mxu0 %v13815_v12  ;;  %11849 = vmatprep.subr.bf16.mxu1 %v14048_v33  ;;  %v9541_v18 = vld [vmem:[#allocation6 + $0x6c8] sm:$0xff]  ;;  %v14000_v11 = vcombine.high %v9653_v43, %v9657_v13  ;;  %v13999_v33 = vcombine.low %v9653_v43, %v9657_v13  ;;  %v9366_v43 = vld [vmem:[#allocation6 + $0x150] sm:$0xff] }
 0x603   :  { %11804 = vmatprep.subr.bf16.mxu0 %v13808_v7  ;;  %v9545_v30 = vld [vmem:[#allocation6 + $0x6e8] sm:$0xff]  ;;  %v9370_v13 = vld [vmem:[#allocation6 + $0x170] sm:$0xff] }
 0x604   :  { %v13888_v48 = vcombine.high %v9541_v18, %v9545_v30  ;;  %v9645_v20 = vld [vmem:[#allocation6 + $0xa08] sm:$0xff]  ;;  %v13887_v22 = vcombine.low %v9541_v18, %v9545_v30  ;;  %v13833_v18 = vcombine.low %v9486_v26, %v9490_v54 }
 0x605   :  { %11850 = vmatpush2.bf16.msra.mxu1 %v14047_v35  ;;  %v9649_v39 = vld [vmem:[#allocation6 + $0xa28] sm:$0xff]  ;;  %v9514_v35 = vld [vmem:[#allocation6 + $0x5f0] sm:$0xff] }
 0x606   :  { %11805 = vmatpush1.bf16.msra.mxu0 %v13807_v9  ;;  %11851 = vmatprep.subr.bf16.mxu1 %v14040_v27  ;;  %v9533_v62 = vld [vmem:[#allocation6 + $0x688] sm:$0xff]  ;;  %v13992_v19 = vcombine.high %v9645_v20, %v9649_v39  ;;  %v13991_v41 = vcombine.low %v9645_v20, %v9649_v39  ;;  %v13858_v8 = vcombine.high %v9510_v47, %v9514_v35  ;;  %v9358_v20 = vld [vmem:[#allocation6 + $0x110] sm:$0xff] }
 0x607   :  { %11806 = vmatprep.subr.bf16.mxu0 %v13800_v6  ;;  %v9537_v12 = vld [vmem:[#allocation6 + $0x6a8] sm:$0xff]  ;;  %v13857_v14 = vcombine.low %v9510_v47, %v9514_v35  ;;  %v9362_v39 = vld [vmem:[#allocation6 + $0x130] sm:$0xff] }
 0x608   :  { %v13880_v17 = vcombine.high %v9533_v62, %v9537_v12  ;;  %v9525_v27 = vld [vmem:[#allocation6 + $0x648] sm:$0xff]  ;;  %v13879_v53 = vcombine.low %v9533_v62, %v9537_v12  ;;  %v13713_v12 = vcombine.low %v9366_v43, %v9370_v13  ;;  %v9350_v47 = vld [vmem:[#allocation6 + $0xd0] sm:$0xff] }
 0x609   :  { %11852 = vmatpush2.bf16.msra.mxu1 %v14039_v34  ;;  %v9529_v6 = vld [vmem:[#allocation6 + $0x668] sm:$0xff]  ;;  %v9354_v35 = vld [vmem:[#allocation6 + $0xf0] sm:$0xff] }
 0x60a   :  { %11807 = vmatpush1.bf16.msra.mxu0 %v13799_v1  ;;  %11853 = vmatprep.subr.bf16.mxu1 %v14032_v36  ;;  %v13872_v34 = vcombine.high %v9525_v27, %v9529_v6  ;;  %v9502_v1 = vld [vmem:[#allocation6 + $0x590] sm:$0xff]  ;;  %v9517_v40 = vld [vmem:[#allocation6 + $0x608] sm:$0xff]  ;;  %v13871_v58 = vcombine.low %v9525_v27, %v9529_v6  ;;  %v13705_v6 = vcombine.low %v9358_v20, %v9362_v39 }
 0x60b   :  { %11808 = vmatprep.subr.bf16.mxu0 %v13920_v25  ;;  %v9506_v36 = vld [vmem:[#allocation6 + $0x5b0] sm:$0xff]  ;;  %v9521_v16 = vld [vmem:[#allocation6 + $0x628] sm:$0xff] }
 0x60c   :  { %v13849_v23 = vcombine.low %v9502_v1, %v9506_v36  ;;  %v13863_v32 = vcombine.low %v9517_v40, %v9521_v16 }
 0x60d   :  { %11854 = vmatpush2.bf16.msra.mxu1 %v14031_v10  ;;  %v13850_v10 = vcombine.high %v9502_v1, %v9506_v36  ;;  %v9346_v1 = vld [vmem:[#allocation6 + $0xb0] sm:$0xff] }
 0x60e   :  { %11809 = vmatpush2.bf16.msra.mxu0 %v13919_v21  ;;  %11855 = vmatprep.subr.bf16.mxu1 %v14024_v52  ;;  %v13864_v21 = vcombine.high %v9517_v40, %v9521_v16  ;;  %v9494_v52 = vld [vmem:[#allocation6 + $0x550] sm:$0xff] }
 0x60f   :  { %11810 = vmatprep.subr.bf16.mxu0 %v13912_v42  ;;  %v9498_v42 = vld [vmem:[#allocation6 + $0x570] sm:$0xff] }
 0x610   :  { %v13841_v37 = vcombine.low %v9494_v52, %v9498_v42 }
 0x611   :  { %11856 = vmatpush2.bf16.msra.mxu1 %v14023_v46  ;;  %v13842_v46 = vcombine.high %v9494_v52, %v9498_v42 }
 0x612   :  { %11811 = vmatpush2.bf16.msra.mxu0 %v13911_v38  ;;  %11857 = vmatprep.subr.bf16.mxu1 %v14016_v59  ;;  %v13730_v38 = vcombine.high %v9382_v45, %v9386_v49  ;;  %v9374_v59 = vld [vmem:[#allocation6 + $0x190] sm:$0xff] }
 0x613   :  { %11812 = vmatprep.subr.bf16.mxu0 %v13904_v55  ;;  %v9378_v55 = vld [vmem:[#allocation6 + $0x1b0] sm:$0xff] }
 0x614   :  { %v13721_v30 = vcombine.low %v9374_v59, %v9378_v55 }
 0x615   :  { %11858 = vmatpush2.bf16.msra.mxu1 %v14015_v51  ;;  %v13722_v51 = vcombine.high %v9374_v59, %v9378_v55 }
 0x616   :  { %11813 = vmatpush2.bf16.msra.mxu0 %v13903_v15  ;;  %11859 = vmatprep.subr.bf16.mxu1 %v14008_v60  ;;  %v13834_v15 = vcombine.high %v9486_v26, %v9490_v54  ;;  %v9478_v60 = vld [vmem:[#allocation6 + $0x4d0] sm:$0xff] }
 0x617   :  { %11814 = vmatprep.subr.bf16.mxu0 %v13896_v0  ;;  %v9482_v0 = vld [vmem:[#allocation6 + $0x4f0] sm:$0xff] }
 0x618   :  { %v13825_v62 = vcombine.low %v9478_v60, %v9482_v0 }
 0x619   :  { %11860 = vmatpush2.bf16.msra.mxu1 %v14007_v2  ;;  %v14893_v7 = vpop.f32.mrf.mxu0  ;;  %v13826_v2 = vcombine.high %v9478_v60, %v9482_v0 }
 0x61a   :  { %11815 = vmatpush2.bf16.msra.mxu0 %v13895_v4  ;;  %11861 = vmatprep.subr.bf16.mxu1 %v14000_v11  ;;  %v13714_v4 = vcombine.high %v9366_v43, %v9370_v13  ;;  %v9470_v11 = vld [vmem:[#allocation6 + $0x490] sm:$0xff] }
 0x61b   :  { %11816 = vmatprep.subr.bf16.mxu0 %v13888_v48  ;;  %v14895_v9 = vpop.f32.mrf.mxu0  ;;  %v9474_v48 = vld [vmem:[#allocation6 + $0x4b0] sm:$0xff] }
 0x61c   :  { %v13817_v27 = vcombine.low %v9470_v11, %v9474_v48 }
 0x61d   :  { %11862 = vmatpush2.bf16.msra.mxu1 %v13999_v33  ;;  %v11666_v24 = vpop.f32.mrf.mxu0  ;;  %v13818_v33 = vcombine.high %v9470_v11, %v9474_v48 }
 0x61e   :  { %11817 = vmatpush2.bf16.msra.mxu0 %v13887_v22  ;;  %11863 = vmatprep.subr.bf16.mxu1 %v13992_v19  ;;  %v13706_v22 = vcombine.high %v9358_v20, %v9362_v39  ;;  %v9462_v19 = vld [vmem:[#allocation6 + $0x450] sm:$0xff]  ;;  %v13698_v24 = vcombine.high %v9350_v47, %v9354_v35 }
 0x61f   :  { %11818 = vmatprep.subr.bf16.mxu0 %v13880_v17  ;;  %v11667_v25 = vpop.f32.mrf.mxu0  ;;  %v9466_v17 = vld [vmem:[#allocation6 + $0x470] sm:$0xff] }
 0x620   :  { %v13809_v36 = vcombine.low %v9462_v19, %v9466_v17  ;;  %v13697_v25 = vcombine.low %v9350_v47, %v9354_v35 }
 0x621   :  { %11864 = vmatpush2.bf16.msra.mxu1 %v13991_v41  ;;  %v13810_v41 = vcombine.high %v9462_v19, %v9466_v17 }
 0x622   :  { %11819 = vmatpush2.bf16.msra.mxu0 %v13879_v53  ;;  %11915 = vmatprep.subr.bf16.mxu1 %v13858_v8  ;;  %v9454_v53 = vld [vmem:[#allocation6 + $0x410] sm:$0xff] }
 0x623   :  { %11820 = vmatprep.subr.bf16.mxu0 %v13872_v34  ;;  %v9458_v8 = vld [vmem:[#allocation6 + $0x430] sm:$0xff] }
 0x624   :  { %11866 = vmatmul.mubr.bf16.vlgmr.msra.gmra.mxu1 %v14884_v3  ;;  %v9342_v34 = vld [vmem:[#allocation6 + $0x90] sm:$0xff]  ;;  %v13802_v40 = vcombine.high %v9454_v53, %v9458_v8  ;;  %v13801_v52 = vcombine.low %v9454_v53, %v9458_v8 }
 0x625   :  { %11916 = vmatpush1.bf16.msra.mxu1 %v13857_v14  ;;  %11947 = vmatprep.mubr.bf16.mxu1 %v14854_v5  ;;  %v13690_v16 = vcombine.high %v9342_v34, %v9346_v1  ;;  %v9574_v14 = vld [vmem:[#allocation6 + $0x7d0] sm:$0xff]  ;;  %v13689_v42 = vcombine.low %v9342_v34, %v9346_v1 }
 0x626   :  { %11821 = vmatpush2.bf16.msra.mxu0 %v13871_v58  ;;  %11917 = vmatprep.subr.bf16.mxu1 %v13850_v10  ;;  %v9578_v58 = vld [vmem:[#allocation6 + $0x7f0] sm:$0xff] }
 0x627   :  { %11822 = vmatprep.subr.bf16.mxu0 %v13864_v21  ;;  %v9334_v10 = vld [vmem:[#allocation6 + $0x50] sm:$0xff]  ;;  %v13922_v45 = vcombine.high %v9574_v14, %v9578_v58  ;;  %v13921_v59 = vcombine.low %v9574_v14, %v9578_v58 }
 0x628   :  { %v9338_v21 = vld [vmem:[#allocation6 + $0x70] sm:$0xff] }
 0x629   :  { %11918 = vmatpush1.bf16.msra.mxu1 %v13849_v23  ;;  %v13682_v49 = vcombine.high %v9334_v10, %v9338_v21  ;;  %v9566_v23 = vld [vmem:[#allocation6 + $0x790] sm:$0xff]  ;;  %v13681_v55 = vcombine.low %v9334_v10, %v9338_v21 }
 0x62a   :  { %11823 = vmatpush2.bf16.msra.mxu0 %v13863_v32  ;;  %11919 = vmatprep.subr.bf16.mxu1 %v13842_v46  ;;  %v9570_v32 = vld [vmem:[#allocation6 + $0x7b0] sm:$0xff] }
 0x62b   :  { %11874 = vmatprep.subr.bf16.mxu0 %v13730_v38  ;;  %v9326_v46 = vld [vmem:[#allocation6 + $0x10] sm:$0xff]  ;;  %v13914_v26 = vcombine.high %v9566_v23, %v9570_v32  ;;  %v13913_v60 = vcombine.low %v9566_v23, %v9570_v32 }
 0x62c   :  { %v9330_v38 = vld [vmem:[#allocation6 + $0x30] sm:$0xff] }
 0x62d   :  { %11825 = vmatmul.mubr.bf16.vlgmr.msra.gmra.mxu0 %v14857_v44  ;;  %11920 = vmatpush1.bf16.msra.mxu1 %v13841_v37  ;;  %v13674_v54 = vcombine.high %v9326_v46, %v9330_v38  ;;  %v9558_v37 = vld [vmem:[#allocation6 + $0x750] sm:$0xff]  ;;  %v13673_v0 = vcombine.low %v9326_v46, %v9330_v38 }
 0x62e   :  { %11875 = vmatpush1.bf16.msra.mxu0 %v13729_v57  ;;  %11906 = vmatprep.mubr.bf16.mxu0 %v14793_v63  ;;  %v9562_v57 = vld [vmem:[#allocation6 + $0x770] sm:$0xff] }
 0x62f   :  { %11876 = vmatprep.subr.bf16.mxu0 %v13722_v51  ;;  %11921 = vmatprep.subr.bf16.mxu1 %v13834_v15  ;;  %v9446_v51 = vld [vmem:[#allocation6 + $0x3d0] sm:$0xff]  ;;  %v13906_v43 = vcombine.high %v9558_v37, %v9562_v57  ;;  %v13905_v11 = vcombine.low %v9558_v37, %v9562_v57 }
 0x630   :  { %v9450_v15 = vld [vmem:[#allocation6 + $0x3f0] sm:$0xff] }
 0x631   :  { %11922 = vmatpush1.bf16.msra.mxu1 %v13833_v18  ;;  %v13794_v13 = vcombine.high %v9446_v51, %v9450_v15  ;;  %v9550_v18 = vld [vmem:[#allocation6 + $0x710] sm:$0xff]  ;;  %v13793_v48 = vcombine.low %v9446_v51, %v9450_v15 }
 0x632   :  { %11877 = vmatpush1.bf16.msra.mxu0 %v13721_v30  ;;  %11923 = vmatprep.subr.bf16.mxu1 %v13826_v2  ;;  %v9554_v30 = vld [vmem:[#allocation6 + $0x730] sm:$0xff] }
 0x633   :  { %11878 = vmatprep.subr.bf16.mxu0 %v13714_v4  ;;  %v9438_v2 = vld [vmem:[#allocation6 + $0x390] sm:$0xff]  ;;  %v13898_v20 = vcombine.high %v9550_v18, %v9554_v30  ;;  %v13897_v19 = vcombine.low %v9550_v18, %v9554_v30 }
 0x634   :  { %v9442_v4 = vld [vmem:[#allocation6 + $0x3b0] sm:$0xff] }
 0x635   :  { %11924 = vmatpush1.bf16.msra.mxu1 %v13825_v62  ;;  %v13786_v39 = vcombine.high %v9438_v2, %v9442_v4  ;;  %v9542_v62 = vld [vmem:[#allocation6 + $0x6d0] sm:$0xff]  ;;  %v13785_v17 = vcombine.low %v9438_v2, %v9442_v4 }
 0x636   :  { %11879 = vmatpush1.bf16.msra.mxu0 %v13713_v12  ;;  %11925 = vmatprep.subr.bf16.mxu1 %v13818_v33  ;;  %v9546_v12 = vld [vmem:[#allocation6 + $0x6f0] sm:$0xff] }
 0x637   :  { %11880 = vmatprep.subr.bf16.mxu0 %v13706_v22  ;;  %v9430_v33 = vld [vmem:[#allocation6 + $0x350] sm:$0xff]  ;;  %v13890_v47 = vcombine.high %v9542_v62, %v9546_v12  ;;  %v13889_v53 = vcombine.low %v9542_v62, %v9546_v12 }
 0x638   :  { %v9434_v22 = vld [vmem:[#allocation6 + $0x370] sm:$0xff] }
 0x639   :  { %11926 = vmatpush1.bf16.msra.mxu1 %v13817_v27  ;;  %v13778_v35 = vcombine.high %v9430_v33, %v9434_v22  ;;  %v9534_v27 = vld [vmem:[#allocation6 + $0x690] sm:$0xff]  ;;  %v13777_v8 = vcombine.low %v9430_v33, %v9434_v22 }
 0x63a   :  { %11881 = vmatpush1.bf16.msra.mxu0 %v13705_v6  ;;  %11927 = vmatprep.subr.bf16.mxu1 %v13810_v41  ;;  %v9538_v6 = vld [vmem:[#allocation6 + $0x6b0] sm:$0xff] }
 0x63b   :  { %11882 = vmatprep.subr.bf16.mxu0 %v13698_v24  ;;  %v9422_v41 = vld [vmem:[#allocation6 + $0x310] sm:$0xff]  ;;  %v13882_v34 = vcombine.high %v9534_v27, %v9538_v6  ;;  %v13881_v14 = vcombine.low %v9534_v27, %v9538_v6  ;;  %v9359_v6 = vld [vmem:[#allocation6 + $0x118] sm:$0xff] }
 0x63c   :  { %v9426_v24 = vld [vmem:[#allocation6 + $0x330] sm:$0xff] }
 0x63d   :  { %11928 = vmatpush1.bf16.msra.mxu1 %v13809_v36  ;;  %v13770_v1 = vcombine.high %v9422_v41, %v9426_v24  ;;  %v9526_v36 = vld [vmem:[#allocation6 + $0x650] sm:$0xff]  ;;  %v13769_v58 = vcombine.low %v9422_v41, %v9426_v24  ;;  %v9363_v41 = vld [vmem:[#allocation6 + $0x138] sm:$0xff] }
 0x63e   :  { %11883 = vmatpush1.bf16.msra.mxu0 %v13697_v25  ;;  %11929 = vmatprep.subr.bf16.mxu1 %v13802_v40  ;;  %v9530_v25 = vld [vmem:[#allocation6 + $0x670] sm:$0xff] }
 0x63f   :  { %11884 = vmatprep.subr.bf16.mxu0 %v13690_v16  ;;  %v9414_v40 = vld [vmem:[#allocation6 + $0x2d0] sm:$0xff]  ;;  %v13874_v10 = vcombine.high %v9526_v36, %v9530_v25  ;;  %v13873_v23 = vcombine.low %v9526_v36, %v9530_v25  ;;  %v9355_v36 = vld [vmem:[#allocation6 + $0xf8] sm:$0xff] }
 0x640   :  { %v9418_v16 = vld [vmem:[#allocation6 + $0x2f0] sm:$0xff] }
 0x641   :  { %11930 = vmatpush1.bf16.msra.mxu1 %v13801_v52  ;;  %v13762_v21 = vcombine.high %v9414_v40, %v9418_v16  ;;  %v9518_v52 = vld [vmem:[#allocation6 + $0x610] sm:$0xff]  ;;  %v13761_v32 = vcombine.low %v9414_v40, %v9418_v16  ;;  %v13707_v16 = vcombine.low %v9359_v6, %v9363_v41 }
 0x642   :  { %11885 = vmatpush1.bf16.msra.mxu0 %v13689_v42  ;;  %11931 = vmatprep.subr.bf16.mxu1 %v13922_v45  ;;  %v9522_v42 = vld [vmem:[#allocation6 + $0x630] sm:$0xff] }
 0x643   :  { %11886 = vmatprep.subr.bf16.mxu0 %v13682_v49  ;;  %v9406_v45 = vld [vmem:[#allocation6 + $0x290] sm:$0xff]  ;;  %v13866_v46 = vcombine.high %v9518_v52, %v9522_v42  ;;  %v13865_v37 = vcombine.low %v9518_v52, %v9522_v42  ;;  %v9347_v52 = vld [vmem:[#allocation6 + $0xb8] sm:$0xff] }
 0x644   :  { %v9410_v49 = vld [vmem:[#allocation6 + $0x2b0] sm:$0xff] }
 0x645   :  { %11932 = vmatpush2.bf16.msra.mxu1 %v13921_v59  ;;  %v13754_v38 = vcombine.high %v9406_v45, %v9410_v49  ;;  %v9383_v59 = vld [vmem:[#allocation6 + $0x1d8] sm:$0xff]  ;;  %v13753_v57 = vcombine.low %v9406_v45, %v9410_v49  ;;  %v9642_v62 = vld [vmem:[#allocation6 + $0x9f0] sm:$0xff] }
 0x646   :  { %11887 = vmatpush1.bf16.msra.mxu0 %v13681_v55  ;;  %11933 = vmatprep.subr.bf16.mxu1 %v13914_v26  ;;  %v9387_v55 = vld [vmem:[#allocation6 + $0x1f8] sm:$0xff]  ;;  %v9398_v26 = vld [vmem:[#allocation6 + $0x250] sm:$0xff] }
 0x647   :  { %11888 = vmatprep.subr.bf16.mxu0 %v13674_v54  ;;  %v9402_v54 = vld [vmem:[#allocation6 + $0x270] sm:$0xff]  ;;  %v13732_v51 = vcombine.high %v9383_v59, %v9387_v55  ;;  %v13731_v18 = vcombine.low %v9383_v59, %v9387_v55  ;;  %v9339_v59 = vld [vmem:[#allocation6 + $0x78] sm:$0xff] }
 0x648   :  { %v13746_v15 = vcombine.high %v9398_v26, %v9402_v54  ;;  %v13745_v30 = vcombine.low %v9398_v26, %v9402_v54  ;;  %v9634_v27 = vld [vmem:[#allocation6 + $0x9b0] sm:$0xff] }
 0x649   :  { %11934 = vmatpush2.bf16.msra.mxu1 %v13913_v60  ;;  %v9375_v60 = vld [vmem:[#allocation6 + $0x198] sm:$0xff]  ;;  %v9622_v25 = vld [vmem:[#allocation6 + $0x950] sm:$0xff] }
 0x64a   :  { %11889 = vmatpush1.bf16.msra.mxu0 %v13673_v0  ;;  %11935 = vmatprep.subr.bf16.mxu1 %v13906_v43  ;;  %v9379_v0 = vld [vmem:[#allocation6 + $0x1b8] sm:$0xff]  ;;  %v9390_v43 = vld [vmem:[#allocation6 + $0x210] sm:$0xff] }
 0x64b   :  { %11890 = vmatprep.subr.bf16.mxu0 %v13794_v13  ;;  %v9394_v13 = vld [vmem:[#allocation6 + $0x230] sm:$0xff]  ;;  %v13724_v2 = vcombine.high %v9375_v60, %v9379_v0  ;;  %v13723_v12 = vcombine.low %v9375_v60, %v9379_v0  ;;  %v9331_v60 = vld [vmem:[#allocation6 + $0x38] sm:$0xff] }
 0x64c   :  { %v13738_v4 = vcombine.high %v9390_v43, %v9394_v13  ;;  %v13737_v22 = vcombine.low %v9390_v43, %v9394_v13  ;;  %v9626_v40 = vld [vmem:[#allocation6 + $0x970] sm:$0xff] }
 0x64d   :  { %11936 = vmatpush2.bf16.msra.mxu1 %v13905_v11  ;;  %v9367_v11 = vld [vmem:[#allocation6 + $0x158] sm:$0xff]  ;;  %v9614_v42 = vld [vmem:[#allocation6 + $0x910] sm:$0xff] }
 0x64e   :  { %11891 = vmatpush2.bf16.msra.mxu0 %v13793_v48  ;;  %11937 = vmatprep.subr.bf16.mxu1 %v13898_v20  ;;  %v9371_v48 = vld [vmem:[#allocation6 + $0x178] sm:$0xff]  ;;  %v9618_v45 = vld [vmem:[#allocation6 + $0x930] sm:$0xff] }
 0x64f   :  { %11892 = vmatprep.subr.bf16.mxu0 %v13786_v39  ;;  %v9638_v39 = vld [vmem:[#allocation6 + $0x9d0] sm:$0xff]  ;;  %v13715_v24 = vcombine.low %v9367_v11, %v9371_v48 }
 0x650   :  { %v9606_v55 = vld [vmem:[#allocation6 + $0x8d0] sm:$0xff] }
 0x651   :  { %11938 = vmatpush2.bf16.msra.mxu1 %v13897_v19  ;;  %v13716_v19 = vcombine.high %v9367_v11, %v9371_v48  ;;  %v9610_v26 = vld [vmem:[#allocation6 + $0x8f0] sm:$0xff]  ;;  %v9451_v11 = vld [vmem:[#allocation6 + $0x3f8] sm:$0xff] }
 0x652   :  { %11893 = vmatpush2.bf16.msra.mxu0 %v13785_v17  ;;  %11939 = vmatprep.subr.bf16.mxu1 %v13890_v47  ;;  %v13986_v17 = vcombine.high %v9638_v39, %v9642_v62  ;;  %v9630_v47 = vld [vmem:[#allocation6 + $0x990] sm:$0xff] }
 0x653   :  { %11894 = vmatprep.subr.bf16.mxu0 %v13778_v35  ;;  %v9598_v0 = vld [vmem:[#allocation6 + $0x890] sm:$0xff] }
 0x654   :  { %v9602_v43 = vld [vmem:[#allocation6 + $0x8b0] sm:$0xff] }
 0x655   :  { %11940 = vmatpush2.bf16.msra.mxu1 %v13889_v53  ;;  %v9590_v48 = vld [vmem:[#allocation6 + $0x850] sm:$0xff] }
 0x656   :  { %11895 = vmatpush2.bf16.msra.mxu0 %v13777_v8  ;;  %11941 = vmatprep.subr.bf16.mxu1 %v13882_v34  ;;  %v13985_v8 = vcombine.low %v9638_v39, %v9642_v62  ;;  %v13708_v34 = vcombine.high %v9359_v6, %v9363_v41  ;;  %v9594_v39 = vld [vmem:[#allocation6 + $0x870] sm:$0xff] }
 0x657   :  { %11896 = vmatprep.subr.bf16.mxu0 %v13770_v1  ;;  %v9351_v1 = vld [vmem:[#allocation6 + $0xd8] sm:$0xff]  ;;  %v13937_v41 = vcombine.low %v9590_v48, %v9594_v39 }
 0x658   :  { %v13699_v49 = vcombine.low %v9351_v1, %v9355_v36 }
 0x659   :  { %11942 = vmatpush2.bf16.msra.mxu1 %v13881_v14  ;;  %v13977_v14 = vcombine.low %v9630_v47, %v9634_v27 }
 0x65a   :  { %11897 = vmatpush2.bf16.msra.mxu0 %v13769_v58  ;;  %11943 = vmatprep.subr.bf16.mxu1 %v13874_v10  ;;  %v13700_v58 = vcombine.high %v9351_v1, %v9355_v36  ;;  %v13970_v10 = vcombine.high %v9622_v25, %v9626_v40  ;;  %v9706_v1 = vld [vmem:[#allocation6 + $0xbf0] sm:$0xff] }
 0x65b   :  { %11898 = vmatprep.subr.bf16.mxu0 %v13762_v21  ;;  %v9343_v21 = vld [vmem:[#allocation6 + $0x98] sm:$0xff] }
 0x65c   :  { %v13691_v54 = vcombine.low %v9343_v21, %v9347_v52 }
 0x65d   :  { %11944 = vmatpush2.bf16.msra.mxu1 %v13873_v23  ;;  %v13969_v23 = vcombine.low %v9622_v25, %v9626_v40 }
 0x65e   :  { %11899 = vmatpush2.bf16.msra.mxu0 %v13761_v32  ;;  %11945 = vmatprep.subr.bf16.mxu1 %v13866_v46  ;;  %v13692_v32 = vcombine.high %v9343_v21, %v9347_v52  ;;  %v13962_v46 = vcombine.high %v9614_v42, %v9618_v45  ;;  %v9698_v21 = vld [vmem:[#allocation6 + $0xbb0] sm:$0xff] }
 0x65f   :  { %11900 = vmatprep.subr.bf16.mxu0 %v13754_v38  ;;  %v9335_v38 = vld [vmem:[#allocation6 + $0x58] sm:$0xff] }
 0x660   :  { %v13683_v13 = vcombine.low %v9335_v38, %v9339_v59 }
 0x661   :  { %11946 = vmatpush2.bf16.msra.mxu1 %v13865_v37  ;;  %v13961_v37 = vcombine.low %v9614_v42, %v9618_v45 }
 0x662   :  { %11901 = vmatpush2.bf16.msra.mxu0 %v13753_v57  ;;  %11997 = vmatprep.subr.bf16.mxu1 %v13732_v51  ;;  %v13684_v57 = vcombine.high %v9335_v38, %v9339_v59  ;;  %v13954_v51 = vcombine.high %v9606_v55, %v9610_v26  ;;  %v9690_v38 = vld [vmem:[#allocation6 + $0xb70] sm:$0xff] }
 0x663   :  { %11902 = vmatprep.subr.bf16.mxu0 %v13746_v15  ;;  %v14902_v20 = vpop.f32.mrf.mxu1  ;;  %v9327_v15 = vld [vmem:[#allocation6 + $0x18] sm:$0xff] }
 0x664   :  { %11948 = vmatmul.mubr.bf16.vlgmr.msra.gmra.mxu1 %v14857_v44  ;;  %v13675_v62 = vcombine.low %v9327_v15, %v9331_v60 }
 0x665   :  { %11998 = vmatpush1.bf16.msra.mxu1 %v13731_v18  ;;  %12029 = vmatprep.mubr.bf16.mxu1 %v14793_v63  ;;  %v14905_v33 = vpop.f32.mrf.mxu1  ;;  %v13978_v63 = vcombine.high %v9630_v47, %v9634_v27  ;;  %v13953_v18 = vcombine.low %v9606_v55, %v9610_v26  ;;  %v9443_v47 = vld [vmem:[#allocation6 + $0x3b8] sm:$0xff]  ;;  %v9586_v27 = vld [vmem:[#allocation6 + $0x830] sm:$0xff] }
 0x666   :  { %11903 = vmatpush2.bf16.msra.mxu0 %v13745_v30  ;;  %11999 = vmatprep.subr.bf16.mxu1 %v13724_v2  ;;  %v13676_v30 = vcombine.high %v9327_v15, %v9331_v60  ;;  %v13946_v2 = vcombine.high %v9598_v0, %v9602_v43  ;;  %v9682_v15 = vld [vmem:[#allocation6 + $0xb30] sm:$0xff] }
 0x667   :  { %11904 = vmatprep.subr.bf16.mxu0 %v13738_v4  ;;  %v11707_v35 = vpop.f32.mrf.mxu1  ;;  %v9447_v4 = vld [vmem:[#allocation6 + $0x3d8] sm:$0xff] }
 0x668   :  { %v9582_v35 = vld [vmem:[#allocation6 + $0x810] sm:$0xff]  ;;  %v13795_v6 = vcombine.low %v9447_v4, %v9451_v11 }
 0x669   :  { %12000 = vmatpush1.bf16.msra.mxu1 %v13723_v12  ;;  %v11708_v53 = vpop.f32.mrf.mxu1  ;;  %v13945_v12 = vcombine.low %v9598_v0, %v9602_v43  ;;  %v13929_v25 = vcombine.low %v9582_v35, %v9586_v27 }
 0x66a   :  { %11905 = vmatpush2.bf16.msra.mxu0 %v13737_v22  ;;  %12001 = vmatprep.subr.bf16.mxu1 %v13716_v19  ;;  %v13796_v22 = vcombine.high %v9447_v4, %v9451_v11  ;;  %v13938_v19 = vcombine.high %v9590_v48, %v9594_v39  ;;  %v13930_v53 = vcombine.high %v9582_v35, %v9586_v27  ;;  %v9674_v4 = vld [vmem:[#allocation6 + $0xaf0] sm:$0xff] }
 0x66b   :  { %11956 = vmatprep.subr.bf16.mxu0 %v13986_v17  ;;  %v9439_v17 = vld [vmem:[#allocation6 + $0x398] sm:$0xff] }
 0x66c   :  { %v13787_v36 = vcombine.low %v9439_v17, %v9443_v47 }
 0x66d   :  { %11907 = vmatmul.mubr.bf16.vlgmr.msra.gmra.mxu0 %v14817_v50  ;;  %12002 = vmatpush1.bf16.msra.mxu1 %v13715_v24  ;;  %v13788_v24 = vcombine.high %v9439_v17, %v9443_v47  ;;  %v9666_v17 = vld [vmem:[#allocation6 + $0xab0] sm:$0xff] }
 0x66e   :  { %11957 = vmatpush1.bf16.msra.mxu0 %v13985_v8  ;;  %11988 = vmatprep.mubr.bf16.mxu0 %v14881_v61  ;;  %v9431_v8 = vld [vmem:[#allocation6 + $0x358] sm:$0xff] }
 0x66f   :  { %11958 = vmatprep.subr.bf16.mxu0 %v13978_v63  ;;  %12003 = vmatprep.subr.bf16.mxu1 %v13708_v34  ;;  %v9435_v63 = vld [vmem:[#allocation6 + $0x378] sm:$0xff]  ;;  %v9702_v34 = vld [vmem:[#allocation6 + $0xbd0] sm:$0xff] }
 0x670   :  { %v13780_v40 = vcombine.high %v9431_v8, %v9435_v63  ;;  %v13779_v52 = vcombine.low %v9431_v8, %v9435_v63  ;;  %v14049_v42 = vcombine.low %v9702_v34, %v9706_v1  ;;  %v9658_v8 = vld [vmem:[#allocation6 + $0xa70] sm:$0xff] }
 0x671   :  { %12004 = vmatpush1.bf16.msra.mxu1 %v13707_v16  ;;  %v14050_v16 = vcombine.high %v9702_v34, %v9706_v1 }
 0x672   :  { %11959 = vmatpush1.bf16.msra.mxu0 %v13977_v14  ;;  %12005 = vmatprep.subr.bf16.mxu1 %v13700_v58  ;;  %v9423_v14 = vld [vmem:[#allocation6 + $0x318] sm:$0xff] }
 0x673   :  { %11960 = vmatprep.subr.bf16.mxu0 %v13970_v10  ;;  %v9427_v58 = vld [vmem:[#allocation6 + $0x338] sm:$0xff]  ;;  %v9694_v10 = vld [vmem:[#allocation6 + $0xb90] sm:$0xff] }
 0x674   :  { %v13772_v45 = vcombine.high %v9423_v14, %v9427_v58  ;;  %v13771_v59 = vcombine.low %v9423_v14, %v9427_v58  ;;  %v14041_v55 = vcombine.low %v9694_v10, %v9698_v21  ;;  %v9650_v14 = vld [vmem:[#allocation6 + $0xa30] sm:$0xff] }
 0x675   :  { %12006 = vmatpush1.bf16.msra.mxu1 %v13699_v49  ;;  %v14042_v49 = vcombine.high %v9694_v10, %v9698_v21 }
 0x676   :  { %11961 = vmatpush1.bf16.msra.mxu0 %v13969_v23  ;;  %12007 = vmatprep.subr.bf16.mxu1 %v13692_v32  ;;  %v9415_v23 = vld [vmem:[#allocation6 + $0x2d8] sm:$0xff] }
 0x677   :  { %11962 = vmatprep.subr.bf16.mxu0 %v13962_v46  ;;  %v9419_v32 = vld [vmem:[#allocation6 + $0x2f8] sm:$0xff]  ;;  %v9686_v46 = vld [vmem:[#allocation6 + $0xb50] sm:$0xff] }
 0x678   :  { %v13764_v26 = vcombine.high %v9415_v23, %v9419_v32  ;;  %v13763_v60 = vcombine.low %v9415_v23, %v9419_v32  ;;  %v14033_v0 = vcombine.low %v9686_v46, %v9690_v38  ;;  %v9511_v23 = vld [vmem:[#allocation6 + $0x5d8] sm:$0xff] }
 0x679   :  { %12008 = vmatpush1.bf16.msra.mxu1 %v13691_v54  ;;  %v14034_v54 = vcombine.high %v9686_v46, %v9690_v38  ;;  %v9515_v32 = vld [vmem:[#allocation6 + $0x5f8] sm:$0xff] }
 0x67a   :  { %11963 = vmatpush1.bf16.msra.mxu0 %v13961_v37  ;;  %12009 = vmatprep.subr.bf16.mxu1 %v13684_v57  ;;  %v9407_v37 = vld [vmem:[#allocation6 + $0x298] sm:$0xff] }
 0x67b   :  { %11964 = vmatprep.subr.bf16.mxu0 %v13954_v51  ;;  %v9411_v57 = vld [vmem:[#allocation6 + $0x2b8] sm:$0xff]  ;;  %v9678_v51 = vld [vmem:[#allocation6 + $0xb10] sm:$0xff] }
 0x67c   :  { %v13756_v43 = vcombine.high %v9407_v37, %v9411_v57  ;;  %v13755_v11 = vcombine.low %v9407_v37, %v9411_v57  ;;  %v14025_v48 = vcombine.low %v9678_v51, %v9682_v15  ;;  %v9507_v57 = vld [vmem:[#allocation6 + $0x5b8] sm:$0xff] }
 0x67d   :  { %12010 = vmatpush1.bf16.msra.mxu1 %v13683_v13  ;;  %v14026_v13 = vcombine.high %v9678_v51, %v9682_v15  ;;  %v9615_v51 = vld [vmem:[#allocation6 + $0x918] sm:$0xff] }
 0x67e   :  { %11965 = vmatpush1.bf16.msra.mxu0 %v13953_v18  ;;  %12011 = vmatprep.subr.bf16.mxu1 %v13676_v30  ;;  %v9399_v18 = vld [vmem:[#allocation6 + $0x258] sm:$0xff] }
 0x67f   :  { %11966 = vmatprep.subr.bf16.mxu0 %v13946_v2  ;;  %v9403_v30 = vld [vmem:[#allocation6 + $0x278] sm:$0xff]  ;;  %v9670_v2 = vld [vmem:[#allocation6 + $0xad0] sm:$0xff] }
 0x680   :  { %v13748_v39 = vcombine.high %v9399_v18, %v9403_v30  ;;  %v13747_v47 = vcombine.low %v9399_v18, %v9403_v30  ;;  %v14017_v35 = vcombine.low %v9670_v2, %v9674_v4  ;;  %v9619_v15 = vld [vmem:[#allocation6 + $0x938] sm:$0xff]  ;;  %v11704_v30 = vadd.f32 %v14902_v20, %v14893_v7 }
 0x681   :  { %12012 = vmatpush1.bf16.msra.mxu1 %v13675_v62  ;;  %v14018_v62 = vcombine.high %v9670_v2, %v9674_v4  ;;  %v9611_v18 = vld [vmem:[#allocation6 + $0x8f8] sm:$0xff] }
 0x682   :  { %11967 = vmatpush1.bf16.msra.mxu0 %v13945_v12  ;;  %12013 = vmatprep.subr.bf16.mxu1 %v13796_v22  ;;  %v9391_v12 = vld [vmem:[#allocation6 + $0x218] sm:$0xff] }
 0x683   :  { %11968 = vmatprep.subr.bf16.mxu0 %v13938_v19  ;;  %v9395_v22 = vld [vmem:[#allocation6 + $0x238] sm:$0xff]  ;;  %v9662_v19 = vld [vmem:[#allocation6 + $0xa90] sm:$0xff] }
 0x684   :  { %v13740_v27 = vcombine.high %v9391_v12, %v9395_v22  ;;  %v13739_v63 = vcombine.low %v9391_v12, %v9395_v22  ;;  %v14009_v34 = vcombine.low %v9662_v19, %v9666_v17  ;;  %v9495_v2 = vld [vmem:[#allocation6 + $0x558] sm:$0xff] }
 0x685   :  { %12014 = vmatpush2.bf16.msra.mxu1 %v13795_v6  ;;  %v14010_v6 = vcombine.high %v9662_v19, %v9666_v17  ;;  %v9499_v4 = vld [vmem:[#allocation6 + $0x578] sm:$0xff] }
 0x686   :  { %11969 = vmatpush1.bf16.msra.mxu0 %v13937_v41  ;;  %12015 = vmatprep.subr.bf16.mxu1 %v13788_v24  ;;  %v9639_v41 = vld [vmem:[#allocation6 + $0x9d8] sm:$0xff]  ;;  %v13844_v7 = vcombine.high %v9495_v2, %v9499_v4 }
 0x687   :  { %11970 = vmatprep.subr.bf16.mxu0 %v13930_v53  ;;  %v9643_v24 = vld [vmem:[#allocation6 + $0x9f8] sm:$0xff]  ;;  %v9654_v53 = vld [vmem:[#allocation6 + $0xa50] sm:$0xff] }
 0x688   :  { %v13988_v1 = vcombine.high %v9639_v41, %v9643_v24  ;;  %v13987_v58 = vcombine.low %v9639_v41, %v9643_v24  ;;  %v14001_v10 = vcombine.low %v9654_v53, %v9658_v8  ;;  %v9599_v20 = vld [vmem:[#allocation6 + $0x898] sm:$0xff] }
 0x689   :  { %12016 = vmatpush2.bf16.msra.mxu1 %v13787_v36  ;;  %v14002_v36 = vcombine.high %v9654_v53, %v9658_v8  ;;  %v9603_v17 = vld [vmem:[#allocation6 + $0x8b8] sm:$0xff] }
 0x68a   :  { %11971 = vmatpush1.bf16.msra.mxu0 %v13929_v25  ;;  %12017 = vmatprep.subr.bf16.mxu1 %v13780_v40  ;;  %v9631_v25 = vld [vmem:[#allocation6 + $0x998] sm:$0xff] }
 0x68b   :  { %11972 = vmatprep.subr.bf16.mxu0 %v14050_v16  ;;  %v9635_v40 = vld [vmem:[#allocation6 + $0x9b8] sm:$0xff]  ;;  %v9646_v16 = vld [vmem:[#allocation6 + $0xa10] sm:$0xff] }
 0x68c   :  { %v13980_v21 = vcombine.high %v9631_v25, %v9635_v40  ;;  %v13979_v46 = vcombine.low %v9631_v25, %v9635_v40  ;;  %v9591_v53 = vld [vmem:[#allocation6 + $0x858] sm:$0xff] }
 0x68d   :  { %12018 = vmatpush2.bf16.msra.mxu1 %v13779_v52  ;;  %v13994_v52 = vcombine.high %v9646_v16, %v9650_v14  ;;  %v9595_v8 = vld [vmem:[#allocation6 + $0x878] sm:$0xff] }
 0x68e   :  { %11973 = vmatpush2.bf16.msra.mxu0 %v14049_v42  ;;  %12019 = vmatprep.subr.bf16.mxu1 %v13772_v45  ;;  %v9623_v42 = vld [vmem:[#allocation6 + $0x958] sm:$0xff]  ;;  %v13940_v25 = vcombine.high %v9591_v53, %v9595_v8 }
 0x68f   :  { %11974 = vmatprep.subr.bf16.mxu0 %v14042_v49  ;;  %v9627_v45 = vld [vmem:[#allocation6 + $0x978] sm:$0xff] }
 0x691   :  { %12020 = vmatpush2.bf16.msra.mxu1 %v13771_v59  ;;  %v13993_v59 = vcombine.low %v9646_v16, %v9650_v14  ;;  %v9583_v16 = vld [vmem:[#allocation6 + $0x818] sm:$0xff] }
 0x692   :  { %11975 = vmatpush2.bf16.msra.mxu0 %v14041_v55  ;;  %12021 = vmatprep.subr.bf16.mxu1 %v13764_v26  ;;  %v13972_v55 = vcombine.high %v9623_v42, %v9627_v45  ;;  %v13860_v26 = vcombine.high %v9511_v23, %v9515_v32  ;;  %v9587_v14 = vld [vmem:[#allocation6 + $0x838] sm:$0xff] }
 0x693   :  { %11976 = vmatprep.subr.bf16.mxu0 %v14034_v54  ;;  %v9503_v54 = vld [vmem:[#allocation6 + $0x598] sm:$0xff] }
 0x695   :  { %12022 = vmatpush2.bf16.msra.mxu1 %v13763_v60 }
 0x696   :  { %11977 = vmatpush2.bf16.msra.mxu0 %v14033_v0  ;;  %12023 = vmatprep.subr.bf16.mxu1 %v13756_v43  ;;  %v13859_v0 = vcombine.low %v9511_v23, %v9515_v32  ;;  %v13964_v43 = vcombine.high %v9615_v51, %v9619_v15  ;;  %v9703_v23 = vld [vmem:[#allocation6 + $0xbd8] sm:$0xff] }
 0x697   :  { %11978 = vmatprep.subr.bf16.mxu0 %v14026_v13  ;;  %v9607_v13 = vld [vmem:[#allocation6 + $0x8d8] sm:$0xff] }
 0x698   :  { %v13956_v22 = vcombine.high %v9607_v13, %v9611_v18  ;;  %v13955_v41 = vcombine.low %v9607_v13, %v9611_v18  ;;  %v9707_v32 = vld [vmem:[#allocation6 + $0xbf8] sm:$0xff] }
 0x699   :  { %12024 = vmatpush2.bf16.msra.mxu1 %v13755_v11  ;;  %v9687_v13 = vld [vmem:[#allocation6 + $0xb58] sm:$0xff] }
 0x69a   :  { %11979 = vmatpush2.bf16.msra.mxu0 %v14025_v48  ;;  %12025 = vmatprep.subr.bf16.mxu1 %v13748_v39  ;;  %v13851_v48 = vcombine.low %v9503_v54, %v9507_v57  ;;  %v13963_v39 = vcombine.low %v9615_v51, %v9619_v15  ;;  %v9699_v51 = vld [vmem:[#allocation6 + $0xbb8] sm:$0xff] }
 0x69b   :  { %11980 = vmatprep.subr.bf16.mxu0 %v14018_v62  ;;  %v11706_v62 = vadd.f32 %v14905_v33, %v14895_v9  ;;  %v13843_v9 = vcombine.low %v9495_v2, %v9499_v4  ;;  %v13948_v33 = vcombine.high %v9599_v20, %v9603_v17  ;;  %v9455_v15 = vld [vmem:[#allocation6 + $0x418] sm:$0xff] }
 0x69c   :  { %v9691_v18 = vld [vmem:[#allocation6 + $0xb78] sm:$0xff] }
 0x69d   :  { %12026 = vmatpush2.bf16.msra.mxu1 %v13747_v47  ;;  %v9579_v2 = vld [vmem:[#allocation6 + $0x7f8] sm:$0xff] }
 0x69e   :  { %11981 = vmatpush2.bf16.msra.mxu0 %v14017_v35  ;;  %12027 = vmatprep.subr.bf16.mxu1 %v13740_v27  ;;  %v9487_v35 = vld [vmem:[#allocation6 + $0x518] sm:$0xff] }
 0x69f   :  { %11982 = vmatprep.subr.bf16.mxu0 %v14010_v6  ;;  %v9491_v27 = vld [vmem:[#allocation6 + $0x538] sm:$0xff] }
 0x6a1   :  { %12028 = vmatpush2.bf16.msra.mxu1 %v13739_v63  ;;  %v9479_v63 = vld [vmem:[#allocation6 + $0x4d8] sm:$0xff] }
 0x6a2   :  { %11983 = vmatpush2.bf16.msra.mxu0 %v14009_v34  ;;  %12079 = vmatprep.subr.bf16.mxu1 %v13988_v1  ;;  %v9483_v34 = vld [vmem:[#allocation6 + $0x4f8] sm:$0xff]  ;;  %v13947_v1 = vcombine.low %v9599_v20, %v9603_v17  ;;  %v14035_v20 = vcombine.low %v9687_v13, %v9691_v18 }
 0x6a3   :  { %11984 = vmatprep.subr.bf16.mxu0 %v14002_v36  ;;  %v14909_v49 = vpop.f32.mrf.mxu1  ;;  %v13835_v36 = vcombine.low %v9487_v35, %v9491_v27  ;;  %v13828_v40 = vcombine.high %v9479_v63, %v9483_v34 }
 0x6a4   :  { %12030 = vmatmul.mubr.bf16.vlgmr.msra.gmra.mxu1 %v14817_v50  ;;  %v13971_v50 = vcombine.low %v9623_v42, %v9627_v45  ;;  %v13932_v42 = vcombine.high %v9583_v16, %v9587_v14 }
 0x6a5   :  { %12080 = vmatpush1.bf16.msra.mxu1 %v13987_v58  ;;  %12111 = vmatprep.mubr.bf16.mxu1 %v14881_v61  ;;  %v14913_v38 = vpop.f32.mrf.mxu1  ;;  %v13852_v61 = vcombine.high %v9503_v54, %v9507_v57  ;;  %v9471_v58 = vld [vmem:[#allocation6 + $0x498] sm:$0xff]  ;;  %v14052_v54 = vcombine.high %v9703_v23, %v9707_v32 }
 0x6a6   :  { %11985 = vmatpush2.bf16.msra.mxu0 %v14001_v10  ;;  %12081 = vmatprep.subr.bf16.mxu1 %v13980_v21  ;;  %v9475_v10 = vld [vmem:[#allocation6 + $0x4b8] sm:$0xff]  ;;  %v13939_v21 = vcombine.low %v9591_v53, %v9595_v8 }
 0x6a7   :  { %11986 = vmatprep.subr.bf16.mxu0 %v13994_v52  ;;  %v11789_v37 = vpop.f32.mrf.mxu1  ;;  %v13827_v52 = vcombine.low %v9479_v63, %v9483_v34  ;;  %v13820_v45 = vcombine.high %v9471_v58, %v9475_v10  ;;  %v9695_v57 = vld [vmem:[#allocation6 + $0xb98] sm:$0xff] }
 0x6a8   :  { %v14043_v4 = vcombine.low %v9695_v57, %v9699_v51  ;;  %v9663_v63 = vld [vmem:[#allocation6 + $0xa98] sm:$0xff] }
 0x6a9   :  { %12082 = vmatpush1.bf16.msra.mxu1 %v13979_v46  ;;  %v11790_v60 = vpop.f32.mrf.mxu1  ;;  %v9463_v46 = vld [vmem:[#allocation6 + $0x458] sm:$0xff] }
 0x6aa   :  { %11987 = vmatpush2.bf16.msra.mxu0 %v13993_v59  ;;  %12083 = vmatprep.subr.bf16.mxu1 %v13972_v55  ;;  %v9467_v59 = vld [vmem:[#allocation6 + $0x478] sm:$0xff]  ;;  %v13931_v55 = vcombine.low %v9583_v16, %v9587_v14  ;;  %v14051_v60 = vcombine.low %v9703_v23, %v9707_v32 }
 0x6ab   :  { %12038 = vmatprep.subr.bf16.mxu0 %v13860_v26  ;;  %v13819_v26 = vcombine.low %v9471_v58, %v9475_v10  ;;  %v13812_v37 = vcombine.high %v9463_v46, %v9467_v59  ;;  %v9667_v34 = vld [vmem:[#allocation6 + $0xab8] sm:$0xff] }
 0x6ac   :  { %v14012_v16 = vcombine.high %v9663_v63, %v9667_v34  ;;  %v9655_v58 = vld [vmem:[#allocation6 + $0xa58] sm:$0xff] }
 0x6ad   :  { %11989 = vmatmul.mubr.bf16.vlgmr.msra.gmra.mxu0 %v14884_v3  ;;  %v11744_v11 = vpop.f32.mrf.mxu0  ;;  %12084 = vmatpush1.bf16.msra.mxu1 %v13971_v50  ;;  %v9459_v50 = vld [vmem:[#allocation6 + $0x438] sm:$0xff] }
 0x6ae   :  { %v14920_v12 = vadd.f32 %v11744_v11, %v11704_v30  ;;  %12039 = vmatpush1.bf16.msra.mxu0 %v13859_v0  ;;  %12070 = vmatprep.mubr.bf16.mxu0 %v14854_v5  ;;  %v13836_v5 = vcombine.high %v9487_v35, %v9491_v27  ;;  %v13811_v0 = vcombine.low %v9463_v46, %v9467_v59  ;;  %v9575_v30 = vld [vmem:[#allocation6 + $0x7d8] sm:$0xff] }
 0x6af   :  { %v11746_v19 = vpop.f32.mrf.mxu0  ;;  %12040 = vmatprep.subr.bf16.mxu0 %v13852_v61  ;;  %12085 = vmatprep.subr.bf16.mxu1 %v13964_v43  ;;  %v14044_v61 = vcombine.high %v9695_v57, %v9699_v51  ;;  %v13804_v43 = vcombine.high %v9455_v15, %v9459_v50  ;;  %v13803_v11 = vcombine.low %v9455_v15, %v9459_v50  ;;  %v9659_v10 = vld [vmem:[#allocation6 + $0xa78] sm:$0xff] }
 0x6b0   :  { %v14923_v47 = vadd.f32 %v11746_v19, %v11706_v62  ;;  %v9679_v62 = vld [vmem:[#allocation6 + $0xb18] sm:$0xff]  ;;  %v13923_v17 = vcombine.low %v9575_v30, %v9579_v2  ;;  %v14004_v23 = vcombine.high %v9655_v58, %v9659_v10 }
 0x6b1   :  { %v11748_v6 = vpop.f32.mrf.mxu0  ;;  %12086 = vmatpush1.bf16.msra.mxu1 %v13963_v39  ;;  %v13924_v39 = vcombine.high %v9575_v30, %v9579_v2  ;;  %v9567_v19 = vld [vmem:[#allocation6 + $0x798] sm:$0xff] }
 0x6b2   :  { %12041 = vmatpush1.bf16.msra.mxu0 %v13851_v48  ;;  %12087 = vmatprep.subr.bf16.mxu1 %v13956_v22  ;;  %v14036_v48 = vcombine.high %v9687_v13, %v9691_v18  ;;  %v9683_v22 = vld [vmem:[#allocation6 + $0xb38] sm:$0xff] }
 0x6b3   :  { %v11749_v24 = vpop.f32.mrf.mxu0  ;;  %12042 = vmatprep.subr.bf16.mxu0 %v13844_v7  ;;  %v9571_v7 = vld [vmem:[#allocation6 + $0x7b8] sm:$0xff]  ;;  %v14028_v35 = vcombine.high %v9679_v62, %v9683_v22 }
 0x6b4   :  { %v13916_v27 = vcombine.high %v9567_v19, %v9571_v7  ;;  %v9671_v6 = vld [vmem:[#allocation6 + $0xad8] sm:$0xff]  ;;  %v14027_v24 = vcombine.low %v9679_v62, %v9683_v22 }
 0x6b5   :  { %12088 = vmatpush1.bf16.msra.mxu1 %v13955_v41  ;;  %v9675_v41 = vld [vmem:[#allocation6 + $0xaf8] sm:$0xff] }
 0x6b6   :  { %12043 = vmatpush1.bf16.msra.mxu0 %v13843_v9  ;;  %12089 = vmatprep.subr.bf16.mxu1 %v13948_v33  ;;  %v9559_v9 = vld [vmem:[#allocation6 + $0x758] sm:$0xff]  ;;  %v14020_v53 = vcombine.high %v9671_v6, %v9675_v41 }
 0x6b7   :  { %12044 = vmatprep.subr.bf16.mxu0 %v13836_v5  ;;  %v9563_v33 = vld [vmem:[#allocation6 + $0x778] sm:$0xff]  ;;  %v13915_v5 = vcombine.low %v9567_v19, %v9571_v7 }
 0x6b8   :  { %v13908_v8 = vcombine.high %v9559_v9, %v9563_v33  ;;  %v9647_v46 = vld [vmem:[#allocation6 + $0xa18] sm:$0xff] }
 0x6b9   :  { %12090 = vmatpush1.bf16.msra.mxu1 %v13947_v1  ;;  %v9551_v1 = vld [vmem:[#allocation6 + $0x718] sm:$0xff] }
 0x6ba   :  { %12045 = vmatpush1.bf16.msra.mxu0 %v13835_v36  ;;  %12091 = vmatprep.subr.bf16.mxu1 %v13940_v25  ;;  %v9555_v36 = vld [vmem:[#allocation6 + $0x738] sm:$0xff]  ;;  %v14019_v25 = vcombine.low %v9671_v6, %v9675_v41 }
 0x6bb   :  { %12046 = vmatprep.subr.bf16.mxu0 %v13828_v40  ;;  %v13907_v40 = vcombine.low %v9559_v9, %v9563_v33  ;;  %v13900_v14 = vcombine.high %v9551_v1, %v9555_v36  ;;  %v9651_v59 = vld [vmem:[#allocation6 + $0xa38] sm:$0xff] }
 0x6bc   :  { %v13996_v57 = vcombine.high %v9647_v46, %v9651_v59  ;;  %v9527_v15 = vld [vmem:[#allocation6 + $0x658] sm:$0xff] }
 0x6bd   :  { %12092 = vmatpush1.bf16.msra.mxu1 %v13939_v21  ;;  %v9543_v21 = vld [vmem:[#allocation6 + $0x6d8] sm:$0xff] }
 0x6be   :  { %12047 = vmatpush1.bf16.msra.mxu0 %v13827_v52  ;;  %12093 = vmatprep.subr.bf16.mxu1 %v13932_v42  ;;  %v9547_v52 = vld [vmem:[#allocation6 + $0x6f8] sm:$0xff]  ;;  %v14011_v42 = vcombine.low %v9663_v63, %v9667_v34  ;;  %v14159_v63 = vld [vmem:[#allocation9 + $0x28] sm:$0xff]  }
 0x6bf   :  { %12048 = vmatprep.subr.bf16.mxu0 %v13820_v45  ;;  %v13899_v45 = vcombine.low %v9551_v1, %v9555_v36  ;;  %v13892_v32 = vcombine.high %v9543_v21, %v9547_v52  ;;  %v9531_v50 = vld [vmem:[#allocation6 + $0x678] sm:$0xff]  ;;  %v14160_v1 = vld [vmem:[#allocation9 + $0x60] sm:$0xff]  }
 0x6c0   :  { %v9523_v13 = vld [vmem:[#allocation6 + $0x638] sm:$0xff]  ;;  %v13875_v18 = vcombine.low %v9527_v15, %v9531_v50 }
 0x6c1   :  { %12094 = vmatpush1.bf16.msra.mxu1 %v13931_v55  ;;  %v9535_v55 = vld [vmem:[#allocation6 + $0x698] sm:$0xff] }
 0x6c2   :  { %12049 = vmatpush1.bf16.msra.mxu0 %v13819_v26  ;;  %12095 = vmatprep.subr.bf16.mxu1 %v14052_v54  ;;  %v9539_v26 = vld [vmem:[#allocation6 + $0x6b8] sm:$0xff]  ;;  %v14003_v54 = vcombine.low %v9655_v58, %v9659_v10 }
 0x6c3   :  { %12050 = vmatprep.subr.bf16.mxu0 %v13812_v37  ;;  %v13891_v37 = vcombine.low %v9543_v21, %v9547_v52  ;;  %v13884_v51 = vcombine.high %v9535_v55, %v9539_v26  ;;  %v14154_v41 = vld [vmem:[#allocation9 + $0x78] sm:$0xff]   ;;  %v14156_v33 = vld [vmem:[#allocation9 + $0x70] sm:$0xff]  }
 0x6c4   :  { %v14155_v9 = vld [vmem:[#allocation9 + $0x38] sm:$0xff]   ;;  %v14164_v52 = vld [vmem:[#allocation9 + $0x50] sm:$0xff]  }
 0x6c5   :  { %12096 = vmatpush2.bf16.msra.mxu1 %v14051_v60  ;;  %v13995_v60 = vcombine.low %v9647_v46, %v9651_v59  ;;  %v14168_v46 = vld [vmem:[#allocation9 + $0x40] sm:$0xff]  }
 0x6c6   :  { %12051 = vmatpush1.bf16.msra.mxu0 %v13811_v0  ;;  %12097 = vmatprep.subr.bf16.mxu1 %v14044_v61  ;;  %v13883_v0 = vcombine.low %v9535_v55, %v9539_v26  ;;  %v13876_v61 = vcombine.high %v9527_v15, %v9531_v50  ;;  %v14169_v59 = vld [vmem:[#allocation9] sm:$0xff]   ;;  %v14372_v26 = vmov 0.0  }
 0x6c7   :  { %12052 = vmatprep.subr.bf16.mxu0 %v13804_v43  ;;  %v9519_v43 = vld [vmem:[#allocation6 + $0x618] sm:$0xff] }
 0x6c8   :  { %v13868_v30 = vcombine.high %v9519_v43, %v9523_v13  ;;  %v14170_v55 = vld [vmem:[#allocation12 + $0x38] sm:$0xff]  }
 0x6c9   :  { %12098 = vmatpush2.bf16.msra.mxu1 %v14043_v4 }
 0x6ca   :  { %12053 = vmatpush1.bf16.msra.mxu0 %v13803_v11  ;;  %12099 = vmatprep.subr.bf16.mxu1 %v14036_v48  ;;  %v13867_v11 = vcombine.low %v9519_v43, %v9523_v13 }
 0x6cb   :  { %12054 = vmatprep.subr.bf16.mxu0 %v13924_v39 }
 0x6cd   :  { %12100 = vmatpush2.bf16.msra.mxu1 %v14035_v20 }
 0x6ce   :  { %12055 = vmatpush2.bf16.msra.mxu0 %v13923_v17  ;;  %12101 = vmatprep.subr.bf16.mxu1 %v14028_v35 }
 0x6cf   :  { %12056 = vmatprep.subr.bf16.mxu0 %v13916_v27 }
 0x6d1   :  { %12102 = vmatpush2.bf16.msra.mxu1 %v14027_v24  ;;  %v12121_v24 = vpack.c.bf16 %v14923_v47, %v14923_v47  ;;  %v14161_v47 = vld [vmem:[#allocation9 + $0x20] sm:$0xff]  }
 0x6d2   :  { %12057 = vmatpush2.bf16.msra.mxu0 %v13915_v5  ;;  %12103 = vmatprep.subr.bf16.mxu1 %v14020_v53  ;;  %v14158_v53 = vld [vmem:[#allocation9 + $0x68] sm:$0xff]  }
 0x6d3   :  { %12058 = vmatprep.subr.bf16.mxu0 %v13908_v8 }
 0x6d5   :  { %12104 = vmatpush2.bf16.msra.mxu1 %v14019_v25 }
 0x6d6   :  { %12059 = vmatpush2.bf16.msra.mxu0 %v13907_v40  ;;  %12105 = vmatprep.subr.bf16.mxu1 %v14012_v16  ;;  %v14162_v40 = vld [vmem:[#allocation9 + $0x58] sm:$0xff]  }
 0x6d7   :  { %12060 = vmatprep.subr.bf16.mxu0 %v13900_v14  ;;  %v14163_v14 = vld [vmem:[#allocation9 + $0x18] sm:$0xff]  }
 0x6d9   :  { %12106 = vmatpush2.bf16.msra.mxu1 %v14011_v42  ;;  %v14165_v42 = vld [vmem:[#allocation9 + $0x10] sm:$0xff]  }
 0x6da   :  { %12061 = vmatpush2.bf16.msra.mxu0 %v13899_v45  ;;  %12107 = vmatprep.subr.bf16.mxu1 %v14004_v23  ;;  %v14166_v23 = vld [vmem:[#allocation9 + $0x48] sm:$0xff]  }
 0x6db   :  { %12062 = vmatprep.subr.bf16.mxu0 %v13892_v32  ;;  %v14167_v32 = vld [vmem:[#allocation9 + $0x8] sm:$0xff]  }
 0x6dd   :  { %12108 = vmatpush2.bf16.msra.mxu1 %v14003_v54  ;;  %v14171_v54 = vld [vmem:[#allocation12 + $0x30] sm:$0xff]  }
 0x6de   :  { %12063 = vmatpush2.bf16.msra.mxu0 %v13891_v37  ;;  %12109 = vmatprep.subr.bf16.mxu1 %v13996_v57  ;;  %v14172_v37 = vld [vmem:[#allocation12 + $0x28] sm:$0xff]   ;;  %v14173_v57 = vld [vmem:[#allocation12 + $0x20] sm:$0xff]  }
 0x6df   :  { %12064 = vmatprep.subr.bf16.mxu0 %v13884_v51  ;;  %v14174_v51 = vld [vmem:[#allocation12 + $0x18] sm:$0xff]  }
 0x6e1   :  { %12110 = vmatpush2.bf16.msra.mxu1 %v13995_v60 }
 0x6e2   :  { %12065 = vmatpush2.bf16.msra.mxu0 %v13883_v0  ;;  %14110 = vmatprep.subr.bf16.mxu1 %v14372_v26 }
 0x6e3   :  { %12066 = vmatprep.subr.bf16.mxu0 %v13876_v61 }
 0x6e4   :  { %v11867_v2 = vpop.f32.mrf.mxu1  ;;  %12112 = vmatmul.mubr.bf16.vlgmr.msra.gmra.mxu1 %v14884_v3  ;;  %v12120_v3 = vpack.c.bf16 %v14920_v12, %v14920_v12 }
 0x6e5   :  { %14111 = vmatpush3.bf16.msra.mxu1 %v14170_v55  ;;  %14126 = vmatprep.mubr.msk.bf16.mxu1 %vm14373_vm1, %v14372_v26 }
 0x6e6   :  { %12067 = vmatpush2.bf16.msra.mxu0 %v13875_v18  ;;  %v11869_v4 = vpop.f32.mrf.mxu1  ;;  %14112 = vmatprep.subr.bf16.mxu1 %v14372_v26 }
 0x6e7   :  { %12068 = vmatprep.subr.bf16.mxu0 %v13868_v30 }
 0x6e8   :  { %v11871_v48 = vpop.f32.mrf.mxu1 }
 0x6e9   :  { %14113 = vmatpush3.bf16.msra.mxu1 %v14171_v54  ;;  %v12134_v48 = vld [vmem:[#allocation7] sm:$0x3] }
 0x6ea   :  { %12069 = vmatpush2.bf16.msra.mxu0 %v13867_v11  ;;  %v11872_v39 = vpop.f32.mrf.mxu1  ;;  %14114 = vmatprep.subr.bf16.mxu1 %v14372_v26 }
 0x6eb   :  { %14079 = vmatprep.subr.bf16.mxu0 %v14154_v41 }
 0x6ed   :  { %v11826_v62 = vpop.f32.mrf.mxu0  ;;  %12071 = vmatmul.mubr.bf16.vlgmr.msra.gmra.mxu0 %v14857_v44  ;;  %14115 = vmatpush3.bf16.msra.mxu1 %v14172_v37 }
 0x6ee   :  { %v11827_v22 = vadd.f32 %v11826_v62, %v14909_v49  ;;  %14080 = vmatpush3.bf16.msra.mxu0 %v14155_v9  ;;  %14116 = vmatprep.subr.bf16.mxu1 %v14372_v26  ;;  %v12139_v62 = vrot.slane %v12134_v48, %v14779_v29 }
 0x6ef   :  { %v11828_v19 = vpop.f32.mrf.mxu0  ;;  %14081 = vmatprep.subr.bf16.mxu0 %v14156_v33 }
 0x6f0   :  { %v11868_v7 = vadd.f32 %v11867_v2, %v11827_v22  ;;  %v11829_v20 = vadd.f32 %v11828_v19, %v14913_v38  ;;  %v14157_v38 = vld [vmem:[#allocation9 + $0x30] sm:$0xff]   ;;  %v12143_v19 = vrot.slane %v12134_v48, %v9240_v56 }
 0x6f1   :  { %v11830_v17 = vpop.f32.mrf.mxu0  ;;  %14117 = vmatpush3.bf16.msra.mxu1 %v14173_v57 }
 0x6f2   :  { %v12122_v35 = vpack.c.bf16 %v11868_v7, %v11868_v7  ;;  %v11870_v27 = vadd.f32 %v11869_v4, %v11829_v20  ;;  %14082 = vmatpush3.bf16.msra.mxu0 %v14157_v38  ;;  %14118 = vmatprep.subr.bf16.mxu1 %v14372_v26  ;;  %v12146_v20 = vpack.c.bf16 %v12139_v62, %v12139_v62 }
 0x6f3   :  { %v11831_v6 = vpop.f32.mrf.mxu0  ;;  %14083 = vmatprep.subr.bf16.mxu0 %v14158_v53 }
 0x6f4   :  { %v14933_v44 = vmax.bf16 %v12122_v35, %v12120_v3  ;;  %v12123_v49 = vpack.c.bf16 %v11870_v27, %v11870_v27  ;;  %v12147_v3 = vpack.c.bf16 %v12143_v19, %v12143_v19  ;;  %v12149_v41 = vpack.i.b16 %v12146_v20, %v12146_v20 }
 0x6f5   :  { %14119 = vmatpush3.bf16.msra.mxu1 %v14174_v51 }
 0x6f6   :  { %v14935_v5 = vmax.bf16 %v12123_v49, %v12121_v24  ;;  %14084 = vmatpush3.bf16.msra.mxu0 %v14159_v63  ;;  %14120 = vmatprep.subr.bf16.mxu1 %v14372_v26  ;;  %v12156_v38 = vpack.i.b16 %v12147_v3, %v12147_v3  ;;  %v12154_v28 = vrot.slane %v12149_v41, %v14779_v29 }
 0x6f7   :  { %14085 = vmatprep.subr.bf16.mxu0 %v14160_v1 }
 0x6f8   :  { %v12161_v1 = vrot.slane %v12156_v38, %v14779_v29 }
 0x6fa   :  { %14086 = vmatpush3.bf16.msra.mxu0 %v14161_v47 }
 0x6fb   :  { %14087 = vmatprep.subr.bf16.mxu0 %v14162_v40 }
 0x6fe   :  { %14088 = vmatpush3.bf16.msra.mxu0 %v14163_v14  ;;  %v14175_v14 = vld [vmem:[#allocation12 + $0x10] sm:$0xff]  }
 0x6ff   :  { %14089 = vmatprep.subr.bf16.mxu0 %v14164_v52  ;;  %14121 = vmatpush3.bf16.msra.mxu1 %v14175_v14 }
 0x700   :  { %14122 = vmatprep.subr.bf16.mxu1 %v14372_v26 }
 0x702   :  { %14090 = vmatpush3.bf16.msra.mxu0 %v14165_v42 }
 0x703   :  { %14091 = vmatprep.subr.bf16.mxu0 %v14166_v23 }
 0x706   :  { %14092 = vmatpush3.bf16.msra.mxu0 %v14167_v32  ;;  %v14070_v32 = vld [vmem:[#allocation13] ss:$0 sm:$0xff] }
 0x707   :  { %14093 = vmatprep.subr.bf16.mxu0 %v14168_v46 }
 0x70a   :  { %14094 = vmatpush3.bf16.msra.mxu0 %v14169_v59 }
 0x724   :  { %v11949_v12 = vpop.f32.mrf.mxu1 }
 0x726   :  { %v11951_v8 = vpop.f32.mrf.mxu1 }
 0x728   :  { %v11953_v34 = vpop.f32.mrf.mxu1 }
 0x72a   :  { %v11954_v36 = vpop.f32.mrf.mxu1 }
 0x72d   :  { %v11908_v25 = vpop.f32.mrf.mxu0 }
 0x72e   :  { %v11950_v16 = vadd.f32 %v11949_v12, %v11908_v25 }
 0x72f   :  { %v11910_v58 = vpop.f32.mrf.mxu0 }
 0x730   :  { %v11952_v10 = vadd.f32 %v11951_v8, %v11910_v58  ;;  %v14176_v58 = vld [vmem:[#allocation12 + $0x8] sm:$0xff]  }
 0x731   :  { %v11912_v21 = vpop.f32.mrf.mxu0  ;;  %14123 = vmatpush3.bf16.msra.mxu1 %v14176_v58 }
 0x732   :  { %14124 = vmatprep.subr.bf16.mxu1 %v14372_v26 }
 0x733   :  { %v11913_v45 = vpop.f32.mrf.mxu0 }
 0x764   :  { %v12031_v15 = vpop.f32.mrf.mxu1 }
 0x766   :  { %v12033_v50 = vpop.f32.mrf.mxu1 }
 0x768   :  { %v12035_v60 = vpop.f32.mrf.mxu1 }
 0x76a   :  { %v12036_v0 = vpop.f32.mrf.mxu1 }
 0x76d   :  { %v11990_v61 = vpop.f32.mrf.mxu0 }
 0x76e   :  { %v11991_v43 = vadd.f32 %v11990_v61, %v11950_v16 }
 0x76f   :  { %v11992_v13 = vpop.f32.mrf.mxu0 }
 0x770   :  { %v11993_v18 = vadd.f32 %v11992_v13, %v11952_v10  ;;  %v12124_v33 = vpack.c.bf16 %v11991_v43, %v11991_v43 }
 0x771   :  { %v11994_v30 = vpop.f32.mrf.mxu0 }
 0x772   :  { %v12125_v53 = vpack.c.bf16 %v11993_v18, %v11993_v18 }
 0x773   :  { %v11995_v2 = vpop.f32.mrf.mxu0 }
 0x7a4   :  { %v12113_v4 = vpop.f32.mrf.mxu1 }
 0x7a6   :  { %v12115_v11 = vpop.f32.mrf.mxu1 }
 0x7a8   :  { %v12117_v39 = vpop.f32.mrf.mxu1 }
 0x7aa   :  { %v12118_v22 = vpop.f32.mrf.mxu1 }
 0x7ad   :  { %v12072_v7 = vpop.f32.mrf.mxu0 }
 0x7ae   :  { %v12073_v17 = vadd.f32 %v12072_v7, %v12031_v15 }
 0x7af   :  { %v12074_v35 = vpop.f32.mrf.mxu0 }
 0x7b0   :  { %v12114_v27 = vadd.f32 %v12113_v4, %v12073_v17  ;;  %v12075_v6 = vadd.f32 %v12074_v35, %v12033_v50 }
 0x7b1   :  { %v12076_v9 = vpop.f32.mrf.mxu0 }
 0x7b2   :  { %v12126_v24 = vpack.c.bf16 %v12114_v27, %v12114_v27  ;;  %v12116_v49 = vadd.f32 %v12115_v11, %v12075_v6 }
 0x7b3   :  { %v12077_v12 = vpop.f32.mrf.mxu0 }
 0x7b4   :  { %v12130_v8 = vmax.bf16 %v12126_v24, %v12124_v33  ;;  %v12127_v63 = vpack.c.bf16 %v12116_v49, %v12116_v49 }
 0x7b6   :  { %v12132_v56 = vmax.bf16 %v12130_v8, %v14933_v44  ;;  %v12131_v34 = vmax.bf16 %v12127_v63, %v12125_v53  ;;  %v14177_v44 = vld [vmem:[#allocation12] sm:$0xff]  }
 0x7b7   :  { %14125 = vmatpush3.bf16.msra.mxu1 %v14177_v44 }
 0x7b8   :  { %v12133_v36 = vmax.bf16 %v12131_v34, %v14935_v5  ;;  %v12162_v47 = vadd.bf16 %v12154_v28, %v12132_v56  ;;  %v14053_v5 = vld [vmem:[#allocation10] ss:$0 sm:$0xff] }
 0x7ba   :  { %v12163_v25 = vadd.bf16 %v12161_v1, %v12133_v36  ;;  %v12164_v16 = vmax.bf16 %v14371_v31, %v12162_v47 }
 0x7bc   :  { %v12165_v40 = vmax.bf16 %v14371_v31, %v12163_v25 }
 0x7be   :  { %12333 = vmatprep.mubr.bf16.mxu0 %v12165_v40 }
 0x7bf   :  { %12334 = vmatmul.mubr.bf16.vlgmr.msra.gmra.mxu0 %v12164_v16 }
 0x87f   :  { %v14095_v29 = vpop.f32.mrf.mxu0 }
 0x881   :  { %v14096_v10 = vpop.f32.mrf.mxu0 }
 0x882   :  { %v14097_v21 = vadd.f32 %v14096_v10, %v14095_v29 }
 0x883   :  { %v14098_v31 = vpop.f32.mrf.mxu0 }
 0x884   :  { %v12336_v52 = vadd.f32 %v14097_v21, %v14053_v5 }
 0x885   :  { %v14099_v42 = vpop.f32.mrf.mxu0 }
 0x886   :  { %v12341_v45 = vmax.f32 %v12336_v52, 0.0 }
 0x888   :  { %v12342_v23 = vpack.c.bf16 %v12341_v45, %v12341_v45 }
 0x88a   :  { %14127 = vmatmul.mubr.bf16.vlgmr.msra.gmra.mxu1 %v12342_v23 }
 0x94a   :  { %v12448_v46 = vpop.f32.mrf.mxu1 }
 0x94b   :  { %v12449_v59 = vadd.f32 %v14070_v32, %v12448_v46 }
 0x94c   :  { %v14128_v55 = vpop.f32.mrf.mxu1 }
 0x94d   :  { %12454 = vmax.xlane.f32.xlu0 %v12449_v59 }
 0x94e   :  { %v12451_v54 = vpop.f32.mrf.mxu1 }
 0x950   :  { %v14129_v37 = vpop.f32.mrf.mxu1 }
 0x9d6   :  { %v12455_v57 = vpop.xlane.xlu0 %12454 }
 0x9d7   :  { %v12456_v51 = vsub.f32 %v12449_v59, %v12455_v57 }
 0x9d9   :  { %v12457_v26 = vmul.f32 1.442695, %v12456_v51 }
 0x9db   :  { %14178 = vpow2.f32 %v12457_v26 }
 0x9e8   :  { %v14179_v15 = vpop.eup %14178 }
 0x9e9   :  { %12459 = vadd.xlane.f32.xlu0 %v14179_v15 }
 0xa72   :  { %v12460_v50 = vpop.xlane.xlu0 %12459 }
 0xa73   :  { %14180 = vlog2.f32 %v12460_v50 }
 0xa80   :  { %v14181_v60 = vpop.eup %14180 }
 0xa81   :  { %v12462_v0 = vmul.f32 0.6931472, %v14181_v60 }
 0xa83   :  { %v12463_v61 = vsub.f32 %v12456_v51, %v12462_v0 }
 0xa85   :  { %12464 = vst [vmem:[%s14967_s9] sm:$0xff] %v12463_v61 }
 0xa86   :  { %12469 = vsyncpa [#allocation3], 1 }
 0xa87   :  { %12470 = vsyncpa [#allocation5], 1 }
 0xa88   :  { %12471 = vsyncpa [#allocation8], 1 }
 0xa89   :  { %12472 = vsyncpa [#allocation11], 1 }
 0xa8a   :  { %12473 = vsyncpa [#allocation14], 1 }

</bundles_post_ra>
